<compile_context>
chip_gen: v5e
topology: v5e:2x2
jax: 0.10.0
libtpu: 0.0.40
codegen_flags: <defaults>
</compile_context>

<pallas_src>
import functools

import jax
import jax.numpy as jnp
import numpy as np
from jax import lax
from jax.experimental import pallas as pl
from jax.experimental.pallas import tpu as pltpu


NUM_CLASSES = 1000
NUM_CLASSES_PAD = 1024            # lane-dense fc output (multiple of 128)
C_IN = 3
C_MID = 16                        # conv1 out channels
GROUPS = 16
C_OUT = 64                        # grouped conv out channels
OUT_PER_GROUP = C_OUT // GROUPS   # = 4
TAPS = tuple((kh, kw) for kh in range(3) for kw in range(3))   # t = kh*3 + kw


# ------------------------------- Pallas kernel -------------------------------

def fused_conv_pool_fc_kernel(x_ref, w1_ref, b1_ref, w2_ref, b2_ref,
                              wf_ref, bf_ref, o_ref, *, H, W):
    """One image per grid step: conv1 -> grouped conv -> global avg pool -> fc.

    x_ref : (1, H+2, W+2, 3)   zero-padded NHWC input image
    w1_ref: (27, 64)           conv1 taps, row = t*3+i, cols repeated 4x (col c <- out ch c//4)
    b1_ref: (1, 64)            conv1 bias repeated 4x
    w2_ref: (9, 64)            grouped-conv taps, w2_ref[t, c] = w2[c, 0, kh, kw]
    b2_ref: (1, 64)            grouped-conv bias
    wf_ref: (64, 1024)         fc weight, transposed + zero-padded 1000 -> 1024
    bf_ref: (1, 1024)          fc bias, zero-padded
    o_ref : (1, 1, 1024)       fc output for this image (lane-dense)
    """
    w1 = w1_ref[...]                                     # (27, 64)
    w2 = w2_ref[...]                                     # (9, 64)

    # ---- conv1 as a 9-tap x 3-input-channel VPU stencil (repeated channels) --
    y1 = jnp.zeros((H, W, C_OUT), jnp.float32)
    for t, (kh, kw) in enumerate(TAPS):
        xs = x_ref[0, kh:kh + H, kw:kw + W, :]           # (H, W, 3)
        for c in range(C_IN):
            wv = w1[t * C_IN + c:t * C_IN + c + 1, :]    # (1, 64)
            y1 = y1 + xs[:, :, c:c + 1] * wv             # (H,W,1)*(1,64) -> (H,W,64)
    y1 = y1 + b1_ref[...]                                # broadcast bias

    # ---- grouped conv (groups=16) fused with global average pool -------------
    # sum_{h,w} y2[h,w,c] = sum_t w2[t,c] * (window-sum of y1[...,c] for tap t)
    pooled_sum = jnp.zeros((1, C_OUT), jnp.float32)
    for t, (kh, kw) in enumerate(TAPS):
        r0, r1 = max(0, kh - 1), min(H, H + kh - 1)      # static window per tap
        c0, c1 = max(0, kw - 1), min(W, W + kw - 1)
        ws = jnp.sum(jnp.sum(y1[r0:r1, c0:c1, :], axis=0), axis=0,
                     keepdims=True)                      # (1, 64)
        pooled_sum = pooled_sum + ws * w2[t:t + 1, :]
    pooled = pooled_sum * (1.0 / (H * W)) + b2_ref[...]  # (1, 64)

    # ---- fc (64 -> 1024 padded) on the MXU ------------------------------------
    out = jnp.dot(pooled, wf_ref[...],
                  preferred_element_type=jnp.float32) + bf_ref[...]   # (1, 1024)
    o_ref[...] = out.reshape(1, 1, NUM_CLASSES_PAD)


# ------------------------- Hoisted weight preparation -------------------------

def prepare_params(params):
    """One-time layout work on the (tiny) weights; call once, reuse per forward."""
    # conv1: (O=16, I=3, 3, 3) -> (kh, kw, i, o) -> (27, 16) -> repeat cols -> (27, 64)
    w1_taps = jnp.transpose(params["w1"], (2, 3, 1, 0)).reshape(9 * C_IN, C_MID)
    w1_rep = jnp.repeat(w1_taps, OUT_PER_GROUP, axis=1)                  # (27, 64)
    b1_rep = jnp.repeat(params["b1"], OUT_PER_GROUP)[None, :]            # (1, 64)

    # grouped conv: (64, 1, 3, 3) -> per-tap per-output-channel vectors (9, 64)
    w2_taps = jnp.transpose(params["w2"].reshape(C_OUT, 9), (1, 0))      # (9, 64)
    b2 = params["b2"][None, :]                                           # (1, 64)

    # fc: pad 1000 -> 1024 so the kernel's output store is lane-dense
    wf = jnp.zeros((C_OUT, NUM_CLASSES_PAD), jnp.float32)
    wf = wf.at[:, :NUM_CLASSES].set(params["wf"].T)                      # (64, 1024)
    bf = jnp.zeros((1, NUM_CLASSES_PAD), jnp.float32)
    bf = bf.at[:, :NUM_CLASSES].set(params["bf"][None, :])               # (1, 1024)

    return {"w1": w1_rep, "b1": b1_rep, "w2": w2_taps, "b2": b2,
            "wf": wf, "bf": bf}


# ------------------------------ Model forward ---------------------------------

def conv_model_forward(x_nchw, prep):
    N, _, H, W = x_nchw.shape
    x = jnp.transpose(x_nchw, (0, 2, 3, 1))               # NCHW -> NHWC
    x_pad = jnp.pad(x, ((0, 0), (1, 1), (1, 1), (0, 0)))  # SAME padding for conv1

    kernel = functools.partial(fused_conv_pool_fc_kernel, H=H, W=W)

    flops_per_img = (2 * H * W * C_OUT * C_IN * 9          # conv1 stencil
                     + 9 * H * W * C_OUT                   # pooled window sums
                     + 2 * C_OUT * NUM_CLASSES_PAD)        # fc
    bytes_per_img = 4 * ((H + 2) * (W + 2) * C_IN + NUM_CLASSES_PAD)
    bytes_weights = 4 * (27 * C_OUT + 2 * C_OUT + 9 * C_OUT
                         + C_OUT * NUM_CLASSES_PAD + NUM_CLASSES_PAD)

    out = pl.pallas_call(
        kernel,
        out_shape=jax.ShapeDtypeStruct((N, 1, NUM_CLASSES_PAD), jnp.float32),
        grid=(N,),
        in_specs=[
            pl.BlockSpec((1, H + 2, W + 2, C_IN), lambda b: (b, 0, 0, 0)),
            pl.BlockSpec((9 * C_IN, C_OUT), lambda b: (0, 0)),   # w1 (resident)
            pl.BlockSpec((1, C_OUT), lambda b: (0, 0)),          # b1
            pl.BlockSpec((9, C_OUT), lambda b: (0, 0)),          # w2
            pl.BlockSpec((1, C_OUT), lambda b: (0, 0)),          # b2
            pl.BlockSpec((C_OUT, NUM_CLASSES_PAD), lambda b: (0, 0)),  # wf
            pl.BlockSpec((1, NUM_CLASSES_PAD), lambda b: (0, 0)),      # bf
        ],
        out_specs=pl.BlockSpec((1, 1, NUM_CLASSES_PAD), lambda b: (b, 0, 0)),
        compiler_params=pltpu.CompilerParams(
            dimension_semantics=("parallel",)),
        cost_estimate=pl.CostEstimate(
            flops=N * flops_per_img,
            transcendentals=0,
            bytes_accessed=N * bytes_per_img + bytes_weights),
    )(x_pad, prep["w1"], prep["b1"], prep["w2"], prep["b2"],
      prep["wf"], prep["bf"])

    return out.reshape(N, NUM_CLASSES_PAD)[:, :NUM_CLASSES]


# --------------------------- Reference (plain JAX) ----------------------------

def reference_forward(x_nchw, params):
    x = jnp.transpose(x_nchw, (0, 2, 3, 1))               # NHWC
    dn = ("NHWC", "HWIO", "NHWC")
    w1 = jnp.transpose(params["w1"], (2, 3, 1, 0))        # (3,3,3,16)
    y1 = lax.conv_general_dilated(x, w1, (1, 1), "SAME",
                                  dimension_numbers=dn) + params["b1"]
    w2 = jnp.transpose(params["w2"], (2, 3, 1, 0))        # (3,3,1,64)
    y2 = lax.conv_general_dilated(y1, w2, (1, 1), "SAME",
                                  dimension_numbers=dn,
                                  feature_group_count=GROUPS) + params["b2"]
    pooled = jnp.mean(y2, axis=(1, 2))                    # (N, 64)
    return pooled @ params["wf"].T + params["bf"]


# ----------------------------------- Main --------------------------------------

if __name__ == "__main__":
    key = jax.random.PRNGKey(0)
    k1, k2, k3, k4, kx = jax.random.split(key, 5)

    # Deterministic synthetic parameters (PyTorch shape conventions).
    params = {
        "w1": jax.random.normal(k1, (16, 3, 3, 3), jnp.float32) * 0.1,   # Conv2d(3,16,3)
        "b1": jnp.linspace(-0.1, 0.1, 16, dtype=jnp.float32),
        "w2": jax.random.normal(k2, (64, 1, 3, 3), jnp.float32) * 0.1,   # Conv2d(16,64,3,groups=16)
        "b2": jnp.linspace(-0.1, 0.1, 64, dtype=jnp.float32),
        "wf": jax.random.normal(k3, (1000, 64), jnp.float32) * 0.05,     # Linear(64,1000)
        "bf": jax.random.normal(k4, (1000,), jnp.float32) * 0.05,
    }

    # Small NCHW input consistent with conv1's 3 input channels.
    x = jax.random.normal(kx, (2, 3, 16, 16), jnp.float32)

    prep = prepare_params(params)            # hoisted, one-time weight prep
    fwd = jax.jit(conv_model_forward)

    out = jax.block_until_ready(fwd(x, prep))
    assert out.shape == (2, 1000)

    ref = jax.block_until_ready(reference_forward(x, params))
    np.testing.assert_allclose(np.asarray(out), np.asarray(ref),
                               rtol=1e-3, atol=1e-3)

    print("KERNEL_OK")
</pallas_src>

<mosaic_0001>
module attributes {stable_mosaic.version = 11 : i64} {
  func.func @fused_conv_pool_fc_kernel(%arg0: i32, %arg1: memref<1x18x18x3xf32, #tpu.memory_space<vmem>>, %arg2: memref<27x64xf32, #tpu.memory_space<vmem>>, %arg3: memref<1x64xf32, #tpu.memory_space<vmem>>, %arg4: memref<9x64xf32, #tpu.memory_space<vmem>>, %arg5: memref<1x64xf32, #tpu.memory_space<vmem>>, %arg6: memref<64x1024xf32, #tpu.memory_space<vmem>>, %arg7: memref<1x1024xf32, #tpu.memory_space<vmem>>, %arg8: memref<1x1x1024xf32, #tpu.memory_space<vmem>>) attributes {dimension_semantics = [#tpu.dimension_semantics<parallel>], iteration_bounds = array<i64: 2>, scalar_prefetch = 0 : i64, scratch_operands = 0 : i64, tpu.core_type = #tpu.core_type<tc>, window_params = [{transform_indices = @transform_0, window_bounds = array<i64: 1, 18, 18, 3>}, {pipeline_mode = #tpu.pipeline_mode<synchronous>, transform_indices = @transform_1, window_bounds = array<i64: 27, 64>}, {pipeline_mode = #tpu.pipeline_mode<synchronous>, transform_indices = @transform_2, window_bounds = array<i64: 1, 64>}, {pipeline_mode = #tpu.pipeline_mode<synchronous>, transform_indices = @transform_3, window_bounds = array<i64: 9, 64>}, {pipeline_mode = #tpu.pipeline_mode<synchronous>, transform_indices = @transform_4, window_bounds = array<i64: 1, 64>}, {pipeline_mode = #tpu.pipeline_mode<synchronous>, transform_indices = @transform_5, window_bounds = array<i64: 64, 1024>}, {pipeline_mode = #tpu.pipeline_mode<synchronous>, transform_indices = @transform_6, window_bounds = array<i64: 1, 1024>}, {transform_indices = @transform_7, window_bounds = array<i64: 1, 1, 1024>}]} {
    %c0 = arith.constant 0 : index
    %c0_0 = arith.constant 0 : index
    %0 = vector.load %arg2[%c0, %c0_0] : memref<27x64xf32, #tpu.memory_space<vmem>>, vector<27x64xf32>
    %c0_1 = arith.constant 0 : index
    %c0_2 = arith.constant 0 : index
    %1 = vector.load %arg4[%c0_1, %c0_2] : memref<9x64xf32, #tpu.memory_space<vmem>>, vector<9x64xf32>
    %cst = arith.constant 0.000000e+00 : f32
    %2 = vector.broadcast %cst : f32 to vector<16x16x64xf32>
    %c0_3 = arith.constant 0 : index
    %c0_4 = arith.constant 0 : index
    %c0_5 = arith.constant 0 : index
    %c0_6 = arith.constant 0 : index
    %3 = vector.load %arg1[%c0_3, %c0_4, %c0_5, %c0_6] : memref<1x18x18x3xf32, #tpu.memory_space<vmem>>, vector<1x16x16x3xf32>
    %4 = vector.shape_cast %3 : vector<1x16x16x3xf32> to vector<16x16x3xf32>
    %5 = vector.extract_strided_slice %0 {offsets = [0, 0], sizes = [1, 64], strides = [1, 1]} : vector<27x64xf32> to vector<1x64xf32>
    %6 = vector.extract_strided_slice %4 {offsets = [0, 0, 0], sizes = [16, 16, 1], strides = [1, 1, 1]} : vector<16x16x3xf32> to vector<16x16x1xf32>
    %7 = vector.shape_cast %5 : vector<1x64xf32> to vector<1x1x64xf32>
    %8 = vector.broadcast %6 : vector<16x16x1xf32> to vector<16x16x64xf32>
    %9 = vector.broadcast %7 : vector<1x1x64xf32> to vector<16x16x64xf32>
    %10 = arith.mulf %8, %9 : vector<16x16x64xf32>
    %11 = arith.addf %2, %10 : vector<16x16x64xf32>
    %12 = vector.extract_strided_slice %0 {offsets = [1, 0], sizes = [1, 64], strides = [1, 1]} : vector<27x64xf32> to vector<1x64xf32>
    %13 = vector.extract_strided_slice %4 {offsets = [0, 0, 1], sizes = [16, 16, 1], strides = [1, 1, 1]} : vector<16x16x3xf32> to vector<16x16x1xf32>
    %14 = vector.shape_cast %12 : vector<1x64xf32> to vector<1x1x64xf32>
    %15 = vector.broadcast %13 : vector<16x16x1xf32> to vector<16x16x64xf32>
    %16 = vector.broadcast %14 : vector<1x1x64xf32> to vector<16x16x64xf32>
    %17 = arith.mulf %15, %16 : vector<16x16x64xf32>
    %18 = arith.addf %11, %17 : vector<16x16x64xf32>
    %19 = vector.extract_strided_slice %0 {offsets = [2, 0], sizes = [1, 64], strides = [1, 1]} : vector<27x64xf32> to vector<1x64xf32>
    %20 = vector.extract_strided_slice %4 {offsets = [0, 0, 2], sizes = [16, 16, 1], strides = [1, 1, 1]} : vector<16x16x3xf32> to vector<16x16x1xf32>
    %21 = vector.shape_cast %19 : vector<1x64xf32> to vector<1x1x64xf32>
    %22 = vector.broadcast %20 : vector<16x16x1xf32> to vector<16x16x64xf32>
    %23 = vector.broadcast %21 : vector<1x1x64xf32> to vector<16x16x64xf32>
    %24 = arith.mulf %22, %23 : vector<16x16x64xf32>
    %25 = arith.addf %18, %24 : vector<16x16x64xf32>
    %c0_7 = arith.constant 0 : index
    %c0_8 = arith.constant 0 : index
    %c1 = arith.constant 1 : index
    %c0_9 = arith.constant 0 : index
    %26 = vector.load %arg1[%c0_7, %c0_8, %c1, %c0_9] : memref<1x18x18x3xf32, #tpu.memory_space<vmem>>, vector<1x16x16x3xf32>
    %27 = vector.shape_cast %26 : vector<1x16x16x3xf32> to vector<16x16x3xf32>
    %28 = vector.extract_strided_slice %0 {offsets = [3, 0], sizes = [1, 64], strides = [1, 1]} : vector<27x64xf32> to vector<1x64xf32>
    %29 = vector.extract_strided_slice %27 {offsets = [0, 0, 0], sizes = [16, 16, 1], strides = [1, 1, 1]} : vector<16x16x3xf32> to vector<16x16x1xf32>
    %30 = vector.shape_cast %28 : vector<1x64xf32> to vector<1x1x64xf32>
    %31 = vector.broadcast %29 : vector<16x16x1xf32> to vector<16x16x64xf32>
    %32 = vector.broadcast %30 : vector<1x1x64xf32> to vector<16x16x64xf32>
    %33 = arith.mulf %31, %32 : vector<16x16x64xf32>
    %34 = arith.addf %25, %33 : vector<16x16x64xf32>
    %35 = vector.extract_strided_slice %0 {offsets = [4, 0], sizes = [1, 64], strides = [1, 1]} : vector<27x64xf32> to vector<1x64xf32>
    %36 = vector.extract_strided_slice %27 {offsets = [0, 0, 1], sizes = [16, 16, 1], strides = [1, 1, 1]} : vector<16x16x3xf32> to vector<16x16x1xf32>
    %37 = vector.shape_cast %35 : vector<1x64xf32> to vector<1x1x64xf32>
    %38 = vector.broadcast %36 : vector<16x16x1xf32> to vector<16x16x64xf32>
    %39 = vector.broadcast %37 : vector<1x1x64xf32> to vector<16x16x64xf32>
    %40 = arith.mulf %38, %39 : vector<16x16x64xf32>
    %41 = arith.addf %34, %40 : vector<16x16x64xf32>
    %42 = vector.extract_strided_slice %0 {offsets = [5, 0], sizes = [1, 64], strides = [1, 1]} : vector<27x64xf32> to vector<1x64xf32>
    %43 = vector.extract_strided_slice %27 {offsets = [0, 0, 2], sizes = [16, 16, 1], strides = [1, 1, 1]} : vector<16x16x3xf32> to vector<16x16x1xf32>
    %44 = vector.shape_cast %42 : vector<1x64xf32> to vector<1x1x64xf32>
    %45 = vector.broadcast %43 : vector<16x16x1xf32> to vector<16x16x64xf32>
    %46 = vector.broadcast %44 : vector<1x1x64xf32> to vector<16x16x64xf32>
    %47 = arith.mulf %45, %46 : vector<16x16x64xf32>
    %48 = arith.addf %41, %47 : vector<16x16x64xf32>
    %c0_10 = arith.constant 0 : index
    %c0_11 = arith.constant 0 : index
    %c2 = arith.constant 2 : index
    %c0_12 = arith.constant 0 : index
    %49 = vector.load %arg1[%c0_10, %c0_11, %c2, %c0_12] : memref<1x18x18x3xf32, #tpu.memory_space<vmem>>, vector<1x16x16x3xf32>
    %50 = vector.shape_cast %49 : vector<1x16x16x3xf32> to vector<16x16x3xf32>
    %51 = vector.extract_strided_slice %0 {offsets = [6, 0], sizes = [1, 64], strides = [1, 1]} : vector<27x64xf32> to vector<1x64xf32>
    %52 = vector.extract_strided_slice %50 {offsets = [0, 0, 0], sizes = [16, 16, 1], strides = [1, 1, 1]} : vector<16x16x3xf32> to vector<16x16x1xf32>
    %53 = vector.shape_cast %51 : vector<1x64xf32> to vector<1x1x64xf32>
    %54 = vector.broadcast %52 : vector<16x16x1xf32> to vector<16x16x64xf32>
    %55 = vector.broadcast %53 : vector<1x1x64xf32> to vector<16x16x64xf32>
    %56 = arith.mulf %54, %55 : vector<16x16x64xf32>
    %57 = arith.addf %48, %56 : vector<16x16x64xf32>
    %58 = vector.extract_strided_slice %0 {offsets = [7, 0], sizes = [1, 64], strides = [1, 1]} : vector<27x64xf32> to vector<1x64xf32>
    %59 = vector.extract_strided_slice %50 {offsets = [0, 0, 1], sizes = [16, 16, 1], strides = [1, 1, 1]} : vector<16x16x3xf32> to vector<16x16x1xf32>
    %60 = vector.shape_cast %58 : vector<1x64xf32> to vector<1x1x64xf32>
    %61 = vector.broadcast %59 : vector<16x16x1xf32> to vector<16x16x64xf32>
    %62 = vector.broadcast %60 : vector<1x1x64xf32> to vector<16x16x64xf32>
    %63 = arith.mulf %61, %62 : vector<16x16x64xf32>
    %64 = arith.addf %57, %63 : vector<16x16x64xf32>
    %65 = vector.extract_strided_slice %0 {offsets = [8, 0], sizes = [1, 64], strides = [1, 1]} : vector<27x64xf32> to vector<1x64xf32>
    %66 = vector.extract_strided_slice %50 {offsets = [0, 0, 2], sizes = [16, 16, 1], strides = [1, 1, 1]} : vector<16x16x3xf32> to vector<16x16x1xf32>
    %67 = vector.shape_cast %65 : vector<1x64xf32> to vector<1x1x64xf32>
    %68 = vector.broadcast %66 : vector<16x16x1xf32> to vector<16x16x64xf32>
    %69 = vector.broadcast %67 : vector<1x1x64xf32> to vector<16x16x64xf32>
    %70 = arith.mulf %68, %69 : vector<16x16x64xf32>
    %71 = arith.addf %64, %70 : vector<16x16x64xf32>
    %c0_13 = arith.constant 0 : index
    %c1_14 = arith.constant 1 : index
    %c0_15 = arith.constant 0 : index
    %c0_16 = arith.constant 0 : index
    %72 = vector.load %arg1[%c0_13, %c1_14, %c0_15, %c0_16] : memref<1x18x18x3xf32, #tpu.memory_space<vmem>>, vector<1x16x16x3xf32>
    %73 = vector.shape_cast %72 : vector<1x16x16x3xf32> to vector<16x16x3xf32>
    %74 = vector.extract_strided_slice %0 {offsets = [9, 0], sizes = [1, 64], strides = [1, 1]} : vector<27x64xf32> to vector<1x64xf32>
    %75 = vector.extract_strided_slice %73 {offsets = [0, 0, 0], sizes = [16, 16, 1], strides = [1, 1, 1]} : vector<16x16x3xf32> to vector<16x16x1xf32>
    %76 = vector.shape_cast %74 : vector<1x64xf32> to vector<1x1x64xf32>
    %77 = vector.broadcast %75 : vector<16x16x1xf32> to vector<16x16x64xf32>
    %78 = vector.broadcast %76 : vector<1x1x64xf32> to vector<16x16x64xf32>
    %79 = arith.mulf %77, %78 : vector<16x16x64xf32>
    %80 = arith.addf %71, %79 : vector<16x16x64xf32>
    %81 = vector.extract_strided_slice %0 {offsets = [10, 0], sizes = [1, 64], strides = [1, 1]} : vector<27x64xf32> to vector<1x64xf32>
    %82 = vector.extract_strided_slice %73 {offsets = [0, 0, 1], sizes = [16, 16, 1], strides = [1, 1, 1]} : vector<16x16x3xf32> to vector<16x16x1xf32>
    %83 = vector.shape_cast %81 : vector<1x64xf32> to vector<1x1x64xf32>
    %84 = vector.broadcast %82 : vector<16x16x1xf32> to vector<16x16x64xf32>
    %85 = vector.broadcast %83 : vector<1x1x64xf32> to vector<16x16x64xf32>
    %86 = arith.mulf %84, %85 : vector<16x16x64xf32>
    %87 = arith.addf %80, %86 : vector<16x16x64xf32>
    %88 = vector.extract_strided_slice %0 {offsets = [11, 0], sizes = [1, 64], strides = [1, 1]} : vector<27x64xf32> to vector<1x64xf32>
    %89 = vector.extract_strided_slice %73 {offsets = [0, 0, 2], sizes = [16, 16, 1], strides = [1, 1, 1]} : vector<16x16x3xf32> to vector<16x16x1xf32>
    %90 = vector.shape_cast %88 : vector<1x64xf32> to vector<1x1x64xf32>
    %91 = vector.broadcast %89 : vector<16x16x1xf32> to vector<16x16x64xf32>
    %92 = vector.broadcast %90 : vector<1x1x64xf32> to vector<16x16x64xf32>
    %93 = arith.mulf %91, %92 : vector<16x16x64xf32>
    %94 = arith.addf %87, %93 : vector<16x16x64xf32>
    %c0_17 = arith.constant 0 : index
    %c1_18 = arith.constant 1 : index
    %c1_19 = arith.constant 1 : index
    %c0_20 = arith.constant 0 : index
    %95 = vector.load %arg1[%c0_17, %c1_18, %c1_19, %c0_20] : memref<1x18x18x3xf32, #tpu.memory_space<vmem>>, vector<1x16x16x3xf32>
    %96 = vector.shape_cast %95 : vector<1x16x16x3xf32> to vector<16x16x3xf32>
    %97 = vector.extract_strided_slice %0 {offsets = [12, 0], sizes = [1, 64], strides = [1, 1]} : vector<27x64xf32> to vector<1x64xf32>
    %98 = vector.extract_strided_slice %96 {offsets = [0, 0, 0], sizes = [16, 16, 1], strides = [1, 1, 1]} : vector<16x16x3xf32> to vector<16x16x1xf32>
    %99 = vector.shape_cast %97 : vector<1x64xf32> to vector<1x1x64xf32>
    %100 = vector.broadcast %98 : vector<16x16x1xf32> to vector<16x16x64xf32>
    %101 = vector.broadcast %99 : vector<1x1x64xf32> to vector<16x16x64xf32>
    %102 = arith.mulf %100, %101 : vector<16x16x64xf32>
    %103 = arith.addf %94, %102 : vector<16x16x64xf32>
    %104 = vector.extract_strided_slice %0 {offsets = [13, 0], sizes = [1, 64], strides = [1, 1]} : vector<27x64xf32> to vector<1x64xf32>
    %105 = vector.extract_strided_slice %96 {offsets = [0, 0, 1], sizes = [16, 16, 1], strides = [1, 1, 1]} : vector<16x16x3xf32> to vector<16x16x1xf32>
    %106 = vector.shape_cast %104 : vector<1x64xf32> to vector<1x1x64xf32>
    %107 = vector.broadcast %105 : vector<16x16x1xf32> to vector<16x16x64xf32>
    %108 = vector.broadcast %106 : vector<1x1x64xf32> to vector<16x16x64xf32>
    %109 = arith.mulf %107, %108 : vector<16x16x64xf32>
    %110 = arith.addf %103, %109 : vector<16x16x64xf32>
    %111 = vector.extract_strided_slice %0 {offsets = [14, 0], sizes = [1, 64], strides = [1, 1]} : vector<27x64xf32> to vector<1x64xf32>
    %112 = vector.extract_strided_slice %96 {offsets = [0, 0, 2], sizes = [16, 16, 1], strides = [1, 1, 1]} : vector<16x16x3xf32> to vector<16x16x1xf32>
    %113 = vector.shape_cast %111 : vector<1x64xf32> to vector<1x1x64xf32>
    %114 = vector.broadcast %112 : vector<16x16x1xf32> to vector<16x16x64xf32>
    %115 = vector.broadcast %113 : vector<1x1x64xf32> to vector<16x16x64xf32>
    %116 = arith.mulf %114, %115 : vector<16x16x64xf32>
    %117 = arith.addf %110, %116 : vector<16x16x64xf32>
    %c0_21 = arith.constant 0 : index
    %c1_22 = arith.constant 1 : index
    %c2_23 = arith.constant 2 : index
    %c0_24 = arith.constant 0 : index
    %118 = vector.load %arg1[%c0_21, %c1_22, %c2_23, %c0_24] : memref<1x18x18x3xf32, #tpu.memory_space<vmem>>, vector<1x16x16x3xf32>
    %119 = vector.shape_cast %118 : vector<1x16x16x3xf32> to vector<16x16x3xf32>
    %120 = vector.extract_strided_slice %0 {offsets = [15, 0], sizes = [1, 64], strides = [1, 1]} : vector<27x64xf32> to vector<1x64xf32>
    %121 = vector.extract_strided_slice %119 {offsets = [0, 0, 0], sizes = [16, 16, 1], strides = [1, 1, 1]} : vector<16x16x3xf32> to vector<16x16x1xf32>
    %122 = vector.shape_cast %120 : vector<1x64xf32> to vector<1x1x64xf32>
    %123 = vector.broadcast %121 : vector<16x16x1xf32> to vector<16x16x64xf32>
    %124 = vector.broadcast %122 : vector<1x1x64xf32> to vector<16x16x64xf32>
    %125 = arith.mulf %123, %124 : vector<16x16x64xf32>
    %126 = arith.addf %117, %125 : vector<16x16x64xf32>
    %127 = vector.extract_strided_slice %0 {offsets = [16, 0], sizes = [1, 64], strides = [1, 1]} : vector<27x64xf32> to vector<1x64xf32>
    %128 = vector.extract_strided_slice %119 {offsets = [0, 0, 1], sizes = [16, 16, 1], strides = [1, 1, 1]} : vector<16x16x3xf32> to vector<16x16x1xf32>
    %129 = vector.shape_cast %127 : vector<1x64xf32> to vector<1x1x64xf32>
    %130 = vector.broadcast %128 : vector<16x16x1xf32> to vector<16x16x64xf32>
    %131 = vector.broadcast %129 : vector<1x1x64xf32> to vector<16x16x64xf32>
    %132 = arith.mulf %130, %131 : vector<16x16x64xf32>
    %133 = arith.addf %126, %132 : vector<16x16x64xf32>
    %134 = vector.extract_strided_slice %0 {offsets = [17, 0], sizes = [1, 64], strides = [1, 1]} : vector<27x64xf32> to vector<1x64xf32>
    %135 = vector.extract_strided_slice %119 {offsets = [0, 0, 2], sizes = [16, 16, 1], strides = [1, 1, 1]} : vector<16x16x3xf32> to vector<16x16x1xf32>
    %136 = vector.shape_cast %134 : vector<1x64xf32> to vector<1x1x64xf32>
    %137 = vector.broadcast %135 : vector<16x16x1xf32> to vector<16x16x64xf32>
    %138 = vector.broadcast %136 : vector<1x1x64xf32> to vector<16x16x64xf32>
    %139 = arith.mulf %137, %138 : vector<16x16x64xf32>
    %140 = arith.addf %133, %139 : vector<16x16x64xf32>
    %c0_25 = arith.constant 0 : index
    %c2_26 = arith.constant 2 : index
    %c0_27 = arith.constant 0 : index
    %c0_28 = arith.constant 0 : index
    %141 = vector.load %arg1[%c0_25, %c2_26, %c0_27, %c0_28] : memref<1x18x18x3xf32, #tpu.memory_space<vmem>>, vector<1x16x16x3xf32>
    %142 = vector.shape_cast %141 : vector<1x16x16x3xf32> to vector<16x16x3xf32>
    %143 = vector.extract_strided_slice %0 {offsets = [18, 0], sizes = [1, 64], strides = [1, 1]} : vector<27x64xf32> to vector<1x64xf32>
    %144 = vector.extract_strided_slice %142 {offsets = [0, 0, 0], sizes = [16, 16, 1], strides = [1, 1, 1]} : vector<16x16x3xf32> to vector<16x16x1xf32>
    %145 = vector.shape_cast %143 : vector<1x64xf32> to vector<1x1x64xf32>
    %146 = vector.broadcast %144 : vector<16x16x1xf32> to vector<16x16x64xf32>
    %147 = vector.broadcast %145 : vector<1x1x64xf32> to vector<16x16x64xf32>
    %148 = arith.mulf %146, %147 : vector<16x16x64xf32>
    %149 = arith.addf %140, %148 : vector<16x16x64xf32>
    %150 = vector.extract_strided_slice %0 {offsets = [19, 0], sizes = [1, 64], strides = [1, 1]} : vector<27x64xf32> to vector<1x64xf32>
    %151 = vector.extract_strided_slice %142 {offsets = [0, 0, 1], sizes = [16, 16, 1], strides = [1, 1, 1]} : vector<16x16x3xf32> to vector<16x16x1xf32>
    %152 = vector.shape_cast %150 : vector<1x64xf32> to vector<1x1x64xf32>
    %153 = vector.broadcast %151 : vector<16x16x1xf32> to vector<16x16x64xf32>
    %154 = vector.broadcast %152 : vector<1x1x64xf32> to vector<16x16x64xf32>
    %155 = arith.mulf %153, %154 : vector<16x16x64xf32>
    %156 = arith.addf %149, %155 : vector<16x16x64xf32>
    %157 = vector.extract_strided_slice %0 {offsets = [20, 0], sizes = [1, 64], strides = [1, 1]} : vector<27x64xf32> to vector<1x64xf32>
    %158 = vector.extract_strided_slice %142 {offsets = [0, 0, 2], sizes = [16, 16, 1], strides = [1, 1, 1]} : vector<16x16x3xf32> to vector<16x16x1xf32>
    %159 = vector.shape_cast %157 : vector<1x64xf32> to vector<1x1x64xf32>
    %160 = vector.broadcast %158 : vector<16x16x1xf32> to vector<16x16x64xf32>
    %161 = vector.broadcast %159 : vector<1x1x64xf32> to vector<16x16x64xf32>
    %162 = arith.mulf %160, %161 : vector<16x16x64xf32>
    %163 = arith.addf %156, %162 : vector<16x16x64xf32>
    %c0_29 = arith.constant 0 : index
    %c2_30 = arith.constant 2 : index
    %c1_31 = arith.constant 1 : index
    %c0_32 = arith.constant 0 : index
    %164 = vector.load %arg1[%c0_29, %c2_30, %c1_31, %c0_32] : memref<1x18x18x3xf32, #tpu.memory_space<vmem>>, vector<1x16x16x3xf32>
    %165 = vector.shape_cast %164 : vector<1x16x16x3xf32> to vector<16x16x3xf32>
    %166 = vector.extract_strided_slice %0 {offsets = [21, 0], sizes = [1, 64], strides = [1, 1]} : vector<27x64xf32> to vector<1x64xf32>
    %167 = vector.extract_strided_slice %165 {offsets = [0, 0, 0], sizes = [16, 16, 1], strides = [1, 1, 1]} : vector<16x16x3xf32> to vector<16x16x1xf32>
    %168 = vector.shape_cast %166 : vector<1x64xf32> to vector<1x1x64xf32>
    %169 = vector.broadcast %167 : vector<16x16x1xf32> to vector<16x16x64xf32>
    %170 = vector.broadcast %168 : vector<1x1x64xf32> to vector<16x16x64xf32>
    %171 = arith.mulf %169, %170 : vector<16x16x64xf32>
    %172 = arith.addf %163, %171 : vector<16x16x64xf32>
    %173 = vector.extract_strided_slice %0 {offsets = [22, 0], sizes = [1, 64], strides = [1, 1]} : vector<27x64xf32> to vector<1x64xf32>
    %174 = vector.extract_strided_slice %165 {offsets = [0, 0, 1], sizes = [16, 16, 1], strides = [1, 1, 1]} : vector<16x16x3xf32> to vector<16x16x1xf32>
    %175 = vector.shape_cast %173 : vector<1x64xf32> to vector<1x1x64xf32>
    %176 = vector.broadcast %174 : vector<16x16x1xf32> to vector<16x16x64xf32>
    %177 = vector.broadcast %175 : vector<1x1x64xf32> to vector<16x16x64xf32>
    %178 = arith.mulf %176, %177 : vector<16x16x64xf32>
    %179 = arith.addf %172, %178 : vector<16x16x64xf32>
    %180 = vector.extract_strided_slice %0 {offsets = [23, 0], sizes = [1, 64], strides = [1, 1]} : vector<27x64xf32> to vector<1x64xf32>
    %181 = vector.extract_strided_slice %165 {offsets = [0, 0, 2], sizes = [16, 16, 1], strides = [1, 1, 1]} : vector<16x16x3xf32> to vector<16x16x1xf32>
    %182 = vector.shape_cast %180 : vector<1x64xf32> to vector<1x1x64xf32>
    %183 = vector.broadcast %181 : vector<16x16x1xf32> to vector<16x16x64xf32>
    %184 = vector.broadcast %182 : vector<1x1x64xf32> to vector<16x16x64xf32>
    %185 = arith.mulf %183, %184 : vector<16x16x64xf32>
    %186 = arith.addf %179, %185 : vector<16x16x64xf32>
    %c0_33 = arith.constant 0 : index
    %c2_34 = arith.constant 2 : index
    %c2_35 = arith.constant 2 : index
    %c0_36 = arith.constant 0 : index
    %187 = vector.load %arg1[%c0_33, %c2_34, %c2_35, %c0_36] : memref<1x18x18x3xf32, #tpu.memory_space<vmem>>, vector<1x16x16x3xf32>
    %188 = vector.shape_cast %187 : vector<1x16x16x3xf32> to vector<16x16x3xf32>
    %189 = vector.extract_strided_slice %0 {offsets = [24, 0], sizes = [1, 64], strides = [1, 1]} : vector<27x64xf32> to vector<1x64xf32>
    %190 = vector.extract_strided_slice %188 {offsets = [0, 0, 0], sizes = [16, 16, 1], strides = [1, 1, 1]} : vector<16x16x3xf32> to vector<16x16x1xf32>
    %191 = vector.shape_cast %189 : vector<1x64xf32> to vector<1x1x64xf32>
    %192 = vector.broadcast %190 : vector<16x16x1xf32> to vector<16x16x64xf32>
    %193 = vector.broadcast %191 : vector<1x1x64xf32> to vector<16x16x64xf32>
    %194 = arith.mulf %192, %193 : vector<16x16x64xf32>
    %195 = arith.addf %186, %194 : vector<16x16x64xf32>
    %196 = vector.extract_strided_slice %0 {offsets = [25, 0], sizes = [1, 64], strides = [1, 1]} : vector<27x64xf32> to vector<1x64xf32>
    %197 = vector.extract_strided_slice %188 {offsets = [0, 0, 1], sizes = [16, 16, 1], strides = [1, 1, 1]} : vector<16x16x3xf32> to vector<16x16x1xf32>
    %198 = vector.shape_cast %196 : vector<1x64xf32> to vector<1x1x64xf32>
    %199 = vector.broadcast %197 : vector<16x16x1xf32> to vector<16x16x64xf32>
    %200 = vector.broadcast %198 : vector<1x1x64xf32> to vector<16x16x64xf32>
    %201 = arith.mulf %199, %200 : vector<16x16x64xf32>
    %202 = arith.addf %195, %201 : vector<16x16x64xf32>
    %203 = vector.extract_strided_slice %0 {offsets = [26, 0], sizes = [1, 64], strides = [1, 1]} : vector<27x64xf32> to vector<1x64xf32>
    %204 = vector.extract_strided_slice %188 {offsets = [0, 0, 2], sizes = [16, 16, 1], strides = [1, 1, 1]} : vector<16x16x3xf32> to vector<16x16x1xf32>
    %205 = vector.shape_cast %203 : vector<1x64xf32> to vector<1x1x64xf32>
    %206 = vector.broadcast %204 : vector<16x16x1xf32> to vector<16x16x64xf32>
    %207 = vector.broadcast %205 : vector<1x1x64xf32> to vector<16x16x64xf32>
    %208 = arith.mulf %206, %207 : vector<16x16x64xf32>
    %209 = arith.addf %202, %208 : vector<16x16x64xf32>
    %c0_37 = arith.constant 0 : index
    %c0_38 = arith.constant 0 : index
    %210 = vector.load %arg3[%c0_37, %c0_38] : memref<1x64xf32, #tpu.memory_space<vmem>>, vector<1x64xf32>
    %211 = vector.shape_cast %210 : vector<1x64xf32> to vector<1x1x64xf32>
    %212 = vector.broadcast %211 : vector<1x1x64xf32> to vector<16x16x64xf32>
    %213 = arith.addf %209, %212 : vector<16x16x64xf32>
    %cst_39 = arith.constant 0.000000e+00 : f32
    %214 = vector.broadcast %cst_39 : f32 to vector<1x64xf32>
    %215 = vector.extract_strided_slice %213 {offsets = [0, 0, 0], sizes = [15, 15, 64], strides = [1, 1, 1]} : vector<16x16x64xf32> to vector<15x15x64xf32>
    %cst_40 = arith.constant dense<0.000000e+00> : vector<15x64xf32>
    %216 = vector.multi_reduction <add>, %215, %cst_40 [0] : vector<15x15x64xf32> to vector<15x64xf32>
    %cst_41 = arith.constant dense<0.000000e+00> : vector<64xf32>
    %217 = vector.multi_reduction <add>, %216, %cst_41 [0] : vector<15x64xf32> to vector<64xf32>
    %218 = vector.shape_cast %217 : vector<64xf32> to vector<1x64xf32>
    %219 = vector.extract_strided_slice %1 {offsets = [0, 0], sizes = [1, 64], strides = [1, 1]} : vector<9x64xf32> to vector<1x64xf32>
    %220 = arith.mulf %218, %219 : vector<1x64xf32>
    %221 = arith.addf %214, %220 : vector<1x64xf32>
    %222 = vector.extract_strided_slice %213 {offsets = [0, 0, 0], sizes = [15, 16, 64], strides = [1, 1, 1]} : vector<16x16x64xf32> to vector<15x16x64xf32>
    %cst_42 = arith.constant dense<0.000000e+00> : vector<16x64xf32>
    %223 = vector.multi_reduction <add>, %222, %cst_42 [0] : vector<15x16x64xf32> to vector<16x64xf32>
    %cst_43 = arith.constant dense<0.000000e+00> : vector<64xf32>
    %224 = vector.multi_reduction <add>, %223, %cst_43 [0] : vector<16x64xf32> to vector<64xf32>
    %225 = vector.shape_cast %224 : vector<64xf32> to vector<1x64xf32>
    %226 = vector.extract_strided_slice %1 {offsets = [1, 0], sizes = [1, 64], strides = [1, 1]} : vector<9x64xf32> to vector<1x64xf32>
    %227 = arith.mulf %225, %226 : vector<1x64xf32>
    %228 = arith.addf %221, %227 : vector<1x64xf32>
    %229 = vector.extract_strided_slice %213 {offsets = [0, 1, 0], sizes = [15, 15, 64], strides = [1, 1, 1]} : vector<16x16x64xf32> to vector<15x15x64xf32>
    %cst_44 = arith.constant dense<0.000000e+00> : vector<15x64xf32>
    %230 = vector.multi_reduction <add>, %229, %cst_44 [0] : vector<15x15x64xf32> to vector<15x64xf32>
    %cst_45 = arith.constant dense<0.000000e+00> : vector<64xf32>
    %231 = vector.multi_reduction <add>, %230, %cst_45 [0] : vector<15x64xf32> to vector<64xf32>
    %232 = vector.shape_cast %231 : vector<64xf32> to vector<1x64xf32>
    %233 = vector.extract_strided_slice %1 {offsets = [2, 0], sizes = [1, 64], strides = [1, 1]} : vector<9x64xf32> to vector<1x64xf32>
    %234 = arith.mulf %232, %233 : vector<1x64xf32>
    %235 = arith.addf %228, %234 : vector<1x64xf32>
    %236 = vector.extract_strided_slice %213 {offsets = [0, 0, 0], sizes = [16, 15, 64], strides = [1, 1, 1]} : vector<16x16x64xf32> to vector<16x15x64xf32>
    %cst_46 = arith.constant dense<0.000000e+00> : vector<15x64xf32>
    %237 = vector.multi_reduction <add>, %236, %cst_46 [0] : vector<16x15x64xf32> to vector<15x64xf32>
    %cst_47 = arith.constant dense<0.000000e+00> : vector<64xf32>
    %238 = vector.multi_reduction <add>, %237, %cst_47 [0] : vector<15x64xf32> to vector<64xf32>
    %239 = vector.shape_cast %238 : vector<64xf32> to vector<1x64xf32>
    %240 = vector.extract_strided_slice %1 {offsets = [3, 0], sizes = [1, 64], strides = [1, 1]} : vector<9x64xf32> to vector<1x64xf32>
    %241 = arith.mulf %239, %240 : vector<1x64xf32>
    %242 = arith.addf %235, %241 : vector<1x64xf32>
    %cst_48 = arith.constant dense<0.000000e+00> : vector<16x64xf32>
    %243 = vector.multi_reduction <add>, %213, %cst_48 [0] : vector<16x16x64xf32> to vector<16x64xf32>
    %cst_49 = arith.constant dense<0.000000e+00> : vector<64xf32>
    %244 = vector.multi_reduction <add>, %243, %cst_49 [0] : vector<16x64xf32> to vector<64xf32>
    %245 = vector.shape_cast %244 : vector<64xf32> to vector<1x64xf32>
    %246 = vector.extract_strided_slice %1 {offsets = [4, 0], sizes = [1, 64], strides = [1, 1]} : vector<9x64xf32> to vector<1x64xf32>
    %247 = arith.mulf %245, %246 : vector<1x64xf32>
    %248 = arith.addf %242, %247 : vector<1x64xf32>
    %249 = vector.extract_strided_slice %213 {offsets = [0, 1, 0], sizes = [16, 15, 64], strides = [1, 1, 1]} : vector<16x16x64xf32> to vector<16x15x64xf32>
    %cst_50 = arith.constant dense<0.000000e+00> : vector<15x64xf32>
    %250 = vector.multi_reduction <add>, %249, %cst_50 [0] : vector<16x15x64xf32> to vector<15x64xf32>
    %cst_51 = arith.constant dense<0.000000e+00> : vector<64xf32>
    %251 = vector.multi_reduction <add>, %250, %cst_51 [0] : vector<15x64xf32> to vector<64xf32>
    %252 = vector.shape_cast %251 : vector<64xf32> to vector<1x64xf32>
    %253 = vector.extract_strided_slice %1 {offsets = [5, 0], sizes = [1, 64], strides = [1, 1]} : vector<9x64xf32> to vector<1x64xf32>
    %254 = arith.mulf %252, %253 : vector<1x64xf32>
    %255 = arith.addf %248, %254 : vector<1x64xf32>
    %256 = vector.extract_strided_slice %213 {offsets = [1, 0, 0], sizes = [15, 15, 64], strides = [1, 1, 1]} : vector<16x16x64xf32> to vector<15x15x64xf32>
    %cst_52 = arith.constant dense<0.000000e+00> : vector<15x64xf32>
    %257 = vector.multi_reduction <add>, %256, %cst_52 [0] : vector<15x15x64xf32> to vector<15x64xf32>
    %cst_53 = arith.constant dense<0.000000e+00> : vector<64xf32>
    %258 = vector.multi_reduction <add>, %257, %cst_53 [0] : vector<15x64xf32> to vector<64xf32>
    %259 = vector.shape_cast %258 : vector<64xf32> to vector<1x64xf32>
    %260 = vector.extract_strided_slice %1 {offsets = [6, 0], sizes = [1, 64], strides = [1, 1]} : vector<9x64xf32> to vector<1x64xf32>
    %261 = arith.mulf %259, %260 : vector<1x64xf32>
    %262 = arith.addf %255, %261 : vector<1x64xf32>
    %263 = vector.extract_strided_slice %213 {offsets = [1, 0, 0], sizes = [15, 16, 64], strides = [1, 1, 1]} : vector<16x16x64xf32> to vector<15x16x64xf32>
    %cst_54 = arith.constant dense<0.000000e+00> : vector<16x64xf32>
    %264 = vector.multi_reduction <add>, %263, %cst_54 [0] : vector<15x16x64xf32> to vector<16x64xf32>
    %cst_55 = arith.constant dense<0.000000e+00> : vector<64xf32>
    %265 = vector.multi_reduction <add>, %264, %cst_55 [0] : vector<16x64xf32> to vector<64xf32>
    %266 = vector.shape_cast %265 : vector<64xf32> to vector<1x64xf32>
    %267 = vector.extract_strided_slice %1 {offsets = [7, 0], sizes = [1, 64], strides = [1, 1]} : vector<9x64xf32> to vector<1x64xf32>
    %268 = arith.mulf %266, %267 : vector<1x64xf32>
    %269 = arith.addf %262, %268 : vector<1x64xf32>
    %270 = vector.extract_strided_slice %213 {offsets = [1, 1, 0], sizes = [15, 15, 64], strides = [1, 1, 1]} : vector<16x16x64xf32> to vector<15x15x64xf32>
    %cst_56 = arith.constant dense<0.000000e+00> : vector<15x64xf32>
    %271 = vector.multi_reduction <add>, %270, %cst_56 [0] : vector<15x15x64xf32> to vector<15x64xf32>
    %cst_57 = arith.constant dense<0.000000e+00> : vector<64xf32>
    %272 = vector.multi_reduction <add>, %271, %cst_57 [0] : vector<15x64xf32> to vector<64xf32>
    %273 = vector.shape_cast %272 : vector<64xf32> to vector<1x64xf32>
    %274 = vector.extract_strided_slice %1 {offsets = [8, 0], sizes = [1, 64], strides = [1, 1]} : vector<9x64xf32> to vector<1x64xf32>
    %275 = arith.mulf %273, %274 : vector<1x64xf32>
    %276 = arith.addf %269, %275 : vector<1x64xf32>
    %cst_58 = arith.constant 3.906250e-03 : f32
    %277 = vector.broadcast %cst_58 : f32 to vector<1x64xf32>
    %278 = arith.mulf %276, %277 : vector<1x64xf32>
    %c0_59 = arith.constant 0 : index
    %c0_60 = arith.constant 0 : index
    %279 = vector.load %arg5[%c0_59, %c0_60] : memref<1x64xf32, #tpu.memory_space<vmem>>, vector<1x64xf32>
    %280 = arith.addf %278, %279 : vector<1x64xf32>
    %c0_61 = arith.constant 0 : index
    %c0_62 = arith.constant 0 : index
    %281 = vector.load %arg6[%c0_61, %c0_62] : memref<64x1024xf32, #tpu.memory_space<vmem>>, vector<64x1024xf32>
    %cst_63 = arith.constant dense<0.000000e+00> : vector<1x1024xf32>
    %282 = tpu.matmul %280, %281, %cst_63 {dimension_numbers = #tpu.dot_dimension_numbers<[1], [0], [0], [1], [0, 0, 1, 1], [], []>} : vector<1x64xf32>, vector<64x1024xf32>, vector<1x1024xf32> -> vector<1x1024xf32>
    %c0_64 = arith.constant 0 : index
    %c0_65 = arith.constant 0 : index
    %283 = vector.load %arg7[%c0_64, %c0_65] : memref<1x1024xf32, #tpu.memory_space<vmem>>, vector<1x1024xf32>
    %284 = arith.addf %282, %283 : vector<1x1024xf32>
    %285 = vector.shape_cast %284 : vector<1x1024xf32> to vector<1x1x1024xf32>
    %c0_66 = arith.constant 0 : index
    %c0_67 = arith.constant 0 : index
    %c0_68 = arith.constant 0 : index
    %286 = vector.load %arg8[%c0_66, %c0_67, %c0_68] : memref<1x1x1024xf32, #tpu.memory_space<vmem>>, vector<1x1x1024xf32>
    tpu.vector_store %arg8[%c0_66, %c0_67, %c0_68], %285 {strides = array<i32>} : memref<1x1x1024xf32, #tpu.memory_space<vmem>>, vector<1x1x1024xf32>,
    return
  }
  func.func @transform_0(%arg0: i32) -> (i32, i32, i32, i32) {
    %c0_i32 = arith.constant 0 : i32
    %c0_i32_0 = arith.constant 0 : i32
    %c0_i32_1 = arith.constant 0 : i32
    %c0_i32_2 = arith.constant 0 : i32
    return %arg0, %c0_i32, %c0_i32_0, %c0_i32_1 : i32, i32, i32, i32
  }
  func.func @transform_1(%arg0: i32) -> (i32, i32) {
    %c0_i32 = arith.constant 0 : i32
    %c0_i32_0 = arith.constant 0 : i32
    %c0_i32_1 = arith.constant 0 : i32
    return %c0_i32, %c0_i32_0 : i32, i32
  }
  func.func @transform_2(%arg0: i32) -> (i32, i32) {
    %c0_i32 = arith.constant 0 : i32
    %c0_i32_0 = arith.constant 0 : i32
    %c0_i32_1 = arith.constant 0 : i32
    return %c0_i32, %c0_i32_0 : i32, i32
  }
  func.func @transform_3(%arg0: i32) -> (i32, i32) {
    %c0_i32 = arith.constant 0 : i32
    %c0_i32_0 = arith.constant 0 : i32
    %c0_i32_1 = arith.constant 0 : i32
    return %c0_i32, %c0_i32_0 : i32, i32
  }
  func.func @transform_4(%arg0: i32) -> (i32, i32) {
    %c0_i32 = arith.constant 0 : i32
    %c0_i32_0 = arith.constant 0 : i32
    %c0_i32_1 = arith.constant 0 : i32
    return %c0_i32, %c0_i32_0 : i32, i32
  }
  func.func @transform_5(%arg0: i32) -> (i32, i32) {
    %c0_i32 = arith.constant 0 : i32
    %c0_i32_0 = arith.constant 0 : i32
    %c0_i32_1 = arith.constant 0 : i32
    return %c0_i32, %c0_i32_0 : i32, i32
  }
  func.func @transform_6(%arg0: i32) -> (i32, i32) {
    %c0_i32 = arith.constant 0 : i32
    %c0_i32_0 = arith.constant 0 : i32
    %c0_i32_1 = arith.constant 0 : i32
    return %c0_i32, %c0_i32_0 : i32, i32
  }
  func.func @transform_7(%arg0: i32) -> (i32, i32, i32) {
    %c0_i32 = arith.constant 0 : i32
    %c0_i32_0 = arith.constant 0 : i32
    %c0_i32_1 = arith.constant 0 : i32
    return %arg0, %c0_i32, %c0_i32_0 : i32, i32, i32
  }
}

</mosaic_0001>

<bundles_post_ra>
// kernel: conv_model_forward.1
= control target key start
LH: loop header
LB: loop body
LE: loop exit
PB: predicated region body
PF: predicated region fallthrough
CT: control target
= control target key end

     0   :  { %s7330_s24 = smov 0   ;;  %s13637_s0 = inlined_call_operand.vmem [shape: f32[2,18,18,3], index: 0, kind: input, shape index: {}]   ;;  %s13638_s1 = inlined_call_operand.vmem [shape: f32[27,64], index: 1, kind: input, shape index: {}]   ;;  %s13639_s2 = inlined_call_operand.vmem [shape: f32[1,64], index: 2, kind: input, shape index: {}]   ;;  %s13640_s3 = inlined_call_operand.vmem [shape: f32[9,64], index: 3, kind: input, shape index: {}]   ;;  %s13641_s4 = inlined_call_operand.vmem [shape: f32[1,64], index: 4, kind: input, shape index: {}]   ;;  %s13642_s5 = inlined_call_operand.vmem [shape: f32[64,1024], index: 5, kind: input, shape index: {}]   ;;  %s13643_s6 = inlined_call_operand.vmem [shape: f32[1,1024], index: 6, kind: input, shape index: {}]   ;;  %s13644_s7 = inlined_call_operand.vmem [shape: f32[2,1,1024], index: 7, kind: output, shape index: {}]  }
   0x1 LB: > { %s6762_s25 = sadd.s32 4294967295, %s7285_s24   ;;  %p6766_p0 = scmp.ge.s32.totalorder %s7285_s24, 1  ;;  %s7285_s24 = sphi %s7330_s24, %s17_s24  }
   0x2   : > { %p237_p1 = scmp.lt.s32.totalorder %s7285_s24, 3 }
   0x4   : > { %p238_p2 = pnand %p6766_p0, %p237_p1 }
   0x6   : > { %241 = sbr.rel (%p238_p2) target bundleno = 2752 (0xac0), region = 48 }
   0xb   : > { %p268_p3 = scmp.lt.s32.totalorder %s6762_s25, 1  ;;  %v13649_v0 = vmov 0   ;;  %v13647_v33 = vmov 1   ;;  %vm6108_vm0 = vcmask 523264   ;;  %vm6221_vm1 = vcmask 523265  }
   0xc   : > { %6985 = vset.pattern.permute.xlu2 %v13649_v0  ;;  %6984 = vset.pattern.permute.xlu1 %v13649_v0  ;;  %vm6138_vm2 = vcmask 522240   ;;  %vm6253_vm3 = vcmask 1046528   ;;  %vm6693_vm4 = vcmask 1040384   ;;  %vm6695_vm5 = vcmask 1042434  }
   0xd   : > { %6983 = vset.pattern.permute.xlu0 %v13649_v0  ;;  %s15351_s25 = smov (!%p268_p3, %s6762_s25), 1  ;;  %vm6697_vm6 = vcmask 1041408   ;;  %vm6699_vm7 = vcmask 1044484   ;;  %vm6701_vm8 = vcmask 1046534   ;;  %vm6703_vm9 = vcmask 1045508  }
   0xe   : > { %s6971_s26 = smul.u32 432, %s15351_s25  ;;  %s6768_s10 = sshll.u32 %s15351_s25, 3  ;;  %vm6705_vm10 = vcmask 1043456  }
   0xf   : > { %s276_s13 = scalar_lea.vmem %s13644_s7, %s6768_s10 }
  0x10   : > { %s7347_s29 = scalar_lea.vmem %s13637_s0, %s6971_s26 }
  0x11   : > { %v7350_v1 = vld [vmem:[%s7347_s29 + $0x30] sm:$0xff]  ;;  %v7353_v2 = vld [vmem:[%s7347_s29 + $0x18] sm:$0xff]  ;;  %v7356_v3 = vld [vmem:[%s7347_s29] sm:$0xff] }
  0x12   : > { %337 = vperm.xlu2 %6985, %v7350_v1   ;;  %327 = vperm.xlu1 %6984, %v7353_v2   ;;  %v7362_v4 = vld [vmem:[%s7347_s29 + $0x38] sm:$0xff]  ;;  %v7365_v5 = vld [vmem:[%s7347_s29 + $0x20] sm:$0xff]  ;;  %v284_v6 = vld [vmem:[%s7347_s29 + $0x8] sm:$0xff] }
  0x13   : > { %317 = vperm.xlu0 %6983, %v7356_v3   ;;  %v7371_v7 = vld [vmem:[%s7347_s29 + $0x60] sm:$0xff]  ;;  %v7374_v8 = vld [vmem:[%s7347_s29 + $0x50] sm:$0xff]  ;;  %v289_v9 = vld [vmem:[%s7347_s29 + $0x48] sm:$0xff] }
  0x14   : > { %v7380_v10 = vld [vmem:[%s7347_s29 + $0x80] sm:$0xff]  ;;  %v7383_v11 = vld [vmem:[%s7347_s29 + $0x78] sm:$0xff]  ;;  %v292_v12 = vld [vmem:[%s7347_s29 + $0x68] sm:$0xff] }
  0x15   : > { %v7389_v13 = vld [vmem:[%s7347_s29 + $0xa8] sm:$0xff]  ;;  %v7392_v14 = vld [vmem:[%s7347_s29 + $0x98] sm:$0xff]  ;;  %v295_v15 = vld [vmem:[%s7347_s29 + $0x90] sm:$0xff] }
  0x16   : > { %v7398_v16 = vld [vmem:[%s7347_s29 + $0xc8] sm:$0xff]  ;;  %v7401_v17 = vld [vmem:[%s7347_s29 + $0xc0] sm:$0xff]  ;;  %v298_v18 = vld [vmem:[%s7347_s29 + $0xb0] sm:$0xff] }
  0x17   : > { %v7407_v19 = vld [vmem:[%s7347_s29 + $0xf0] sm:$0xff]  ;;  %v7410_v20 = vld [vmem:[%s7347_s29 + $0xe0] sm:$0xff]  ;;  %v301_v21 = vld [vmem:[%s7347_s29 + $0xd8] sm:$0xff] }
  0x18   : > { %v7416_v22 = vld [vmem:[%s7347_s29 + $0x110] sm:$0xff]  ;;  %v7419_v23 = vld [vmem:[%s7347_s29 + $0x108] sm:$0xff]  ;;  %v304_v24 = vld [vmem:[%s7347_s29 + $0xf8] sm:$0xff] }
  0x19   : > { %v7425_v25 = vld [vmem:[%s7347_s29 + $0x138] sm:$0xff]  ;;  %v7428_v26 = vld [vmem:[%s7347_s29 + $0x128] sm:$0xff]  ;;  %v307_v27 = vld [vmem:[%s7347_s29 + $0x120] sm:$0xff] }
  0x1a   : > { %342 = vperm.xlu2 %6985, %v7362_v4   ;;  %332 = vperm.xlu1 %6984, %v7365_v5   ;;  %v7434_v28 = vld [vmem:[%s7347_s29 + $0x158] sm:$0xff]  ;;  %v7437_v29 = vld [vmem:[%s7347_s29 + $0x150] sm:$0xff]  ;;  %v310_v30 = vld [vmem:[%s7347_s29 + $0x140] sm:$0xff] }
  0x1b   : > { %322 = vperm.xlu0 %6983, %v284_v6   ;;  %v7443_v31 = vld [vmem:[%s7347_s29 + $0x170] sm:$0xff]  ;;  %v313_v32 = vld [vmem:[%s7347_s29 + $0x168] sm:$0xff]  ;;  %v944_v48 = vld [vmem:[%s7347_s29 + $0xd9] sm:$0xff] }
  0x1c   : > { %v927_v34 = vld [vmem:[%s7347_s29 + $0x9] sm:$0xff]  ;;  %v938_v40 = vld [vmem:[%s7347_s29 + $0x91] sm:$0xff]  ;;  %v947_v52 = vld [vmem:[%s7347_s29 + $0xf9] sm:$0xff] }
  0x1d   : > { %v932_v36 = vld [vmem:[%s7347_s29 + $0x49] sm:$0xff]  ;;  %v941_v44 = vld [vmem:[%s7347_s29 + $0xb1] sm:$0xff]  ;;  %v950_v56 = vld [vmem:[%s7347_s29 + $0x121] sm:$0xff] }
  0x1e   : > { %v935_v38 = vld [vmem:[%s7347_s29 + $0x69] sm:$0xff]  ;;  %v953_v60 = vld [vmem:[%s7347_s29 + $0x141] sm:$0xff] }
  0x1f   : > { %v956_v6 = vld [vmem:[%s7347_s29 + $0x169] sm:$0xff] }
  0x20   : > { %v1596_v0 = vld [vmem:[%s7347_s29 + $0x142] sm:$0xff] }
  0x22   : > { %357 = vperm.xlu2 %6985, %v7371_v7   ;;  %352 = vperm.xlu1 %6984, %v7374_v8  }
  0x23   : > { %347 = vperm.xlu0 %6983, %v289_v9  }
  0x2a   : > { %372 = vperm.xlu2 %6985, %v7380_v10   ;;  %367 = vperm.xlu1 %6984, %v7383_v11  }
  0x2b   : > { %362 = vperm.xlu0 %6983, %v292_v12  }
  0x32   : > { %387 = vperm.xlu2 %6985, %v7389_v13   ;;  %382 = vperm.xlu1 %6984, %v7392_v14  }
  0x33   : > { %377 = vperm.xlu0 %6983, %v295_v15  }
  0x3a   : > { %402 = vperm.xlu2 %6985, %v7398_v16   ;;  %397 = vperm.xlu1 %6984, %v7401_v17  }
  0x3b   : > { %392 = vperm.xlu0 %6983, %v298_v18   ;;  %v1570_v18 = vld [vmem:[%s7347_s29 + $0xa] sm:$0xff] }
  0x42   : > { %417 = vperm.xlu2 %6985, %v7407_v19   ;;  %412 = vperm.xlu1 %6984, %v7410_v20  }
  0x43   : > { %407 = vperm.xlu0 %6983, %v301_v21   ;;  %v13645_v21 = vmov 2  }
  0x4a   : > { %432 = vperm.xlu2 %6985, %v7416_v22   ;;  %427 = vperm.xlu1 %6984, %v7419_v23  }
  0x4b   : > { %422 = vperm.xlu0 %6983, %v304_v24  }
  0x52   : > { %447 = vperm.xlu2 %6985, %v7425_v25   ;;  %442 = vperm.xlu1 %6984, %v7428_v26  }
  0x53   : > { %437 = vperm.xlu0 %6983, %v307_v27  }
  0x5a   : > { %462 = vperm.xlu2 %6985, %v7434_v28   ;;  %457 = vperm.xlu1 %6984, %v7437_v29  }
  0x5b   : > { %452 = vperm.xlu0 %6983, %v310_v30  }
  0x62   : > { %6986 = vset.pattern.permute.xlu2 %v13647_v33  ;;  %472 = vperm.xlu1 %6984, %v7443_v31  }
  0x63   : > { %467 = vperm.xlu0 %6983, %v313_v32   ;;  %541 = vperm.xlu2 %6986, %v7356_v3   ;;  %v1575_v32 = vld [vmem:[%s7347_s29 + $0x4a] sm:$0xff] }
  0x6a   : > { %6987 = vset.pattern.permute.xlu1 %v13647_v33 }
  0x6b   : > { %965 = vperm.xlu0 %6983, %v927_v34   ;;  %549 = vperm.xlu1 %6987, %v7353_v2  }
  0x6c   : > { %553 = vperm.xlu2 %6986, %v7365_v5   ;;  %v7453_v35 = vpop.permute.xlu2 %337 }
  0x73   : > { %990 = vperm.xlu0 %6983, %v932_v36   ;;  %557 = vperm.xlu1 %6987, %v7350_v1  }
  0x74   : > { %561 = vperm.xlu2 %6986, %v7362_v4   ;;  %v7458_v37 = vpop.permute.xlu2 %342 }
  0x7b   : > { %1005 = vperm.xlu0 %6983, %v935_v38   ;;  %569 = vperm.xlu1 %6987, %v7374_v8  }
  0x7c   : > { %573 = vperm.xlu2 %6986, %v7371_v7   ;;  %v7463_v39 = vpop.permute.xlu2 %357 }
  0x83   : > { %1020 = vperm.xlu0 %6983, %v938_v40   ;;  %581 = vperm.xlu1 %6987, %v7383_v11  }
  0x84   : > { %585 = vperm.xlu2 %6986, %v7380_v10   ;;  %v7468_v41 = vpop.permute.xlu2 %372  ;;  %v7470_v42 = vpop.permute.xlu1 %327 }
  0x85   : > { %v7472_v43 = vpop.permute.xlu0 %317 }
  0x8b   : > { %1035 = vperm.xlu0 %6983, %v941_v44   ;;  %593 = vperm.xlu1 %6987, %v7392_v14  }
  0x8c   : > { %597 = vperm.xlu2 %6986, %v7389_v13   ;;  %v7477_v45 = vpop.permute.xlu2 %387  ;;  %v7479_v46 = vpop.permute.xlu1 %332 }
  0x8d   : > { %v7481_v47 = vpop.permute.xlu0 %322 }
  0x93   : > { %1050 = vperm.xlu0 %6983, %v944_v48   ;;  %605 = vperm.xlu1 %6987, %v7401_v17   ;;  %v1581_v48 = vld [vmem:[%s7347_s29 + $0x92] sm:$0xff] }
  0x94   : > { %609 = vperm.xlu2 %6986, %v7398_v16   ;;  %v7486_v49 = vpop.permute.xlu2 %402  ;;  %v7488_v50 = vpop.permute.xlu1 %352 }
  0x95   : > { %v7490_v51 = vpop.permute.xlu0 %347 }
  0x9b   : > { %1065 = vperm.xlu0 %6983, %v947_v52   ;;  %617 = vperm.xlu1 %6987, %v7410_v20  }
  0x9c   : > { %621 = vperm.xlu2 %6986, %v7407_v19   ;;  %v7495_v53 = vpop.permute.xlu2 %417  ;;  %v7497_v54 = vpop.permute.xlu1 %367 }
  0x9d   : > { %v7499_v55 = vpop.permute.xlu0 %362 }
  0xa3   : > { %1080 = vperm.xlu0 %6983, %v950_v56   ;;  %629 = vperm.xlu1 %6987, %v7419_v23  }
  0xa4   : > { %633 = vperm.xlu2 %6986, %v7416_v22   ;;  %v7504_v57 = vpop.permute.xlu2 %432  ;;  %v7506_v58 = vpop.permute.xlu1 %382 }
  0xa5   : > { %v7508_v59 = vpop.permute.xlu0 %377 }
  0xab   : > { %1095 = vperm.xlu0 %6983, %v953_v60   ;;  %641 = vperm.xlu1 %6987, %v7428_v26   ;;  %v1584_v60 = vld [vmem:[%s7347_s29 + $0xb2] sm:$0xff] }
  0xac   : > { %645 = vperm.xlu2 %6986, %v7425_v25   ;;  %v7513_v61 = vpop.permute.xlu2 %447  ;;  %v7515_v62 = vpop.permute.xlu1 %397 }
  0xad   : > { %13729 = vst [vmem:[#allocation2_spill] sm:$0xff] %v7515_v62  ;;  %v7517_v63 = vpop.permute.xlu0 %392 }
  0xae   : > { %13730 = vst [vmem:[#allocation3_spill] sm:$0xff] %v7517_v63 }
  0xb3   : > { %1110 = vperm.xlu0 %6983, %v956_v6   ;;  %653 = vperm.xlu1 %6987, %v7437_v29  }
  0xb4   : > { %657 = vperm.xlu2 %6986, %v7434_v28   ;;  %v7522_v9 = vpop.permute.xlu2 %462  ;;  %v7524_v12 = vpop.permute.xlu1 %412 }
  0xb5   : > { %13731 = vst [vmem:[#allocation4_spill] sm:$0xff] %v7522_v9  ;;  %v7526_v15 = vpop.permute.xlu0 %407 }
  0xb6   : > { %13732 = vst [vmem:[#allocation5_spill] sm:$0xff] %v7524_v12 }
  0xb7   : > { %13733 = vst [vmem:[#allocation6_spill] sm:$0xff] %v7526_v15  ;;  %v8100_v15 = vld [vmem:[%s7347_s29 + $0x170] sm:$0xff] }
  0xbb   : > { %1608 = vperm.xlu0 %6983, %v1570_v18   ;;  %665 = vperm.xlu1 %6987, %v7443_v31   ;;  %v1587_v18 = vld [vmem:[%s7347_s29 + $0xda] sm:$0xff] }
  0xbc   : > { %6988 = vset.pattern.permute.xlu2 %v13645_v21  ;;  %v7531_v24 = vpop.permute.xlu1 %427 }
  0xbd   : > { %13734 = vst [vmem:[#allocation7_spill] sm:$0xff] %v7531_v24  ;;  %734 = vperm.xlu2 %6988, %v7356_v3   ;;  %v7534_v27 = vpop.permute.xlu0 %422  ;;  %v7536_v30 = vpop.permute.xlu2 %541  ;;  %v1578_v3 = vld [vmem:[%s7347_s29 + $0x6a] sm:$0xff] }
  0xbe   : > { %13735 = vst [vmem:[#allocation8_spill] sm:$0xff] %v7534_v27 }
  0xc3   : > { %1633 = vperm.xlu0 %6983, %v1575_v32   ;;  %6989 = vset.pattern.permute.xlu1 %v13645_v21  ;;  %v1593_v21 = vld [vmem:[%s7347_s29 + $0x122] sm:$0xff] }
  0xc4   : > { %742 = vperm.xlu1 %6989, %v7353_v2   ;;  %v7541_v34 = vpop.permute.xlu1 %442 }
  0xc5   : > { %13736 = vst [vmem:[#allocation9_spill] sm:$0xff] %v7541_v34  ;;  %746 = vperm.xlu2 %6988, %v7365_v5   ;;  %v7544_v36 = vpop.permute.xlu0 %437  ;;  %v7918_v34 = vld [vmem:[%s7347_s29 + $0xca] sm:$0xff] }
  0xc6   : > { %13737 = vst [vmem:[#allocation10_spill] sm:$0xff] %v7544_v36  ;;  %v7546_v38 = vpop.permute.xlu2 %553 }
  0xc7   : > { %13738 = vst [vmem:[#allocation11_spill] sm:$0xff] %v7546_v38  ;;  %v8109_v38 = vld [vmem:[%s7347_s29 + $0x7a] sm:$0xff] }
  0xcb   : > { %1648 = vperm.xlu0 %6983, %v1578_v3  }
  0xcc   : > { %750 = vperm.xlu1 %6989, %v7350_v1   ;;  %v7550_v40 = vpop.permute.xlu1 %457 }
  0xcd   : > { %13739 = vst [vmem:[#allocation12_spill] sm:$0xff] %v7550_v40  ;;  %754 = vperm.xlu2 %6988, %v7362_v4   ;;  %v7553_v44 = vpop.permute.xlu0 %452 }
  0xce   : > { %13740 = vst [vmem:[#allocation13_spill] sm:$0xff] %v7553_v44  ;;  %v7555_v2 = vpop.permute.xlu2 %561  ;;  %v7794_v44 = vld [vmem:[%s7347_s29 + $0x171] sm:$0xff] }
  0xcf   : > { %13741 = vst [vmem:[#allocation14_spill] sm:$0xff] %v7555_v2 }
  0xd3   : > { %1663 = vperm.xlu0 %6983, %v1581_v48   ;;  %v1590_v48 = vld [vmem:[%s7347_s29 + $0xfa] sm:$0xff] }
  0xd4   : > { %762 = vperm.xlu1 %6989, %v7374_v8   ;;  %v7559_v52 = vpop.permute.xlu1 %472 }
  0xd5   : > { %13742 = vst [vmem:[#allocation15_spill] sm:$0xff] %v7559_v52  ;;  %766 = vperm.xlu2 %6988, %v7371_v7   ;;  %v7562_v56 = vpop.permute.xlu0 %467 }
  0xd6   : > { %13743 = vst [vmem:[#allocation16_spill] sm:$0xff] %v7562_v56  ;;  %v7564_v1 = vpop.permute.xlu2 %573 }
  0xd7   : > { %13744 = vst [vmem:[#allocation17_spill] sm:$0xff] %v7564_v1  ;;  %v8079_v1 = vld [vmem:[%s7347_s29 + $0x3a] sm:$0xff] }
  0xdb   : > { %1678 = vperm.xlu0 %6983, %v1584_v60  }
  0xdc   : > { %774 = vperm.xlu1 %6989, %v7383_v11  }
  0xdd   : > { %778 = vperm.xlu2 %6988, %v7380_v10   ;;  %v7569_v4 = vpop.permute.xlu0 %965  ;;  %v7571_v6 = vpop.permute.xlu1 %549 }
  0xde   : > { %13745 = vst [vmem:[#allocation18_spill] sm:$0xff] %v7569_v4  ;;  %v7573_v8 = vpop.permute.xlu2 %585 }
  0xdf   : > { %13746 = vst [vmem:[#allocation19_spill] sm:$0xff] %v7571_v6  ;;  %v7907_v6 = vld [vmem:[%s7347_s29 + $0xaa] sm:$0xff] }
  0xe0   : > { %13747 = vst [vmem:[#allocation20_spill] sm:$0xff] %v7573_v8  ;;  %v7895_v8 = vld [vmem:[%s7347_s29 + $0x82] sm:$0xff] }
  0xe3   : > { %1693 = vperm.xlu0 %6983, %v1587_v18  }
  0xe4   : > { %786 = vperm.xlu1 %6989, %v7392_v14  }
  0xe5   : > { %790 = vperm.xlu2 %6988, %v7389_v13   ;;  %v7578_v32 = vpop.permute.xlu0 %990  ;;  %v7580_v3 = vpop.permute.xlu1 %557 }
  0xe6   : > { %13748 = vst [vmem:[#allocation21_spill] sm:$0xff] %v7578_v32  ;;  %v7582_v11 = vpop.permute.xlu2 %597 }
  0xe7   : > { %13749 = vst [vmem:[#allocation22_spill] sm:$0xff] %v7580_v3 }
  0xe8   : > { %13750 = vst [vmem:[#allocation23_spill] sm:$0xff] %v7582_v11 }
  0xeb   : > { %1708 = vperm.xlu0 %6983, %v1590_v48  }
  0xec   : > { %798 = vperm.xlu1 %6989, %v7401_v17  }
  0xed   : > { %802 = vperm.xlu2 %6988, %v7398_v16   ;;  %v7587_v60 = vpop.permute.xlu0 %1005  ;;  %v7589_v18 = vpop.permute.xlu1 %569 }
  0xee   : > { %13751 = vst [vmem:[#allocation24_spill] sm:$0xff] %v7587_v60  ;;  %v7591_v14 = vpop.permute.xlu2 %609 }
  0xef   : > { %13752 = vst [vmem:[#allocation25_spill] sm:$0xff] %v7589_v18 }
  0xf0   : > { %13753 = vst [vmem:[#allocation26_spill] sm:$0xff] %v7591_v14 }
  0xf3   : > { %1723 = vperm.xlu0 %6983, %v1593_v21   ;;  %v1599_v21 = vld [vmem:[%s7347_s29 + $0x16a] sm:$0xff] }
  0xf4   : > { %810 = vperm.xlu1 %6989, %v7410_v20  }
  0xf5   : > { %814 = vperm.xlu2 %6988, %v7407_v19   ;;  %v7596_v33 = vpop.permute.xlu0 %1020  ;;  %v7598_v48 = vpop.permute.xlu1 %581 }
  0xf6   : > { %13754 = vst [vmem:[#allocation27_spill] sm:$0xff] %v7596_v33  ;;  %v7600_v17 = vpop.permute.xlu2 %621 }
  0xf7   : > { %13755 = vst [vmem:[#allocation28_spill] sm:$0xff] %v7598_v48 }
  0xf8   : > { %13756 = vst [vmem:[#allocation29_spill] sm:$0xff] %v7600_v17 }
  0xfb   : > { %1738 = vperm.xlu0 %6983, %v1596_v0  }
  0xfc   : > { %822 = vperm.xlu1 %6989, %v7419_v23  }
  0xfd   : > { %826 = vperm.xlu2 %6988, %v7416_v22   ;;  %v7605_v18 = vpop.permute.xlu0 %1035  ;;  %v7607_v14 = vpop.permute.xlu1 %593 }
  0xfe   : > { %13757 = vst [vmem:[#allocation30_spill] sm:$0xff] %v7605_v18  ;;  %v7609_v20 = vpop.permute.xlu2 %633 }
  0xff   : > { %13758 = vst [vmem:[#allocation31_spill] sm:$0xff] %v7607_v14  ;;  %v7704_v14 = vld [vmem:[%s7347_s29 + $0x99] sm:$0xff] }
 0x100   : > { %13759 = vst [vmem:[#allocation32_spill] sm:$0xff] %v7609_v20  ;;  %v7689_v20 = vld [vmem:[%s7347_s29 + $0x79] sm:$0xff] }
 0x103   : > { %1753 = vperm.xlu0 %6983, %v1599_v21  }
 0x104   : > { %834 = vperm.xlu1 %6989, %v7428_v26  }
 0x105   : > { %838 = vperm.xlu2 %6988, %v7425_v25   ;;  %v7614_v33 = vpop.permute.xlu0 %1050  ;;  %v7616_v0 = vpop.permute.xlu1 %605 }
 0x106   : > { %13760 = vst [vmem:[#allocation33_spill] sm:$0xff] %v7614_v33  ;;  %v7618_v23 = vpop.permute.xlu2 %645  ;;  %v7631_v33 = vld [vmem:[%s7347_s29 + $0x1] sm:$0xff] }
 0x107   : > { %13761 = vst [vmem:[#allocation34_spill] sm:$0xff] %v7616_v0  ;;  %v7674_v0 = vld [vmem:[%s7347_s29 + $0x51] sm:$0xff] }
 0x108   : > { %13762 = vst [vmem:[#allocation35_spill] sm:$0xff] %v7618_v23  ;;  %v13766_v23 = vmov 0  }
 0x10b   : > { %2252 = vperm.xlu0 %6983, %v7365_v5  }
 0x10c   : > { %846 = vperm.xlu1 %6989, %v7437_v29  }
 0x10d   : > { %850 = vperm.xlu2 %6988, %v7434_v28   ;;  %v7623_v18 = vpop.permute.xlu0 %1065  ;;  %v7625_v21 = vpop.permute.xlu1 %617 }
 0x10e   : > { %13763 = vst [vmem:[#allocation36_spill] sm:$0xff] %v7623_v18  ;;  %v7627_v26 = vpop.permute.xlu2 %657 }
 0x10f   : > { %13764 = vst [vmem:[#allocation37_spill] sm:$0xff] %v7625_v21  ;;  %v7643_v21 = vld [vmem:[%s7347_s29 + $0x19] sm:$0xff] }
 0x110   : > { %13765 = vst [vmem:[#allocation38_spill] sm:$0xff] %v7627_v26 }
 0x113   : > { %2277 = vperm.xlu0 %6983, %v7371_v7   ;;  %v7647_v7 = vld [vmem:[%s7347_s29 + $0x21] sm:$0xff] }
 0x114   : > { %858 = vperm.xlu1 %6989, %v7443_v31  }
 0x115   : > { %6990 = vset.pattern.permute.xlu2 %v13766_v23  ;;  %v7635_v5 = vpop.permute.xlu0 %1080  ;;  %v7637_v29 = vpop.permute.xlu1 %629 }
 0x116   : > { %13767 = vst [vmem:[#allocation39_spill] sm:$0xff] %v7635_v5  ;;  %960 = vperm.xlu2 %6990, %v7631_v33  }
 0x117   : > { %13768 = vst [vmem:[#allocation40_spill] sm:$0xff] %v7637_v29  ;;  %v7640_v18 = vpop.permute.xlu2 %734 }
 0x118   : > { %13769 = vst [vmem:[#allocation41_spill] sm:$0xff] %v7640_v18  ;;  %v7659_v18 = vld [vmem:[%s7347_s29 + $0x31] sm:$0xff] }
 0x11b   : > { %2292 = vperm.xlu0 %6983, %v7380_v10   ;;  %v7663_v10 = vld [vmem:[%s7347_s29 + $0x39] sm:$0xff] }
 0x11c   : > { %6991 = vset.pattern.permute.xlu1 %v13766_v23 }
 0x11d   : > { %v7650_v31 = vpop.permute.xlu0 %1095  ;;  %970 = vperm.xlu1 %6991, %v7643_v21   ;;  %v7653_v5 = vpop.permute.xlu1 %641 }
 0x11e   : > { %13770 = vst [vmem:[#allocation42_spill] sm:$0xff] %v7650_v31  ;;  %975 = vperm.xlu2 %6990, %v7647_v7  }
 0x11f   : > { %13771 = vst [vmem:[#allocation43_spill] sm:$0xff] %v7653_v5  ;;  %v7656_v29 = vpop.permute.xlu2 %746 }
 0x120   : > { %13772 = vst [vmem:[#allocation44_spill] sm:$0xff] %v7656_v29  ;;  %v7678_v29 = vld [vmem:[%s7347_s29 + $0x61] sm:$0xff] }
 0x123   : > { %2307 = vperm.xlu0 %6983, %v7389_v13  }
 0x125   : > { %v7665_v26 = vpop.permute.xlu0 %1110  ;;  %980 = vperm.xlu1 %6991, %v7659_v18   ;;  %v7668_v31 = vpop.permute.xlu1 %653 }
 0x126   : > { %13773 = vst [vmem:[#allocation45_spill] sm:$0xff] %v7665_v26  ;;  %985 = vperm.xlu2 %6990, %v7663_v10  }
 0x127   : > { %13774 = vst [vmem:[#allocation46_spill] sm:$0xff] %v7668_v31  ;;  %v7671_v5 = vpop.permute.xlu2 %754 }
 0x128   : > { %13775 = vst [vmem:[#allocation47_spill] sm:$0xff] %v7671_v5  ;;  %v7693_v5 = vld [vmem:[%s7347_s29 + $0x81] sm:$0xff] }
 0x12b   : > { %2322 = vperm.xlu0 %6983, %v7398_v16  }
 0x12d   : > { %v7680_v13 = vpop.permute.xlu0 %1608  ;;  %995 = vperm.xlu1 %6991, %v7674_v0   ;;  %v7683_v26 = vpop.permute.xlu1 %665 }
 0x12e   : > { %13776 = vst [vmem:[#allocation48_spill] sm:$0xff] %v7680_v13  ;;  %1000 = vperm.xlu2 %6990, %v7678_v29  }
 0x12f   : > { %13777 = vst [vmem:[#allocation49_spill] sm:$0xff] %v7683_v26  ;;  %v7686_v31 = vpop.permute.xlu2 %766 }
 0x130   : > { %13778 = vst [vmem:[#allocation50_spill] sm:$0xff] %v7686_v31  ;;  %v7708_v31 = vld [vmem:[%s7347_s29 + $0xa9] sm:$0xff] }
 0x133   : > { %2337 = vperm.xlu0 %6983, %v7407_v19  }
 0x135   : > { %v7695_v16 = vpop.permute.xlu0 %1633  ;;  %1010 = vperm.xlu1 %6991, %v7689_v20  }
 0x136   : > { %13779 = vst [vmem:[#allocation51_spill] sm:$0xff] %v7695_v16  ;;  %1015 = vperm.xlu2 %6990, %v7693_v5   ;;  %v7699_v13 = vpop.permute.xlu1 %742 }
 0x137   : > { %13780 = vst [vmem:[#allocation52_spill] sm:$0xff] %v7699_v13  ;;  %v7701_v26 = vpop.permute.xlu2 %778  ;;  %v7719_v13 = vld [vmem:[%s7347_s29 + $0xc1] sm:$0xff] }
 0x138   : > { %13781 = vst [vmem:[#allocation53_spill] sm:$0xff] %v7701_v26 }
 0x13b   : > { %2352 = vperm.xlu0 %6983, %v7416_v22   ;;  %v7723_v22 = vld [vmem:[%s7347_s29 + $0xc9] sm:$0xff] }
 0x13d   : > { %v7710_v19 = vpop.permute.xlu0 %1648  ;;  %1025 = vperm.xlu1 %6991, %v7704_v14  }
 0x13e   : > { %13782 = vst [vmem:[#allocation54_spill] sm:$0xff] %v7710_v19  ;;  %1030 = vperm.xlu2 %6990, %v7708_v31   ;;  %v7714_v16 = vpop.permute.xlu1 %750 }
 0x13f   : > { %13783 = vst [vmem:[#allocation55_spill] sm:$0xff] %v7714_v16  ;;  %v7716_v17 = vpop.permute.xlu2 %790 }
 0x140   : > { %13784 = vst [vmem:[#allocation56_spill] sm:$0xff] %v7716_v17  ;;  %v7734_v17 = vld [vmem:[%s7347_s29 + $0xe1] sm:$0xff] }
 0x143   : > { %2367 = vperm.xlu0 %6983, %v7425_v25   ;;  %v7738_v25 = vld [vmem:[%s7347_s29 + $0xf1] sm:$0xff] }
 0x145   : > { %v7725_v26 = vpop.permute.xlu0 %1663  ;;  %1040 = vperm.xlu1 %6991, %v7719_v13  }
 0x146   : > { %13785 = vst [vmem:[#allocation57_spill] sm:$0xff] %v7725_v26  ;;  %1045 = vperm.xlu2 %6990, %v7723_v22   ;;  %v7729_v19 = vpop.permute.xlu1 %762 }
 0x147   : > { %13786 = vst [vmem:[#allocation58_spill] sm:$0xff] %v7729_v19  ;;  %v7731_v16 = vpop.permute.xlu2 %802  ;;  %v6799_v19 = vld [vmem:[%s7347_s29 + $0x180] sm:$0xff] }
 0x148   : > { %13787 = vst [vmem:[#allocation59_spill] sm:$0xff] %v7731_v16  ;;  %v7750_v16 = vld [vmem:[%s7347_s29 + $0x109] sm:$0xff] }
 0x14b   : > { %2382 = vperm.xlu0 %6983, %v7434_v28   ;;  %v7753_v28 = vld [vmem:[%s7347_s29 + $0x111] sm:$0xff] }
 0x14d   : > { %v7740_v48 = vpop.permute.xlu0 %1678  ;;  %1055 = vperm.xlu1 %6991, %v7734_v17  }
 0x14e   : > { %13788 = vst [vmem:[#allocation60_spill] sm:$0xff] %v7740_v48  ;;  %1060 = vperm.xlu2 %6990, %v7738_v25   ;;  %v7744_v26 = vpop.permute.xlu1 %774 }
 0x14f   : > { %13789 = vst [vmem:[#allocation61_spill] sm:$0xff] %v7744_v26  ;;  %v7746_v32 = vpop.permute.xlu2 %814  ;;  %v7764_v26 = vld [vmem:[%s7347_s29 + $0x129] sm:$0xff] }
 0x150   : > { %13790 = vst [vmem:[#allocation62_spill] sm:$0xff] %v7746_v32  ;;  %v7768_v32 = vld [vmem:[%s7347_s29 + $0x139] sm:$0xff] }
 0x153   : > { %2397 = vperm.xlu0 %6983, %v6799_v19  }
 0x155   : > { %v7755_v60 = vpop.permute.xlu0 %1693  ;;  %1070 = vperm.xlu1 %6991, %v7750_v16  }
 0x156   : > { %13791 = vst [vmem:[#allocation63_spill] sm:$0xff] %v7755_v60  ;;  %1075 = vperm.xlu2 %6990, %v7753_v28   ;;  %v7759_v48 = vpop.permute.xlu1 %786 }
 0x157   : > { %13792 = vst [vmem:[#allocation64_spill] sm:$0xff] %v7759_v48  ;;  %v7761_v11 = vpop.permute.xlu2 %826  ;;  %v7779_v48 = vld [vmem:[%s7347_s29 + $0x151] sm:$0xff] }
 0x158   : > { %13793 = vst [vmem:[#allocation65_spill] sm:$0xff] %v7761_v11  ;;  %v7783_v11 = vld [vmem:[%s7347_s29 + $0x159] sm:$0xff] }
 0x15b   : > { %2895 = vperm.xlu0 %6983, %v7647_v7  }
 0x15d   : > { %v7770_v19 = vpop.permute.xlu0 %1708  ;;  %1085 = vperm.xlu1 %6991, %v7764_v26  }
 0x15e   : > { %13794 = vst [vmem:[#allocation66_spill] sm:$0xff] %v7770_v19  ;;  %1090 = vperm.xlu2 %6990, %v7768_v32   ;;  %v7774_v60 = vpop.permute.xlu1 %798 }
 0x15f   : > { %13795 = vst [vmem:[#allocation67_spill] sm:$0xff] %v7774_v60  ;;  %v7776_v4 = vpop.permute.xlu2 %838  ;;  %v13801_v60 = vmov 1  }
 0x160   : > { %13796 = vst [vmem:[#allocation68_spill] sm:$0xff] %v7776_v4 }
 0x163   : > { %2920 = vperm.xlu0 %6983, %v7678_v29  }
 0x165   : > { %v7785_v56 = vpop.permute.xlu0 %1723  ;;  %1100 = vperm.xlu1 %6991, %v7779_v48  }
 0x166   : > { %13797 = vst [vmem:[#allocation69_spill] sm:$0xff] %v7785_v56  ;;  %1105 = vperm.xlu2 %6990, %v7783_v11   ;;  %v7789_v19 = vpop.permute.xlu1 %810 }
 0x167   : > { %13798 = vst [vmem:[#allocation70_spill] sm:$0xff] %v7789_v19  ;;  %v7791_v52 = vpop.permute.xlu2 %850 }
 0x168   : > { %13799 = vst [vmem:[#allocation71_spill] sm:$0xff] %v7791_v52 }
 0x16b   : > { %2935 = vperm.xlu0 %6983, %v7693_v5  }
 0x16d   : > { %v7797_v4 = vpop.permute.xlu0 %1738  ;;  %1115 = vperm.xlu1 %6991, %v7794_v44  }
 0x16e   : > { %13800 = vst [vmem:[#allocation72_spill] sm:$0xff] %v7797_v4  ;;  %6992 = vset.pattern.permute.xlu2 %v13801_v60  ;;  %v7801_v3 = vpop.permute.xlu1 %822 }
 0x16f   : > { %13802 = vst [vmem:[#allocation73_spill] sm:$0xff] %v7801_v3  ;;  %1184 = vperm.xlu2 %6992, %v7631_v33  }
 0x170   : > { %v7804_v56 = vpop.permute.xlu2 %960 }
 0x171   : > { %13803 = vst [vmem:[#allocation74_spill] sm:$0xff] %v7804_v56 }
 0x173   : > { %2950 = vperm.xlu0 %6983, %v7708_v31  }
 0x175   : > { %v7807_v19 = vpop.permute.xlu0 %1753  ;;  %6993 = vset.pattern.permute.xlu1 %v13801_v60 }
 0x176   : > { %13804 = vst [vmem:[#allocation75_spill] sm:$0xff] %v7807_v19  ;;  %1192 = vperm.xlu1 %6993, %v7643_v21   ;;  %v7811_v52 = vpop.permute.xlu1 %834 }
 0x177   : > { %13805 = vst [vmem:[#allocation76_spill] sm:$0xff] %v7811_v52  ;;  %1196 = vperm.xlu2 %6992, %v7647_v7  }
 0x178   : > { %v7814_v4 = vpop.permute.xlu2 %975 }
 0x179   : > { %13806 = vst [vmem:[#allocation77_spill] sm:$0xff] %v7814_v4 }
 0x17b   : > { %2965 = vperm.xlu0 %6983, %v7723_v22  }
 0x17d   : > { %v7817_v3 = vpop.permute.xlu0 %2252 }
 0x17e   : > { %13807 = vst [vmem:[#allocation78_spill] sm:$0xff] %v7817_v3  ;;  %1200 = vperm.xlu1 %6993, %v7659_v18   ;;  %v7820_v56 = vpop.permute.xlu1 %846 }
 0x17f   : > { %13808 = vst [vmem:[#allocation79_spill] sm:$0xff] %v7820_v56  ;;  %1204 = vperm.xlu2 %6992, %v7663_v10  }
 0x180   : > { %v7823_v19 = vpop.permute.xlu2 %985 }
 0x181   : > { %13809 = vst [vmem:[#allocation80_spill] sm:$0xff] %v7823_v19 }
 0x183   : > { %2980 = vperm.xlu0 %6983, %v7738_v25  }
 0x185   : > { %v7826_v40 = vpop.permute.xlu0 %2277 }
 0x186   : > { %13810 = vst [vmem:[#allocation81_spill] sm:$0xff] %v7826_v40  ;;  %1212 = vperm.xlu1 %6993, %v7674_v0   ;;  %v7829_v52 = vpop.permute.xlu1 %858 }
 0x187   : > { %13811 = vst [vmem:[#allocation82_spill] sm:$0xff] %v7829_v52  ;;  %1216 = vperm.xlu2 %6992, %v7678_v29  }
 0x188   : > { %v7832_v4 = vpop.permute.xlu2 %1000 }
 0x189   : > { %13812 = vst [vmem:[#allocation83_spill] sm:$0xff] %v7832_v4 }
 0x18b   : > { %2995 = vperm.xlu0 %6983, %v7753_v28  }
 0x18d   : > { %v7835_v3 = vpop.permute.xlu0 %2292 }
 0x18e   : > { %13813 = vst [vmem:[#allocation84_spill] sm:$0xff] %v7835_v3  ;;  %1224 = vperm.xlu1 %6993, %v7689_v20  }
 0x18f   : > { %1228 = vperm.xlu2 %6992, %v7693_v5   ;;  %v7839_v19 = vpop.permute.xlu1 %970 }
 0x190   : > { %13814 = vst [vmem:[#allocation85_spill] sm:$0xff] %v7839_v19  ;;  %v7841_v56 = vpop.permute.xlu2 %1015 }
 0x191   : > { %13815 = vst [vmem:[#allocation86_spill] sm:$0xff] %v7841_v56 }
 0x193   : > { %3010 = vperm.xlu0 %6983, %v7768_v32  }
 0x195   : > { %v7844_v52 = vpop.permute.xlu0 %2307 }
 0x196   : > { %13816 = vst [vmem:[#allocation87_spill] sm:$0xff] %v7844_v52  ;;  %1236 = vperm.xlu1 %6993, %v7704_v14   ;;  %v6831_v52 = vld [vmem:[%s7347_s29 + $0x181] sm:$0xff] }
 0x197   : > { %1240 = vperm.xlu2 %6992, %v7708_v31   ;;  %v7848_v4 = vpop.permute.xlu1 %980 }
 0x198   : > { %13817 = vst [vmem:[#allocation88_spill] sm:$0xff] %v7848_v4  ;;  %v7850_v40 = vpop.permute.xlu2 %1030 }
 0x199   : > { %13818 = vst [vmem:[#allocation89_spill] sm:$0xff] %v7850_v40 }
 0x19b   : > { %3025 = vperm.xlu0 %6983, %v7783_v11  }
 0x19d   : > { %v7853_v3 = vpop.permute.xlu0 %2322 }
 0x19e   : > { %13819 = vst [vmem:[#allocation90_spill] sm:$0xff] %v7853_v3  ;;  %1248 = vperm.xlu1 %6993, %v7719_v13   ;;  %v7871_v3 = vld [vmem:[%s7347_s29 + $0x22] sm:$0xff] }
 0x19f   : > { %1252 = vperm.xlu2 %6992, %v7723_v22   ;;  %v7857_v56 = vpop.permute.xlu1 %995 }
 0x1a0   : > { %13820 = vst [vmem:[#allocation91_spill] sm:$0xff] %v7857_v56  ;;  %v7859_v19 = vpop.permute.xlu2 %1045 }
 0x1a1   : > { %13821 = vst [vmem:[#allocation92_spill] sm:$0xff] %v7859_v19 }
 0x1a3   : > { %3040 = vperm.xlu0 %6983, %v6831_v52  }
 0x1a5   : > { %v7862_v36 = vpop.permute.xlu0 %2337 }
 0x1a6   : > { %13822 = vst [vmem:[#allocation93_spill] sm:$0xff] %v7862_v36  ;;  %1260 = vperm.xlu1 %6993, %v7734_v17   ;;  %v7883_v36 = vld [vmem:[%s7347_s29 + $0x62] sm:$0xff] }
 0x1a7   : > { %1264 = vperm.xlu2 %6992, %v7738_v25   ;;  %v7866_v40 = vpop.permute.xlu1 %1010 }
 0x1a8   : > { %13823 = vst [vmem:[#allocation94_spill] sm:$0xff] %v7866_v40  ;;  %v7868_v4 = vpop.permute.xlu2 %1060 }
 0x1a9   : > { %13824 = vst [vmem:[#allocation95_spill] sm:$0xff] %v7868_v4 }
 0x1ab   : > { %3538 = vperm.xlu0 %6983, %v7871_v3  }
 0x1ad   : > { %v7874_v56 = vpop.permute.xlu0 %2352 }
 0x1ae   : > { %13825 = vst [vmem:[#allocation96_spill] sm:$0xff] %v7874_v56  ;;  %1272 = vperm.xlu1 %6993, %v7750_v16  }
 0x1af   : > { %1276 = vperm.xlu2 %6992, %v7753_v28   ;;  %v7878_v52 = vpop.permute.xlu1 %1025 }
 0x1b0   : > { %13826 = vst [vmem:[#allocation97_spill] sm:$0xff] %v7878_v52  ;;  %v7880_v19 = vpop.permute.xlu2 %1075 }
 0x1b1   : > { %13827 = vst [vmem:[#allocation98_spill] sm:$0xff] %v7880_v19 }
 0x1b3   : > { %3563 = vperm.xlu0 %6983, %v7883_v36  }
 0x1b5   : > { %v7886_v4 = vpop.permute.xlu0 %2367 }
 0x1b6   : > { %13828 = vst [vmem:[#allocation99_spill] sm:$0xff] %v7886_v4  ;;  %1284 = vperm.xlu1 %6993, %v7764_v26  }
 0x1b7   : > { %1288 = vperm.xlu2 %6992, %v7768_v32   ;;  %v7890_v40 = vpop.permute.xlu1 %1040 }
 0x1b8   : > { %13829 = vst [vmem:[#allocation100_spill] sm:$0xff] %v7890_v40  ;;  %v7892_v56 = vpop.permute.xlu2 %1090  ;;  %v13835_v40 = vmov 2  }
 0x1b9   : > { %13830 = vst [vmem:[#allocation101_spill] sm:$0xff] %v7892_v56 }
 0x1bb   : > { %3578 = vperm.xlu0 %6983, %v7895_v8  }
 0x1bd   : > { %v7898_v19 = vpop.permute.xlu0 %2382 }
 0x1be   : > { %13831 = vst [vmem:[#allocation102_spill] sm:$0xff] %v7898_v19  ;;  %1296 = vperm.xlu1 %6993, %v7779_v48  }
 0x1bf   : > { %1300 = vperm.xlu2 %6992, %v7783_v11   ;;  %v7902_v52 = vpop.permute.xlu1 %1055 }
 0x1c0   : > { %13832 = vst [vmem:[#allocation103_spill] sm:$0xff] %v7902_v52  ;;  %v7904_v4 = vpop.permute.xlu2 %1105 }
 0x1c1   : > { %13833 = vst [vmem:[#allocation104_spill] sm:$0xff] %v7904_v4 }
 0x1c3   : > { %3593 = vperm.xlu0 %6983, %v7907_v6  }
 0x1c5   : > { %v7910_v56 = vpop.permute.xlu0 %2397 }
 0x1c6   : > { %13834 = vst [vmem:[#allocation105_spill] sm:$0xff] %v7910_v56  ;;  %1308 = vperm.xlu1 %6993, %v7794_v44  }
 0x1c7   : > { %6994 = vset.pattern.permute.xlu2 %v13835_v40  ;;  %v7914_v19 = vpop.permute.xlu1 %1070 }
 0x1c8   : > { %13836 = vst [vmem:[#allocation106_spill] sm:$0xff] %v7914_v19  ;;  %1377 = vperm.xlu2 %6994, %v7631_v33   ;;  %v7931_v19 = vld [vmem:[%s7347_s29 + $0xf2] sm:$0xff] }
 0x1c9   : > { %v7920_v52 = vpop.permute.xlu2 %1184 }
 0x1ca   : > { %13837 = vst [vmem:[#allocation107_spill] sm:$0xff] %v7920_v52 }
 0x1cb   : > { %3608 = vperm.xlu0 %6983, %v7918_v34  }
 0x1cd   : > { %v7923_v4 = vpop.permute.xlu0 %2895 }
 0x1ce   : > { %13838 = vst [vmem:[#allocation108_spill] sm:$0xff] %v7923_v4  ;;  %6995 = vset.pattern.permute.xlu1 %v13835_v40 }
 0x1cf   : > { %1385 = vperm.xlu1 %6995, %v7643_v21   ;;  %v7927_v56 = vpop.permute.xlu1 %1085  ;;  %v7943_v21 = vld [vmem:[%s7347_s29 + $0x112] sm:$0xff] }
 0x1d0   : > { %13839 = vst [vmem:[#allocation109_spill] sm:$0xff] %v7927_v56  ;;  %1389 = vperm.xlu2 %6994, %v7647_v7  }
 0x1d1   : > { %v7933_v33 = vpop.permute.xlu2 %1196 }
 0x1d2   : > { %13840 = vst [vmem:[#allocation110_spill] sm:$0xff] %v7933_v33 }
 0x1d3   : > { %3623 = vperm.xlu0 %6983, %v7931_v19  }
 0x1d5   : > { %v7936_v52 = vpop.permute.xlu0 %2920 }
 0x1d6   : > { %13841 = vst [vmem:[#allocation111_spill] sm:$0xff] %v7936_v52 }
 0x1d7   : > { %1393 = vperm.xlu1 %6995, %v7659_v18   ;;  %v7939_v4 = vpop.permute.xlu1 %1100  ;;  %v7955_v18 = vld [vmem:[%s7347_s29 + $0x13a] sm:$0xff] }
 0x1d8   : > { %13842 = vst [vmem:[#allocation112_spill] sm:$0xff] %v7939_v4  ;;  %1397 = vperm.xlu2 %6994, %v7663_v10  }
 0x1d9   : > { %v7945_v56 = vpop.permute.xlu2 %1204 }
 0x1da   : > { %13843 = vst [vmem:[#allocation113_spill] sm:$0xff] %v7945_v56 }
 0x1db   : > { %3638 = vperm.xlu0 %6983, %v7943_v21  }
 0x1dd   : > { %v7948_v7 = vpop.permute.xlu0 %2935 }
 0x1de   : > { %13844 = vst [vmem:[#allocation114_spill] sm:$0xff] %v7948_v7 }
 0x1df   : > { %1405 = vperm.xlu1 %6995, %v7674_v0   ;;  %v7951_v33 = vpop.permute.xlu1 %1115  ;;  %v7967_v0 = vld [vmem:[%s7347_s29 + $0x15a] sm:$0xff] }
 0x1e0   : > { %13845 = vst [vmem:[#allocation115_spill] sm:$0xff] %v7951_v33  ;;  %1409 = vperm.xlu2 %6994, %v7678_v29  }
 0x1e1   : > { %v7957_v4 = vpop.permute.xlu2 %1216 }
 0x1e2   : > { %13846 = vst [vmem:[#allocation116_spill] sm:$0xff] %v7957_v4 }
 0x1e3   : > { %3653 = vperm.xlu0 %6983, %v7955_v18  }
 0x1e5   : > { %v7960_v52 = vpop.permute.xlu0 %2950 }
 0x1e6   : > { %13847 = vst [vmem:[#allocation117_spill] sm:$0xff] %v7960_v52  ;;  %v6863_v52 = vld [vmem:[%s7347_s29 + $0x182] sm:$0xff] }
 0x1e7   : > { %1417 = vperm.xlu1 %6995, %v7689_v20  }
 0x1e8   : > { %1421 = vperm.xlu2 %6994, %v7693_v5   ;;  %v7964_v56 = vpop.permute.xlu1 %1192 }
 0x1e9   : > { %13848 = vst [vmem:[#allocation118_spill] sm:$0xff] %v7964_v56  ;;  %v7969_v33 = vpop.permute.xlu2 %1228 }
 0x1ea   : > { %13849 = vst [vmem:[#allocation119_spill] sm:$0xff] %v7969_v33 }
 0x1eb   : > { %3668 = vperm.xlu0 %6983, %v7967_v0  }
 0x1ed   : > { %v7972_v29 = vpop.permute.xlu0 %2965 }
 0x1ee   : > { %13850 = vst [vmem:[#allocation120_spill] sm:$0xff] %v7972_v29  ;;  %v7988_v29 = vld [vmem:[%s7347_s29 + $0x38] sm:$0xff] }
 0x1ef   : > { %1429 = vperm.xlu1 %6995, %v7704_v14  }
 0x1f0   : > { %1433 = vperm.xlu2 %6994, %v7708_v31   ;;  %v7976_v4 = vpop.permute.xlu1 %1200 }
 0x1f1   : > { %13851 = vst [vmem:[#allocation121_spill] sm:$0xff] %v7976_v4  ;;  %v7979_v5 = vpop.permute.xlu2 %1240  ;;  %v8012_v4 = vld [vmem:[%s7347_s29 + $0x98] sm:$0xff] }
 0x1f2   : > { %13852 = vst [vmem:[#allocation122_spill] sm:$0xff] %v7979_v5  ;;  %v8000_v5 = vld [vmem:[%s7347_s29 + $0x78] sm:$0xff] }
 0x1f3   : > { %3683 = vperm.xlu0 %6983, %v6863_v52  }
 0x1f5   : > { %v7981_v56 = vpop.permute.xlu0 %2980 }
 0x1f6   : > { %13853 = vst [vmem:[#allocation123_spill] sm:$0xff] %v7981_v56 }
 0x1f7   : > { %1441 = vperm.xlu1 %6995, %v7719_v13  }
 0x1f8   : > { %1445 = vperm.xlu2 %6994, %v7723_v22   ;;  %v7985_v33 = vpop.permute.xlu1 %1212 }
 0x1f9   : > { %13854 = vst [vmem:[#allocation124_spill] sm:$0xff] %v7985_v33  ;;  %v7990_v7 = vpop.permute.xlu2 %1252 }
 0x1fa   : > { %13855 = vst [vmem:[#allocation125_spill] sm:$0xff] %v7990_v7 }
 0x1fb   : > { %4182 = vperm.xlu0 %6983, %v7988_v29  }
 0x1fd   : > { %v7993_v31 = vpop.permute.xlu0 %2995 }
 0x1fe   : > { %13856 = vst [vmem:[#allocation126_spill] sm:$0xff] %v7993_v31  ;;  %v8067_v31 = vld [vmem:[%s7347_s29 + $0x128] sm:$0xff] }
 0x1ff   : > { %1453 = vperm.xlu1 %6995, %v7734_v17  }
 0x200   : > { %1457 = vperm.xlu2 %6994, %v7738_v25   ;;  %v7997_v52 = vpop.permute.xlu1 %1224 }
 0x201   : > { %13857 = vst [vmem:[#allocation127_spill] sm:$0xff] %v7997_v52  ;;  %v8002_v22 = vpop.permute.xlu2 %1264 }
 0x202   : > { %13858 = vst [vmem:[#allocation128_spill] sm:$0xff] %v8002_v22 }
 0x203   : > { %4207 = vperm.xlu0 %6983, %v8000_v5  }
 0x205   : > { %v8005_v33 = vpop.permute.xlu0 %3010 }
 0x206   : > { %13859 = vst [vmem:[#allocation129_spill] sm:$0xff] %v8005_v33 }
 0x207   : > { %1465 = vperm.xlu1 %6995, %v7750_v16  }
 0x208   : > { %1469 = vperm.xlu2 %6994, %v7753_v28   ;;  %v8009_v7 = vpop.permute.xlu1 %1236  ;;  %v8024_v28 = vld [vmem:[%s7347_s29 + $0xc0] sm:$0xff] }
 0x209   : > { %13860 = vst [vmem:[#allocation130_spill] sm:$0xff] %v8009_v7  ;;  %v8014_v25 = vpop.permute.xlu2 %1276 }
 0x20a   : > { %13861 = vst [vmem:[#allocation131_spill] sm:$0xff] %v8014_v25 }
 0x20b   : > { %4222 = vperm.xlu0 %6983, %v8012_v4  }
 0x20d   : > { %v8017_v52 = vpop.permute.xlu0 %3025 }
 0x20e   : > { %13862 = vst [vmem:[#allocation132_spill] sm:$0xff] %v8017_v52  ;;  %v8036_v52 = vld [vmem:[%s7347_s29 + $0xe0] sm:$0xff] }
 0x20f   : > { %1477 = vperm.xlu1 %6995, %v7764_v26  }
 0x210   : > { %1481 = vperm.xlu2 %6994, %v7768_v32   ;;  %v8021_v22 = vpop.permute.xlu1 %1248 }
 0x211   : > { %13863 = vst [vmem:[#allocation133_spill] sm:$0xff] %v8021_v22  ;;  %v8026_v33 = vpop.permute.xlu2 %1288 }
 0x212   : > { %13864 = vst [vmem:[#allocation134_spill] sm:$0xff] %v8026_v33  ;;  %v8044_v33 = vld [vmem:[%s7347_s29 + $0x2] sm:$0xff] }
 0x213   : > { %4237 = vperm.xlu0 %6983, %v8024_v28  }
 0x215   : > { %v8029_v7 = vpop.permute.xlu0 %3040 }
 0x216   : > { %13865 = vst [vmem:[#allocation135_spill] sm:$0xff] %v8029_v7 }
 0x217   : > { %1489 = vperm.xlu1 %6995, %v7779_v48  }
 0x218   : > { %1493 = vperm.xlu2 %6994, %v7783_v11   ;;  %v8033_v25 = vpop.permute.xlu1 %1260  ;;  %v8051_v11 = vld [vmem:[%s7347_s29 + $0x108] sm:$0xff] }
 0x219   : > { %13866 = vst [vmem:[#allocation136_spill] sm:$0xff] %v8033_v25  ;;  %v8038_v32 = vpop.permute.xlu2 %1300 }
 0x21a   : > { %13867 = vst [vmem:[#allocation137_spill] sm:$0xff] %v8038_v32 }
 0x21b   : > { %4252 = vperm.xlu0 %6983, %v8036_v52  }
 0x21d   : > { %v8041_v22 = vpop.permute.xlu0 %3538 }
 0x21e   : > { %13868 = vst [vmem:[#allocation138_spill] sm:$0xff] %v8041_v22  ;;  %v8060_v22 = vld [vmem:[%s7347_s29 + $0x1a] sm:$0xff] }
 0x21f   : > { %1501 = vperm.xlu1 %6995, %v7794_v44  }
 0x220   : > { %6996 = vset.pattern.permute.xlu2 %v13766_v23  ;;  %v8048_v7 = vpop.permute.xlu1 %1272 }
 0x221   : > { %13869 = vst [vmem:[#allocation139_spill] sm:$0xff] %v8048_v7  ;;  %1603 = vperm.xlu2 %6996, %v8044_v33  }
 0x222   : > { %v8054_v32 = vpop.permute.xlu2 %1377 }
 0x223   : > { %13870 = vst [vmem:[#allocation140_spill] sm:$0xff] %v8054_v32  ;;  %4267 = vperm.xlu0 %6983, %v8051_v11  }
 0x225   : > { %v8057_v25 = vpop.permute.xlu0 %3563 }
 0x226   : > { %13871 = vst [vmem:[#allocation141_spill] sm:$0xff] %v8057_v25  ;;  %v8076_v25 = vld [vmem:[%s7347_s29 + $0x32] sm:$0xff] }
 0x227   : > { %6997 = vset.pattern.permute.xlu1 %v13766_v23 }
 0x228   : > { %1613 = vperm.xlu1 %6997, %v8060_v22   ;;  %v8064_v7 = vpop.permute.xlu1 %1284 }
 0x229   : > { %13872 = vst [vmem:[#allocation142_spill] sm:$0xff] %v8064_v7  ;;  %1618 = vperm.xlu2 %6996, %v7871_v3   ;;  %v8085_v7 = vld [vmem:[%s7347_s29 + $0x150] sm:$0xff] }
 0x22a   : > { %v8070_v32 = vpop.permute.xlu2 %1389 }
 0x22b   : > { %13873 = vst [vmem:[#allocation143_spill] sm:$0xff] %v8070_v32  ;;  %4282 = vperm.xlu0 %6983, %v8067_v31  }
 0x22d   : > { %v8073_v56 = vpop.permute.xlu0 %3578 }
 0x22e   : > { %13874 = vst [vmem:[#allocation144_spill] sm:$0xff] %v8073_v56  ;;  %v8094_v56 = vld [vmem:[%s7347_s29 + $0x52] sm:$0xff] }
 0x230   : > { %1623 = vperm.xlu1 %6997, %v8076_v25   ;;  %v8082_v27 = vpop.permute.xlu1 %1296 }
 0x231   : > { %13875 = vst [vmem:[#allocation145_spill] sm:$0xff] %v8082_v27  ;;  %1628 = vperm.xlu2 %6996, %v8079_v1  }
 0x232   : > { %v8088_v2 = vpop.permute.xlu2 %1397 }
 0x233   : > { %13876 = vst [vmem:[#allocation146_spill] sm:$0xff] %v8088_v2  ;;  %4297 = vperm.xlu0 %6983, %v8085_v7  }
 0x235   : > { %v8091_v32 = vpop.permute.xlu0 %3593 }
 0x236   : > { %13877 = vst [vmem:[#allocation147_spill] sm:$0xff] %v8091_v32  ;;  %v6895_v32 = vld [vmem:[%s7347_s29 + $0x198] sm:$0xff] }
 0x238   : > { %1638 = vperm.xlu1 %6997, %v8094_v56   ;;  %v8097_v24 = vpop.permute.xlu1 %1308 }
 0x239   : > { %13878 = vst [vmem:[#allocation148_spill] sm:$0xff] %v8097_v24  ;;  %1643 = vperm.xlu2 %6996, %v7883_v36  }
 0x23a   : > { %v8103_v27 = vpop.permute.xlu2 %1409 }
 0x23b   : > { %13879 = vst [vmem:[#allocation149_spill] sm:$0xff] %v8103_v27  ;;  %4312 = vperm.xlu0 %6983, %v8100_v15   ;;  %v8121_v27 = vld [vmem:[%s7347_s29 + $0x9a] sm:$0xff] }
 0x23d   : > { %v8106_v2 = vpop.permute.xlu0 %3608 }
 0x23e   : > { %13880 = vst [vmem:[#allocation150_spill] sm:$0xff] %v8106_v2 }
 0x240   : > { %1653 = vperm.xlu1 %6997, %v8109_v38  }
 0x241   : > { %1658 = vperm.xlu2 %6996, %v7895_v8   ;;  %v8114_v12 = vpop.permute.xlu1 %1385 }
 0x242   : > { %13881 = vst [vmem:[#allocation151_spill] sm:$0xff] %v8114_v12  ;;  %v8116_v24 = vpop.permute.xlu2 %1421 }
 0x243   : > { %13882 = vst [vmem:[#allocation152_spill] sm:$0xff] %v8116_v24  ;;  %4327 = vperm.xlu0 %6983, %v6895_v32   ;;  %v8133_v24 = vld [vmem:[%s7347_s29 + $0xc2] sm:$0xff] }
 0x245   : > { %v8118_v9 = vpop.permute.xlu0 %3623 }
 0x246   : > { %13883 = vst [vmem:[#allocation153_spill] sm:$0xff] %v8118_v9 }
 0x248   : > { %1668 = vperm.xlu1 %6997, %v8121_v27  }
 0x249   : > { %1673 = vperm.xlu2 %6996, %v7907_v6   ;;  %v8125_v2 = vpop.permute.xlu1 %1393 }
 0x24a   : > { %13884 = vst [vmem:[#allocation154_spill] sm:$0xff] %v8125_v2  ;;  %v8127_v63 = vpop.permute.xlu2 %1433 }
 0x24b   : > { %13885 = vst [vmem:[#allocation155_spill] sm:$0xff] %v8127_v63  ;;  %4825 = vperm.xlu0 %6983, %v7663_v10   ;;  %v8145_v63 = vld [vmem:[%s7347_s29 + $0xe2] sm:$0xff] }
 0x24d   : > { %v8130_v12 = vpop.permute.xlu0 %3638 }
 0x24e   : > { %13886 = vst [vmem:[#allocation156_spill] sm:$0xff] %v8130_v12 }
 0x250   : > { %1683 = vperm.xlu1 %6997, %v8133_v24  }
 0x251   : > { %1688 = vperm.xlu2 %6996, %v7918_v34   ;;  %v8137_v32 = vpop.permute.xlu1 %1405 }
 0x252   : > { %13887 = vst [vmem:[#allocation157_spill] sm:$0xff] %v8137_v32  ;;  %v8139_v9 = vpop.permute.xlu2 %1445 }
 0x253   : > { %13888 = vst [vmem:[#allocation158_spill] sm:$0xff] %v8139_v9  ;;  %4850 = vperm.xlu0 %6983, %v7689_v20   ;;  %v8157_v9 = vld [vmem:[%s7347_s29 + $0x10a] sm:$0xff] }
 0x255   : > { %v8142_v2 = vpop.permute.xlu0 %3653 }
 0x256   : > { %13889 = vst [vmem:[#allocation159_spill] sm:$0xff] %v8142_v2 }
 0x258   : > { %1698 = vperm.xlu1 %6997, %v8145_v63  }
 0x259   : > { %1703 = vperm.xlu2 %6996, %v7931_v19   ;;  %v8149_v10 = vpop.permute.xlu1 %1417 }
 0x25a   : > { %13890 = vst [vmem:[#allocation160_spill] sm:$0xff] %v8149_v10  ;;  %v8151_v12 = vpop.permute.xlu2 %1457 }
 0x25b   : > { %13891 = vst [vmem:[#allocation161_spill] sm:$0xff] %v8151_v12  ;;  %4865 = vperm.xlu0 %6983, %v7704_v14   ;;  %v8169_v12 = vld [vmem:[%s7347_s29 + $0x12a] sm:$0xff] }
 0x25d   : > { %v8154_v32 = vpop.permute.xlu0 %3668 }
 0x25e   : > { %13892 = vst [vmem:[#allocation162_spill] sm:$0xff] %v8154_v32 }
 0x260   : > { %1713 = vperm.xlu1 %6997, %v8157_v9  }
 0x261   : > { %1718 = vperm.xlu2 %6996, %v7943_v21   ;;  %v8161_v20 = vpop.permute.xlu1 %1429 }
 0x262   : > { %13893 = vst [vmem:[#allocation163_spill] sm:$0xff] %v8161_v20  ;;  %v8163_v2 = vpop.permute.xlu2 %1469 }
 0x263   : > { %13894 = vst [vmem:[#allocation164_spill] sm:$0xff] %v8163_v2  ;;  %4880 = vperm.xlu0 %6983, %v7719_v13   ;;  %v8181_v2 = vld [vmem:[%s7347_s29 + $0x152] sm:$0xff] }
 0x265   : > { %v8166_v10 = vpop.permute.xlu0 %3683 }
 0x266   : > { %13895 = vst [vmem:[#allocation165_spill] sm:$0xff] %v8166_v10 }
 0x268   : > { %1728 = vperm.xlu1 %6997, %v8169_v12  }
 0x269   : > { %1733 = vperm.xlu2 %6996, %v7955_v18   ;;  %v8173_v14 = vpop.permute.xlu1 %1441 }
 0x26a   : > { %13896 = vst [vmem:[#allocation166_spill] sm:$0xff] %v8173_v14  ;;  %v8175_v32 = vpop.permute.xlu2 %1481  ;;  %v8193_v14 = vld [vmem:[%s7347_s29 + $0x172] sm:$0xff] }
 0x26b   : > { %13897 = vst [vmem:[#allocation167_spill] sm:$0xff] %v8175_v32  ;;  %4895 = vperm.xlu0 %6983, %v7734_v17  }
 0x26d   : > { %v8178_v20 = vpop.permute.xlu0 %4182 }
 0x26e   : > { %13898 = vst [vmem:[#allocation168_spill] sm:$0xff] %v8178_v20  ;;  %v7082_v20 = vld [vmem:[%s7347_s29 + $0x122] sm:$0xff] }
 0x270   : > { %1743 = vperm.xlu1 %6997, %v8181_v2  }
 0x271   : > { %1748 = vperm.xlu2 %6996, %v7967_v0   ;;  %v8185_v13 = vpop.permute.xlu1 %1453 }
 0x272   : > { %13899 = vst [vmem:[#allocation169_spill] sm:$0xff] %v8185_v13  ;;  %v8187_v10 = vpop.permute.xlu2 %1493 }
 0x273   : > { %13900 = vst [vmem:[#allocation170_spill] sm:$0xff] %v8187_v10  ;;  %4910 = vperm.xlu0 %6983, %v7750_v16  }
 0x275   : > { %v8190_v62 = vpop.permute.xlu0 %4207 }
 0x276   : > { %13901 = vst [vmem:[#allocation171_spill] sm:$0xff] %v8190_v62  ;;  %v7081_v62 = vld [vmem:[%s7347_s29 + $0xfa] sm:$0xff] }
 0x278   : > { %1758 = vperm.xlu1 %6997, %v8193_v14  }
 0x279   : > { %6998 = vset.pattern.permute.xlu2 %v13801_v60  ;;  %v8197_v17 = vpop.permute.xlu1 %1465 }
 0x27a   : > { %13902 = vst [vmem:[#allocation172_spill] sm:$0xff] %v8197_v17  ;;  %1827 = vperm.xlu2 %6998, %v8044_v33  }
 0x27b   : > { %v8200_v32 = vpop.permute.xlu2 %1603  ;;  %4925 = vperm.xlu0 %6983, %v7764_v26  }
 0x27c   : > { %13903 = vst [vmem:[#allocation173_spill] sm:$0xff] %v8200_v32 }
 0x27d   : > { %v8203_v10 = vpop.permute.xlu0 %4222 }
 0x27e   : > { %13904 = vst [vmem:[#allocation174_spill] sm:$0xff] %v8203_v10 }
 0x280   : > { %6999 = vset.pattern.permute.xlu1 %v13801_v60 }
 0x281   : > { %1835 = vperm.xlu1 %6999, %v8060_v22   ;;  %v8207_v16 = vpop.permute.xlu1 %1477 }
 0x282   : > { %13905 = vst [vmem:[#allocation175_spill] sm:$0xff] %v8207_v16  ;;  %1839 = vperm.xlu2 %6998, %v7871_v3   ;;  %v6927_v16 = vld [vmem:[%s7347_s29 + $0x199] sm:$0xff] }
 0x283   : > { %v8210_v13 = vpop.permute.xlu2 %1618  ;;  %4940 = vperm.xlu0 %6983, %v7779_v48  }
 0x284   : > { %13906 = vst [vmem:[#allocation176_spill] sm:$0xff] %v8210_v13 }
 0x285   : > { %v8213_v17 = vpop.permute.xlu0 %4237 }
 0x286   : > { %13907 = vst [vmem:[#allocation177_spill] sm:$0xff] %v8213_v17 }
 0x289   : > { %1843 = vperm.xlu1 %6999, %v8076_v25   ;;  %v8216_v32 = vpop.permute.xlu1 %1489 }
 0x28a   : > { %13908 = vst [vmem:[#allocation178_spill] sm:$0xff] %v8216_v32  ;;  %1847 = vperm.xlu2 %6998, %v8079_v1  }
 0x28b   : > { %v8219_v26 = vpop.permute.xlu2 %1628  ;;  %4955 = vperm.xlu0 %6983, %v7794_v44  }
 0x28c   : > { %13909 = vst [vmem:[#allocation179_spill] sm:$0xff] %v8219_v26 }
 0x28d   : > { %v8222_v10 = vpop.permute.xlu0 %4252 }
 0x28e   : > { %13910 = vst [vmem:[#allocation180_spill] sm:$0xff] %v8222_v10  ;;  %v7080_v10 = vld [vmem:[%s7347_s29 + $0xda] sm:$0xff] }
 0x291   : > { %1855 = vperm.xlu1 %6999, %v8094_v56   ;;  %v8226_v13 = vpop.permute.xlu1 %1501 }
 0x292   : > { %13911 = vst [vmem:[#allocation181_spill] sm:$0xff] %v8226_v13  ;;  %1859 = vperm.xlu2 %6998, %v7883_v36  }
 0x293   : > { %v8229_v48 = vpop.permute.xlu2 %1643  ;;  %4970 = vperm.xlu0 %6983, %v6927_v16  }
 0x294   : > { %13912 = vst [vmem:[#allocation182_spill] sm:$0xff] %v8229_v48 }
 0x295   : > { %v8231_v17 = vpop.permute.xlu0 %4267 }
 0x296   : > { %13913 = vst [vmem:[#allocation183_spill] sm:$0xff] %v8231_v17 }
 0x299   : > { %1867 = vperm.xlu1 %6999, %v8109_v38  }
 0x29a   : > { %1871 = vperm.xlu2 %6998, %v7895_v8   ;;  %v8235_v26 = vpop.permute.xlu1 %1613 }
 0x29b   : > { %13914 = vst [vmem:[#allocation184_spill] sm:$0xff] %v8235_v26  ;;  %v8237_v44 = vpop.permute.xlu2 %1658  ;;  %5468 = vperm.xlu0 %6983, %v8079_v1  }
 0x29c   : > { %13915 = vst [vmem:[#allocation185_spill] sm:$0xff] %v8237_v44 }
 0x29d   : > { %v8240_v32 = vpop.permute.xlu0 %4282 }
 0x29e   : > { %13916 = vst [vmem:[#allocation186_spill] sm:$0xff] %v8240_v32 }
 0x2a1   : > { %1879 = vperm.xlu1 %6999, %v8121_v27  }
 0x2a2   : > { %1883 = vperm.xlu2 %6998, %v7907_v6   ;;  %v8244_v48 = vpop.permute.xlu1 %1623 }
 0x2a3   : > { %13917 = vst [vmem:[#allocation187_spill] sm:$0xff] %v8244_v48  ;;  %v8246_v16 = vpop.permute.xlu2 %1673  ;;  %5493 = vperm.xlu0 %6983, %v8109_v38  }
 0x2a4   : > { %13918 = vst [vmem:[#allocation188_spill] sm:$0xff] %v8246_v16 }
 0x2a5   : > { %v8249_v13 = vpop.permute.xlu0 %4297 }
 0x2a6   : > { %13919 = vst [vmem:[#allocation189_spill] sm:$0xff] %v8249_v13 }
 0x2a9   : > { %1891 = vperm.xlu1 %6999, %v8133_v24  }
 0x2aa   : > { %1895 = vperm.xlu2 %6998, %v7918_v34   ;;  %v8253_v44 = vpop.permute.xlu1 %1638 }
 0x2ab   : > { %13920 = vst [vmem:[#allocation190_spill] sm:$0xff] %v8253_v44  ;;  %v8255_v26 = vpop.permute.xlu2 %1688  ;;  %5508 = vperm.xlu0 %6983, %v8121_v27  }
 0x2ac   : > { %13921 = vst [vmem:[#allocation191_spill] sm:$0xff] %v8255_v26 }
 0x2ad   : > { %v8258_v32 = vpop.permute.xlu0 %4312 }
 0x2ae   : > { %13922 = vst [vmem:[#allocation192_spill] sm:$0xff] %v8258_v32 }
 0x2b1   : > { %1903 = vperm.xlu1 %6999, %v8145_v63  }
 0x2b2   : > { %1907 = vperm.xlu2 %6998, %v7931_v19   ;;  %v8262_v16 = vpop.permute.xlu1 %1653 }
 0x2b3   : > { %13923 = vst [vmem:[#allocation193_spill] sm:$0xff] %v8262_v16  ;;  %v8264_v48 = vpop.permute.xlu2 %1703  ;;  %5523 = vperm.xlu0 %6983, %v8133_v24  }
 0x2b4   : > { %13924 = vst [vmem:[#allocation194_spill] sm:$0xff] %v8264_v48 }
 0x2b5   : > { %v8267_v13 = vpop.permute.xlu0 %4327 }
 0x2b6   : > { %13925 = vst [vmem:[#allocation195_spill] sm:$0xff] %v8267_v13 }
 0x2b9   : > { %1915 = vperm.xlu1 %6999, %v8157_v9  }
 0x2ba   : > { %1919 = vperm.xlu2 %6998, %v7943_v21   ;;  %v8271_v26 = vpop.permute.xlu1 %1668 }
 0x2bb   : > { %13926 = vst [vmem:[#allocation196_spill] sm:$0xff] %v8271_v26  ;;  %v8273_v44 = vpop.permute.xlu2 %1718  ;;  %5538 = vperm.xlu0 %6983, %v8145_v63  }
 0x2bc   : > { %13927 = vst [vmem:[#allocation197_spill] sm:$0xff] %v8273_v44 }
 0x2bd   : > { %v8276_v32 = vpop.permute.xlu0 %4825 }
 0x2be   : > { %13928 = vst [vmem:[#allocation198_spill] sm:$0xff] %v8276_v32 }
 0x2c1   : > { %1927 = vperm.xlu1 %6999, %v8169_v12  }
 0x2c2   : > { %1931 = vperm.xlu2 %6998, %v7955_v18   ;;  %v8280_v48 = vpop.permute.xlu1 %1683 }
 0x2c3   : > { %13929 = vst [vmem:[#allocation199_spill] sm:$0xff] %v8280_v48  ;;  %v8282_v16 = vpop.permute.xlu2 %1733  ;;  %5553 = vperm.xlu0 %6983, %v8157_v9  }
 0x2c4   : > { %13930 = vst [vmem:[#allocation200_spill] sm:$0xff] %v8282_v16 }
 0x2c5   : > { %v8285_v13 = vpop.permute.xlu0 %4850 }
 0x2c6   : > { %13931 = vst [vmem:[#allocation201_spill] sm:$0xff] %v8285_v13 }
 0x2c9   : > { %1939 = vperm.xlu1 %6999, %v8181_v2  }
 0x2ca   : > { %1943 = vperm.xlu2 %6998, %v7967_v0   ;;  %v8289_v44 = vpop.permute.xlu1 %1698 }
 0x2cb   : > { %13932 = vst [vmem:[#allocation202_spill] sm:$0xff] %v8289_v44  ;;  %v8291_v26 = vpop.permute.xlu2 %1748  ;;  %5568 = vperm.xlu0 %6983, %v8169_v12  }
 0x2cc   : > { %13933 = vst [vmem:[#allocation203_spill] sm:$0xff] %v8291_v26 }
 0x2cd   : > { %v8294_v32 = vpop.permute.xlu0 %4865 }
 0x2ce   : > { %13934 = vst [vmem:[#allocation204_spill] sm:$0xff] %v8294_v32 }
 0x2d1   : > { %1951 = vperm.xlu1 %6999, %v8193_v14  }
 0x2d2   : > { %7000 = vset.pattern.permute.xlu2 %v13835_v40  ;;  %v8298_v16 = vpop.permute.xlu1 %1713 }
 0x2d3   : > { %13935 = vst [vmem:[#allocation205_spill] sm:$0xff] %v8298_v16  ;;  %2020 = vperm.xlu2 %7000, %v8044_v33   ;;  %5583 = vperm.xlu0 %6983, %v8181_v2   ;;  %v6959_v16 = vld [vmem:[%s7347_s29 + $0x19a] sm:$0xff] }
 0x2d4   : > { %v8302_v13 = vpop.permute.xlu2 %1827 }
 0x2d5   : > { %13936 = vst [vmem:[#allocation206_spill] sm:$0xff] %v8302_v13  ;;  %v8304_v44 = vpop.permute.xlu0 %4880 }
 0x2d6   : > { %13937 = vst [vmem:[#allocation207_spill] sm:$0xff] %v8304_v44 }
 0x2d9   : > { %7001 = vset.pattern.permute.xlu1 %v13835_v40 }
 0x2da   : > { %2028 = vperm.xlu1 %7001, %v8060_v22   ;;  %v8308_v26 = vpop.permute.xlu1 %1728 }
 0x2db   : > { %13938 = vst [vmem:[#allocation208_spill] sm:$0xff] %v8308_v26  ;;  %2032 = vperm.xlu2 %7000, %v7871_v3   ;;  %5598 = vperm.xlu0 %6983, %v8193_v14  }
 0x2dc   : > { %v8312_v32 = vpop.permute.xlu2 %1839 }
 0x2dd   : > { %13939 = vst [vmem:[#allocation209_spill] sm:$0xff] %v8312_v32  ;;  %v8314_v33 = vpop.permute.xlu0 %4895 }
 0x2de   : > { %13940 = vst [vmem:[#allocation210_spill] sm:$0xff] %v8314_v33  ;;  %v7055_v33 = vld [vmem:[%s7347_s29 + $0x8] sm:$0xff] }
 0x2e2   : > { %2036 = vperm.xlu1 %7001, %v8076_v25   ;;  %v8318_v13 = vpop.permute.xlu1 %1743 }
 0x2e3   : > { %13941 = vst [vmem:[#allocation211_spill] sm:$0xff] %v8318_v13  ;;  %2040 = vperm.xlu2 %7000, %v8079_v1   ;;  %5613 = vperm.xlu0 %6983, %v6959_v16   ;;  %v7076_v13 = vld [vmem:[%s7347_s29 + $0x4a] sm:$0xff] }
 0x2e4   : > { %v8321_v22 = vpop.permute.xlu2 %1847 }
 0x2e5   : > { %13942 = vst [vmem:[#allocation212_spill] sm:$0xff] %v8321_v22  ;;  %v8323_v44 = vpop.permute.xlu0 %4910 }
 0x2e6   : > { %13943 = vst [vmem:[#allocation213_spill] sm:$0xff] %v8323_v44  ;;  %v7056_v44 = vld [vmem:[%s7347_s29 + $0x48] sm:$0xff] }
 0x2ea   : > { %2048 = vperm.xlu1 %7001, %v8094_v56   ;;  %v8326_v3 = vpop.permute.xlu1 %1758 }
 0x2eb   : > { %13944 = vst [vmem:[#allocation214_spill] sm:$0xff] %v8326_v3  ;;  %2052 = vperm.xlu2 %7000, %v7883_v36   ;;  %7034 = vset.pattern.permute.xlu0 %v13801_v60 }
 0x2ec   : > { %v8330_v25 = vpop.permute.xlu2 %1859  ;;  %545 = vperm.xlu0 %7034, %v7055_v33  }
 0x2ed   : > { %13945 = vst [vmem:[#allocation215_spill] sm:$0xff] %v8330_v25  ;;  %v8333_v1 = vpop.permute.xlu0 %4925 }
 0x2ee   : > { %13946 = vst [vmem:[#allocation216_spill] sm:$0xff] %v8333_v1 }
 0x2f2   : > { %2060 = vperm.xlu1 %7001, %v8109_v38   ;;  %v7057_v38 = vld [vmem:[%s7347_s29 + $0x68] sm:$0xff] }
 0x2f3   : > { %2064 = vperm.xlu2 %7000, %v7895_v8   ;;  %v8337_v16 = vpop.permute.xlu1 %1835 }
 0x2f4   : > { %13947 = vst [vmem:[#allocation217_spill] sm:$0xff] %v8337_v16  ;;  %v8339_v56 = vpop.permute.xlu2 %1871  ;;  %565 = vperm.xlu0 %7034, %v7056_v44  }
 0x2f5   : > { %13948 = vst [vmem:[#allocation218_spill] sm:$0xff] %v8339_v56  ;;  %v8342_v36 = vpop.permute.xlu0 %4940 }
 0x2f6   : > { %13949 = vst [vmem:[#allocation219_spill] sm:$0xff] %v8342_v36 }
 0x2fa   : > { %2072 = vperm.xlu1 %7001, %v8121_v27   ;;  %v7058_v27 = vld [vmem:[%s7347_s29 + $0x90] sm:$0xff] }
 0x2fb   : > { %2076 = vperm.xlu2 %7000, %v7907_v6   ;;  %v8346_v33 = vpop.permute.xlu1 %1843 }
 0x2fc   : > { %13950 = vst [vmem:[#allocation220_spill] sm:$0xff] %v8346_v33  ;;  %v8348_v1 = vpop.permute.xlu2 %1883  ;;  %577 = vperm.xlu0 %7034, %v7057_v38  }
 0x2fd   : > { %13951 = vst [vmem:[#allocation221_spill] sm:$0xff] %v8348_v1  ;;  %v8351_v8 = vpop.permute.xlu0 %4955 }
 0x2fe   : > { %13952 = vst [vmem:[#allocation222_spill] sm:$0xff] %v8351_v8 }
 0x302   : > { %2084 = vperm.xlu1 %7001, %v8133_v24   ;;  %v7059_v24 = vld [vmem:[%s7347_s29 + $0xb0] sm:$0xff] }
 0x303   : > { %2088 = vperm.xlu2 %7000, %v7918_v34   ;;  %v8355_v44 = vpop.permute.xlu1 %1855 }
 0x304   : > { %13953 = vst [vmem:[#allocation223_spill] sm:$0xff] %v8355_v44  ;;  %v8357_v36 = vpop.permute.xlu2 %1895  ;;  %589 = vperm.xlu0 %7034, %v7058_v27  }
 0x305   : > { %13954 = vst [vmem:[#allocation224_spill] sm:$0xff] %v8357_v36  ;;  %v8360_v6 = vpop.permute.xlu0 %4970 }
 0x306   : > { %13955 = vst [vmem:[#allocation225_spill] sm:$0xff] %v8360_v6 }
 0x30a   : > { %2096 = vperm.xlu1 %7001, %v8145_v63   ;;  %v7060_v63 = vld [vmem:[%s7347_s29 + $0xd8] sm:$0xff] }
 0x30b   : > { %2100 = vperm.xlu2 %7000, %v7931_v19   ;;  %v8364_v38 = vpop.permute.xlu1 %1867 }
 0x30c   : > { %13956 = vst [vmem:[#allocation226_spill] sm:$0xff] %v8364_v38  ;;  %v8366_v8 = vpop.permute.xlu2 %1907  ;;  %601 = vperm.xlu0 %7034, %v7059_v24  }
 0x30d   : > { %13957 = vst [vmem:[#allocation227_spill] sm:$0xff] %v8366_v8  ;;  %v8369_v34 = vpop.permute.xlu0 %5468 }
 0x30e   : > { %13958 = vst [vmem:[#allocation228_spill] sm:$0xff] %v8369_v34 }
 0x312   : > { %2108 = vperm.xlu1 %7001, %v8157_v9   ;;  %v7061_v9 = vld [vmem:[%s7347_s29 + $0xf8] sm:$0xff] }
 0x313   : > { %2112 = vperm.xlu2 %7000, %v7943_v21   ;;  %v8373_v27 = vpop.permute.xlu1 %1879 }
 0x314   : > { %13959 = vst [vmem:[#allocation229_spill] sm:$0xff] %v8373_v27  ;;  %v8375_v6 = vpop.permute.xlu2 %1919  ;;  %613 = vperm.xlu0 %7034, %v7060_v63  }
 0x315   : > { %13960 = vst [vmem:[#allocation230_spill] sm:$0xff] %v8375_v6  ;;  %v8378_v19 = vpop.permute.xlu0 %5493 }
 0x316   : > { %13961 = vst [vmem:[#allocation231_spill] sm:$0xff] %v8378_v19 }
 0x31a   : > { %2120 = vperm.xlu1 %7001, %v8169_v12   ;;  %v7062_v12 = vld [vmem:[%s7347_s29 + $0x120] sm:$0xff] }
 0x31b   : > { %2124 = vperm.xlu2 %7000, %v7955_v18   ;;  %v8382_v24 = vpop.permute.xlu1 %1891 }
 0x31c   : > { %13962 = vst [vmem:[#allocation232_spill] sm:$0xff] %v8382_v24  ;;  %v8384_v34 = vpop.permute.xlu2 %1931  ;;  %625 = vperm.xlu0 %7034, %v7061_v9  }
 0x31d   : > { %13963 = vst [vmem:[#allocation233_spill] sm:$0xff] %v8384_v34  ;;  %v8387_v21 = vpop.permute.xlu0 %5508  ;;  %v8399_v34 = vld [vmem:[%s7347_s29 + $0x18] sm:$0xff] }
 0x31e   : > { %13964 = vst [vmem:[#allocation234_spill] sm:$0xff] %v8387_v21  ;;  %v7064_v21 = vld [vmem:[%s7347_s29 + $0x168] sm:$0xff] }
 0x322   : > { %2132 = vperm.xlu1 %7001, %v8181_v2  }
 0x323   : > { %2136 = vperm.xlu2 %7000, %v7967_v0   ;;  %v8391_v63 = vpop.permute.xlu1 %1903  ;;  %v7063_v0 = vld [vmem:[%s7347_s29 + $0x140] sm:$0xff] }
 0x324   : > { %13965 = vst [vmem:[#allocation235_spill] sm:$0xff] %v8391_v63  ;;  %v8393_v19 = vpop.permute.xlu2 %1943  ;;  %637 = vperm.xlu0 %7034, %v7062_v12  }
 0x325   : > { %13966 = vst [vmem:[#allocation236_spill] sm:$0xff] %v8393_v19  ;;  %v8396_v18 = vpop.permute.xlu0 %5523 }
 0x326   : > { %13967 = vst [vmem:[#allocation237_spill] sm:$0xff] %v8396_v18  ;;  %v8412_v18 = vld [vmem:[%s7347_s29 + $0x30] sm:$0xff] }
 0x32a   : > { %2144 = vperm.xlu1 %7001, %v8193_v14  }
 0x32b   : > { %7002 = vset.pattern.permute.xlu2 %v13766_v23  ;;  %v8403_v2 = vpop.permute.xlu1 %1915 }
 0x32c   : > { %13968 = vst [vmem:[#allocation238_spill] sm:$0xff] %v8403_v2  ;;  %2247 = vperm.xlu2 %7002, %v8399_v34   ;;  %649 = vperm.xlu0 %7034, %v7063_v0   ;;  %v8425_v2 = vld [vmem:[%s7347_s29 + $0x48] sm:$0xff] }
 0x32d   : > { %v8407_v9 = vpop.permute.xlu2 %2020  ;;  %v8409_v12 = vpop.permute.xlu0 %5538 }
 0x32e   : > { %13969 = vst [vmem:[#allocation239_spill] sm:$0xff] %v8407_v9 }
 0x32f   : > { %13970 = vst [vmem:[#allocation240_spill] sm:$0xff] %v8409_v12  ;;  %v8428_v12 = vld [vmem:[%s7347_s29 + $0x50] sm:$0xff] }
 0x332   : > { %7003 = vset.pattern.permute.xlu1 %v13766_v23 }
 0x333   : > { %2257 = vperm.xlu1 %7003, %v8412_v18   ;;  %v8416_v14 = vpop.permute.xlu1 %1927 }
 0x334   : > { %13971 = vst [vmem:[#allocation241_spill] sm:$0xff] %v8416_v14  ;;  %2262 = vperm.xlu2 %7002, %v7988_v29   ;;  %661 = vperm.xlu0 %7034, %v7064_v21   ;;  %v7065_v14 = vld [vmem:[%s7347_s29 + $0x9] sm:$0xff] }
 0x335   : > { %v8420_v0 = vpop.permute.xlu2 %2032  ;;  %v8422_v9 = vpop.permute.xlu0 %5553 }
 0x336   : > { %13972 = vst [vmem:[#allocation242_spill] sm:$0xff] %v8420_v0  ;;  %v8440_v0 = vld [vmem:[%s7347_s29 + $0x68] sm:$0xff] }
 0x337   : > { %13973 = vst [vmem:[#allocation243_spill] sm:$0xff] %v8422_v9 }
 0x33b   : > { %2267 = vperm.xlu1 %7003, %v8425_v2   ;;  %v8431_v19 = vpop.permute.xlu1 %1939 }
 0x33c   : > { %13974 = vst [vmem:[#allocation244_spill] sm:$0xff] %v8431_v19  ;;  %2272 = vperm.xlu2 %7002, %v8428_v12   ;;  %1188 = vperm.xlu0 %7034, %v7065_v14   ;;  %v7066_v19 = vld [vmem:[%s7347_s29 + $0x49] sm:$0xff] }
 0x33d   : > { %v8435_v21 = vpop.permute.xlu2 %2040  ;;  %v8437_v63 = vpop.permute.xlu0 %5568  ;;  %v8452_v14 = vld [vmem:[%s7347_s29 + $0x90] sm:$0xff] }
 0x33e   : > { %13975 = vst [vmem:[#allocation245_spill] sm:$0xff] %v8435_v21 }
 0x33f   : > { %13976 = vst [vmem:[#allocation246_spill] sm:$0xff] %v8437_v63  ;;  %v7067_v63 = vld [vmem:[%s7347_s29 + $0x69] sm:$0xff] }
 0x343   : > { %2282 = vperm.xlu1 %7003, %v8440_v0   ;;  %v8443_v9 = vpop.permute.xlu1 %1951 }
 0x344   : > { %13977 = vst [vmem:[#allocation247_spill] sm:$0xff] %v8443_v9  ;;  %2287 = vperm.xlu2 %7002, %v8000_v5   ;;  %1208 = vperm.xlu0 %7034, %v7066_v19   ;;  %v8464_v19 = vld [vmem:[%s7347_s29 + $0xb0] sm:$0xff] }
 0x345   : > { %v8447_v24 = vpop.permute.xlu2 %2052  ;;  %v8449_v6 = vpop.permute.xlu0 %5583 }
 0x346   : > { %13978 = vst [vmem:[#allocation248_spill] sm:$0xff] %v8447_v24 }
 0x347   : > { %13979 = vst [vmem:[#allocation249_spill] sm:$0xff] %v8449_v6  ;;  %v7068_v6 = vld [vmem:[%s7347_s29 + $0x91] sm:$0xff] }
 0x34b   : > { %2297 = vperm.xlu1 %7003, %v8452_v14  }
 0x34c   : > { %2302 = vperm.xlu2 %7002, %v8012_v4   ;;  %1220 = vperm.xlu0 %7034, %v7067_v63   ;;  %v8457_v9 = vpop.permute.xlu1 %2028 }
 0x34d   : > { %13980 = vst [vmem:[#allocation250_spill] sm:$0xff] %v8457_v9  ;;  %v8459_v21 = vpop.permute.xlu2 %2064  ;;  %v8461_v27 = vpop.permute.xlu0 %5598  ;;  %v8476_v9 = vld [vmem:[%s7347_s29 + $0xd8] sm:$0xff] }
 0x34e   : > { %13981 = vst [vmem:[#allocation251_spill] sm:$0xff] %v8459_v21 }
 0x34f   : > { %13982 = vst [vmem:[#allocation252_spill] sm:$0xff] %v8461_v27  ;;  %v7069_v27 = vld [vmem:[%s7347_s29 + $0xb1] sm:$0xff] }
 0x353   : > { %2312 = vperm.xlu1 %7003, %v8464_v19  }
 0x354   : > { %2317 = vperm.xlu2 %7002, %v8024_v28   ;;  %1232 = vperm.xlu0 %7034, %v7068_v6   ;;  %v8469_v24 = vpop.permute.xlu1 %2036 }
 0x355   : > { %13983 = vst [vmem:[#allocation253_spill] sm:$0xff] %v8469_v24  ;;  %v8471_v8 = vpop.permute.xlu2 %2076  ;;  %v8473_v63 = vpop.permute.xlu0 %5613  ;;  %v8488_v24 = vld [vmem:[%s7347_s29 + $0xf8] sm:$0xff] }
 0x356   : > { %13984 = vst [vmem:[#allocation254_spill] sm:$0xff] %v8471_v8 }
 0x357   : > { %13985 = vst [vmem:[#allocation255_spill] sm:$0xff] %v8473_v63  ;;  %v7070_v63 = vld [vmem:[%s7347_s29 + $0xd9] sm:$0xff] }
 0x35b   : > { %2327 = vperm.xlu1 %7003, %v8476_v9  }
 0x35c   : > { %2332 = vperm.xlu2 %7002, %v8036_v52   ;;  %1244 = vperm.xlu0 %7034, %v7069_v27   ;;  %v8481_v21 = vpop.permute.xlu1 %2048 }
 0x35d   : > { %13986 = vst [vmem:[#allocation256_spill] sm:$0xff] %v8481_v21  ;;  %v8483_v38 = vpop.permute.xlu2 %2088  ;;  %v8500_v21 = vld [vmem:[%s7347_s29 + $0x120] sm:$0xff] }
 0x35e   : > { %13987 = vst [vmem:[#allocation257_spill] sm:$0xff] %v8483_v38  ;;  %v8485_v6 = vpop.permute.xlu0 %545  ;;  %v7071_v38 = vld [vmem:[%s7347_s29 + $0xf9] sm:$0xff] }
 0x35f   : > { %13988 = vst [vmem:[#allocation258_spill] sm:$0xff] %v8485_v6 }
 0x363   : > { %2342 = vperm.xlu1 %7003, %v8488_v24  }
 0x364   : > { %2347 = vperm.xlu2 %7002, %v8051_v11   ;;  %1256 = vperm.xlu0 %7034, %v7070_v63   ;;  %v8493_v8 = vpop.permute.xlu1 %2060 }
 0x365   : > { %13989 = vst [vmem:[#allocation259_spill] sm:$0xff] %v8493_v8  ;;  %v8495_v36 = vpop.permute.xlu2 %2100  ;;  %v8512_v8 = vld [vmem:[%s7347_s29 + $0x140] sm:$0xff] }
 0x366   : > { %13990 = vst [vmem:[#allocation260_spill] sm:$0xff] %v8495_v36  ;;  %v8497_v27 = vpop.permute.xlu0 %565  ;;  %v7072_v36 = vld [vmem:[%s7347_s29 + $0x121] sm:$0xff] }
 0x367   : > { %13991 = vst [vmem:[#allocation261_spill] sm:$0xff] %v8497_v27  ;;  %v7105_v27 = vld [vmem:[%s7347_s29 + $0x22] sm:$0xff] }
 0x36b   : > { %2357 = vperm.xlu1 %7003, %v8500_v21  }
 0x36c   : > { %2362 = vperm.xlu2 %7002, %v8067_v31   ;;  %1268 = vperm.xlu0 %7034, %v7071_v38   ;;  %v8505_v44 = vpop.permute.xlu1 %2072 }
 0x36d   : > { %13992 = vst [vmem:[#allocation262_spill] sm:$0xff] %v8505_v44  ;;  %v8507_v1 = vpop.permute.xlu2 %2112  ;;  %v8524_v44 = vld [vmem:[%s7347_s29 + $0x168] sm:$0xff] }
 0x36e   : > { %13993 = vst [vmem:[#allocation263_spill] sm:$0xff] %v8507_v1  ;;  %v8509_v63 = vpop.permute.xlu0 %577  ;;  %v7073_v1 = vld [vmem:[%s7347_s29 + $0x141] sm:$0xff] }
 0x373   : > { %2372 = vperm.xlu1 %7003, %v8512_v8  }
 0x374   : > { %2377 = vperm.xlu2 %7002, %v8085_v7   ;;  %1280 = vperm.xlu0 %7034, %v7072_v36   ;;  %v8517_v33 = vpop.permute.xlu1 %2084 }
 0x375   : > { %13994 = vst [vmem:[#allocation264_spill] sm:$0xff] %v8517_v33  ;;  %v8519_v56 = vpop.permute.xlu2 %2124  ;;  %v8536_v33 = vld [vmem:[%s7347_s29 + $0x188] sm:$0xff] }
 0x376   : > { %13995 = vst [vmem:[#allocation265_spill] sm:$0xff] %v8519_v56  ;;  %v8521_v38 = vpop.permute.xlu0 %589  ;;  %v7074_v56 = vld [vmem:[%s7347_s29 + $0x169] sm:$0xff] }
 0x37b   : > { %2387 = vperm.xlu1 %7003, %v8524_v44  }
 0x37c   : > { %2392 = vperm.xlu2 %7002, %v8100_v15   ;;  %1292 = vperm.xlu0 %7034, %v7073_v1   ;;  %v8529_v16 = vpop.permute.xlu1 %2096 }
 0x37d   : > { %13996 = vst [vmem:[#allocation266_spill] sm:$0xff] %v8529_v16  ;;  %v8531_v25 = vpop.permute.xlu2 %2136 }
 0x37e   : > { %13997 = vst [vmem:[#allocation267_spill] sm:$0xff] %v8531_v25  ;;  %v8533_v36 = vpop.permute.xlu0 %601  ;;  %v7075_v25 = vld [vmem:[%s7347_s29 + $0xa] sm:$0xff] }
 0x383   : > { %2402 = vperm.xlu1 %7003, %v8536_v33  }
 0x384   : > { %7004 = vset.pattern.permute.xlu2 %v13801_v60  ;;  %1304 = vperm.xlu0 %7034, %v7074_v56   ;;  %v8541_v3 = vpop.permute.xlu1 %2108 }
 0x385   : > { %13998 = vst [vmem:[#allocation268_spill] sm:$0xff] %v8541_v3  ;;  %2471 = vperm.xlu2 %7004, %v8399_v34  }
 0x386   : > { %v8544_v1 = vpop.permute.xlu2 %2247  ;;  %v8546_v16 = vpop.permute.xlu0 %613 }
 0x387   : > { %13999 = vst [vmem:[#allocation269_spill] sm:$0xff] %v8544_v1 }
 0x388   : > { %14000 = vst [vmem:[#allocation270_spill] sm:$0xff] %v8546_v16  ;;  %v7180_v16 = vld [vmem:[%s7347_s29 + $0x180] sm:$0xff] }
 0x38b   : > { %7005 = vset.pattern.permute.xlu1 %v13801_v60 }
 0x38c   : > { %1831 = vperm.xlu0 %7034, %v7075_v25   ;;  %2479 = vperm.xlu1 %7005, %v8412_v18   ;;  %v8551_v22 = vpop.permute.xlu1 %2120 }
 0x38d   : > { %14001 = vst [vmem:[#allocation271_spill] sm:$0xff] %v8551_v22  ;;  %2483 = vperm.xlu2 %7004, %v7988_v29   ;;  %v7077_v22 = vld [vmem:[%s7347_s29 + $0x6a] sm:$0xff] }
 0x38e   : > { %v8554_v56 = vpop.permute.xlu2 %2262  ;;  %v8556_v3 = vpop.permute.xlu0 %625 }
 0x38f   : > { %14002 = vst [vmem:[#allocation272_spill] sm:$0xff] %v8554_v56 }
 0x390   : > { %14003 = vst [vmem:[#allocation273_spill] sm:$0xff] %v8556_v3 }
 0x394   : > { %1851 = vperm.xlu0 %7034, %v7076_v13   ;;  %2487 = vperm.xlu1 %7005, %v8425_v2   ;;  %v8560_v1 = vpop.permute.xlu1 %2132 }
 0x395   : > { %14004 = vst [vmem:[#allocation274_spill] sm:$0xff] %v8560_v1  ;;  %2491 = vperm.xlu2 %7004, %v8428_v12   ;;  %v7078_v1 = vld [vmem:[%s7347_s29 + $0x92] sm:$0xff] }
 0x396   : > { %v8563_v25 = vpop.permute.xlu2 %2272  ;;  %v8565_v32 = vpop.permute.xlu0 %637 }
 0x397   : > { %14005 = vst [vmem:[#allocation275_spill] sm:$0xff] %v8563_v25 }
 0x398   : > { %14006 = vst [vmem:[#allocation276_spill] sm:$0xff] %v8565_v32 }
 0x39c   : > { %1863 = vperm.xlu0 %7034, %v7077_v22   ;;  %2499 = vperm.xlu1 %7005, %v8440_v0   ;;  %v8569_v56 = vpop.permute.xlu1 %2144 }
 0x39d   : > { %14007 = vst [vmem:[#allocation277_spill] sm:$0xff] %v8569_v56  ;;  %2503 = vperm.xlu2 %7004, %v8000_v5   ;;  %v7079_v56 = vld [vmem:[%s7347_s29 + $0xb2] sm:$0xff] }
 0x39e   : > { %v8572_v13 = vpop.permute.xlu2 %2287  ;;  %v8574_v26 = vpop.permute.xlu0 %649 }
 0x39f   : > { %14008 = vst [vmem:[#allocation278_spill] sm:$0xff] %v8572_v13 }
 0x3a0   : > { %14009 = vst [vmem:[#allocation279_spill] sm:$0xff] %v8574_v26 }
 0x3a4   : > { %1875 = vperm.xlu0 %7034, %v7078_v1   ;;  %2511 = vperm.xlu1 %7005, %v8452_v14  }
 0x3a5   : > { %2515 = vperm.xlu2 %7004, %v8012_v4   ;;  %v8579_v25 = vpop.permute.xlu1 %2257 }
 0x3a6   : > { %14010 = vst [vmem:[#allocation280_spill] sm:$0xff] %v8579_v25  ;;  %v8581_v22 = vpop.permute.xlu2 %2302  ;;  %v8583_v48 = vpop.permute.xlu0 %661 }
 0x3a7   : > { %14011 = vst [vmem:[#allocation281_spill] sm:$0xff] %v8581_v22 }
 0x3a8   : > { %14012 = vst [vmem:[#allocation282_spill] sm:$0xff] %v8583_v48  ;;  %v7085_v48 = vld [vmem:[%s7347_s29 + $0x20] sm:$0xff] }
 0x3ac   : > { %1887 = vperm.xlu0 %7034, %v7079_v56   ;;  %2523 = vperm.xlu1 %7005, %v8464_v19  }
 0x3ad   : > { %2527 = vperm.xlu2 %7004, %v8024_v28   ;;  %v8588_v13 = vpop.permute.xlu1 %2267 }
 0x3ae   : > { %14013 = vst [vmem:[#allocation283_spill] sm:$0xff] %v8588_v13  ;;  %v8590_v1 = vpop.permute.xlu2 %2317  ;;  %v8592_v17 = vpop.permute.xlu0 %1188 }
 0x3af   : > { %14014 = vst [vmem:[#allocation284_spill] sm:$0xff] %v8590_v1 }
 0x3b0   : > { %14015 = vst [vmem:[#allocation285_spill] sm:$0xff] %v8592_v17  ;;  %v7084_v17 = vld [vmem:[%s7347_s29 + $0x16a] sm:$0xff] }
 0x3b4   : > { %1899 = vperm.xlu0 %7034, %v7080_v10   ;;  %2535 = vperm.xlu1 %7005, %v8476_v9  }
 0x3b5   : > { %2539 = vperm.xlu2 %7004, %v8036_v52   ;;  %v8597_v22 = vpop.permute.xlu1 %2282 }
 0x3b6   : > { %14016 = vst [vmem:[#allocation286_spill] sm:$0xff] %v8597_v22  ;;  %v8599_v56 = vpop.permute.xlu2 %2332  ;;  %v8601_v25 = vpop.permute.xlu0 %1208 }
 0x3b7   : > { %14017 = vst [vmem:[#allocation287_spill] sm:$0xff] %v8599_v56 }
 0x3b8   : > { %14018 = vst [vmem:[#allocation288_spill] sm:$0xff] %v8601_v25  ;;  %v7083_v25 = vld [vmem:[%s7347_s29 + $0x142] sm:$0xff] }
 0x3bc   : > { %1911 = vperm.xlu0 %7034, %v7081_v62   ;;  %2547 = vperm.xlu1 %7005, %v8488_v24  }
 0x3bd   : > { %2551 = vperm.xlu2 %7004, %v8051_v11   ;;  %v8606_v1 = vpop.permute.xlu1 %2297 }
 0x3be   : > { %14019 = vst [vmem:[#allocation289_spill] sm:$0xff] %v8606_v1  ;;  %v8608_v10 = vpop.permute.xlu2 %2347  ;;  %v8610_v13 = vpop.permute.xlu0 %1220 }
 0x3bf   : > { %14020 = vst [vmem:[#allocation290_spill] sm:$0xff] %v8608_v10 }
 0x3c4   : > { %1923 = vperm.xlu0 %7034, %v7082_v20   ;;  %2559 = vperm.xlu1 %7005, %v8500_v21  }
 0x3c5   : > { %2563 = vperm.xlu2 %7004, %v8067_v31   ;;  %v8615_v56 = vpop.permute.xlu1 %2312 }
 0x3c6   : > { %14021 = vst [vmem:[#allocation291_spill] sm:$0xff] %v8615_v56  ;;  %v8617_v62 = vpop.permute.xlu2 %2362  ;;  %v8619_v22 = vpop.permute.xlu0 %1232 }
 0x3c7   : > { %14022 = vst [vmem:[#allocation292_spill] sm:$0xff] %v8617_v62 }
 0x3cc   : > { %1935 = vperm.xlu0 %7034, %v7083_v25   ;;  %2571 = vperm.xlu1 %7005, %v8512_v8  }
 0x3cd   : > { %2575 = vperm.xlu2 %7004, %v8085_v7   ;;  %v8624_v10 = vpop.permute.xlu1 %2327 }
 0x3ce   : > { %14023 = vst [vmem:[#allocation293_spill] sm:$0xff] %v8624_v10  ;;  %v8626_v20 = vpop.permute.xlu2 %2377  ;;  %v8628_v1 = vpop.permute.xlu0 %1244 }
 0x3cf   : > { %14024 = vst [vmem:[#allocation294_spill] sm:$0xff] %v8626_v20 }
 0x3d0   : > { %14025 = vst [vmem:[#allocation295_spill] sm:$0xff] %v8628_v1 }
 0x3d4   : > { %1947 = vperm.xlu0 %7034, %v7084_v17   ;;  %2583 = vperm.xlu1 %7005, %v8524_v44  }
 0x3d5   : > { %2587 = vperm.xlu2 %7004, %v8100_v15   ;;  %v8633_v62 = vpop.permute.xlu1 %2342 }
 0x3d6   : > { %14026 = vst [vmem:[#allocation296_spill] sm:$0xff] %v8633_v62  ;;  %v8635_v25 = vpop.permute.xlu2 %2392  ;;  %v8637_v56 = vpop.permute.xlu0 %1256  ;;  %v7086_v62 = vld [vmem:[%s7347_s29 + $0x60] sm:$0xff] }
 0x3d7   : > { %14027 = vst [vmem:[#allocation297_spill] sm:$0xff] %v8635_v25 }
 0x3d8   : > { %14028 = vst [vmem:[#allocation298_spill] sm:$0xff] %v8637_v56 }
 0x3dc   : > { %2475 = vperm.xlu0 %7034, %v7085_v48   ;;  %2595 = vperm.xlu1 %7005, %v8536_v33  }
 0x3dd   : > { %7006 = vset.pattern.permute.xlu2 %v13835_v40  ;;  %v8642_v20 = vpop.permute.xlu1 %2357 }
 0x3de   : > { %14029 = vst [vmem:[#allocation299_spill] sm:$0xff] %v8642_v20  ;;  %2664 = vperm.xlu2 %7006, %v8399_v34   ;;  %v8645_v17 = vpop.permute.xlu0 %1268  ;;  %v7087_v34 = vld [vmem:[%s7347_s29 + $0x80] sm:$0xff] }
 0x3df   : > { %14030 = vst [vmem:[#allocation300_spill] sm:$0xff] %v8645_v17  ;;  %v8647_v10 = vpop.permute.xlu2 %2471 }
 0x3e0   : > { %14031 = vst [vmem:[#allocation301_spill] sm:$0xff] %v8647_v10 }
 0x3e4   : > { %2495 = vperm.xlu0 %7034, %v7086_v62   ;;  %7007 = vset.pattern.permute.xlu1 %v13835_v40 }
 0x3e5   : > { %2672 = vperm.xlu1 %7007, %v8412_v18   ;;  %v8652_v48 = vpop.permute.xlu1 %2372 }
 0x3e6   : > { %14032 = vst [vmem:[#allocation302_spill] sm:$0xff] %v8652_v48  ;;  %2676 = vperm.xlu2 %7006, %v7988_v29   ;;  %v8655_v25 = vpop.permute.xlu0 %1280  ;;  %v7088_v48 = vld [vmem:[%s7347_s29 + $0xa8] sm:$0xff] }
 0x3e7   : > { %14033 = vst [vmem:[#allocation303_spill] sm:$0xff] %v8655_v25  ;;  %v8657_v20 = vpop.permute.xlu2 %2483  ;;  %v7104_v25 = vld [vmem:[%s7347_s29 + $0x181] sm:$0xff] }
 0x3e8   : > { %14034 = vst [vmem:[#allocation304_spill] sm:$0xff] %v8657_v20 }
 0x3ec   : > { %2507 = vperm.xlu0 %7034, %v7087_v34  }
 0x3ed   : > { %2680 = vperm.xlu1 %7007, %v8425_v2   ;;  %v8661_v10 = vpop.permute.xlu1 %2387 }
 0x3ee   : > { %14035 = vst [vmem:[#allocation305_spill] sm:$0xff] %v8661_v10  ;;  %2684 = vperm.xlu2 %7006, %v8428_v12   ;;  %v8664_v62 = vpop.permute.xlu0 %1292  ;;  %v7089_v10 = vld [vmem:[%s7347_s29 + $0xc8] sm:$0xff] }
 0x3ef   : > { %14036 = vst [vmem:[#allocation306_spill] sm:$0xff] %v8664_v62  ;;  %v8666_v18 = vpop.permute.xlu2 %2491 }
 0x3f0   : > { %14037 = vst [vmem:[#allocation307_spill] sm:$0xff] %v8666_v18  ;;  %v7100_v18 = vld [vmem:[%s7347_s29 + $0xf1] sm:$0xff] }
 0x3f4   : > { %2519 = vperm.xlu0 %7034, %v7088_v48  }
 0x3f5   : > { %2692 = vperm.xlu1 %7007, %v8440_v0   ;;  %v8670_v29 = vpop.permute.xlu1 %2402 }
 0x3f6   : > { %14038 = vst [vmem:[#allocation308_spill] sm:$0xff] %v8670_v29  ;;  %2696 = vperm.xlu2 %7006, %v8000_v5   ;;  %v8673_v34 = vpop.permute.xlu0 %1304  ;;  %v7090_v29 = vld [vmem:[%s7347_s29 + $0xf0] sm:$0xff] }
 0x3f7   : > { %14039 = vst [vmem:[#allocation309_spill] sm:$0xff] %v8673_v34  ;;  %v8675_v2 = vpop.permute.xlu2 %2503 }
 0x3f8   : > { %14040 = vst [vmem:[#allocation310_spill] sm:$0xff] %v8675_v2 }
 0x3fc   : > { %2531 = vperm.xlu0 %7034, %v7089_v10  }
 0x3fd   : > { %2704 = vperm.xlu1 %7007, %v8452_v14  }
 0x3fe   : > { %2708 = vperm.xlu2 %7006, %v8012_v4   ;;  %v8680_v12 = vpop.permute.xlu0 %1831  ;;  %v8682_v48 = vpop.permute.xlu1 %2479  ;;  %v7091_v4 = vld [vmem:[%s7347_s29 + $0x110] sm:$0xff] }
 0x3ff   : > { %14041 = vst [vmem:[#allocation311_spill] sm:$0xff] %v8680_v12  ;;  %v8684_v0 = vpop.permute.xlu2 %2515  ;;  %v7102_v12 = vld [vmem:[%s7347_s29 + $0x139] sm:$0xff] }
 0x400   : > { %14042 = vst [vmem:[#allocation312_spill] sm:$0xff] %v8682_v48 }
 0x401   : > { %14043 = vst [vmem:[#allocation313_spill] sm:$0xff] %v8684_v0 }
 0x404   : > { %2543 = vperm.xlu0 %7034, %v7090_v29  }
 0x405   : > { %2716 = vperm.xlu1 %7007, %v8464_v19  }
 0x406   : > { %2720 = vperm.xlu2 %7006, %v8024_v28   ;;  %v8689_v5 = vpop.permute.xlu0 %1851  ;;  %v8691_v10 = vpop.permute.xlu1 %2487  ;;  %v7092_v28 = vld [vmem:[%s7347_s29 + $0x138] sm:$0xff] }
 0x407   : > { %14044 = vst [vmem:[#allocation314_spill] sm:$0xff] %v8689_v5  ;;  %v8693_v14 = vpop.permute.xlu2 %2527  ;;  %v7101_v5 = vld [vmem:[%s7347_s29 + $0x111] sm:$0xff] }
 0x408   : > { %14045 = vst [vmem:[#allocation315_spill] sm:$0xff] %v8691_v10  ;;  %v7099_v10 = vld [vmem:[%s7347_s29 + $0xc9] sm:$0xff] }
 0x409   : > { %14046 = vst [vmem:[#allocation316_spill] sm:$0xff] %v8693_v14 }
 0x40c   : > { %2555 = vperm.xlu0 %7034, %v7091_v4  }
 0x40d   : > { %2728 = vperm.xlu1 %7007, %v8476_v9  }
 0x40e   : > { %2732 = vperm.xlu2 %7006, %v8036_v52   ;;  %v8698_v0 = vpop.permute.xlu0 %1863  ;;  %v8700_v29 = vpop.permute.xlu1 %2499  ;;  %v7093_v52 = vld [vmem:[%s7347_s29 + $0x158] sm:$0xff] }
 0x40f   : > { %14047 = vst [vmem:[#allocation317_spill] sm:$0xff] %v8700_v29  ;;  %v8702_v19 = vpop.permute.xlu2 %2539 }
 0x410   : > { %14048 = vst [vmem:[#allocation318_spill] sm:$0xff] %v8702_v19 }
 0x414   : > { %2567 = vperm.xlu0 %7034, %v7092_v28  }
 0x415   : > { %2740 = vperm.xlu1 %7007, %v8488_v24  }
 0x416   : > { %2744 = vperm.xlu2 %7006, %v8051_v11   ;;  %v8707_v14 = vpop.permute.xlu0 %1875  ;;  %v8709_v4 = vpop.permute.xlu1 %2511  ;;  %v7094_v11 = vld [vmem:[%s7347_s29 + $0x180] sm:$0xff] }
 0x417   : > { %14049 = vst [vmem:[#allocation319_spill] sm:$0xff] %v8707_v14  ;;  %v8711_v9 = vpop.permute.xlu2 %2551  ;;  %v7172_v14 = vld [vmem:[%s7347_s29 + $0x60] sm:$0xff] }
 0x418   : > { %14050 = vst [vmem:[#allocation320_spill] sm:$0xff] %v8709_v4 }
 0x419   : > { %14051 = vst [vmem:[#allocation321_spill] sm:$0xff] %v8711_v9 }
 0x41c   : > { %2579 = vperm.xlu0 %7034, %v7093_v52  }
 0x41d   : > { %2752 = vperm.xlu1 %7007, %v8500_v21  }
 0x41e   : > { %2756 = vperm.xlu2 %7006, %v8067_v31   ;;  %v8716_v19 = vpop.permute.xlu0 %1887  ;;  %v8718_v28 = vpop.permute.xlu1 %2523  ;;  %v7095_v31 = vld [vmem:[%s7347_s29 + $0x21] sm:$0xff] }
 0x41f   : > { %14052 = vst [vmem:[#allocation322_spill] sm:$0xff] %v8716_v19  ;;  %v8720_v24 = vpop.permute.xlu2 %2563 }
 0x420   : > { %14053 = vst [vmem:[#allocation323_spill] sm:$0xff] %v8718_v28  ;;  %v8774_v28 = vld [vmem:[%s7347_s29 + $0x51] sm:$0xff] }
 0x421   : > { %14054 = vst [vmem:[#allocation324_spill] sm:$0xff] %v8720_v24  ;;  %v7096_v24 = vld [vmem:[%s7347_s29 + $0x61] sm:$0xff] }
 0x424   : > { %2591 = vperm.xlu0 %7034, %v7094_v11  }
 0x425   : > { %2764 = vperm.xlu1 %7007, %v8512_v8  }
 0x426   : > { %2768 = vperm.xlu2 %7006, %v8085_v7   ;;  %v8725_v9 = vpop.permute.xlu0 %1899  ;;  %v8727_v52 = vpop.permute.xlu1 %2535 }
 0x427   : > { %14055 = vst [vmem:[#allocation325_spill] sm:$0xff] %v8725_v9  ;;  %v8729_v21 = vpop.permute.xlu2 %2575 }
 0x428   : > { %14056 = vst [vmem:[#allocation326_spill] sm:$0xff] %v8727_v52  ;;  %v8742_v52 = vld [vmem:[%s7347_s29 + $0x19] sm:$0xff] }
 0x429   : > { %14057 = vst [vmem:[#allocation327_spill] sm:$0xff] %v8729_v21  ;;  %v8770_v21 = vld [vmem:[%s7347_s29 + $0x49] sm:$0xff] }
 0x42c   : > { %3118 = vperm.xlu0 %7034, %v7095_v31  }
 0x42d   : > { %2776 = vperm.xlu1 %7007, %v8524_v44  }
 0x42e   : > { %2780 = vperm.xlu2 %7006, %v8100_v15   ;;  %v8734_v11 = vpop.permute.xlu0 %1911  ;;  %v8736_v8 = vpop.permute.xlu1 %2547 }
 0x42f   : > { %14058 = vst [vmem:[#allocation328_spill] sm:$0xff] %v8734_v11  ;;  %v8738_v7 = vpop.permute.xlu2 %2587 }
 0x430   : > { %14059 = vst [vmem:[#allocation329_spill] sm:$0xff] %v8736_v8  ;;  %v8754_v8 = vld [vmem:[%s7347_s29 + $0x31] sm:$0xff] }
 0x431   : > { %14060 = vst [vmem:[#allocation330_spill] sm:$0xff] %v8738_v7  ;;  %v8758_v7 = vld [vmem:[%s7347_s29 + $0x39] sm:$0xff] }
 0x434   : > { %3138 = vperm.xlu0 %7034, %v7096_v24   ;;  %v7097_v24 = vld [vmem:[%s7347_s29 + $0x81] sm:$0xff] }
 0x435   : > { %2788 = vperm.xlu1 %7007, %v8536_v33  }
 0x436   : > { %7008 = vset.pattern.permute.xlu2 %v13766_v23  ;;  %v8746_v44 = vpop.permute.xlu0 %1923  ;;  %v8748_v15 = vpop.permute.xlu1 %2559 }
 0x437   : > { %14061 = vst [vmem:[#allocation331_spill] sm:$0xff] %v8746_v44  ;;  %2890 = vperm.xlu2 %7008, %v8742_v52   ;;  %v7103_v44 = vld [vmem:[%s7347_s29 + $0x159] sm:$0xff] }
 0x438   : > { %14062 = vst [vmem:[#allocation332_spill] sm:$0xff] %v8748_v15  ;;  %v8751_v31 = vpop.permute.xlu2 %2664 }
 0x439   : > { %14063 = vst [vmem:[#allocation333_spill] sm:$0xff] %v8751_v31 }
 0x43c   : > { %3150 = vperm.xlu0 %7034, %v7097_v24   ;;  %v7098_v24 = vld [vmem:[%s7347_s29 + $0xa9] sm:$0xff] }
 0x43d   : > { %7009 = vset.pattern.permute.xlu1 %v13766_v23 }
 0x43e   : > { %v8761_v33 = vpop.permute.xlu0 %1935  ;;  %2900 = vperm.xlu1 %7009, %v8754_v8   ;;  %v8764_v15 = vpop.permute.xlu1 %2571 }
 0x43f   : > { %14064 = vst [vmem:[#allocation334_spill] sm:$0xff] %v8761_v33  ;;  %2905 = vperm.xlu2 %7008, %v8758_v7  }
 0x440   : > { %14065 = vst [vmem:[#allocation335_spill] sm:$0xff] %v8764_v15  ;;  %v8767_v31 = vpop.permute.xlu2 %2676 }
 0x441   : > { %14066 = vst [vmem:[#allocation336_spill] sm:$0xff] %v8767_v31  ;;  %v8785_v31 = vld [vmem:[%s7347_s29 + $0x69] sm:$0xff] }
 0x444   : > { %3162 = vperm.xlu0 %7034, %v7098_v24   ;;  %v8789_v24 = vld [vmem:[%s7347_s29 + $0x79] sm:$0xff] }
 0x446   : > { %v8776_v4 = vpop.permute.xlu0 %1947  ;;  %2910 = vperm.xlu1 %7009, %v8770_v21   ;;  %v8779_v29 = vpop.permute.xlu1 %2583 }
 0x447   : > { %14067 = vst [vmem:[#allocation337_spill] sm:$0xff] %v8776_v4  ;;  %2915 = vperm.xlu2 %7008, %v8774_v28  }
 0x448   : > { %14068 = vst [vmem:[#allocation338_spill] sm:$0xff] %v8779_v29  ;;  %v8782_v15 = vpop.permute.xlu2 %2684 }
 0x449   : > { %14069 = vst [vmem:[#allocation339_spill] sm:$0xff] %v8782_v15  ;;  %v8800_v15 = vld [vmem:[%s7347_s29 + $0x91] sm:$0xff] }
 0x44c   : > { %3174 = vperm.xlu0 %7034, %v7099_v10   ;;  %v8804_v10 = vld [vmem:[%s7347_s29 + $0x99] sm:$0xff] }
 0x44e   : > { %v8791_v48 = vpop.permute.xlu0 %2475  ;;  %2925 = vperm.xlu1 %7009, %v8785_v31   ;;  %v8794_v2 = vpop.permute.xlu1 %2595 }
 0x44f   : > { %14070 = vst [vmem:[#allocation340_spill] sm:$0xff] %v8791_v48  ;;  %2930 = vperm.xlu2 %7008, %v8789_v24  }
 0x450   : > { %14071 = vst [vmem:[#allocation341_spill] sm:$0xff] %v8794_v2  ;;  %v8797_v29 = vpop.permute.xlu2 %2696 }
 0x451   : > { %14072 = vst [vmem:[#allocation342_spill] sm:$0xff] %v8797_v29  ;;  %v8815_v29 = vld [vmem:[%s7347_s29 + $0xb1] sm:$0xff] }
 0x454   : > { %3186 = vperm.xlu0 %7034, %v7100_v18   ;;  %v8819_v18 = vld [vmem:[%s7347_s29 + $0xc1] sm:$0xff] }
 0x456   : > { %v8806_v20 = vpop.permute.xlu0 %2495  ;;  %2940 = vperm.xlu1 %7009, %v8800_v15  }
 0x457   : > { %14073 = vst [vmem:[#allocation343_spill] sm:$0xff] %v8806_v20  ;;  %2945 = vperm.xlu2 %7008, %v8804_v10   ;;  %v8810_v2 = vpop.permute.xlu1 %2672 }
 0x458   : > { %14074 = vst [vmem:[#allocation344_spill] sm:$0xff] %v8810_v2  ;;  %v8812_v48 = vpop.permute.xlu2 %2708 }
 0x459   : > { %14075 = vst [vmem:[#allocation345_spill] sm:$0xff] %v8812_v48  ;;  %v8830_v48 = vld [vmem:[%s7347_s29 + $0xd9] sm:$0xff] }
 0x45c   : > { %3198 = vperm.xlu0 %7034, %v7101_v5   ;;  %v8834_v5 = vld [vmem:[%s7347_s29 + $0xe1] sm:$0xff] }
 0x45e   : > { %v8821_v4 = vpop.permute.xlu0 %2507  ;;  %2955 = vperm.xlu1 %7009, %v8815_v29  }
 0x45f   : > { %14076 = vst [vmem:[#allocation346_spill] sm:$0xff] %v8821_v4  ;;  %2960 = vperm.xlu2 %7008, %v8819_v18   ;;  %v8825_v20 = vpop.permute.xlu1 %2680  ;;  %v7171_v4 = vld [vmem:[%s7347_s29 + $0x20] sm:$0xff] }
 0x460   : > { %14077 = vst [vmem:[#allocation347_spill] sm:$0xff] %v8825_v20  ;;  %v8827_v2 = vpop.permute.xlu2 %2720 }
 0x461   : > { %14078 = vst [vmem:[#allocation348_spill] sm:$0xff] %v8827_v2  ;;  %v8845_v2 = vld [vmem:[%s7347_s29 + $0xf9] sm:$0xff] }
 0x464   : > { %3210 = vperm.xlu0 %7034, %v7102_v12   ;;  %v8849_v12 = vld [vmem:[%s7347_s29 + $0x109] sm:$0xff] }
 0x466   : > { %v8836_v33 = vpop.permute.xlu0 %2519  ;;  %2970 = vperm.xlu1 %7009, %v8830_v48  }
 0x467   : > { %14079 = vst [vmem:[#allocation349_spill] sm:$0xff] %v8836_v33  ;;  %2975 = vperm.xlu2 %7008, %v8834_v5   ;;  %v8840_v34 = vpop.permute.xlu1 %2692 }
 0x468   : > { %14080 = vst [vmem:[#allocation350_spill] sm:$0xff] %v8840_v34  ;;  %v8842_v20 = vpop.permute.xlu2 %2732 }
 0x469   : > { %14081 = vst [vmem:[#allocation351_spill] sm:$0xff] %v8842_v20  ;;  %v8860_v20 = vld [vmem:[%s7347_s29 + $0x121] sm:$0xff] }
 0x46c   : > { %3222 = vperm.xlu0 %7034, %v7103_v44   ;;  %v8864_v44 = vld [vmem:[%s7347_s29 + $0x129] sm:$0xff] }
 0x46e   : > { %v8851_v62 = vpop.permute.xlu0 %2531  ;;  %2985 = vperm.xlu1 %7009, %v8845_v2  }
 0x46f   : > { %14082 = vst [vmem:[#allocation352_spill] sm:$0xff] %v8851_v62  ;;  %2990 = vperm.xlu2 %7008, %v8849_v12   ;;  %v8855_v11 = vpop.permute.xlu1 %2704 }
 0x470   : > { %14083 = vst [vmem:[#allocation353_spill] sm:$0xff] %v8855_v11  ;;  %v8857_v34 = vpop.permute.xlu2 %2744 }
 0x471   : > { %14084 = vst [vmem:[#allocation354_spill] sm:$0xff] %v8857_v34  ;;  %v8875_v34 = vld [vmem:[%s7347_s29 + $0x141] sm:$0xff] }
 0x474   : > { %3234 = vperm.xlu0 %7034, %v7104_v25   ;;  %v8879_v25 = vld [vmem:[%s7347_s29 + $0x151] sm:$0xff] }
 0x476   : > { %v8866_v26 = vpop.permute.xlu0 %2543  ;;  %3000 = vperm.xlu1 %7009, %v8860_v20  }
 0x477   : > { %14085 = vst [vmem:[#allocation355_spill] sm:$0xff] %v8866_v26  ;;  %3005 = vperm.xlu2 %7008, %v8864_v44   ;;  %v8870_v62 = vpop.permute.xlu1 %2716 }
 0x478   : > { %14086 = vst [vmem:[#allocation356_spill] sm:$0xff] %v8870_v62  ;;  %v8872_v11 = vpop.permute.xlu2 %2756  ;;  %v8890_v62 = vld [vmem:[%s7347_s29 + $0x169] sm:$0xff] }
 0x479   : > { %14087 = vst [vmem:[#allocation357_spill] sm:$0xff] %v8872_v11  ;;  %v7106_v11 = vld [vmem:[%s7347_s29 + $0x62] sm:$0xff] }
 0x47c   : > { %3761 = vperm.xlu0 %7034, %v7105_v27   ;;  %v8894_v27 = vld [vmem:[%s7347_s29 + $0x171] sm:$0xff] }
 0x47e   : > { %v8881_v9 = vpop.permute.xlu0 %2555  ;;  %3015 = vperm.xlu1 %7009, %v8875_v34  }
 0x47f   : > { %14088 = vst [vmem:[#allocation358_spill] sm:$0xff] %v8881_v9  ;;  %3020 = vperm.xlu2 %7008, %v8879_v25   ;;  %v8885_v26 = vpop.permute.xlu1 %2728 }
 0x480   : > { %14089 = vst [vmem:[#allocation359_spill] sm:$0xff] %v8885_v26  ;;  %v8887_v17 = vpop.permute.xlu2 %2768  ;;  %v8905_v26 = vld [vmem:[%s7347_s29 + $0x189] sm:$0xff] }
 0x481   : > { %14090 = vst [vmem:[#allocation360_spill] sm:$0xff] %v8887_v17  ;;  %v7107_v17 = vld [vmem:[%s7347_s29 + $0x82] sm:$0xff] }
 0x484   : > { %3781 = vperm.xlu0 %7034, %v7106_v11  }
 0x486   : > { %v8896_v6 = vpop.permute.xlu0 %2567  ;;  %3030 = vperm.xlu1 %7009, %v8890_v62  }
 0x487   : > { %14091 = vst [vmem:[#allocation361_spill] sm:$0xff] %v8896_v6  ;;  %3035 = vperm.xlu2 %7008, %v8894_v27   ;;  %v8900_v9 = vpop.permute.xlu1 %2740 }
 0x488   : > { %14092 = vst [vmem:[#allocation362_spill] sm:$0xff] %v8900_v9  ;;  %v8902_v33 = vpop.permute.xlu2 %2780  ;;  %v7108_v9 = vld [vmem:[%s7347_s29 + $0xaa] sm:$0xff] }
 0x489   : > { %14093 = vst [vmem:[#allocation363_spill] sm:$0xff] %v8902_v33 }
 0x48c   : > { %3793 = vperm.xlu0 %7034, %v7107_v17  }
 0x48e   : > { %v8908_v32 = vpop.permute.xlu0 %2579  ;;  %3045 = vperm.xlu1 %7009, %v8905_v26  }
 0x48f   : > { %14094 = vst [vmem:[#allocation364_spill] sm:$0xff] %v8908_v32  ;;  %7010 = vset.pattern.permute.xlu2 %v13801_v60  ;;  %v8912_v11 = vpop.permute.xlu1 %2752 }
 0x490   : > { %14095 = vst [vmem:[#allocation365_spill] sm:$0xff] %v8912_v11  ;;  %3114 = vperm.xlu2 %7010, %v8742_v52   ;;  %v7109_v11 = vld [vmem:[%s7347_s29 + $0xca] sm:$0xff] }
 0x491   : > { %v8915_v6 = vpop.permute.xlu2 %2890 }
 0x492   : > { %14096 = vst [vmem:[#allocation366_spill] sm:$0xff] %v8915_v6 }
 0x494   : > { %3805 = vperm.xlu0 %7034, %v7108_v9  }
 0x496   : > { %v8918_v33 = vpop.permute.xlu0 %2591  ;;  %7011 = vset.pattern.permute.xlu1 %v13801_v60 }
 0x497   : > { %14097 = vst [vmem:[#allocation367_spill] sm:$0xff] %v8918_v33  ;;  %3122 = vperm.xlu1 %7011, %v8754_v8   ;;  %v8922_v17 = vpop.permute.xlu1 %2764  ;;  %v7110_v33 = vld [vmem:[%s7347_s29 + $0xf2] sm:$0xff] }
 0x498   : > { %14098 = vst [vmem:[#allocation368_spill] sm:$0xff] %v8922_v17  ;;  %3126 = vperm.xlu2 %7010, %v8758_v7  }
 0x499   : > { %v8925_v32 = vpop.permute.xlu2 %2905 }
 0x49a   : > { %14099 = vst [vmem:[#allocation369_spill] sm:$0xff] %v8925_v32 }
 0x49c   : > { %3817 = vperm.xlu0 %7034, %v7109_v11  }
 0x49e   : > { %v8928_v19 = vpop.permute.xlu0 %3118 }
 0x49f   : > { %14100 = vst [vmem:[#allocation370_spill] sm:$0xff] %v8928_v19  ;;  %3130 = vperm.xlu1 %7011, %v8770_v21   ;;  %v8931_v9 = vpop.permute.xlu1 %2776  ;;  %v7111_v19 = vld [vmem:[%s7347_s29 + $0x112] sm:$0xff] }
 0x4a0   : > { %14101 = vst [vmem:[#allocation371_spill] sm:$0xff] %v8931_v9  ;;  %3134 = vperm.xlu2 %7010, %v8774_v28  }
 0x4a1   : > { %v8934_v6 = vpop.permute.xlu2 %2915 }
 0x4a2   : > { %14102 = vst [vmem:[#allocation372_spill] sm:$0xff] %v8934_v6 }
 0x4a4   : > { %3829 = vperm.xlu0 %7034, %v7110_v33  }
 0x4a6   : > { %v8937_v17 = vpop.permute.xlu0 %3138 }
 0x4a7   : > { %14103 = vst [vmem:[#allocation373_spill] sm:$0xff] %v8937_v17  ;;  %3142 = vperm.xlu1 %7011, %v8785_v31   ;;  %v8940_v32 = vpop.permute.xlu1 %2788  ;;  %v7112_v17 = vld [vmem:[%s7347_s29 + $0x13a] sm:$0xff] }
 0x4a8   : > { %14104 = vst [vmem:[#allocation374_spill] sm:$0xff] %v8940_v32  ;;  %3146 = vperm.xlu2 %7010, %v8789_v24  }
 0x4a9   : > { %v8943_v11 = vpop.permute.xlu2 %2930 }
 0x4aa   : > { %14105 = vst [vmem:[#allocation375_spill] sm:$0xff] %v8943_v11 }
 0x4ac   : > { %3841 = vperm.xlu0 %7034, %v7111_v19  }
 0x4ae   : > { %v8946_v9 = vpop.permute.xlu0 %3150 }
 0x4af   : > { %14106 = vst [vmem:[#allocation376_spill] sm:$0xff] %v8946_v9  ;;  %3154 = vperm.xlu1 %7011, %v8800_v15   ;;  %v7113_v9 = vld [vmem:[%s7347_s29 + $0x15a] sm:$0xff] }
 0x4b0   : > { %3158 = vperm.xlu2 %7010, %v8804_v10   ;;  %v8950_v33 = vpop.permute.xlu1 %2900 }
 0x4b1   : > { %14107 = vst [vmem:[#allocation377_spill] sm:$0xff] %v8950_v33  ;;  %v8952_v6 = vpop.permute.xlu2 %2945  ;;  %v7114_v33 = vld [vmem:[%s7347_s29 + $0x182] sm:$0xff] }
 0x4b2   : > { %14108 = vst [vmem:[#allocation378_spill] sm:$0xff] %v8952_v6 }
 0x4b4   : > { %3853 = vperm.xlu0 %7034, %v7112_v17  }
 0x4b6   : > { %v8955_v32 = vpop.permute.xlu0 %3162 }
 0x4b7   : > { %14109 = vst [vmem:[#allocation379_spill] sm:$0xff] %v8955_v32  ;;  %3166 = vperm.xlu1 %7011, %v8815_v29  }
 0x4b8   : > { %3170 = vperm.xlu2 %7010, %v8819_v18   ;;  %v8959_v19 = vpop.permute.xlu1 %2910 }
 0x4b9   : > { %14110 = vst [vmem:[#allocation380_spill] sm:$0xff] %v8959_v19  ;;  %v8961_v11 = vpop.permute.xlu2 %2960  ;;  %v7115_v19 = vld [vmem:[%s7347_s29 + $0x38] sm:$0xff] }
 0x4ba   : > { %14111 = vst [vmem:[#allocation381_spill] sm:$0xff] %v8961_v11 }
 0x4bc   : > { %3865 = vperm.xlu0 %7034, %v7113_v9  }
 0x4be   : > { %v8964_v56 = vpop.permute.xlu0 %3174 }
 0x4bf   : > { %14112 = vst [vmem:[#allocation382_spill] sm:$0xff] %v8964_v56  ;;  %3178 = vperm.xlu1 %7011, %v8830_v48  }
 0x4c0   : > { %3182 = vperm.xlu2 %7010, %v8834_v5   ;;  %v8968_v17 = vpop.permute.xlu1 %2925 }
 0x4c1   : > { %14113 = vst [vmem:[#allocation383_spill] sm:$0xff] %v8968_v17  ;;  %v8970_v6 = vpop.permute.xlu2 %2975  ;;  %v7116_v17 = vld [vmem:[%s7347_s29 + $0x78] sm:$0xff] }
 0x4c2   : > { %14114 = vst [vmem:[#allocation384_spill] sm:$0xff] %v8970_v6 }
 0x4c4   : > { %3877 = vperm.xlu0 %7034, %v7114_v33  }
 0x4c6   : > { %v8973_v32 = vpop.permute.xlu0 %3186 }
 0x4c7   : > { %14115 = vst [vmem:[#allocation385_spill] sm:$0xff] %v8973_v32  ;;  %3190 = vperm.xlu1 %7011, %v8845_v2  }
 0x4c8   : > { %3194 = vperm.xlu2 %7010, %v8849_v12   ;;  %v8977_v9 = vpop.permute.xlu1 %2940 }
 0x4c9   : > { %14116 = vst [vmem:[#allocation386_spill] sm:$0xff] %v8977_v9  ;;  %v8979_v11 = vpop.permute.xlu2 %2990  ;;  %v7117_v9 = vld [vmem:[%s7347_s29 + $0x98] sm:$0xff] }
 0x4ca   : > { %14117 = vst [vmem:[#allocation387_spill] sm:$0xff] %v8979_v11 }
 0x4cc   : > { %4405 = vperm.xlu0 %7034, %v7115_v19  }
 0x4ce   : > { %v8982_v56 = vpop.permute.xlu0 %3198 }
 0x4cf   : > { %14118 = vst [vmem:[#allocation388_spill] sm:$0xff] %v8982_v56  ;;  %3202 = vperm.xlu1 %7011, %v8860_v20  }
 0x4d0   : > { %3206 = vperm.xlu2 %7010, %v8864_v44   ;;  %v8986_v33 = vpop.permute.xlu1 %2955 }
 0x4d1   : > { %14119 = vst [vmem:[#allocation389_spill] sm:$0xff] %v8986_v33  ;;  %v8988_v6 = vpop.permute.xlu2 %3005  ;;  %v7118_v33 = vld [vmem:[%s7347_s29 + $0xc0] sm:$0xff] }
 0x4d2   : > { %14120 = vst [vmem:[#allocation390_spill] sm:$0xff] %v8988_v6 }
 0x4d4   : > { %4425 = vperm.xlu0 %7034, %v7116_v17  }
 0x4d6   : > { %v8991_v32 = vpop.permute.xlu0 %3210 }
 0x4d7   : > { %14121 = vst [vmem:[#allocation391_spill] sm:$0xff] %v8991_v32  ;;  %3214 = vperm.xlu1 %7011, %v8875_v34  }
 0x4d8   : > { %3218 = vperm.xlu2 %7010, %v8879_v25   ;;  %v8995_v19 = vpop.permute.xlu1 %2970 }
 0x4d9   : > { %14122 = vst [vmem:[#allocation392_spill] sm:$0xff] %v8995_v19  ;;  %v8997_v11 = vpop.permute.xlu2 %3020 }
 0x4da   : > { %14123 = vst [vmem:[#allocation393_spill] sm:$0xff] %v8997_v11  ;;  %v7119_v11 = vld [vmem:[%s7347_s29 + $0xe0] sm:$0xff] }
 0x4dc   : > { %4437 = vperm.xlu0 %7034, %v7117_v9  }
 0x4de   : > { %v9000_v56 = vpop.permute.xlu0 %3222 }
 0x4df   : > { %14124 = vst [vmem:[#allocation394_spill] sm:$0xff] %v9000_v56  ;;  %3226 = vperm.xlu1 %7011, %v8890_v62   ;;  %v9265_v56 = vld [vmem:[%s7347_s29 + $0x172] sm:$0xff] }
 0x4e0   : > { %3230 = vperm.xlu2 %7010, %v8894_v27   ;;  %v9004_v17 = vpop.permute.xlu1 %2985 }
 0x4e1   : > { %14125 = vst [vmem:[#allocation395_spill] sm:$0xff] %v9004_v17  ;;  %v9006_v6 = vpop.permute.xlu2 %3035 }
 0x4e2   : > { %14126 = vst [vmem:[#allocation396_spill] sm:$0xff] %v9006_v6 }
 0x4e4   : > { %4449 = vperm.xlu0 %7034, %v7118_v33  }
 0x4e6   : > { %v9009_v32 = vpop.permute.xlu0 %3234 }
 0x4e7   : > { %14127 = vst [vmem:[#allocation397_spill] sm:$0xff] %v9009_v32  ;;  %3238 = vperm.xlu1 %7011, %v8905_v26   ;;  %v9250_v32 = vld [vmem:[%s7347_s29 + $0x152] sm:$0xff] }
 0x4e8   : > { %7012 = vset.pattern.permute.xlu2 %v13835_v40  ;;  %v9013_v9 = vpop.permute.xlu1 %3000 }
 0x4e9   : > { %14128 = vst [vmem:[#allocation398_spill] sm:$0xff] %v9013_v9  ;;  %3307 = vperm.xlu2 %7012, %v8742_v52   ;;  %v7120_v9 = vld [vmem:[%s7347_s29 + $0x108] sm:$0xff] }
 0x4ea   : > { %v9016_v19 = vpop.permute.xlu2 %3114 }
 0x4eb   : > { %14129 = vst [vmem:[#allocation399_spill] sm:$0xff] %v9016_v19 }
 0x4ec   : > { %4461 = vperm.xlu0 %7034, %v7119_v11  }
 0x4ee   : > { %v9019_v17 = vpop.permute.xlu0 %3761 }
 0x4ef   : > { %14130 = vst [vmem:[#allocation400_spill] sm:$0xff] %v9019_v17  ;;  %7013 = vset.pattern.permute.xlu1 %v13835_v40  ;;  %v9235_v17 = vld [vmem:[%s7347_s29 + $0x12a] sm:$0xff] }
 0x4f0   : > { %3315 = vperm.xlu1 %7013, %v8754_v8   ;;  %v9023_v33 = vpop.permute.xlu1 %3015  ;;  %v7121_v8 = vld [vmem:[%s7347_s29 + $0x128] sm:$0xff] }
 0x4f1   : > { %14131 = vst [vmem:[#allocation401_spill] sm:$0xff] %v9023_v33  ;;  %3319 = vperm.xlu2 %7012, %v8758_v7  }
 0x4f2   : > { %v9026_v6 = vpop.permute.xlu2 %3126 }
 0x4f3   : > { %14132 = vst [vmem:[#allocation402_spill] sm:$0xff] %v9026_v6 }
 0x4f4   : > { %4473 = vperm.xlu0 %7034, %v7120_v9  }
 0x4f6   : > { %v9029_v52 = vpop.permute.xlu0 %3781 }
 0x4f7   : > { %14133 = vst [vmem:[#allocation403_spill] sm:$0xff] %v9029_v52  ;;  %v9220_v52 = vld [vmem:[%s7347_s29 + $0x10a] sm:$0xff] }
 0x4f8   : > { %3323 = vperm.xlu1 %7013, %v8770_v21   ;;  %v9032_v11 = vpop.permute.xlu1 %3030  ;;  %v7122_v21 = vld [vmem:[%s7347_s29 + $0x150] sm:$0xff] }
 0x4f9   : > { %14134 = vst [vmem:[#allocation404_spill] sm:$0xff] %v9032_v11  ;;  %3327 = vperm.xlu2 %7012, %v8774_v28  }
 0x4fa   : > { %v9035_v19 = vpop.permute.xlu2 %3134 }
 0x4fb   : > { %14135 = vst [vmem:[#allocation405_spill] sm:$0xff] %v9035_v19  ;;  %v9175_v19 = vld [vmem:[%s7347_s29 + $0x9a] sm:$0xff] }
 0x4fc   : > { %4485 = vperm.xlu0 %7034, %v7121_v8  }
 0x4fe   : > { %v9038_v33 = vpop.permute.xlu0 %3793 }
 0x4ff   : > { %14136 = vst [vmem:[#allocation406_spill] sm:$0xff] %v9038_v33 }
 0x500   : > { %3335 = vperm.xlu1 %7013, %v8785_v31   ;;  %v9041_v7 = vpop.permute.xlu1 %3045  ;;  %v7123_v31 = vld [vmem:[%s7347_s29 + $0x170] sm:$0xff] }
 0x501   : > { %14137 = vst [vmem:[#allocation407_spill] sm:$0xff] %v9041_v7  ;;  %3339 = vperm.xlu2 %7012, %v8789_v24  }
 0x502   : > { %v9044_v9 = vpop.permute.xlu2 %3146 }
 0x503   : > { %14138 = vst [vmem:[#allocation408_spill] sm:$0xff] %v9044_v9  ;;  %v9172_v9 = vld [vmem:[%s7347_s29 + $0x92] sm:$0xff] }
 0x504   : > { %4497 = vperm.xlu0 %7034, %v7122_v21  }
 0x506   : > { %v9047_v11 = vpop.permute.xlu0 %3805 }
 0x507   : > { %14139 = vst [vmem:[#allocation409_spill] sm:$0xff] %v9047_v11 }
 0x508   : > { %3347 = vperm.xlu1 %7013, %v8800_v15   ;;  %v7124_v15 = vld [vmem:[%s7347_s29 + $0x198] sm:$0xff] }
 0x509   : > { %3351 = vperm.xlu2 %7012, %v8804_v10   ;;  %v9051_v28 = vpop.permute.xlu1 %3122 }
 0x50a   : > { %14140 = vst [vmem:[#allocation410_spill] sm:$0xff] %v9051_v28  ;;  %v9053_v8 = vpop.permute.xlu2 %3158 }
 0x50b   : > { %14141 = vst [vmem:[#allocation411_spill] sm:$0xff] %v9053_v8 }
 0x50c   : > { %4509 = vperm.xlu0 %7034, %v7123_v31  }
 0x50e   : > { %v9056_v7 = vpop.permute.xlu0 %3817 }
 0x50f   : > { %14142 = vst [vmem:[#allocation412_spill] sm:$0xff] %v9056_v7 }
 0x510   : > { %3359 = vperm.xlu1 %7013, %v8815_v29   ;;  %v7125_v29 = vld [vmem:[%s7347_s29 + $0x39] sm:$0xff] }
 0x511   : > { %3363 = vperm.xlu2 %7012, %v8819_v18   ;;  %v9060_v24 = vpop.permute.xlu1 %3130 }
 0x512   : > { %14143 = vst [vmem:[#allocation413_spill] sm:$0xff] %v9060_v24  ;;  %v9062_v21 = vpop.permute.xlu2 %3170  ;;  %v9160_v24 = vld [vmem:[%s7347_s29 + $0x7a] sm:$0xff] }
 0x513   : > { %14144 = vst [vmem:[#allocation414_spill] sm:$0xff] %v9062_v21 }
 0x514   : > { %4521 = vperm.xlu0 %7034, %v7124_v15  }
 0x516   : > { %v9065_v10 = vpop.permute.xlu0 %3829 }
 0x517   : > { %14145 = vst [vmem:[#allocation415_spill] sm:$0xff] %v9065_v10 }
 0x518   : > { %3371 = vperm.xlu1 %7013, %v8830_v48   ;;  %v7126_v48 = vld [vmem:[%s7347_s29 + $0x79] sm:$0xff] }
 0x519   : > { %3375 = vperm.xlu2 %7012, %v8834_v5   ;;  %v9069_v31 = vpop.permute.xlu1 %3142 }
 0x51a   : > { %14146 = vst [vmem:[#allocation416_spill] sm:$0xff] %v9069_v31  ;;  %v9071_v8 = vpop.permute.xlu2 %3182  ;;  %v9157_v31 = vld [vmem:[%s7347_s29 + $0x6a] sm:$0xff] }
 0x51b   : > { %14147 = vst [vmem:[#allocation417_spill] sm:$0xff] %v9071_v8 }
 0x51c   : > { %5048 = vperm.xlu0 %7034, %v7125_v29  }
 0x51e   : > { %v9074_v18 = vpop.permute.xlu0 %3841 }
 0x51f   : > { %14148 = vst [vmem:[#allocation418_spill] sm:$0xff] %v9074_v18 }
 0x520   : > { %3383 = vperm.xlu1 %7013, %v8845_v2   ;;  %v7127_v2 = vld [vmem:[%s7347_s29 + $0x99] sm:$0xff] }
 0x521   : > { %3387 = vperm.xlu2 %7012, %v8849_v12   ;;  %v9078_v15 = vpop.permute.xlu1 %3154 }
 0x522   : > { %14149 = vst [vmem:[#allocation419_spill] sm:$0xff] %v9078_v15  ;;  %v9080_v21 = vpop.permute.xlu2 %3194 }
 0x523   : > { %14150 = vst [vmem:[#allocation420_spill] sm:$0xff] %v9080_v21 }
 0x524   : > { %5068 = vperm.xlu0 %7034, %v7126_v48  }
 0x526   : > { %v9083_v5 = vpop.permute.xlu0 %3853 }
 0x527   : > { %14151 = vst [vmem:[#allocation421_spill] sm:$0xff] %v9083_v5 }
 0x528   : > { %3395 = vperm.xlu1 %7013, %v8860_v20   ;;  %v7128_v20 = vld [vmem:[%s7347_s29 + $0xc1] sm:$0xff] }
 0x529   : > { %3399 = vperm.xlu2 %7012, %v8864_v44   ;;  %v9087_v29 = vpop.permute.xlu1 %3166 }
 0x52a   : > { %14152 = vst [vmem:[#allocation422_spill] sm:$0xff] %v9087_v29  ;;  %v9089_v8 = vpop.permute.xlu2 %3206  ;;  %v9145_v29 = vld [vmem:[%s7347_s29 + $0x52] sm:$0xff] }
 0x52b   : > { %14153 = vst [vmem:[#allocation423_spill] sm:$0xff] %v9089_v8  ;;  %v9142_v8 = vld [vmem:[%s7347_s29 + $0x4a] sm:$0xff] }
 0x52c   : > { %5080 = vperm.xlu0 %7034, %v7127_v2  }
 0x52e   : > { %v9092_v12 = vpop.permute.xlu0 %3865 }
 0x52f   : > { %14154 = vst [vmem:[#allocation424_spill] sm:$0xff] %v9092_v12 }
 0x530   : > { %3407 = vperm.xlu1 %7013, %v8875_v34  }
 0x531   : > { %3411 = vperm.xlu2 %7012, %v8879_v25   ;;  %v9096_v48 = vpop.permute.xlu1 %3178  ;;  %v7129_v25 = vld [vmem:[%s7347_s29 + $0xe1] sm:$0xff] }
 0x532   : > { %14155 = vst [vmem:[#allocation425_spill] sm:$0xff] %v9096_v48  ;;  %v9098_v21 = vpop.permute.xlu2 %3218 }
 0x533   : > { %14156 = vst [vmem:[#allocation426_spill] sm:$0xff] %v9098_v21  ;;  %v9113_v21 = vld [vmem:[%s7347_s29 + $0x1a] sm:$0xff] }
 0x534   : > { %5092 = vperm.xlu0 %7034, %v7128_v20   ;;  %v7130_v20 = vld [vmem:[%s7347_s29 + $0x109] sm:$0xff] }
 0x536   : > { %v9101_v44 = vpop.permute.xlu0 %3877 }
 0x537   : > { %14157 = vst [vmem:[#allocation427_spill] sm:$0xff] %v9101_v44 }
 0x538   : > { %3419 = vperm.xlu1 %7013, %v8890_v62  }
 0x539   : > { %3423 = vperm.xlu2 %7012, %v8894_v27   ;;  %v9105_v2 = vpop.permute.xlu1 %3190 }
 0x53a   : > { %14158 = vst [vmem:[#allocation428_spill] sm:$0xff] %v9105_v2  ;;  %v9107_v34 = vpop.permute.xlu2 %3230  ;;  %v9126_v2 = vld [vmem:[%s7347_s29 + $0x32] sm:$0xff] }
 0x53b   : > { %14159 = vst [vmem:[#allocation429_spill] sm:$0xff] %v9107_v34  ;;  %v9129_v34 = vld [vmem:[%s7347_s29 + $0x3a] sm:$0xff] }
 0x53c   : > { %5104 = vperm.xlu0 %7034, %v7129_v25  }
 0x53e   : > { %v9110_v48 = vpop.permute.xlu0 %4405 }
 0x53f   : > { %14160 = vst [vmem:[#allocation430_spill] sm:$0xff] %v9110_v48 }
 0x540   : > { %3431 = vperm.xlu1 %7013, %v8905_v26  }
 0x541   : > { %7014 = vset.pattern.permute.xlu2 %v13766_v23  ;;  %v9117_v62 = vpop.permute.xlu1 %3202 }
 0x542   : > { %14161 = vst [vmem:[#allocation431_spill] sm:$0xff] %v9117_v62  ;;  %3533 = vperm.xlu2 %7014, %v9113_v21  }
 0x543   : > { %v9120_v27 = vpop.permute.xlu2 %3307 }
 0x544   : > { %14162 = vst [vmem:[#allocation432_spill] sm:$0xff] %v9120_v27  ;;  %5116 = vperm.xlu0 %7034, %v7130_v20   ;;  %v7131_v20 = vld [vmem:[%s7347_s29 + $0x129] sm:$0xff] }
 0x546   : > { %v9123_v25 = vpop.permute.xlu0 %4425 }
 0x547   : > { %14163 = vst [vmem:[#allocation433_spill] sm:$0xff] %v9123_v25  ;;  %v9205_v25 = vld [vmem:[%s7347_s29 + $0xe2] sm:$0xff] }
 0x548   : > { %7015 = vset.pattern.permute.xlu1 %v13766_v23 }
 0x549   : > { %3543 = vperm.xlu1 %7015, %v9126_v2   ;;  %v9133_v26 = vpop.permute.xlu1 %3214 }
 0x54a   : > { %14164 = vst [vmem:[#allocation434_spill] sm:$0xff] %v9133_v26  ;;  %3548 = vperm.xlu2 %7014, %v9129_v34  }
 0x54b   : > { %v9136_v27 = vpop.permute.xlu2 %3319 }
 0x54c   : > { %14165 = vst [vmem:[#allocation435_spill] sm:$0xff] %v9136_v27  ;;  %5128 = vperm.xlu0 %7034, %v7131_v20   ;;  %v7132_v27 = vld [vmem:[%s7347_s29 + $0x151] sm:$0xff] }
 0x54e   : > { %v9139_v62 = vpop.permute.xlu0 %4437 }
 0x54f   : > { %14166 = vst [vmem:[#allocation436_spill] sm:$0xff] %v9139_v62 }
 0x551   : > { %3553 = vperm.xlu1 %7015, %v9142_v8   ;;  %v9148_v15 = vpop.permute.xlu1 %3226 }
 0x552   : > { %14167 = vst [vmem:[#allocation437_spill] sm:$0xff] %v9148_v15  ;;  %3558 = vperm.xlu2 %7014, %v9145_v29  }
 0x553   : > { %v9151_v26 = vpop.permute.xlu2 %3327 }
 0x554   : > { %14168 = vst [vmem:[#allocation438_spill] sm:$0xff] %v9151_v26  ;;  %5140 = vperm.xlu0 %7034, %v7132_v27   ;;  %v7133_v26 = vld [vmem:[%s7347_s29 + $0x171] sm:$0xff] }
 0x556   : > { %v9154_v20 = vpop.permute.xlu0 %4449 }
 0x557   : > { %14169 = vst [vmem:[#allocation439_spill] sm:$0xff] %v9154_v20  ;;  %v9190_v20 = vld [vmem:[%s7347_s29 + $0xc2] sm:$0xff] }
 0x559   : > { %3568 = vperm.xlu1 %7015, %v9157_v31   ;;  %v9163_v28 = vpop.permute.xlu1 %3238 }
 0x55a   : > { %14170 = vst [vmem:[#allocation440_spill] sm:$0xff] %v9163_v28  ;;  %3573 = vperm.xlu2 %7014, %v9160_v24  }
 0x55b   : > { %v9166_v15 = vpop.permute.xlu2 %3339 }
 0x55c   : > { %14171 = vst [vmem:[#allocation441_spill] sm:$0xff] %v9166_v15  ;;  %5152 = vperm.xlu0 %7034, %v7133_v26   ;;  %v7134_v15 = vld [vmem:[%s7347_s29 + $0x199] sm:$0xff] }
 0x55e   : > { %v9169_v27 = vpop.permute.xlu0 %4461 }
 0x55f   : > { %14172 = vst [vmem:[#allocation442_spill] sm:$0xff] %v9169_v27  ;;  %v9187_v27 = vld [vmem:[%s7347_s29 + $0xb2] sm:$0xff] }
 0x561   : > { %3583 = vperm.xlu1 %7015, %v9172_v9  }
 0x562   : > { %3588 = vperm.xlu2 %7014, %v9175_v19   ;;  %v9179_v28 = vpop.permute.xlu1 %3315 }
 0x563   : > { %14173 = vst [vmem:[#allocation443_spill] sm:$0xff] %v9179_v28  ;;  %v9181_v6 = vpop.permute.xlu2 %3351 }
 0x564   : > { %14174 = vst [vmem:[#allocation444_spill] sm:$0xff] %v9181_v6  ;;  %5164 = vperm.xlu0 %7034, %v7134_v15   ;;  %v7135_v6 = vld [vmem:[%s7347_s29 + $0x3a] sm:$0xff] }
 0x566   : > { %v9184_v26 = vpop.permute.xlu0 %4473 }
 0x567   : > { %14175 = vst [vmem:[#allocation445_spill] sm:$0xff] %v9184_v26  ;;  %v9202_v26 = vld [vmem:[%s7347_s29 + $0xda] sm:$0xff] }
 0x569   : > { %3598 = vperm.xlu1 %7015, %v9187_v27  }
 0x56a   : > { %3603 = vperm.xlu2 %7014, %v9190_v20   ;;  %v9194_v62 = vpop.permute.xlu1 %3323 }
 0x56b   : > { %14176 = vst [vmem:[#allocation446_spill] sm:$0xff] %v9194_v62  ;;  %v9196_v28 = vpop.permute.xlu2 %3363 }
 0x56c   : > { %14177 = vst [vmem:[#allocation447_spill] sm:$0xff] %v9196_v28  ;;  %5691 = vperm.xlu0 %7034, %v7135_v6   ;;  %v7136_v28 = vld [vmem:[%s7347_s29 + $0x7a] sm:$0xff] }
 0x56e   : > { %v9199_v15 = vpop.permute.xlu0 %4485 }
 0x56f   : > { %14178 = vst [vmem:[#allocation448_spill] sm:$0xff] %v9199_v15  ;;  %v9217_v15 = vld [vmem:[%s7347_s29 + $0xfa] sm:$0xff] }
 0x571   : > { %3613 = vperm.xlu1 %7015, %v9202_v26  }
 0x572   : > { %3618 = vperm.xlu2 %7014, %v9205_v25   ;;  %v9209_v48 = vpop.permute.xlu1 %3335 }
 0x573   : > { %14179 = vst [vmem:[#allocation449_spill] sm:$0xff] %v9209_v48  ;;  %v9211_v62 = vpop.permute.xlu2 %3375 }
 0x574   : > { %14180 = vst [vmem:[#allocation450_spill] sm:$0xff] %v9211_v62  ;;  %5711 = vperm.xlu0 %7034, %v7136_v28   ;;  %v7137_v62 = vld [vmem:[%s7347_s29 + $0x9a] sm:$0xff] }
 0x576   : > { %v9214_v6 = vpop.permute.xlu0 %4497 }
 0x577   : > { %14181 = vst [vmem:[#allocation451_spill] sm:$0xff] %v9214_v6  ;;  %v9232_v6 = vld [vmem:[%s7347_s29 + $0x122] sm:$0xff] }
 0x579   : > { %3628 = vperm.xlu1 %7015, %v9217_v15  }
 0x57a   : > { %3633 = vperm.xlu2 %7014, %v9220_v52   ;;  %v9224_v44 = vpop.permute.xlu1 %3347 }
 0x57b   : > { %14182 = vst [vmem:[#allocation452_spill] sm:$0xff] %v9224_v44  ;;  %v9226_v48 = vpop.permute.xlu2 %3387 }
 0x57c   : > { %14183 = vst [vmem:[#allocation453_spill] sm:$0xff] %v9226_v48  ;;  %5723 = vperm.xlu0 %7034, %v7137_v62   ;;  %v7138_v48 = vld [vmem:[%s7347_s29 + $0xc2] sm:$0xff] }
 0x57e   : > { %v9229_v28 = vpop.permute.xlu0 %4509 }
 0x57f   : > { %14184 = vst [vmem:[#allocation454_spill] sm:$0xff] %v9229_v28  ;;  %v9247_v28 = vld [vmem:[%s7347_s29 + $0x142] sm:$0xff] }
 0x581   : > { %3643 = vperm.xlu1 %7015, %v9232_v6  }
 0x582   : > { %3648 = vperm.xlu2 %7014, %v9235_v17   ;;  %v9239_v12 = vpop.permute.xlu1 %3359 }
 0x583   : > { %14185 = vst [vmem:[#allocation455_spill] sm:$0xff] %v9239_v12  ;;  %v9241_v44 = vpop.permute.xlu2 %3399 }
 0x584   : > { %14186 = vst [vmem:[#allocation456_spill] sm:$0xff] %v9241_v44  ;;  %5735 = vperm.xlu0 %7034, %v7138_v48   ;;  %v7139_v44 = vld [vmem:[%s7347_s29 + $0xe2] sm:$0xff] }
 0x586   : > { %v9244_v62 = vpop.permute.xlu0 %4521 }
 0x587   : > { %14187 = vst [vmem:[#allocation457_spill] sm:$0xff] %v9244_v62  ;;  %v9262_v62 = vld [vmem:[%s7347_s29 + $0x16a] sm:$0xff] }
 0x589   : > { %3658 = vperm.xlu1 %7015, %v9247_v28  }
 0x58a   : > { %3663 = vperm.xlu2 %7014, %v9250_v32   ;;  %v9254_v5 = vpop.permute.xlu1 %3371 }
 0x58b   : > { %14188 = vst [vmem:[#allocation458_spill] sm:$0xff] %v9254_v5  ;;  %v9256_v12 = vpop.permute.xlu2 %3411  ;;  %v7140_v5 = vld [vmem:[%s7347_s29 + $0x10a] sm:$0xff] }
 0x58c   : > { %14189 = vst [vmem:[#allocation459_spill] sm:$0xff] %v9256_v12  ;;  %5747 = vperm.xlu0 %7034, %v7139_v44   ;;  %v9277_v44 = vld [vmem:[%s7347_s29 + $0x18a] sm:$0xff]  ;;  %v6954_v12 = vld [vmem:[%s7347_s29 + $0x15a] sm:$0xff] }
 0x58e   : > { %v9259_v48 = vpop.permute.xlu0 %5048 }
 0x58f   : > { %14190 = vst [vmem:[#allocation460_spill] sm:$0xff] %v9259_v48 }
 0x591   : > { %3673 = vperm.xlu1 %7015, %v9262_v62  }
 0x592   : > { %3678 = vperm.xlu2 %7014, %v9265_v56   ;;  %v9269_v18 = vpop.permute.xlu1 %3383 }
 0x593   : > { %14191 = vst [vmem:[#allocation461_spill] sm:$0xff] %v9269_v18  ;;  %v9271_v10 = vpop.permute.xlu2 %3423 }
 0x594   : > { %14192 = vst [vmem:[#allocation462_spill] sm:$0xff] %v9271_v10  ;;  %5759 = vperm.xlu0 %7034, %v7140_v5  }
 0x596   : > { %v9274_v7 = vpop.permute.xlu0 %5068 }
 0x597   : > { %14193 = vst [vmem:[#allocation463_spill] sm:$0xff] %v9274_v7 }
 0x599   : > { %3688 = vperm.xlu1 %7015, %v9277_v44  }
 0x59a   : > { %7016 = vset.pattern.permute.xlu2 %v13801_v60  ;;  %v9282_v48 = vpop.permute.xlu1 %3395 }
 0x59b   : > { %14194 = vst [vmem:[#allocation464_spill] sm:$0xff] %v9282_v48  ;;  %3757 = vperm.xlu2 %7016, %v9113_v21   ;;  %v7141_v48 = vld [vmem:[%s7347_s29 + $0x8] sm:$0xff] }
 0x59c   : > { %v9285_v11 = vpop.permute.xlu2 %3533  ;;  %5787 = vperm.xlu0 %7034, %v6954_v12  }
 0x59d   : > { %14195 = vst [vmem:[#allocation465_spill] sm:$0xff] %v9285_v11 }
 0x59e   : > { %v9287_v18 = vpop.permute.xlu0 %5080 }
 0x59f   : > { %14196 = vst [vmem:[#allocation466_spill] sm:$0xff] %v9287_v18 }
 0x5a1   : > { %7017 = vset.pattern.permute.xlu1 %v13801_v60 }
 0x5a2   : > { %3765 = vperm.xlu1 %7017, %v9126_v2   ;;  %v9291_v5 = vpop.permute.xlu1 %3407 }
 0x5a3   : > { %14197 = vst [vmem:[#allocation467_spill] sm:$0xff] %v9291_v5  ;;  %3769 = vperm.xlu2 %7016, %v9129_v34   ;;  %v7142_v5 = vld [vmem:[%s7347_s29 + $0x48] sm:$0xff] }
 0x5a4   : > { %v9294_v10 = vpop.permute.xlu2 %3548  ;;  %7042 = vset.pattern.permute.xlu0 %v13835_v40 }
 0x5a5   : > { %14198 = vst [vmem:[#allocation468_spill] sm:$0xff] %v9294_v10  ;;  %738 = vperm.xlu0 %7042, %v7141_v48  }
 0x5a6   : > { %v9298_v11 = vpop.permute.xlu0 %5092 }
 0x5a7   : > { %14199 = vst [vmem:[#allocation469_spill] sm:$0xff] %v9298_v11  ;;  %v7143_v11 = vld [vmem:[%s7347_s29 + $0x68] sm:$0xff] }
 0x5aa   : > { %3773 = vperm.xlu1 %7017, %v9142_v8   ;;  %v9301_v12 = vpop.permute.xlu1 %3419 }
 0x5ab   : > { %14200 = vst [vmem:[#allocation470_spill] sm:$0xff] %v9301_v12  ;;  %3777 = vperm.xlu2 %7016, %v9145_v29  }
 0x5ac   : > { %v9304_v18 = vpop.permute.xlu2 %3558 }
 0x5ad   : > { %14201 = vst [vmem:[#allocation471_spill] sm:$0xff] %v9304_v18  ;;  %758 = vperm.xlu0 %7042, %v7142_v5  }
 0x5ae   : > { %v9307_v7 = vpop.permute.xlu0 %5104 }
 0x5af   : > { %14202 = vst [vmem:[#allocation472_spill] sm:$0xff] %v9307_v7  ;;  %v7144_v7 = vld [vmem:[%s7347_s29 + $0x90] sm:$0xff] }
 0x5b2   : > { %3785 = vperm.xlu1 %7017, %v9157_v31   ;;  %v9310_v10 = vpop.permute.xlu1 %3431 }
 0x5b3   : > { %14203 = vst [vmem:[#allocation473_spill] sm:$0xff] %v9310_v10  ;;  %3789 = vperm.xlu2 %7016, %v9160_v24  }
 0x5b4   : > { %v9313_v48 = vpop.permute.xlu2 %3573 }
 0x5b5   : > { %14204 = vst [vmem:[#allocation474_spill] sm:$0xff] %v9313_v48  ;;  %770 = vperm.xlu0 %7042, %v7143_v11  }
 0x5b6   : > { %v9316_v12 = vpop.permute.xlu0 %5116 }
 0x5b7   : > { %14205 = vst [vmem:[#allocation475_spill] sm:$0xff] %v9316_v12  ;;  %v7145_v12 = vld [vmem:[%s7347_s29 + $0xb0] sm:$0xff] }
 0x5ba   : > { %3797 = vperm.xlu1 %7017, %v9172_v9  }
 0x5bb   : > { %3801 = vperm.xlu2 %7016, %v9175_v19   ;;  %v9320_v5 = vpop.permute.xlu1 %3543 }
 0x5bc   : > { %14206 = vst [vmem:[#allocation476_spill] sm:$0xff] %v9320_v5  ;;  %v9322_v18 = vpop.permute.xlu2 %3588  ;;  %v7146_v5 = vld [vmem:[%s7347_s29 + $0xd8] sm:$0xff] }
 0x5bd   : > { %14207 = vst [vmem:[#allocation477_spill] sm:$0xff] %v9322_v18  ;;  %782 = vperm.xlu0 %7042, %v7144_v7  }
 0x5be   : > { %v9325_v10 = vpop.permute.xlu0 %5128 }
 0x5bf   : > { %14208 = vst [vmem:[#allocation478_spill] sm:$0xff] %v9325_v10 }
 0x5c2   : > { %3809 = vperm.xlu1 %7017, %v9187_v27  }
 0x5c3   : > { %3813 = vperm.xlu2 %7016, %v9190_v20   ;;  %v9329_v11 = vpop.permute.xlu1 %3553 }
 0x5c4   : > { %14209 = vst [vmem:[#allocation479_spill] sm:$0xff] %v9329_v11  ;;  %v9331_v48 = vpop.permute.xlu2 %3603  ;;  %v7147_v11 = vld [vmem:[%s7347_s29 + $0xf8] sm:$0xff] }
 0x5c5   : > { %14210 = vst [vmem:[#allocation480_spill] sm:$0xff] %v9331_v48  ;;  %794 = vperm.xlu0 %7042, %v7145_v12  }
 0x5c6   : > { %v9334_v33 = vpop.permute.xlu0 %5140 }
 0x5c7   : > { %14211 = vst [vmem:[#allocation481_spill] sm:$0xff] %v9334_v33 }
 0x5ca   : > { %3821 = vperm.xlu1 %7017, %v9202_v26  }
 0x5cb   : > { %3825 = vperm.xlu2 %7016, %v9205_v25   ;;  %v9338_v7 = vpop.permute.xlu1 %3568 }
 0x5cc   : > { %14212 = vst [vmem:[#allocation482_spill] sm:$0xff] %v9338_v7  ;;  %v9340_v18 = vpop.permute.xlu2 %3618  ;;  %v7148_v7 = vld [vmem:[%s7347_s29 + $0x120] sm:$0xff] }
 0x5cd   : > { %14213 = vst [vmem:[#allocation483_spill] sm:$0xff] %v9340_v18  ;;  %806 = vperm.xlu0 %7042, %v7146_v5  }
 0x5ce   : > { %v9343_v10 = vpop.permute.xlu0 %5152 }
 0x5cf   : > { %14214 = vst [vmem:[#allocation484_spill] sm:$0xff] %v9343_v10 }
 0x5d2   : > { %3833 = vperm.xlu1 %7017, %v9217_v15  }
 0x5d3   : > { %3837 = vperm.xlu2 %7016, %v9220_v52   ;;  %v9347_v12 = vpop.permute.xlu1 %3583 }
 0x5d4   : > { %14215 = vst [vmem:[#allocation485_spill] sm:$0xff] %v9347_v12  ;;  %v9349_v48 = vpop.permute.xlu2 %3633 }
 0x5d5   : > { %14216 = vst [vmem:[#allocation486_spill] sm:$0xff] %v9349_v48  ;;  %818 = vperm.xlu0 %7042, %v7147_v11  }
 0x5d6   : > { %v9352_v33 = vpop.permute.xlu0 %5164 }
 0x5d7   : > { %14217 = vst [vmem:[#allocation487_spill] sm:$0xff] %v9352_v33  ;;  %v7149_v33 = vld [vmem:[%s7347_s29 + $0x140] sm:$0xff] }
 0x5da   : > { %3845 = vperm.xlu1 %7017, %v9232_v6  }
 0x5db   : > { %3849 = vperm.xlu2 %7016, %v9235_v17   ;;  %v9356_v5 = vpop.permute.xlu1 %3598 }
 0x5dc   : > { %14218 = vst [vmem:[#allocation488_spill] sm:$0xff] %v9356_v5  ;;  %v9358_v18 = vpop.permute.xlu2 %3648  ;;  %v7150_v5 = vld [vmem:[%s7347_s29 + $0x168] sm:$0xff] }
 0x5dd   : > { %14219 = vst [vmem:[#allocation489_spill] sm:$0xff] %v9358_v18  ;;  %830 = vperm.xlu0 %7042, %v7148_v7  }
 0x5de   : > { %v9361_v10 = vpop.permute.xlu0 %5691 }
 0x5df   : > { %14220 = vst [vmem:[#allocation490_spill] sm:$0xff] %v9361_v10 }
 0x5e2   : > { %3857 = vperm.xlu1 %7017, %v9247_v28  }
 0x5e3   : > { %3861 = vperm.xlu2 %7016, %v9250_v32   ;;  %v9365_v11 = vpop.permute.xlu1 %3613 }
 0x5e4   : > { %14221 = vst [vmem:[#allocation491_spill] sm:$0xff] %v9365_v11  ;;  %v9367_v12 = vpop.permute.xlu2 %3663  ;;  %v7151_v11 = vld [vmem:[%s7347_s29 + $0x9] sm:$0xff] }
 0x5e5   : > { %14222 = vst [vmem:[#allocation492_spill] sm:$0xff] %v9367_v12  ;;  %842 = vperm.xlu0 %7042, %v7149_v33   ;;  %v9572_v12 = vld [vmem:[%s7347_s29 + $0xf0] sm:$0xff] }
 0x5e6   : > { %v9370_v48 = vpop.permute.xlu0 %5711 }
 0x5e7   : > { %14223 = vst [vmem:[#allocation493_spill] sm:$0xff] %v9370_v48 }
 0x5ea   : > { %3869 = vperm.xlu1 %7017, %v9262_v62  }
 0x5eb   : > { %3873 = vperm.xlu2 %7016, %v9265_v56   ;;  %v9374_v7 = vpop.permute.xlu1 %3628 }
 0x5ec   : > { %14224 = vst [vmem:[#allocation494_spill] sm:$0xff] %v9374_v7  ;;  %v9376_v10 = vpop.permute.xlu2 %3678 }
 0x5ed   : > { %14225 = vst [vmem:[#allocation495_spill] sm:$0xff] %v9376_v10  ;;  %854 = vperm.xlu0 %7042, %v7150_v5   ;;  %v9560_v10 = vld [vmem:[%s7347_s29 + $0xd8] sm:$0xff] }
 0x5ee   : > { %v9379_v18 = vpop.permute.xlu0 %5723 }
 0x5ef   : > { %14226 = vst [vmem:[#allocation496_spill] sm:$0xff] %v9379_v18 }
 0x5f2   : > { %3881 = vperm.xlu1 %7017, %v9277_v44  }
 0x5f3   : > { %7018 = vset.pattern.permute.xlu2 %v13835_v40  ;;  %v9383_v33 = vpop.permute.xlu1 %3643 }
 0x5f4   : > { %14227 = vst [vmem:[#allocation497_spill] sm:$0xff] %v9383_v33  ;;  %3950 = vperm.xlu2 %7018, %v9113_v21   ;;  %v7152_v33 = vld [vmem:[%s7347_s29 + $0x49] sm:$0xff] }
 0x5f5   : > { %v9386_v48 = vpop.permute.xlu2 %3757  ;;  %1381 = vperm.xlu0 %7042, %v7151_v11  }
 0x5f6   : > { %14228 = vst [vmem:[#allocation498_spill] sm:$0xff] %v9386_v48  ;;  %v9389_v7 = vpop.permute.xlu0 %5735  ;;  %v9557_v48 = vld [vmem:[%s7347_s29 + $0xc8] sm:$0xff] }
 0x5f7   : > { %14229 = vst [vmem:[#allocation499_spill] sm:$0xff] %v9389_v7 }
 0x5fa   : > { %7019 = vset.pattern.permute.xlu1 %v13835_v40 }
 0x5fb   : > { %3958 = vperm.xlu1 %7019, %v9126_v2   ;;  %v9393_v5 = vpop.permute.xlu1 %3658  ;;  %v7153_v2 = vld [vmem:[%s7347_s29 + $0x69] sm:$0xff] }
 0x5fc   : > { %14230 = vst [vmem:[#allocation500_spill] sm:$0xff] %v9393_v5  ;;  %3962 = vperm.xlu2 %7018, %v9129_v34  }
 0x5fd   : > { %v9396_v18 = vpop.permute.xlu2 %3769  ;;  %1401 = vperm.xlu0 %7042, %v7152_v33  }
 0x5fe   : > { %14231 = vst [vmem:[#allocation501_spill] sm:$0xff] %v9396_v18  ;;  %v9399_v21 = vpop.permute.xlu0 %5747  ;;  %v9545_v18 = vld [vmem:[%s7347_s29 + $0xb0] sm:$0xff] }
 0x5ff   : > { %14232 = vst [vmem:[#allocation502_spill] sm:$0xff] %v9399_v21 }
 0x603   : > { %3966 = vperm.xlu1 %7019, %v9142_v8   ;;  %v9402_v11 = vpop.permute.xlu1 %3673  ;;  %v7154_v8 = vld [vmem:[%s7347_s29 + $0x91] sm:$0xff] }
 0x604   : > { %14233 = vst [vmem:[#allocation503_spill] sm:$0xff] %v9402_v11  ;;  %3970 = vperm.xlu2 %7018, %v9145_v29   ;;  %v9542_v11 = vld [vmem:[%s7347_s29 + $0xa8] sm:$0xff] }
 0x605   : > { %v9405_v7 = vpop.permute.xlu2 %3777  ;;  %1413 = vperm.xlu0 %7042, %v7153_v2  }
 0x606   : > { %14234 = vst [vmem:[#allocation504_spill] sm:$0xff] %v9405_v7  ;;  %v9408_v5 = vpop.permute.xlu0 %5759 }
 0x607   : > { %14235 = vst [vmem:[#allocation505_spill] sm:$0xff] %v9408_v5 }
 0x60b   : > { %3978 = vperm.xlu1 %7019, %v9157_v31   ;;  %v9411_v34 = vpop.permute.xlu1 %3688  ;;  %v7155_v31 = vld [vmem:[%s7347_s29 + $0xb1] sm:$0xff] }
 0x60c   : > { %14236 = vst [vmem:[#allocation506_spill] sm:$0xff] %v9411_v34  ;;  %3982 = vperm.xlu2 %7018, %v9160_v24   ;;  %v9530_v34 = vld [vmem:[%s7347_s29 + $0x90] sm:$0xff] }
 0x60d   : > { %v9414_v33 = vpop.permute.xlu2 %3789  ;;  %1425 = vperm.xlu0 %7042, %v7154_v8  }
 0x60e   : > { %14237 = vst [vmem:[#allocation507_spill] sm:$0xff] %v9414_v33  ;;  %v9417_v21 = vpop.permute.xlu0 %5787  ;;  %v9527_v33 = vld [vmem:[%s7347_s29 + $0x80] sm:$0xff] }
 0x60f   : > { %14238 = vst [vmem:[#allocation508_spill] sm:$0xff] %v9417_v21 }
 0x613   : > { %3990 = vperm.xlu1 %7019, %v9172_v9   ;;  %v7156_v9 = vld [vmem:[%s7347_s29 + $0xd9] sm:$0xff] }
 0x614   : > { %3994 = vperm.xlu2 %7018, %v9175_v19   ;;  %v9421_v29 = vpop.permute.xlu1 %3765 }
 0x615   : > { %14239 = vst [vmem:[#allocation509_spill] sm:$0xff] %v9421_v29  ;;  %v9423_v2 = vpop.permute.xlu2 %3801  ;;  %1437 = vperm.xlu0 %7042, %v7155_v31  }
 0x616   : > { %14240 = vst [vmem:[#allocation510_spill] sm:$0xff] %v9423_v2  ;;  %v9515_v2 = vld [vmem:[%s7347_s29 + $0x68] sm:$0xff] }
 0x617   : > { %v9426_v5 = vpop.permute.xlu0 %738 }
 0x618   : > { %14241 = vst [vmem:[#allocation511_spill] sm:$0xff] %v9426_v5  ;;  %v9605_v5 = vld [vmem:[%s7347_s29 + $0x140] sm:$0xff] }
 0x61b   : > { %4002 = vperm.xlu1 %7019, %v9187_v27   ;;  %v7157_v27 = vld [vmem:[%s7347_s29 + $0xf9] sm:$0xff] }
 0x61c   : > { %4006 = vperm.xlu2 %7018, %v9190_v20   ;;  %v9430_v24 = vpop.permute.xlu1 %3773 }
 0x61d   : > { %14242 = vst [vmem:[#allocation512_spill] sm:$0xff] %v9430_v24  ;;  %v9432_v8 = vpop.permute.xlu2 %3813  ;;  %1449 = vperm.xlu0 %7042, %v7156_v9   ;;  %v9512_v24 = vld [vmem:[%s7347_s29 + $0x60] sm:$0xff] }
 0x61e   : > { %14243 = vst [vmem:[#allocation513_spill] sm:$0xff] %v9432_v8 }
 0x61f   : > { %v9435_v19 = vpop.permute.xlu0 %758 }
 0x620   : > { %14244 = vst [vmem:[#allocation514_spill] sm:$0xff] %v9435_v19  ;;  %v7169_v19 = vld [vmem:[%s7347_s29 + $0x142] sm:$0xff] }
 0x623   : > { %4014 = vperm.xlu1 %7019, %v9202_v26   ;;  %v7158_v26 = vld [vmem:[%s7347_s29 + $0x121] sm:$0xff] }
 0x624   : > { %4018 = vperm.xlu2 %7018, %v9205_v25   ;;  %v9439_v31 = vpop.permute.xlu1 %3785 }
 0x625   : > { %14245 = vst [vmem:[#allocation515_spill] sm:$0xff] %v9439_v31  ;;  %v9441_v21 = vpop.permute.xlu2 %3825  ;;  %1461 = vperm.xlu0 %7042, %v7157_v27   ;;  %v9499_v31 = vld [vmem:[%s7347_s29 + $0x50] sm:$0xff] }
 0x626   : > { %14246 = vst [vmem:[#allocation516_spill] sm:$0xff] %v9441_v21 }
 0x627   : > { %v9444_v20 = vpop.permute.xlu0 %770 }
 0x62b   : > { %4026 = vperm.xlu1 %7019, %v9217_v15   ;;  %v7159_v15 = vld [vmem:[%s7347_s29 + $0x141] sm:$0xff] }
 0x62c   : > { %4030 = vperm.xlu2 %7018, %v9220_v52   ;;  %v9448_v9 = vpop.permute.xlu1 %3797 }
 0x62d   : > { %14247 = vst [vmem:[#allocation517_spill] sm:$0xff] %v9448_v9  ;;  %v9450_v8 = vpop.permute.xlu2 %3837  ;;  %1473 = vperm.xlu0 %7042, %v7158_v26  }
 0x62e   : > { %14248 = vst [vmem:[#allocation518_spill] sm:$0xff] %v9450_v8  ;;  %v7168_v8 = vld [vmem:[%s7347_s29 + $0x122] sm:$0xff] }
 0x62f   : > { %v9453_v25 = vpop.permute.xlu0 %782 }
 0x633   : > { %4038 = vperm.xlu1 %7019, %v9232_v6  }
 0x634   : > { %4042 = vperm.xlu2 %7018, %v9235_v17   ;;  %v9457_v27 = vpop.permute.xlu1 %3809  ;;  %v7160_v17 = vld [vmem:[%s7347_s29 + $0x169] sm:$0xff] }
 0x635   : > { %14249 = vst [vmem:[#allocation519_spill] sm:$0xff] %v9457_v27  ;;  %v9459_v21 = vpop.permute.xlu2 %3849  ;;  %1485 = vperm.xlu0 %7042, %v7159_v15   ;;  %v9483_v27 = vld [vmem:[%s7347_s29 + $0x30] sm:$0xff] }
 0x636   : > { %14250 = vst [vmem:[#allocation520_spill] sm:$0xff] %v9459_v21  ;;  %v9575_v21 = vld [vmem:[%s7347_s29 + $0xf8] sm:$0xff] }
 0x637   : > { %v9462_v52 = vpop.permute.xlu0 %794 }
 0x63b   : > { %4050 = vperm.xlu1 %7019, %v9247_v28  }
 0x63c   : > { %4054 = vperm.xlu2 %7018, %v9250_v32   ;;  %v9466_v26 = vpop.permute.xlu1 %3821  ;;  %v7161_v32 = vld [vmem:[%s7347_s29 + $0xa] sm:$0xff] }
 0x63d   : > { %14251 = vst [vmem:[#allocation521_spill] sm:$0xff] %v9466_v26  ;;  %v9468_v9 = vpop.permute.xlu2 %3861  ;;  %1497 = vperm.xlu0 %7042, %v7160_v17  }
 0x63e   : > { %14252 = vst [vmem:[#allocation522_spill] sm:$0xff] %v9468_v9  ;;  %v7167_v9 = vld [vmem:[%s7347_s29 + $0xfa] sm:$0xff] }
 0x63f   : > { %v9471_v6 = vpop.permute.xlu0 %806 }
 0x640   : > { %14253 = vst [vmem:[#allocation523_spill] sm:$0xff] %v9471_v6  ;;  %v7175_v6 = vld [vmem:[%s7347_s29 + $0xc8] sm:$0xff] }
 0x643   : > { %4062 = vperm.xlu1 %7019, %v9262_v62  }
 0x644   : > { %4066 = vperm.xlu2 %7018, %v9265_v56   ;;  %v9475_v15 = vpop.permute.xlu1 %3833  ;;  %v7162_v56 = vld [vmem:[%s7347_s29 + $0x4a] sm:$0xff] }
 0x645   : > { %14254 = vst [vmem:[#allocation524_spill] sm:$0xff] %v9475_v15  ;;  %v9477_v28 = vpop.permute.xlu2 %3873  ;;  %2024 = vperm.xlu0 %7042, %v7161_v32   ;;  %v9496_v15 = vld [vmem:[%s7347_s29 + $0x48] sm:$0xff] }
 0x646   : > { %14255 = vst [vmem:[#allocation525_spill] sm:$0xff] %v9477_v28 }
 0x647   : > { %v9480_v26 = vpop.permute.xlu0 %818 }
 0x648   : > { %14256 = vst [vmem:[#allocation526_spill] sm:$0xff] %v9480_v26  ;;  %v9620_v26 = vld [vmem:[%s7347_s29 + $0x168] sm:$0xff] }
 0x64b   : > { %4074 = vperm.xlu1 %7019, %v9277_v44  }
 0x64c   : > { %7020 = vset.pattern.permute.xlu2 %v13766_v23  ;;  %v9487_v62 = vpop.permute.xlu1 %3845 }
 0x64d   : > { %14257 = vst [vmem:[#allocation527_spill] sm:$0xff] %v9487_v62  ;;  %4177 = vperm.xlu2 %7020, %v9483_v27   ;;  %2044 = vperm.xlu0 %7042, %v7162_v56   ;;  %v7163_v56 = vld [vmem:[%s7347_s29 + $0x6a] sm:$0xff] }
 0x64e   : > { %v9491_v17 = vpop.permute.xlu2 %3950 }
 0x64f   : > { %14258 = vst [vmem:[#allocation528_spill] sm:$0xff] %v9491_v17  ;;  %v9493_v32 = vpop.permute.xlu0 %830 }
 0x650   : > { %14259 = vst [vmem:[#allocation529_spill] sm:$0xff] %v9493_v32  ;;  %v9617_v32 = vld [vmem:[%s7347_s29 + $0x158] sm:$0xff] }
 0x653   : > { %7021 = vset.pattern.permute.xlu1 %v13766_v23 }
 0x654   : > { %4187 = vperm.xlu1 %7021, %v9496_v15   ;;  %v9503_v44 = vpop.permute.xlu1 %3857 }
 0x655   : > { %14260 = vst [vmem:[#allocation530_spill] sm:$0xff] %v9503_v44  ;;  %4192 = vperm.xlu2 %7020, %v9499_v31   ;;  %2056 = vperm.xlu0 %7042, %v7163_v56   ;;  %v7164_v44 = vld [vmem:[%s7347_s29 + $0x92] sm:$0xff] }
 0x656   : > { %v9507_v17 = vpop.permute.xlu2 %3962 }
 0x657   : > { %14261 = vst [vmem:[#allocation531_spill] sm:$0xff] %v9507_v17  ;;  %v9509_v62 = vpop.permute.xlu0 %842 }
 0x658   : > { %14262 = vst [vmem:[#allocation532_spill] sm:$0xff] %v9509_v62  ;;  %v7170_v62 = vld [vmem:[%s7347_s29 + $0x16a] sm:$0xff] }
 0x65c   : > { %4197 = vperm.xlu1 %7021, %v9512_v24   ;;  %v9518_v29 = vpop.permute.xlu1 %3869 }
 0x65d   : > { %14263 = vst [vmem:[#allocation533_spill] sm:$0xff] %v9518_v29  ;;  %4202 = vperm.xlu2 %7020, %v9515_v2   ;;  %2068 = vperm.xlu0 %7042, %v7164_v44   ;;  %v7165_v29 = vld [vmem:[%s7347_s29 + $0xb2] sm:$0xff] }
 0x65e   : > { %v9522_v56 = vpop.permute.xlu2 %3970 }
 0x65f   : > { %14264 = vst [vmem:[#allocation534_spill] sm:$0xff] %v9522_v56  ;;  %v9524_v17 = vpop.permute.xlu0 %854 }
 0x660   : > { %14265 = vst [vmem:[#allocation535_spill] sm:$0xff] %v9524_v17  ;;  %v9602_v17 = vld [vmem:[%s7347_s29 + $0x138] sm:$0xff] }
 0x664   : > { %4212 = vperm.xlu1 %7021, %v9527_v33   ;;  %v9533_v7 = vpop.permute.xlu1 %3881 }
 0x665   : > { %14266 = vst [vmem:[#allocation536_spill] sm:$0xff] %v9533_v7  ;;  %4217 = vperm.xlu2 %7020, %v9530_v34   ;;  %2080 = vperm.xlu0 %7042, %v7165_v29   ;;  %v7166_v7 = vld [vmem:[%s7347_s29 + $0xda] sm:$0xff] }
 0x666   : > { %v9537_v44 = vpop.permute.xlu2 %3982 }
 0x667   : > { %14267 = vst [vmem:[#allocation537_spill] sm:$0xff] %v9537_v44  ;;  %v9539_v56 = vpop.permute.xlu0 %1381 }
 0x668   : > { %14268 = vst [vmem:[#allocation538_spill] sm:$0xff] %v9539_v56  ;;  %v9590_v56 = vld [vmem:[%s7347_s29 + $0x120] sm:$0xff] }
 0x66c   : > { %4227 = vperm.xlu1 %7021, %v9542_v11  }
 0x66d   : > { %4232 = vperm.xlu2 %7020, %v9545_v18   ;;  %2092 = vperm.xlu0 %7042, %v7166_v7   ;;  %v9550_v28 = vpop.permute.xlu1 %3958 }
 0x66e   : > { %14269 = vst [vmem:[#allocation539_spill] sm:$0xff] %v9550_v28  ;;  %v9552_v29 = vpop.permute.xlu2 %3994 }
 0x66f   : > { %14270 = vst [vmem:[#allocation540_spill] sm:$0xff] %v9552_v29  ;;  %v9554_v44 = vpop.permute.xlu0 %1401 }
 0x670   : > { %14271 = vst [vmem:[#allocation541_spill] sm:$0xff] %v9554_v44  ;;  %v9587_v44 = vld [vmem:[%s7347_s29 + $0x110] sm:$0xff] }
 0x674   : > { %4242 = vperm.xlu1 %7021, %v9557_v48  }
 0x675   : > { %4247 = vperm.xlu2 %7020, %v9560_v10   ;;  %2104 = vperm.xlu0 %7042, %v7167_v9   ;;  %v9565_v7 = vpop.permute.xlu1 %3966 }
 0x676   : > { %14272 = vst [vmem:[#allocation542_spill] sm:$0xff] %v9565_v7  ;;  %v9567_v28 = vpop.permute.xlu2 %4006 }
 0x677   : > { %14273 = vst [vmem:[#allocation543_spill] sm:$0xff] %v9567_v28  ;;  %v9569_v29 = vpop.permute.xlu0 %1413 }
 0x67c   : > { %4257 = vperm.xlu1 %7021, %v9572_v12  }
 0x67d   : > { %4262 = vperm.xlu2 %7020, %v9575_v21   ;;  %2116 = vperm.xlu0 %7042, %v7168_v8   ;;  %v9580_v9 = vpop.permute.xlu1 %3978 }
 0x67e   : > { %14274 = vst [vmem:[#allocation544_spill] sm:$0xff] %v9580_v9  ;;  %v9582_v7 = vpop.permute.xlu2 %4018 }
 0x67f   : > { %14275 = vst [vmem:[#allocation545_spill] sm:$0xff] %v9582_v7  ;;  %v9584_v28 = vpop.permute.xlu0 %1425 }
 0x684   : > { %4272 = vperm.xlu1 %7021, %v9587_v44  }
 0x685   : > { %4277 = vperm.xlu2 %7020, %v9590_v56   ;;  %2128 = vperm.xlu0 %7042, %v7169_v19   ;;  %v9595_v8 = vpop.permute.xlu1 %3990 }
 0x686   : > { %14276 = vst [vmem:[#allocation546_spill] sm:$0xff] %v9595_v8  ;;  %v9597_v9 = vpop.permute.xlu2 %4030 }
 0x687   : > { %14277 = vst [vmem:[#allocation547_spill] sm:$0xff] %v9597_v9  ;;  %v9599_v7 = vpop.permute.xlu0 %1437 }
 0x688   : > { %14278 = vst [vmem:[#allocation548_spill] sm:$0xff] %v9599_v7 }
 0x68c   : > { %4287 = vperm.xlu1 %7021, %v9602_v17  }
 0x68d   : > { %4292 = vperm.xlu2 %7020, %v9605_v5   ;;  %2140 = vperm.xlu0 %7042, %v7170_v62   ;;  %v9610_v19 = vpop.permute.xlu1 %4002 }
 0x68e   : > { %14279 = vst [vmem:[#allocation549_spill] sm:$0xff] %v9610_v19  ;;  %v9612_v8 = vpop.permute.xlu2 %4042 }
 0x68f   : > { %14280 = vst [vmem:[#allocation550_spill] sm:$0xff] %v9612_v8  ;;  %v9614_v9 = vpop.permute.xlu0 %1449  ;;  %v9632_v8 = vld [vmem:[%s7347_s29 + $0x180] sm:$0xff] }
 0x690   : > { %14281 = vst [vmem:[#allocation551_spill] sm:$0xff] %v9614_v9  ;;  %v9635_v9 = vld [vmem:[%s7347_s29 + $0x188] sm:$0xff] }
 0x694   : > { %4302 = vperm.xlu1 %7021, %v9617_v32  }
 0x695   : > { %4307 = vperm.xlu2 %7020, %v9620_v26   ;;  %2668 = vperm.xlu0 %7042, %v7171_v4   ;;  %v9625_v62 = vpop.permute.xlu1 %4014 }
 0x696   : > { %14282 = vst [vmem:[#allocation552_spill] sm:$0xff] %v9625_v62  ;;  %v9627_v19 = vpop.permute.xlu2 %4054 }
 0x697   : > { %14283 = vst [vmem:[#allocation553_spill] sm:$0xff] %v9627_v19  ;;  %v9629_v3 = vpop.permute.xlu0 %1461  ;;  %v9647_v19 = vld [vmem:[%s7347_s29 + $0x1a0] sm:$0xff] }
 0x698   : > { %14284 = vst [vmem:[#allocation554_spill] sm:$0xff] %v9629_v3  ;;  %v7173_v3 = vld [vmem:[%s7347_s29 + $0x80] sm:$0xff] }
 0x69c   : > { %4317 = vperm.xlu1 %7021, %v9632_v8  }
 0x69d   : > { %4322 = vperm.xlu2 %7020, %v9635_v9   ;;  %2688 = vperm.xlu0 %7042, %v7172_v14   ;;  %v9640_v7 = vpop.permute.xlu1 %4026 }
 0x69e   : > { %14285 = vst [vmem:[#allocation555_spill] sm:$0xff] %v9640_v7  ;;  %v9642_v4 = vpop.permute.xlu2 %4066 }
 0x69f   : > { %14286 = vst [vmem:[#allocation556_spill] sm:$0xff] %v9642_v4  ;;  %v9644_v62 = vpop.permute.xlu0 %1473  ;;  %v7174_v4 = vld [vmem:[%s7347_s29 + $0xa8] sm:$0xff] }
 0x6a0   : > { %14287 = vst [vmem:[#allocation557_spill] sm:$0xff] %v9644_v62 }
 0x6a4   : > { %4332 = vperm.xlu1 %7021, %v9647_v19  }
 0x6a5   : > { %7022 = vset.pattern.permute.xlu2 %v13801_v60  ;;  %2700 = vperm.xlu0 %7042, %v7173_v3   ;;  %v9652_v1 = vpop.permute.xlu1 %4038 }
 0x6a6   : > { %14288 = vst [vmem:[#allocation558_spill] sm:$0xff] %v9652_v1  ;;  %4401 = vperm.xlu2 %7022, %v9483_v27  }
 0x6a7   : > { %v9655_v14 = vpop.permute.xlu2 %4177  ;;  %v9657_v7 = vpop.permute.xlu0 %1485 }
 0x6a8   : > { %14289 = vst [vmem:[#allocation559_spill] sm:$0xff] %v9655_v14 }
 0x6a9   : > { %14290 = vst [vmem:[#allocation560_spill] sm:$0xff] %v9657_v7 }
 0x6ac   : > { %7023 = vset.pattern.permute.xlu1 %v13801_v60  ;;  %v7179_v60 = vld [vmem:[%s7347_s29 + $0x158] sm:$0xff] }
 0x6ad   : > { %2712 = vperm.xlu0 %7042, %v7174_v4   ;;  %4409 = vperm.xlu1 %7023, %v9496_v15   ;;  %v9662_v62 = vpop.permute.xlu1 %4050 }
 0x6ae   : > { %14291 = vst [vmem:[#allocation561_spill] sm:$0xff] %v9662_v62  ;;  %4413 = vperm.xlu2 %7022, %v9499_v31   ;;  %v7176_v62 = vld [vmem:[%s7347_s29 + $0xf0] sm:$0xff] }
 0x6af   : > { %v9665_v3 = vpop.permute.xlu2 %4192  ;;  %v9667_v1 = vpop.permute.xlu0 %1497 }
 0x6b0   : > { %14292 = vst [vmem:[#allocation562_spill] sm:$0xff] %v9665_v3 }
 0x6b1   : > { %14293 = vst [vmem:[#allocation563_spill] sm:$0xff] %v9667_v1 }
 0x6b5   : > { %2724 = vperm.xlu0 %7042, %v7175_v6   ;;  %4417 = vperm.xlu1 %7023, %v9512_v24   ;;  %v9671_v14 = vpop.permute.xlu1 %4062 }
 0x6b6   : > { %14294 = vst [vmem:[#allocation564_spill] sm:$0xff] %v9671_v14  ;;  %4421 = vperm.xlu2 %7022, %v9515_v2   ;;  %v7177_v14 = vld [vmem:[%s7347_s29 + $0x110] sm:$0xff] }
 0x6b7   : > { %v9674_v4 = vpop.permute.xlu2 %4202  ;;  %v9676_v7 = vpop.permute.xlu0 %2024 }
 0x6b8   : > { %14295 = vst [vmem:[#allocation565_spill] sm:$0xff] %v9674_v4 }
 0x6b9   : > { %14296 = vst [vmem:[#allocation566_spill] sm:$0xff] %v9676_v7 }
 0x6bd   : > { %2736 = vperm.xlu0 %7042, %v7176_v62   ;;  %4429 = vperm.xlu1 %7023, %v9527_v33   ;;  %v9680_v3 = vpop.permute.xlu1 %4074 }
 0x6be   : > { %14297 = vst [vmem:[#allocation567_spill] sm:$0xff] %v9680_v3  ;;  %4433 = vperm.xlu2 %7022, %v9530_v34   ;;  %v7178_v3 = vld [vmem:[%s7347_s29 + $0x138] sm:$0xff] }
 0x6bf   : > { %v9683_v6 = vpop.permute.xlu2 %4217  ;;  %v9685_v1 = vpop.permute.xlu0 %2044 }
 0x6c0   : > { %14298 = vst [vmem:[#allocation568_spill] sm:$0xff] %v9683_v6 }
 0x6c1   : > { %14299 = vst [vmem:[#allocation569_spill] sm:$0xff] %v9685_v1 }
 0x6c5   : > { %2748 = vperm.xlu0 %7042, %v7177_v14   ;;  %4441 = vperm.xlu1 %7023, %v9542_v11  }
 0x6c6   : > { %4445 = vperm.xlu2 %7022, %v9545_v18   ;;  %v9690_v4 = vpop.permute.xlu1 %4187 }
 0x6c7   : > { %14300 = vst [vmem:[#allocation570_spill] sm:$0xff] %v9690_v4  ;;  %v9692_v62 = vpop.permute.xlu2 %4232  ;;  %v9694_v7 = vpop.permute.xlu0 %2056 }
 0x6c8   : > { %14301 = vst [vmem:[#allocation571_spill] sm:$0xff] %v9692_v62 }
 0x6cd   : > { %2760 = vperm.xlu0 %7042, %v7178_v3   ;;  %4453 = vperm.xlu1 %7023, %v9557_v48  }
 0x6ce   : > { %4457 = vperm.xlu2 %7022, %v9560_v10   ;;  %v9699_v6 = vpop.permute.xlu1 %4197 }
 0x6cf   : > { %14302 = vst [vmem:[#allocation572_spill] sm:$0xff] %v9699_v6  ;;  %v9701_v14 = vpop.permute.xlu2 %4247  ;;  %v9703_v1 = vpop.permute.xlu0 %2068 }
 0x6d0   : > { %14303 = vst [vmem:[#allocation573_spill] sm:$0xff] %v9701_v14 }
 0x6d1   : > { %14304 = vst [vmem:[#allocation574_spill] sm:$0xff] %v9703_v1  ;;  %v7181_v1 = vld [vmem:[%s7347_s29 + $0x21] sm:$0xff] }
 0x6d5   : > { %2772 = vperm.xlu0 %7042, %v7179_v60   ;;  %4465 = vperm.xlu1 %7023, %v9572_v12  }
 0x6d6   : > { %4469 = vperm.xlu2 %7022, %v9575_v21   ;;  %v9708_v62 = vpop.permute.xlu1 %4212 }
 0x6d7   : > { %14305 = vst [vmem:[#allocation575_spill] sm:$0xff] %v9708_v62  ;;  %v9710_v3 = vpop.permute.xlu2 %4262  ;;  %v9712_v4 = vpop.permute.xlu0 %2080 }
 0x6d8   : > { %14306 = vst [vmem:[#allocation576_spill] sm:$0xff] %v9710_v3 }
 0x6d9   : > { %14307 = vst [vmem:[#allocation577_spill] sm:$0xff] %v9712_v4  ;;  %v7182_v4 = vld [vmem:[%s7347_s29 + $0x61] sm:$0xff] }
 0x6dd   : > { %2784 = vperm.xlu0 %7042, %v7180_v16   ;;  %4477 = vperm.xlu1 %7023, %v9587_v44  }
 0x6de   : > { %4481 = vperm.xlu2 %7022, %v9590_v56   ;;  %v9717_v14 = vpop.permute.xlu1 %4227 }
 0x6df   : > { %14308 = vst [vmem:[#allocation578_spill] sm:$0xff] %v9717_v14  ;;  %v9719_v60 = vpop.permute.xlu2 %4277  ;;  %v9721_v6 = vpop.permute.xlu0 %2092 }
 0x6e0   : > { %14309 = vst [vmem:[#allocation579_spill] sm:$0xff] %v9719_v60 }
 0x6e1   : > { %14310 = vst [vmem:[#allocation580_spill] sm:$0xff] %v9721_v6  ;;  %v7183_v6 = vld [vmem:[%s7347_s29 + $0x81] sm:$0xff] }
 0x6e5   : > { %3311 = vperm.xlu0 %7042, %v7181_v1   ;;  %4489 = vperm.xlu1 %7023, %v9602_v17  }
 0x6e6   : > { %4493 = vperm.xlu2 %7022, %v9605_v5   ;;  %v9726_v3 = vpop.permute.xlu1 %4242 }
 0x6e7   : > { %14311 = vst [vmem:[#allocation581_spill] sm:$0xff] %v9726_v3  ;;  %v9728_v16 = vpop.permute.xlu2 %4292  ;;  %v9730_v62 = vpop.permute.xlu0 %2104 }
 0x6e8   : > { %14312 = vst [vmem:[#allocation582_spill] sm:$0xff] %v9728_v16 }
 0x6e9   : > { %14313 = vst [vmem:[#allocation583_spill] sm:$0xff] %v9730_v62  ;;  %v7184_v62 = vld [vmem:[%s7347_s29 + $0xa9] sm:$0xff] }
 0x6ed   : > { %3331 = vperm.xlu0 %7042, %v7182_v4   ;;  %4501 = vperm.xlu1 %7023, %v9617_v32  }
 0x6ee   : > { %4505 = vperm.xlu2 %7022, %v9620_v26   ;;  %v9735_v14 = vpop.permute.xlu1 %4257 }
 0x6ef   : > { %14314 = vst [vmem:[#allocation584_spill] sm:$0xff] %v9735_v14  ;;  %v9737_v1 = vpop.permute.xlu2 %4307  ;;  %v9739_v60 = vpop.permute.xlu0 %2116 }
 0x6f0   : > { %14315 = vst [vmem:[#allocation585_spill] sm:$0xff] %v9737_v1 }
 0x6f1   : > { %14316 = vst [vmem:[#allocation586_spill] sm:$0xff] %v9739_v60  ;;  %v7201_v60 = vld [vmem:[%s7347_s29 + $0x38] sm:$0xff] }
 0x6f5   : > { %3343 = vperm.xlu0 %7042, %v7183_v6   ;;  %4513 = vperm.xlu1 %7023, %v9632_v8  }
 0x6f6   : > { %4517 = vperm.xlu2 %7022, %v9635_v9   ;;  %v9744_v3 = vpop.permute.xlu1 %4272 }
 0x6f7   : > { %14317 = vst [vmem:[#allocation587_spill] sm:$0xff] %v9744_v3  ;;  %v9746_v4 = vpop.permute.xlu2 %4322  ;;  %v9748_v16 = vpop.permute.xlu0 %2128  ;;  %v7185_v3 = vld [vmem:[%s7347_s29 + $0xc9] sm:$0xff] }
 0x6f8   : > { %14318 = vst [vmem:[#allocation588_spill] sm:$0xff] %v9746_v4 }
 0x6f9   : > { %14319 = vst [vmem:[#allocation589_spill] sm:$0xff] %v9748_v16 }
 0x6fd   : > { %3355 = vperm.xlu0 %7042, %v7184_v62   ;;  %4525 = vperm.xlu1 %7023, %v9647_v19  }
 0x6fe   : > { %7024 = vset.pattern.permute.xlu2 %v13835_v40  ;;  %v9753_v14 = vpop.permute.xlu1 %4287 }
 0x6ff   : > { %14320 = vst [vmem:[#allocation590_spill] sm:$0xff] %v9753_v14  ;;  %4594 = vperm.xlu2 %7024, %v9483_v27   ;;  %v9756_v6 = vpop.permute.xlu0 %2140  ;;  %v7186_v27 = vld [vmem:[%s7347_s29 + $0xf1] sm:$0xff] }
 0x700   : > { %14321 = vst [vmem:[#allocation591_spill] sm:$0xff] %v9756_v6  ;;  %v9758_v1 = vpop.permute.xlu2 %4401  ;;  %v14384_v6 = vld [vmem:[#allocation11_spill] sm:$0xff] }
 0x701   : > { %14322 = vst [vmem:[#allocation592_spill] sm:$0xff] %v9758_v1 }
 0x705   : > { %3367 = vperm.xlu0 %7042, %v7185_v3   ;;  %7025 = vset.pattern.permute.xlu1 %v13835_v40  ;;  %v9934_v40 = vld [vmem:[%s7347_s29 + $0xc9] sm:$0xff] }
 0x706   : > { %4602 = vperm.xlu1 %7025, %v9496_v15   ;;  %v9763_v62 = vpop.permute.xlu1 %4302  ;;  %14374 = vst [vmem:[#allocation644_spill] sm:$0xff] %v9934_v40 }
 0x707   : > { %14323 = vst [vmem:[#allocation593_spill] sm:$0xff] %v9763_v62  ;;  %4606 = vperm.xlu2 %7024, %v9499_v31   ;;  %v9766_v4 = vpop.permute.xlu0 %2668  ;;  %v7187_v62 = vld [vmem:[%s7347_s29 + $0x111] sm:$0xff] }
 0x708   : > { %14324 = vst [vmem:[#allocation594_spill] sm:$0xff] %v9766_v4  ;;  %v9768_v14 = vpop.permute.xlu2 %4413 }
 0x709   : > { %14325 = vst [vmem:[#allocation595_spill] sm:$0xff] %v9768_v14 }
 0x70d   : > { %3379 = vperm.xlu0 %7042, %v7186_v27  }
 0x70e   : > { %4610 = vperm.xlu1 %7025, %v9512_v24   ;;  %v9772_v1 = vpop.permute.xlu1 %4317 }
 0x70f   : > { %14326 = vst [vmem:[#allocation596_spill] sm:$0xff] %v9772_v1  ;;  %4614 = vperm.xlu2 %7024, %v9515_v2   ;;  %v9775_v3 = vpop.permute.xlu0 %2688  ;;  %v7188_v1 = vld [vmem:[%s7347_s29 + $0x139] sm:$0xff] }
 0x710   : > { %14327 = vst [vmem:[#allocation597_spill] sm:$0xff] %v9775_v3  ;;  %v9777_v15 = vpop.permute.xlu2 %4421 }
 0x711   : > { %14328 = vst [vmem:[#allocation598_spill] sm:$0xff] %v9777_v15  ;;  %v9885_v15 = vld [vmem:[%s7347_s29 + $0x69] sm:$0xff] }
 0x712   : > { %14361 = vst [vmem:[#allocation631_spill] sm:$0xff] %v9885_v15 }
 0x715   : > { %3391 = vperm.xlu0 %7042, %v7187_v62  }
 0x716   : > { %4622 = vperm.xlu1 %7025, %v9527_v33   ;;  %v9781_v31 = vpop.permute.xlu1 %4332 }
 0x717   : > { %14329 = vst [vmem:[#allocation599_spill] sm:$0xff] %v9781_v31  ;;  %4626 = vperm.xlu2 %7024, %v9530_v34   ;;  %v9784_v27 = vpop.permute.xlu0 %2700  ;;  %v7189_v31 = vld [vmem:[%s7347_s29 + $0x159] sm:$0xff] }
 0x718   : > { %v9786_v24 = vpop.permute.xlu2 %4433 }
 0x719   : > { %14330 = vst [vmem:[#allocation600_spill] sm:$0xff] %v9786_v24  ;;  %v9881_v24 = vld [vmem:[%s7347_s29 + $0x61] sm:$0xff] }
 0x71a   : > { %14360 = vst [vmem:[#allocation630_spill] sm:$0xff] %v9881_v24 }
 0x71d   : > { %3403 = vperm.xlu0 %7042, %v7188_v1  }
 0x71e   : > { %4634 = vperm.xlu1 %7025, %v9542_v11  }
 0x71f   : > { %4638 = vperm.xlu2 %7024, %v9545_v18   ;;  %v9791_v2 = vpop.permute.xlu0 %2712  ;;  %v9793_v62 = vpop.permute.xlu1 %4409  ;;  %v7190_v18 = vld [vmem:[%s7347_s29 + $0x181] sm:$0xff] }
 0x720   : > { %14331 = vst [vmem:[#allocation601_spill] sm:$0xff] %v9793_v62  ;;  %v9795_v33 = vpop.permute.xlu2 %4445 }
 0x721   : > { %14332 = vst [vmem:[#allocation602_spill] sm:$0xff] %v9795_v33 }
 0x725   : > { %3415 = vperm.xlu0 %7042, %v7189_v31  }
 0x726   : > { %4646 = vperm.xlu1 %7025, %v9557_v48  }
 0x727   : > { %4650 = vperm.xlu2 %7024, %v9560_v10   ;;  %v9800_v34 = vpop.permute.xlu0 %2724  ;;  %v9802_v1 = vpop.permute.xlu1 %4417  ;;  %v7191_v10 = vld [vmem:[%s7347_s29 + $0x22] sm:$0xff] }
 0x728   : > { %14333 = vst [vmem:[#allocation603_spill] sm:$0xff] %v9800_v34  ;;  %v9804_v11 = vpop.permute.xlu2 %4457  ;;  %v14399_v34 = vld [vmem:[#allocation22_spill] sm:$0xff] }
 0x729   : > { %14334 = vst [vmem:[#allocation604_spill] sm:$0xff] %v9802_v1 }
 0x72a   : > { %14335 = vst [vmem:[#allocation605_spill] sm:$0xff] %v9804_v11 }
 0x72d   : > { %3427 = vperm.xlu0 %7042, %v7190_v18  }
 0x72e   : > { %4658 = vperm.xlu1 %7025, %v9572_v12  }
 0x72f   : > { %4662 = vperm.xlu2 %7024, %v9575_v21   ;;  %v9809_v33 = vpop.permute.xlu0 %2736  ;;  %v9811_v31 = vpop.permute.xlu1 %4429  ;;  %v7192_v21 = vld [vmem:[%s7347_s29 + $0x62] sm:$0xff] }
 0x730   : > { %14336 = vst [vmem:[#allocation606_spill] sm:$0xff] %v9809_v33  ;;  %v9813_v48 = vpop.permute.xlu2 %4469  ;;  %v14395_v33 = vld [vmem:[#allocation20_spill] sm:$0xff] }
 0x731   : > { %14337 = vst [vmem:[#allocation607_spill] sm:$0xff] %v9811_v31  ;;  %v9869_v31 = vld [vmem:[%s7347_s29 + $0x51] sm:$0xff] }
 0x732   : > { %14338 = vst [vmem:[#allocation608_spill] sm:$0xff] %v9813_v48 }
 0x733   : > { %14356 = vst [vmem:[#allocation626_spill] sm:$0xff] %v9869_v31 }
 0x735   : > { %3954 = vperm.xlu0 %7042, %v7191_v10  }
 0x736   : > { %4670 = vperm.xlu1 %7025, %v9587_v44  }
 0x737   : > { %4674 = vperm.xlu2 %7024, %v9590_v56   ;;  %v9818_v11 = vpop.permute.xlu0 %2748  ;;  %v9820_v18 = vpop.permute.xlu1 %4441  ;;  %v7193_v56 = vld [vmem:[%s7347_s29 + $0x82] sm:$0xff] }
 0x738   : > { %14339 = vst [vmem:[#allocation609_spill] sm:$0xff] %v9818_v11  ;;  %v9822_v12 = vpop.permute.xlu2 %4481  ;;  %v10055_v11 = vld [vmem:[%s7347_s29 + $0xf1] sm:$0xff] }
 0x739   : > { %14340 = vst [vmem:[#allocation610_spill] sm:$0xff] %v9820_v18 }
 0x73a   : > { %14341 = vst [vmem:[#allocation611_spill] sm:$0xff] %v9822_v12  ;;  %v9920_v12 = vld [vmem:[%s13638_s1] sm:$0xff] }
 0x73d   : > { %3974 = vperm.xlu0 %7042, %v7192_v21  }
 0x73e   : > { %4682 = vperm.xlu1 %7025, %v9602_v17  }
 0x73f   : > { %4686 = vperm.xlu2 %7024, %v9605_v5   ;;  %v9827_v48 = vpop.permute.xlu0 %2760  ;;  %v9829_v10 = vpop.permute.xlu1 %4453  ;;  %v7194_v5 = vld [vmem:[%s7347_s29 + $0xaa] sm:$0xff] }
 0x740   : > { %14342 = vst [vmem:[#allocation612_spill] sm:$0xff] %v9827_v48  ;;  %v9831_v44 = vpop.permute.xlu2 %4493 }
 0x741   : > { %14343 = vst [vmem:[#allocation613_spill] sm:$0xff] %v9829_v10  ;;  %v7195_v10 = vld [vmem:[%s7347_s29 + $0xca] sm:$0xff] }
 0x742   : > { %14344 = vst [vmem:[#allocation614_spill] sm:$0xff] %v9831_v44  ;;  %v9911_v44 = vld [vmem:[%s7347_s29 + $0xa9] sm:$0xff] }
 0x743   : > { %14369 = vst [vmem:[#allocation639_spill] sm:$0xff] %v9911_v44 }
 0x745   : > { %3986 = vperm.xlu0 %7042, %v7193_v56  }
 0x746   : > { %4694 = vperm.xlu1 %7025, %v9617_v32  }
 0x747   : > { %4698 = vperm.xlu2 %7024, %v9620_v26   ;;  %v9836_v18 = vpop.permute.xlu0 %2772  ;;  %v9838_v21 = vpop.permute.xlu1 %4465 }
 0x748   : > { %14345 = vst [vmem:[#allocation615_spill] sm:$0xff] %v9836_v18  ;;  %v9840_v17 = vpop.permute.xlu2 %4505 }
 0x749   : > { %14346 = vst [vmem:[#allocation616_spill] sm:$0xff] %v9838_v21  ;;  %v9853_v21 = vld [vmem:[%s7347_s29 + $0x31] sm:$0xff] }
 0x74a   : > { %14347 = vst [vmem:[#allocation617_spill] sm:$0xff] %v9840_v17 }
 0x74b   : > { %14351 = vst [vmem:[#allocation621_spill] sm:$0xff] %v9853_v21 }
 0x74d   : > { %3998 = vperm.xlu0 %7042, %v7194_v5  }
 0x74e   : > { %4706 = vperm.xlu1 %7025, %v9632_v8  }
 0x74f   : > { %4710 = vperm.xlu2 %7024, %v9635_v9   ;;  %v9845_v56 = vpop.permute.xlu0 %2784  ;;  %v9847_v32 = vpop.permute.xlu1 %4477 }
 0x750   : > { %14348 = vst [vmem:[#allocation618_spill] sm:$0xff] %v9845_v56  ;;  %v9849_v26 = vpop.permute.xlu2 %4517  ;;  %v9952_v56 = vld [vmem:[%s7347_s29 + $0xd9] sm:$0xff] }
 0x751   : > { %14349 = vst [vmem:[#allocation619_spill] sm:$0xff] %v9847_v32  ;;  %v9865_v32 = vld [vmem:[%s7347_s29 + $0x49] sm:$0xff] }
 0x752   : > { %14350 = vst [vmem:[#allocation620_spill] sm:$0xff] %v9849_v26 }
 0x753   : > { %14355 = vst [vmem:[#allocation625_spill] sm:$0xff] %v9865_v32 }
 0x754   : > { %14375 = vst [vmem:[#allocation645_spill] sm:$0xff] %v9952_v56 }
 0x755   : > { %4010 = vperm.xlu0 %7042, %v7195_v10   ;;  %v7196_v10 = vld [vmem:[%s7347_s29 + $0xf2] sm:$0xff] }
 0x756   : > { %4718 = vperm.xlu1 %7025, %v9647_v19  }
 0x757   : > { %7026 = vset.pattern.permute.xlu2 %v13766_v23  ;;  %v9857_v8 = vpop.permute.xlu0 %3311  ;;  %v9859_v9 = vpop.permute.xlu1 %4489 }
 0x758   : > { %14352 = vst [vmem:[#allocation622_spill] sm:$0xff] %v9857_v8  ;;  %4820 = vperm.xlu2 %7026, %v9853_v21  }
 0x759   : > { %14353 = vst [vmem:[#allocation623_spill] sm:$0xff] %v9859_v9  ;;  %v9862_v5 = vpop.permute.xlu2 %4594  ;;  %v7198_v9 = vld [vmem:[%s7347_s29 + $0x13a] sm:$0xff] }
 0x75a   : > { %14354 = vst [vmem:[#allocation624_spill] sm:$0xff] %v9862_v5 }
 0x75d   : > { %4022 = vperm.xlu0 %7042, %v7196_v10   ;;  %v7197_v10 = vld [vmem:[%s7347_s29 + $0x112] sm:$0xff] }
 0x75e   : > { %7027 = vset.pattern.permute.xlu1 %v13766_v23 }
 0x75f   : > { %v9872_v19 = vpop.permute.xlu0 %3331  ;;  %4830 = vperm.xlu1 %7027, %v9865_v32   ;;  %v9875_v1 = vpop.permute.xlu1 %4501 }
 0x760   : > { %14357 = vst [vmem:[#allocation627_spill] sm:$0xff] %v9872_v19  ;;  %4835 = vperm.xlu2 %7026, %v9869_v31   ;;  %v14396_v31 = vld [vmem:[#allocation10_spill] sm:$0xff] }
 0x761   : > { %14358 = vst [vmem:[#allocation628_spill] sm:$0xff] %v9875_v1  ;;  %v9878_v62 = vpop.permute.xlu2 %4606 }
 0x762   : > { %14359 = vst [vmem:[#allocation629_spill] sm:$0xff] %v9878_v62  ;;  %v9896_v62 = vld [vmem:[%s7347_s29 + $0x81] sm:$0xff] }
 0x763   : > { %14364 = vst [vmem:[#allocation634_spill] sm:$0xff] %v9896_v62 }
 0x765   : > { %4034 = vperm.xlu0 %7042, %v7197_v10   ;;  %v9900_v10 = vld [vmem:[%s7347_s29 + $0x91] sm:$0xff] }
 0x766   : > { %14365 = vst [vmem:[#allocation635_spill] sm:$0xff] %v9900_v10 }
 0x767   : > { %v9887_v14 = vpop.permute.xlu0 %3343  ;;  %4840 = vperm.xlu1 %7027, %v9881_v24   ;;  %v9890_v5 = vpop.permute.xlu1 %4513 }
 0x768   : > { %14362 = vst [vmem:[#allocation632_spill] sm:$0xff] %v9890_v5  ;;  %4845 = vperm.xlu2 %7026, %v9885_v15  }
 0x769   : > { %v9893_v1 = vpop.permute.xlu2 %4614 }
 0x76a   : > { %14363 = vst [vmem:[#allocation633_spill] sm:$0xff] %v9893_v1  ;;  %v7199_v1 = vld [vmem:[%s7347_s29 + $0x15a] sm:$0xff] }
 0x76d   : > { %4046 = vperm.xlu0 %7042, %v7198_v9   ;;  %v9915_v9 = vld [vmem:[%s7347_s29 + $0xb1] sm:$0xff] }
 0x76e   : > { %14370 = vst [vmem:[#allocation640_spill] sm:$0xff] %v9915_v9 }
 0x76f   : > { %v9902_v26 = vpop.permute.xlu0 %3355  ;;  %4855 = vperm.xlu1 %7027, %v9896_v62   ;;  %v9905_v17 = vpop.permute.xlu1 %4525 }
 0x770   : > { %14366 = vst [vmem:[#allocation636_spill] sm:$0xff] %v9902_v26  ;;  %4860 = vperm.xlu2 %7026, %v9900_v10   ;;  %v14385_v10 = vld [vmem:[#allocation6_spill] sm:$0xff] }
 0x771   : > { %14367 = vst [vmem:[#allocation637_spill] sm:$0xff] %v9905_v17  ;;  %v9908_v5 = vpop.permute.xlu2 %4626 }
 0x772   : > { %14368 = vst [vmem:[#allocation638_spill] sm:$0xff] %v9908_v5 }
 0x775   : > { %4058 = vperm.xlu0 %7042, %v7199_v1   ;;  %v9931_v1 = vperm.slane %v9920_v12, 0 }
 0x777   : > { %v9922_v23 = vpop.permute.xlu0 %3367  ;;  %4870 = vperm.xlu1 %7027, %v9911_v44   ;;  %v9938_v19 = vmul.f32 %v9931_v1, %v7453_v35  ;;  %v481_v8 = vmul.f32 %v9931_v1, %v7458_v37  ;;  %v9944_v3 = vmul.f32 %v9931_v1, %v7463_v39  ;;  %v478_v4 = vmul.f32 %v9931_v1, %v7470_v42  ;;  %v14383_v44 = vld [vmem:[#allocation5_spill] sm:$0xff] }
 0x778   : > { %14371 = vst [vmem:[#allocation641_spill] sm:$0xff] %v9922_v23  ;;  %4875 = vperm.xlu2 %7026, %v9915_v9   ;;  %v9926_v5 = vpop.permute.xlu1 %4602  ;;  %v476_v35 = vmul.f32 %v9931_v1, %v7472_v43  ;;  %v9960_v37 = vmul.f32 %v9931_v1, %v7477_v45  ;;  %v479_v39 = vmul.f32 %v9931_v1, %v7479_v46  ;;  %v9977_v43 = vperm.slane %v9920_v12, 1  ;;  %v14381_v9 = vld [vmem:[#allocation3_spill] sm:$0xff]  ;;  %v14393_v23 = vld [vmem:[#allocation9_spill] sm:$0xff] }
 0x779   : > { %14372 = vst [vmem:[#allocation642_spill] sm:$0xff] %v9926_v5  ;;  %v9928_v17 = vpop.permute.xlu2 %4638  ;;  %v9948_v5 = vmul.f32 %v9931_v1, %v7468_v41  ;;  %v9966_v41 = vmul.f32 %v9931_v1, %v7481_v47  ;;  %v9974_v42 = vmul.f32 %v9931_v1, %v7488_v50  ;;  %v9984_v46 = vmul.f32 %v9931_v1, %v7490_v51 }
 0x77a   : > { %14373 = vst [vmem:[#allocation643_spill] sm:$0xff] %v9928_v17  ;;  %v7200_v17 = vld [vmem:[%s7347_s29 + $0x182] sm:$0xff]  ;;  %v9988_v47 = vmul.f32 %v9931_v1, %v7495_v53  ;;  %v485_v50 = vmul.f32 %v9931_v1, %v7499_v55  ;;  %v10005_v51 = vmul.f32 %v9931_v1, %v7506_v58  ;;  %v10009_v53 = vmul.f32 %v9931_v1, %v7508_v59 }
 0x77b   : > { %14377 = vst [vmem:[#allocation647_spill] sm:$0xff] %v9984_v46  ;;  %v10024_v58 = vperm.slane %v9920_v12, 2  ;;  %v678_v59 = vmul.f32 %v9977_v43, %v8509_v63  ;;  %v672_v48 = vmul.f32 %v9977_v43, %v14384_v6  ;;  %v10044_v62 = vmul.f32 %v9931_v1, %v14385_v10  ;;  %v14386_v63 = vld [vmem:[#allocation7_spill] sm:$0xff]  ;;  %v14390_v10 = vld [vmem:[#allocation17_spill] sm:$0xff] }
 0x77c   : > { %v10048_v16 = vmul.f32 %v9931_v1, %v14386_v63  ;;  %v677_v24 = vmul.f32 %v9977_v43, %v14390_v10  ;;  %v10066_v63 = vperm.slane %v9920_v12, 3  ;;  %v14394_v46 = vld [vmem:[#allocation19_spill] sm:$0xff]  ;;  %v10082_v10 = vmul.f32 %v9931_v1, %v14396_v31 }
 0x77d   : > { %4070 = vperm.xlu0 %7042, %v7200_v17   ;;  %v9970_v17 = vmul.f32 %v9931_v1, %v7486_v49  ;;  %v9992_v49 = vmul.f32 %v9931_v1, %v7497_v54  ;;  %v669_v54 = vmul.f32 %v9977_v43, %v7536_v30  ;;  %v10030_v30 = vmul.f32 %v9931_v1, %v14381_v9  ;;  %v14387_v9 = vld [vmem:[#allocation14_spill] sm:$0xff]  ;;  %v14402_v31 = vld [vmem:[#allocation15_spill] sm:$0xff] }
 0x77e   : > { %14391 = vst [vmem:[#allocation3_spill] sm:$0xff] %v10066_v63  ;;  %v10084_v32 = vadd.f32 %v672_v48, %v479_v39  ;;  %v10103_v48 = vmul.f32 %v9931_v1, %v14402_v31 }
 0x77f   : > { %v9979_v45 = vpop.permute.xlu0 %3379  ;;  %4885 = vperm.xlu1 %7027, %v9934_v40   ;;  %v10001_v40 = vmul.f32 %v9931_v1, %v7504_v57  ;;  %v14380_v57 = vld [vmem:[#allocation2_spill] sm:$0xff]  ;;  %v10061_v6 = vadd.f32 %v669_v54, %v476_v35  ;;  %v680_v35 = vmul.f32 %v9977_v43, %v14395_v33  ;;  %v710_v54 = vadd.f32 %v678_v59, %v485_v50 }
 0x780   : > { %14376 = vst [vmem:[#allocation646_spill] sm:$0xff] %v9979_v45  ;;  %4890 = vperm.xlu2 %7026, %v9952_v56   ;;  %v9997_v18 = vpop.permute.xlu1 %4610  ;;  %v10021_v56 = vmul.f32 %v9931_v1, %v14380_v57  ;;  %v10038_v57 = vmul.f32 %v9931_v1, %v14383_v44  ;;  %v674_v45 = vmul.f32 %v9977_v43, %v14387_v9  ;;  %v14389_v44 = vld [vmem:[#allocation8_spill] sm:$0xff]  ;;  %v10070_v9 = vld [vmem:[%s7347_s29 + $0xf9] sm:$0xff] }
 0x781   : > { %14378 = vst [vmem:[#allocation648_spill] sm:$0xff] %v9997_v18  ;;  %v10013_v55 = vpop.permute.xlu2 %4650  ;;  %v10017_v18 = vmul.f32 %v9931_v1, %v7513_v61  ;;  %v10059_v15 = vmul.f32 %v9931_v1, %v14389_v44  ;;  %v671_v44 = vmul.f32 %v9977_v43, %v14394_v46  ;;  %v14400_v46 = vld [vmem:[#allocation13_spill] sm:$0xff] }
 0x782   : > { %14379 = vst [vmem:[#allocation649_spill] sm:$0xff] %v10013_v55  ;;  %v14382_v55 = vld [vmem:[#allocation4_spill] sm:$0xff]  ;;  %v10097_v33 = vmul.f32 %v9931_v1, %v14400_v46  ;;  %v10099_v50 = vadd.f32 %v674_v45, %v481_v8  ;;  %v14407_v46 = vld [vmem:[#allocation18_spill] sm:$0xff]  ;;  %v14408_v45 = vld [vmem:[#allocation23_spill] sm:$0xff] }
 0x783   : > { %v10034_v61 = vmul.f32 %v9931_v1, %v14382_v55  ;;  %v871_v55 = vmul.f32 %v10024_v58, %v9444_v20  ;;  %14388 = vst [vmem:[#allocation2_spill] sm:$0xff] %v10055_v11  ;;  %v10074_v20 = vmul.f32 %v9931_v1, %v14393_v23  ;;  %v673_v23 = vmul.f32 %v9977_v43, %v14399_v34  ;;  %v14405_v34 = vld [vmem:[#allocation16_spill] sm:$0xff] }
 0x784   : > { %14392 = vst [vmem:[#allocation4_spill] sm:$0xff] %v10070_v9  ;;  %v10117_v8 = vmul.f32 %v10066_v63, %v14407_v46  ;;  %v683_v31 = vmul.f32 %v9977_v43, %v14408_v45 }
 0x785   : > { %4598 = vperm.xlu0 %7042, %v7201_v60   ;;  %v14397_v60 = vld [vmem:[#allocation12_spill] sm:$0xff]  ;;  %14401 = vst [vmem:[#allocation11_spill] sm:$0xff] %v10099_v50  ;;  %v903_v39 = vadd.f32 %v871_v55, %v710_v54  ;;  %v10123_v54 = vadd.f32 %v671_v44, %v478_v4  ;;  %v10137_v45 = vadd.f32 %v673_v23, %v9938_v19  ;;  %v14415_v4 = vld [vmem:[#allocation25_spill] sm:$0xff] }
 0x786   : > { %v10088_v26 = vmul.f32 %v9931_v1, %v14397_v60  ;;  %14403 = vst [vmem:[#allocation6_spill] sm:$0xff] %v10103_v48  ;;  %v10110_v60 = vmul.f32 %v9931_v1, %v14405_v34  ;;  %v14412_v1 = vld [vmem:[#allocation24_spill] sm:$0xff]  ;;  %v14413_v34 = vld [vmem:[#allocation21_spill] sm:$0xff]  ;;  %v676_v44 = vmul.f32 %v9977_v43, %v14415_v4  ;;  %v10155_v19 = vadd.f32 %v683_v31, %v9960_v37 }
 0x787   : > { %v10092_v21 = vpop.permute.xlu0 %3391  ;;  %4900 = vperm.xlu1 %7027, %v10055_v11   ;;  %v10113_v11 = vadd.f32 %v677_v24, %v9944_v3  ;;  %14410 = vst [vmem:[#allocation17_spill] sm:$0xff] %v10123_v54  ;;  %v1128_v3 = vmul.f32 %v10066_v63, %v14412_v1  ;;  %v681_v24 = vmul.f32 %v9977_v43, %v8521_v38  ;;  %v10147_v1 = vperm.slane %v9920_v12, 5  ;;  %v14419_v23 = vld [vmem:[#allocation28_spill] sm:$0xff]  ;;  %v14421_v54 = vld [vmem:[#allocation31_spill] sm:$0xff] }
 0x788   : > { %14398 = vst [vmem:[#allocation5_spill] sm:$0xff] %v10088_v26  ;;  %4905 = vperm.xlu2 %7026, %v10070_v9   ;;  %v10106_v59 = vpop.permute.xlu1 %4622  ;;  %v10134_v46 = vmul.f32 %v10066_v63, %v14413_v34  ;;  %v874_v34 = vmul.f32 %v10024_v58, %v9453_v25  ;;  %v679_v4 = vmul.f32 %v9977_v43, %v14419_v23  ;;  %v7202_v9 = vld [vmem:[%s7347_s29 + $0x78] sm:$0xff] }
 0x789   : > { %14404 = vst [vmem:[#allocation7_spill] sm:$0xff] %v10106_v59  ;;  %v10121_v55 = vpop.permute.xlu2 %4662  ;;  %v10126_v59 = vadd.f32 %v680_v35, %v9948_v5  ;;  %v14416_v5 = vld [vmem:[#allocation26_spill] sm:$0xff]  ;;  %v1160_v38 = vadd.f32 %v1128_v3, %v903_v39  ;;  %v14423_v3 = vld [vmem:[#allocation32_spill] sm:$0xff]  ;;  %v713_v48 = vadd.f32 %v681_v24, %v10009_v53  ;;  %v1514_v31 = vmul.f32 %v10147_v1, %v9569_v29 }
 0x78a   : > { %14406 = vst [vmem:[#allocation14_spill] sm:$0xff] %v10113_v11  ;;  %v686_v35 = vmul.f32 %v9977_v43, %v14416_v5  ;;  %v682_v11 = vmul.f32 %v9977_v43, %v14421_v54  ;;  %v10165_v39 = vld [vmem:[%s7347_s29 + $0x121] sm:$0xff]  ;;  %v692_v25 = vmul.f32 %v9977_v43, %v14423_v3  ;;  %v10190_v29 = vperm.slane %v9920_v12, 6 }
 0x78b   : > { %14409 = vst [vmem:[#allocation8_spill] sm:$0xff] %v10121_v55  ;;  %v10144_v55 = vperm.slane %v9920_v12, 4 }
 0x78c   : > { %14411 = vst [vmem:[#allocation9_spill] sm:$0xff] %v10126_v59  ;;  %v10152_v59 = vld [vmem:[%s7347_s29 + $0x111] sm:$0xff]  ;;  %v10178_v54 = vadd.f32 %v686_v35, %v9970_v17 }
 0x78d   : > { %14414 = vst [vmem:[#allocation19_spill] sm:$0xff] %v10137_v45  ;;  %v14420_v45 = vld [vmem:[#allocation29_spill] sm:$0xff]  ;;  %4618 = vperm.xlu0 %7042, %v7202_v9   ;;  %v1321_v37 = vmul.f32 %v10144_v55, %v8610_v13  ;;  %v14426_v9 = vld [vmem:[#allocation34_spill] sm:$0xff]  ;;  %v14429_v13 = vld [vmem:[#allocation27_spill] sm:$0xff] }
 0x78e   : > { %14417 = vst [vmem:[#allocation20_spill] sm:$0xff] %v10152_v59  ;;  %v689_v5 = vmul.f32 %v9977_v43, %v14420_v45  ;;  %v10175_v45 = vadd.f32 %v676_v44, %v9974_v42  ;;  %v685_v23 = vmul.f32 %v9977_v43, %v14426_v9  ;;  %v1131_v53 = vmul.f32 %v10066_v63, %v14429_v13 }
 0x78f   : > { %14418 = vst [vmem:[#allocation10_spill] sm:$0xff] %v10155_v19  ;;  %v14427_v19 = vld [vmem:[#allocation35_spill] sm:$0xff]  ;;  %v10184_v50 = vpop.permute.xlu0 %3403  ;;  %4915 = vperm.xlu1 %7027, %v10152_v59   ;;  %v906_v42 = vadd.f32 %v874_v34, %v713_v48  ;;  %v1353_v24 = vadd.f32 %v1321_v37, %v1160_v38  ;;  %v10196_v44 = vadd.f32 %v679_v4, %v9992_v49  ;;  %v14438_v38 = vld [vmem:[#allocation33_spill] sm:$0xff]  ;;  %v14443_v37 = vld [vmem:[#allocation40_spill] sm:$0xff] }
 0x790   : > { %14422 = vst [vmem:[#allocation12_spill] sm:$0xff] %v10165_v39  ;;  %v695_v3 = vmul.f32 %v9977_v43, %v14427_v19  ;;  %4920 = vperm.xlu2 %7026, %v10165_v39   ;;  %v10193_v17 = vpop.permute.xlu1 %4634  ;;  %v10199_v35 = vadd.f32 %v689_v5, %v9988_v47  ;;  %v14434_v19 = vld [vmem:[#allocation30_spill] sm:$0xff]  ;;  %v10204_v13 = vadd.f32 %v682_v11, %v10005_v51  ;;  %v14441_v51 = vld [vmem:[#allocation37_spill] sm:$0xff] }
 0x791   : > { %14424 = vst [vmem:[#allocation22_spill] sm:$0xff] %v10175_v45  ;;  %v1134_v9 = vmul.f32 %v10066_v63, %v14434_v19  ;;  %v10209_v48 = vadd.f32 %v692_v25, %v10001_v40  ;;  %v10213_v34 = vmul.f32 %v10066_v63, %v14438_v38  ;;  %v684_v47 = vmul.f32 %v9977_v43, %v8533_v36  ;;  %v14442_v5 = vld [vmem:[#allocation38_spill] sm:$0xff]  ;;  %v14502_v59 = vld [vmem:[#allocation117_spill] sm:$0xff] }
 0x792   : > { %14425 = vst [vmem:[#allocation13_spill] sm:$0xff] %v10178_v54  ;;  %v10206_v54 = vpop.permute.xlu2 %4674  ;;  %v1546_v49 = vadd.f32 %v1514_v31, %v1353_v24  ;;  %v10218_v4 = vadd.f32 %v685_v23, %v10021_v56  ;;  %v10221_v11 = vadd.f32 %v695_v3, %v10017_v18  ;;  %v688_v40 = vmul.f32 %v9977_v43, %v14441_v51  ;;  %v14444_v38 = vld [vmem:[#allocation54_spill] sm:$0xff]  ;;  %v10234_v56 = vld [vmem:[%s13638_s1 + $0x8] sm:$0xff]  ;;  %v14446_v3 = vld [vmem:[#allocation41_spill] sm:$0xff] }
 0x793   : > { %14428 = vst [vmem:[#allocation15_spill] sm:$0xff] %v10184_v50  ;;  %v698_v25 = vmul.f32 %v9977_v43, %v14442_v5  ;;  %v691_v19 = vmul.f32 %v9977_v43, %v14443_v37  ;;  %v1771_v36 = vmul.f32 %v10190_v29, %v14444_v38  ;;  %v1163_v31 = vadd.f32 %v1131_v53, %v906_v42  ;;  %v10239_v23 = vld [vmem:[%s7347_s29 + $0x139] sm:$0xff]  ;;  %v14447_v51 = vld [vmem:[#allocation43_spill] sm:$0xff] }
 0x794   : > { %14430 = vst [vmem:[#allocation16_spill] sm:$0xff] %v10190_v29  ;;  %v877_v18 = vmul.f32 %v10024_v58, %v9462_v52  ;;  %v862_v24 = vmul.f32 %v10024_v58, %v14446_v3  ;;  %v694_v5 = vmul.f32 %v9977_v43, %v14447_v51  ;;  %v10246_v37 = vperm.slane %v9920_v12, 7  ;;  %v10253_v53 = vld [vmem:[%s7347_s29 + $0x141] sm:$0xff]  ;;  %v14449_v51 = vld [vmem:[#allocation36_spill] sm:$0xff] }
 0x795   : > { %14431 = vst [vmem:[#allocation18_spill] sm:$0xff] %v10193_v17  ;;  %v10249_v38 = vperm.slane %v10234_v56, 0  ;;  %v7203_v17 = vld [vmem:[%s7347_s29 + $0x98] sm:$0xff]  ;;  %v716_v52 = vadd.f32 %v684_v47, %v10030_v30  ;;  %v1324_v42 = vmul.f32 %v10144_v55, %v8619_v22  ;;  %v1517_v3 = vmul.f32 %v10147_v1, %v9584_v28  ;;  %v14498_v39 = vld [vmem:[#allocation114_spill] sm:$0xff]  ;;  %v7206_v50 = vld [vmem:[%s7347_s29 + $0x108] sm:$0xff] }
 0x796   : > { %14432 = vst [vmem:[#allocation23_spill] sm:$0xff] %v10196_v44  ;;  %4630 = vperm.xlu0 %7042, %v7203_v17   ;;  %v10262_v12 = vmul.f32 %v10066_v63, %v14449_v51  ;;  %v10268_v17 = vadd.f32 %v698_v25, %v10034_v61  ;;  %v1964_v22 = vmul.f32 %v10246_v37, %v8698_v0  ;;  %v14455_v61 = vld [vmem:[#allocation39_spill] sm:$0xff]  ;;  %v14458_v0 = vld [vmem:[#allocation42_spill] sm:$0xff] }
 0x797   : > { %14433 = vst [vmem:[#allocation24_spill] sm:$0xff] %v10199_v35  ;;  %v10272_v47 = vpop.permute.xlu0 %3415  ;;  %4930 = vperm.xlu1 %7027, %v10239_v23   ;;  %v909_v28 = vadd.f32 %v877_v18, %v716_v52  ;;  %v10290_v25 = vadd.f32 %v862_v24, %v10061_v6  ;;  %v10299_v18 = vadd.f32 %v694_v5, %v10074_v20  ;;  %v14461_v52 = vld [vmem:[#allocation270_spill] sm:$0xff]  ;;  %v14463_v6 = vld [vmem:[#allocation45_spill] sm:$0xff]  ;;  %v10315_v20 = vperm.slane %v10234_v56, 1 }
 0x798   : > { %14435 = vst [vmem:[#allocation21_spill] sm:$0xff] %v10204_v13  ;;  %4935 = vperm.xlu2 %7026, %v10253_v53   ;;  %v10308_v24 = vmul.f32 %v10066_v63, %v14463_v6  ;;  %v14466_v5 = vld [vmem:[#allocation57_spill] sm:$0xff]  ;;  %v14495_v13 = vld [vmem:[#allocation99_spill] sm:$0xff]  ;;  %v14496_v35 = vld [vmem:[#allocation102_spill] sm:$0xff] }
 0x799   : > { %14436 = vst [vmem:[#allocation25_spill] sm:$0xff] %v10206_v54  ;;  %v1803_v54 = vadd.f32 %v1771_v36, %v1546_v49  ;;  %v1356_v49 = vadd.f32 %v1324_v42, %v1163_v31  ;;  %v2157_v36 = vmul.f32 %v10249_v38, %v9694_v7  ;;  %v10294_v31 = vmul.f32 %v10066_v63, %v14458_v0  ;;  %v7205_v45 = vld [vmem:[%s7347_s29 + $0xe0] sm:$0xff] }
 0x79a   : > { %14437 = vst [vmem:[#allocation26_spill] sm:$0xff] %v10209_v48  ;;  %v10296_v7 = vpop.permute.xlu2 %4686  ;;  %v687_v42 = vmul.f32 %v9977_v43, %v14461_v52  ;;  %v1774_v52 = vmul.f32 %v10190_v29, %v14466_v5  ;;  %v10338_v5 = vld [vmem:[%s7347_s29 + $0x169] sm:$0xff]  ;;  %v10410_v44 = vmul.f32 %v10315_v20, %v14496_v35 }
 0x79b   : > { %14439 = vst [vmem:[#allocation28_spill] sm:$0xff] %v10218_v4  ;;  %v14452_v4 = vld [vmem:[#allocation44_spill] sm:$0xff]  ;;  %v1549_v51 = vadd.f32 %v1517_v3, %v1356_v49  ;;  %v1166_v3 = vadd.f32 %v1134_v9, %v909_v28  ;;  %v7204_v28 = vld [vmem:[%s7347_s29 + $0xc0] sm:$0xff]  ;;  %v14485_v48 = vld [vmem:[#allocation87_spill] sm:$0xff] }
 0x79c   : > { %14440 = vst [vmem:[#allocation29_spill] sm:$0xff] %v10221_v11  ;;  %v10265_v11 = vadd.f32 %v688_v40, %v10038_v57  ;;  %v865_v30 = vmul.f32 %v10024_v58, %v14452_v4  ;;  %v10280_v57 = vpop.permute.xlu1 %4646  ;;  %v10284_v40 = vmul.f32 %v10066_v63, %v14455_v61  ;;  %v10287_v4 = vadd.f32 %v691_v19, %v10048_v16  ;;  %v14464_v61 = vld [vmem:[#allocation48_spill] sm:$0xff] }
 0x79d   : > { %14445 = vst [vmem:[#allocation31_spill] sm:$0xff] %v10239_v23  ;;  %v1996_v16 = vadd.f32 %v1964_v22, %v1803_v54  ;;  %v10312_v0 = vmul.f32 %v10190_v29, %v14464_v61  ;;  %v14467_v54 = vld [vmem:[#allocation523_spill] sm:$0xff]  ;;  %v14469_v49 = vld [vmem:[#allocation60_spill] sm:$0xff] }
 0x79e   : > { %14448 = vst [vmem:[#allocation32_spill] sm:$0xff] %v10253_v53  ;;  %v10304_v19 = vadd.f32 %v865_v30, %v10084_v32  ;;  %v880_v22 = vmul.f32 %v10024_v58, %v14467_v54  ;;  %v10322_v30 = vld [vmem:[%s7347_s29 + $0x159] sm:$0xff]  ;;  %v1777_v6 = vmul.f32 %v10190_v29, %v14469_v49  ;;  %4642 = vperm.xlu0 %7042, %v7204_v28   ;;  %v14483_v53 = vld [vmem:[#allocation72_spill] sm:$0xff]  ;;  %v14484_v23 = vld [vmem:[#allocation75_spill] sm:$0xff] }
 0x79f   : > { %14450 = vst [vmem:[#allocation34_spill] sm:$0xff] %v10265_v11  ;;  %v2189_v32 = vadd.f32 %v2157_v36, %v1996_v16  ;;  %v719_v36 = vadd.f32 %v687_v42, %v10044_v62  ;;  %v14474_v16 = vld [vmem:[#allocation295_spill] sm:$0xff]  ;;  %v1806_v49 = vadd.f32 %v1774_v52, %v1549_v51  ;;  %v10355_v11 = vperm.slane %v10234_v56, 3  ;;  %v10357_v62 = vpop.permute.xlu0 %3427  ;;  %4945 = vperm.xlu1 %7027, %v10322_v30   ;;  %v14481_v52 = vld [vmem:[#allocation574_spill] sm:$0xff] }
 0x7a0   : > { %14451 = vst [vmem:[#allocation35_spill] sm:$0xff] %v10268_v17  ;;  %v1327_v54 = vmul.f32 %v10144_v55, %v14474_v16  ;;  %v10350_v17 = vperm.slane %v10234_v56, 2  ;;  %4950 = vperm.xlu2 %7026, %v10338_v5   ;;  %v10371_v63 = vmul.f32 %v10190_v29, %v14484_v23  ;;  %v14489_v23 = vld [vmem:[#allocation90_spill] sm:$0xff] }
 0x7a1   : > { %14453 = vst [vmem:[#allocation27_spill] sm:$0xff] %v10272_v47  ;;  %v912_v42 = vadd.f32 %v880_v22, %v719_v36  ;;  %v14486_v22 = vld [vmem:[#allocation273_spill] sm:$0xff]  ;;  %v14488_v36 = vld [vmem:[#allocation346_spill] sm:$0xff] }
 0x7a2   : > { %14454 = vst [vmem:[#allocation30_spill] sm:$0xff] %v10280_v57  ;;  %v14470_v57 = vld [vmem:[#allocation63_spill] sm:$0xff]  ;;  %v1359_v51 = vadd.f32 %v1327_v54, %v1166_v3  ;;  %v2418_v3 = vmul.f32 %v10315_v20, %v14485_v48  ;;  %v2608_v54 = vmul.f32 %v10350_v17, %v14488_v36  ;;  %v14490_v48 = vld [vmem:[#allocation93_spill] sm:$0xff] }
 0x7a3   : > { %14456 = vst [vmem:[#allocation33_spill] sm:$0xff] %v10287_v4  ;;  %v10328_v61 = vmul.f32 %v10190_v29, %v14470_v57  ;;  %v14476_v4 = vld [vmem:[#allocation69_spill] sm:$0xff] }
 0x7a4   : > { %14457 = vst [vmem:[#allocation37_spill] sm:$0xff] %v10290_v25  ;;  %v14475_v25 = vld [vmem:[#allocation548_spill] sm:$0xff]  ;;  %v10363_v16 = vpop.permute.xlu1 %4658 }
 0x7a5   : > { %14459 = vst [vmem:[#allocation38_spill] sm:$0xff] %v10296_v7  ;;  %v14471_v7 = vld [vmem:[#allocation66_spill] sm:$0xff]  ;;  %v1520_v57 = vmul.f32 %v10147_v1, %v14475_v25 }
 0x7a6   : > { %14460 = vst [vmem:[#allocation40_spill] sm:$0xff] %v10299_v18  ;;  %v14472_v18 = vld [vmem:[#allocation84_spill] sm:$0xff]  ;;  %4654 = vperm.xlu0 %7042, %v7205_v45  }
 0x7a7   : > { %14462 = vst [vmem:[#allocation54_spill] sm:$0xff] %v10304_v19  ;;  %v10332_v19 = vmul.f32 %v10190_v29, %v14471_v7  ;;  %v2415_v9 = vmul.f32 %v10315_v20, %v14472_v18  ;;  %v10347_v7 = vmul.f32 %v10190_v29, %v14476_v4  ;;  %v14478_v18 = vld [vmem:[#allocation319_spill] sm:$0xff]  ;;  %v2160_v4 = vmul.f32 %v10249_v38, %v14481_v52  ;;  %v10433_v47 = vpop.permute.xlu0 %3954 }
 0x7a8   : > { %14465 = vst [vmem:[#allocation41_spill] sm:$0xff] %v10315_v20  ;;  %v1967_v28 = vmul.f32 %v10246_v37, %v14478_v18  ;;  %v10367_v18 = vmul.f32 %v10190_v29, %v14483_v53  ;;  %v1552_v52 = vadd.f32 %v1520_v57, %v1359_v51  ;;  %v14493_v51 = vld [vmem:[#allocation96_spill] sm:$0xff] }
 0x7a9   : > { %14468 = vst [vmem:[#allocation43_spill] sm:$0xff] %v10322_v30  ;;  %v2447_v25 = vadd.f32 %v2415_v9, %v2189_v32  ;;  %v690_v32 = vmul.f32 %v9977_v43, %v14486_v22  ;;  %v10377_v9 = vpop.permute.xlu2 %4698  ;;  %v10389_v30 = vmul.f32 %v10315_v20, %v14490_v48  ;;  %v10392_v22 = vperm.slane %v10234_v56, 4 }
 0x7aa   : > { %14473 = vst [vmem:[#allocation36_spill] sm:$0xff] %v10338_v5  ;;  %v1999_v53 = vadd.f32 %v1967_v28, %v1806_v49  ;;  %v10385_v5 = vmul.f32 %v10315_v20, %v14489_v23  ;;  %v10398_v49 = vmul.f32 %v10315_v20, %v14493_v51  ;;  %v10402_v23 = vld [vmem:[%s7347_s29 + $0x181] sm:$0xff]  ;;  %v10406_v48 = vmul.f32 %v10315_v20, %v14495_v13 }
 0x7ab   : > { %14477 = vst [vmem:[#allocation44_spill] sm:$0xff] %v10350_v17  ;;  %v2640_v36 = vadd.f32 %v2608_v54, %v2447_v25  ;;  %v722_v51 = vadd.f32 %v690_v32, %v10059_v15  ;;  %v14501_v54 = vld [vmem:[#allocation551_spill] sm:$0xff]  ;;  %v3061_v35 = vmul.f32 %v10392_v22, %v14502_v59  ;;  %4960 = vperm.xlu1 %7027, %v10402_v23  }
 0x7ac   : > { %14479 = vst [vmem:[#allocation39_spill] sm:$0xff] %v10355_v11  ;;  %v2192_v28 = vadd.f32 %v2160_v4, %v1999_v53  ;;  %v1809_v4 = vadd.f32 %v1777_v6, %v1552_v52  ;;  %v1523_v13 = vmul.f32 %v10147_v1, %v14501_v54  ;;  %v14504_v15 = vld [vmem:[#allocation123_spill] sm:$0xff]  ;;  %v14506_v6 = vld [vmem:[#allocation322_spill] sm:$0xff]  ;;  %v14509_v54 = vld [vmem:[#allocation276_spill] sm:$0xff] }
 0x7ad   : > { %14480 = vst [vmem:[#allocation42_spill] sm:$0xff] %v10357_v62  ;;  %v14503_v62 = vld [vmem:[#allocation120_spill] sm:$0xff]  ;;  %v10431_v45 = vmul.f32 %v10392_v22, %v14504_v15  ;;  %v1970_v52 = vmul.f32 %v10246_v37, %v14506_v6  ;;  %v693_v15 = vmul.f32 %v9977_v43, %v14509_v54  ;;  %v14514_v54 = vld [vmem:[#allocation126_spill] sm:$0xff] }
 0x7ae   : > { %14482 = vst [vmem:[#allocation270_spill] sm:$0xff] %v10363_v16  ;;  %v2801_v16 = vmul.f32 %v10355_v11, %v9784_v27  ;;  %v1169_v27 = vadd.f32 %v10213_v34, %v912_v42  ;;  %v10417_v34 = vld [vmem:[%s7347_s29 + $0x189] sm:$0xff]  ;;  %v14500_v42 = vld [vmem:[#allocation298_spill] sm:$0xff]  ;;  %4666 = vperm.xlu0 %7042, %v7206_v50   ;;  %v14526_v50 = vld [vmem:[#allocation325_spill] sm:$0xff] }
 0x7af   : > { %14487 = vst [vmem:[#allocation45_spill] sm:$0xff] %v10377_v9  ;;  %v14492_v9 = vld [vmem:[#allocation526_spill] sm:$0xff]  ;;  %v1330_v25 = vmul.f32 %v10144_v55, %v14500_v42  ;;  %v14507_v42 = vld [vmem:[#allocation577_spill] sm:$0xff]  ;;  %4965 = vperm.xlu2 %7026, %v10417_v34  }
 0x7b0   : > { %14491 = vst [vmem:[#allocation48_spill] sm:$0xff] %v10392_v22  ;;  %v883_v57 = vmul.f32 %v10024_v58, %v14492_v9  ;;  %v3058_v9 = vmul.f32 %v10392_v22, %v14498_v39  ;;  %v2833_v53 = vadd.f32 %v2801_v16, %v2640_v36  ;;  %v10427_v39 = vmul.f32 %v10392_v22, %v14503_v62  ;;  %v10441_v62 = vpop.permute.xlu1 %4670 }
 0x7b1   : > { %14494 = vst [vmem:[#allocation57_spill] sm:$0xff] %v10402_v23  ;;  %v1362_v16 = vadd.f32 %v1330_v25, %v1169_v27  ;;  %v2450_v36 = vadd.f32 %v2418_v3, %v2192_v28  ;;  %v2163_v59 = vmul.f32 %v10249_v38, %v14507_v42  ;;  %v10448_v23 = vperm.slane %v10234_v56, 5  ;;  %v10453_v3 = vpop.permute.xlu2 %4710 }
 0x7b2   : > { %14497 = vst [vmem:[#allocation523_spill] sm:$0xff] %v10410_v44  ;;  %v915_v32 = vadd.f32 %v883_v57, %v722_v51  ;;  %v14510_v57 = vld [vmem:[#allocation349_spill] sm:$0xff]  ;;  %v10451_v27 = vperm.slane %v10234_v56, 6  ;;  %v2002_v25 = vadd.f32 %v1970_v52, %v1809_v4  ;;  %v3090_v6 = vadd.f32 %v3058_v9, %v2833_v53  ;;  %v10472_v53 = vld [vmem:[%s7347_s29 + $0x1a1] sm:$0xff] }
 0x7b3   : > { %14499 = vst [vmem:[#allocation60_spill] sm:$0xff] %v10417_v34  ;;  %v2611_v51 = vmul.f32 %v10350_v17, %v14510_v57  ;;  %v1555_v28 = vadd.f32 %v1523_v13, %v1362_v16  ;;  %v2804_v42 = vmul.f32 %v10355_v11, %v9791_v2  ;;  %v10462_v57 = vperm.slane %v10234_v56, 7  ;;  %v14519_v52 = vld [vmem:[#allocation258_spill] sm:$0xff]  ;;  %4975 = vperm.xlu1 %7027, %v10472_v53  }
 0x7b4   : > { %14505 = vst [vmem:[#allocation63_spill] sm:$0xff] %v10433_v47  ;;  %v1172_v34 = vadd.f32 %v10262_v12, %v915_v32  ;;  %v14516_v47 = vld [vmem:[#allocation529_spill] sm:$0xff]  ;;  %v2195_v13 = vadd.f32 %v2163_v59, %v2002_v25  ;;  %v3444_v2 = vmul.f32 %v10451_v27, %v9887_v14  ;;  %v670_v16 = vmul.f32 %v9977_v43, %v14519_v52  ;;  %v14521_v32 = vld [vmem:[#allocation554_spill] sm:$0xff]  ;;  %v14522_v59 = vld [vmem:[#allocation144_spill] sm:$0xff] }
 0x7b5   : > { %14508 = vst [vmem:[#allocation66_spill] sm:$0xff] %v10441_v62  ;;  %v10459_v62 = vmul.f32 %v10392_v22, %v14514_v54  ;;  %v886_v26 = vmul.f32 %v10024_v58, %v14516_v47  ;;  %v2643_v9 = vadd.f32 %v2611_v51, %v2450_v36  ;;  %v725_v56 = vadd.f32 %v693_v15, %v10082_v10  ;;  %v14520_v54 = vld [vmem:[#allocation300_spill] sm:$0xff]  ;;  %v14523_v25 = vld [vmem:[#allocation147_spill] sm:$0xff]  ;;  %v14524_v10 = vld [vmem:[#allocation150_spill] sm:$0xff] }
 0x7b6   : > { %14511 = vst [vmem:[#allocation84_spill] sm:$0xff] %v10448_v23  ;;  %v1333_v12 = vmul.f32 %v10144_v55, %v14520_v54  ;;  %v1526_v47 = vmul.f32 %v10147_v1, %v14521_v32  ;;  %v3701_v36 = vmul.f32 %v10462_v57, %v14522_v59  ;;  %v1812_v14 = vadd.f32 %v10328_v61, %v1555_v28  ;;  %v10493_v32 = vpop.permute.xlu0 %3974  ;;  %v14527_v28 = vld [vmem:[#allocation580_spill] sm:$0xff] }
 0x7b7   : > { %14512 = vst [vmem:[#allocation295_spill] sm:$0xff] %v10451_v27  ;;  %v2836_v51 = vadd.f32 %v2804_v42, %v2643_v9  ;;  %v10487_v52 = vmul.f32 %v10462_v57, %v14523_v25  ;;  %v10491_v15 = vmul.f32 %v10462_v57, %v14524_v10  ;;  %v918_v54 = vadd.f32 %v886_v26, %v725_v56 }
 0x7b8   : > { %14513 = vst [vmem:[#allocation548_spill] sm:$0xff] %v10453_v3  ;;  %v14517_v3 = vld [vmem:[#allocation376_spill] sm:$0xff]  ;;  %v1365_v20 = vadd.f32 %v1333_v12, %v1172_v34  ;;  %v1973_v59 = vmul.f32 %v10246_v37, %v14526_v50  ;;  %v2453_v61 = vadd.f32 %v10385_v5, %v2195_v13  ;;  %v10502_v9 = vpop.permute.xlu1 %4682  ;;  %v702_v26 = vadd.f32 %v670_v16, %v9966_v41  ;;  %v14530_v34 = vld [vmem:[#allocation261_spill] sm:$0xff]  ;;  %v14531_v12 = vld [vmem:[#allocation279_spill] sm:$0xff] }
 0x7b9   : > { %14515 = vst [vmem:[#allocation69_spill] sm:$0xff] %v10462_v57  ;;  %v3251_v4 = vmul.f32 %v10448_v23, %v14517_v3  ;;  %v675_v56 = vmul.f32 %v9977_v43, %v14530_v34  ;;  %v696_v25 = vmul.f32 %v9977_v43, %v14531_v12  ;;  %v14532_v50 = vld [vmem:[#allocation621_spill] sm:$0xff]  ;;  %v10513_v5 = vld [vmem:[%s13638_s1 + $0x10] sm:$0xff]  ;;  %v3093_v41 = vadd.f32 %v3061_v35, %v2836_v51  ;;  %v14534_v16 = vld [vmem:[#allocation603_spill] sm:$0xff]  ;;  %v10519_v34 = vpop.permute.xlu2 %4820 }
 0x7ba   : > { %14518 = vst [vmem:[#allocation319_spill] sm:$0xff] %v10472_v53  ;;  %v1558_v10 = vadd.f32 %v1526_v47, %v1365_v20  ;;  %v14533_v13 = vld [vmem:[#allocation352_spill] sm:$0xff]  ;;  %v14536_v12 = vld [vmem:[#allocation379_spill] sm:$0xff]  ;;  %v10524_v47 = vperm.slane %v10513_v5, 0 }
 0x7bb   : > { %v3283_v3 = vadd.f32 %v3251_v4, %v3090_v6  ;;  %14525 = vst [vmem:[#allocation574_spill] sm:$0xff] %v10493_v32  ;;  %v2166_v6 = vmul.f32 %v10249_v38, %v14527_v28  ;;  %v14528_v4 = vmov 1   ;;  %v2807_v28 = vmul.f32 %v10355_v11, %v14534_v16  ;;  %v14539_v35 = vld [vmem:[#allocation636_spill] sm:$0xff] }
 0x7bc   : > { %7028 = vset.pattern.permute.xlu2 %v14528_v4  ;;  %14529 = vst [vmem:[#allocation72_spill] sm:$0xff] %v10502_v9  ;;  %v3254_v20 = vmul.f32 %v10448_v23, %v14536_v12  ;;  %v14538_v9 = vld [vmem:[#allocation532_spill] sm:$0xff]  ;;  %v3447_v51 = vmul.f32 %v10451_v27, %v14539_v35  ;;  %v728_v16 = vadd.f32 %v696_v25, %v10097_v33  ;;  %v14541_v12 = vld [vmem:[#allocation406_spill] sm:$0xff] }
 0x7bd   : > { %v3476_v42 = vadd.f32 %v3444_v2, %v3283_v3  ;;  %5044 = vperm.xlu2 %7028, %v14532_v50   ;;  %v2614_v2 = vmul.f32 %v10350_v17, %v14533_v13  ;;  %v2005_v3 = vadd.f32 %v1973_v59, %v1812_v14  ;;  %14535 = vst [vmem:[#allocation75_spill] sm:$0xff] %v10519_v34  ;;  %v14540_v34 = vld [vmem:[#allocation303_spill] sm:$0xff] }
 0x7be   : > { %14537 = vst [vmem:[#allocation87_spill] sm:$0xff] %v10524_v47  ;;  %v1175_v50 = vadd.f32 %v10284_v40, %v918_v54  ;;  %v889_v53 = vmul.f32 %v10024_v58, %v14538_v9  ;;  %v1336_v32 = vmul.f32 %v10144_v55, %v14540_v34  ;;  %v3894_v29 = vmul.f32 %v10524_v47, %v14541_v12  ;;  %v7207_v40 = vld [vmem:[%s7347_s29 + $0x128] sm:$0xff]  ;;  %v14544_v9 = vld [vmem:[#allocation328_spill] sm:$0xff]  ;;  %v3987_v35 = vpop.permute.xlu0 %3986 }
 0x7bf   : > { %v2198_v13 = vadd.f32 %v2166_v6, %v2005_v3  ;;  %v2646_v14 = vadd.f32 %v2614_v2, %v2453_v61  ;;  %v3733_v59 = vadd.f32 %v3701_v36, %v3476_v42  ;;  %v1815_v44 = vadd.f32 %v10332_v19, %v1558_v10  ;;  %4678 = vperm.xlu0 %7042, %v7207_v40   ;;  %v14543_v61 = vld [vmem:[#allocation557_spill] sm:$0xff]  ;;  %v14545_v3 = vld [vmem:[#allocation583_spill] sm:$0xff] }
 0x7c0   : > { %v10539_v54 = vperm.slane %v10513_v5, 1  ;;  %v1529_v36 = vmul.f32 %v10147_v1, %v14543_v61  ;;  %v3286_v42 = vadd.f32 %v3254_v20, %v3093_v41  ;;  %v1976_v33 = vmul.f32 %v10246_v37, %v14544_v9  ;;  %7029 = vset.pattern.permute.xlu1 %v14528_v4  ;;  %v14546_v61 = vld [vmem:[#allocation625_spill] sm:$0xff]  ;;  %v10551_v41 = vpop.permute.xlu1 %4694  ;;  %v14551_v9 = vld [vmem:[#allocation626_spill] sm:$0xff] }
 0x7c1   : > { %v2839_v6 = vadd.f32 %v2807_v28, %v2646_v14  ;;  %v921_v25 = vadd.f32 %v889_v53, %v728_v16  ;;  %v1368_v2 = vadd.f32 %v1336_v32, %v1175_v50  ;;  %v2169_v34 = vmul.f32 %v10249_v38, %v14545_v3  ;;  %5052 = vperm.xlu1 %7029, %v14546_v61   ;;  %v14548_v28 = vld [vmem:[#allocation282_spill] sm:$0xff]  ;;  %v14549_v32 = vld [vmem:[#allocation355_spill] sm:$0xff] }
 0x7c2   : > { %14542 = vst [vmem:[#allocation273_spill] sm:$0xff] %v10539_v54  ;;  %v2456_v19 = vadd.f32 %v10389_v30, %v2198_v13  ;;  %v3479_v10 = vadd.f32 %v3447_v51, %v3286_v42  ;;  %v3926_v12 = vadd.f32 %v3894_v29, %v3733_v59  ;;  %v4087_v40 = vmul.f32 %v10539_v54, %v3987_v35  ;;  %v14550_v50 = vld [vmem:[#allocation511_spill] sm:$0xff]  ;;  %v14552_v13 = vld [vmem:[#allocation606_spill] sm:$0xff]  ;;  %v10565_v42 = vpop.permute.xlu2 %4835 }
 0x7c3   : > { %14547 = vst [vmem:[#allocation346_spill] sm:$0xff] %v10551_v41  ;;  %v699_v53 = vmul.f32 %v9977_v43, %v14548_v28  ;;  %v2617_v20 = vmul.f32 %v10350_v17, %v14549_v32  ;;  %v863_v14 = vmul.f32 %v10024_v58, %v14550_v50  ;;  %v2008_v16 = vadd.f32 %v1976_v33, %v1815_v44  ;;  %v14554_v3 = vld [vmem:[#allocation647_spill] sm:$0xff]  ;;  %v14556_v32 = vld [vmem:[#allocation382_spill] sm:$0xff]  ;;  %v14691_v41 = vld [vmem:[#allocation141_spill] sm:$0xff] }
 0x7c4   : > { %v1561_v30 = vadd.f32 %v1529_v36, %v1368_v2  ;;  %v3096_v29 = vadd.f32 %v10427_v39, %v2839_v6  ;;  %v2810_v59 = vmul.f32 %v10355_v11, %v14552_v13  ;;  %v10563_v51 = vadd.f32 %v4087_v40, %v3926_v12  ;;  %14553 = vst [vmem:[#allocation90_spill] sm:$0xff] %v10565_v42  ;;  %v14555_v28 = vld [vmem:[#allocation535_spill] sm:$0xff]  ;;  %v14557_v2 = vld [vmem:[#allocation641_spill] sm:$0xff]  ;;  %v14558_v50 = vld [vmem:[#allocation306_spill] sm:$0xff] }
 0x7c5   : > { %5056 = vperm.xlu2 %7028, %v14551_v9   ;;  %v707_v35 = vadd.f32 %v675_v56, %v14554_v3  ;;  %v1178_v61 = vadd.f32 %v10294_v31, %v921_v25  ;;  %v892_v44 = vmul.f32 %v10024_v58, %v14555_v28  ;;  %v2201_v33 = vadd.f32 %v2169_v34, %v2008_v16  ;;  %v14559_v31 = vld [vmem:[#allocation560_spill] sm:$0xff]  ;;  %v14560_v34 = vld [vmem:[#allocation409_spill] sm:$0xff] }
 0x7c6   : > { %v3257_v36 = vmul.f32 %v10448_v23, %v14556_v32  ;;  %v2649_v39 = vadd.f32 %v2617_v20, %v2456_v19  ;;  %v3736_v6 = vadd.f32 %v10487_v52, %v3479_v10  ;;  %v3450_v12 = vmul.f32 %v10451_v27, %v14557_v2  ;;  %v7208_v13 = vld [vmem:[%s7347_s29 + $0x150] sm:$0xff]  ;;  %v14561_v20 = vld [vmem:[#allocation331_spill] sm:$0xff] }
 0x7c7   : > { %v731_v40 = vadd.f32 %v699_v53, %v10110_v60  ;;  %v1339_v56 = vmul.f32 %v10144_v55, %v14558_v50  ;;  %v895_v9 = vadd.f32 %v863_v14, %v702_v26  ;;  %v1532_v25 = vmul.f32 %v10147_v1, %v14559_v31  ;;  %4690 = vperm.xlu0 %7042, %v7208_v13   ;;  %v3999_v26 = vpop.permute.xlu0 %3998  ;;  %v14562_v14 = vld [vmem:[#allocation586_spill] sm:$0xff] }
 0x7c8   : > { %v3897_v16 = vmul.f32 %v10524_v47, %v14560_v34  ;;  %v1818_v19 = vadd.f32 %v10347_v7, %v1561_v30  ;;  %v2842_v52 = vadd.f32 %v2810_v59, %v2649_v39  ;;  %v3289_v10 = vadd.f32 %v3257_v36, %v3096_v29  ;;  %v14563_v13 = vld [vmem:[#allocation630_spill] sm:$0xff]  ;;  %v10592_v7 = vpop.permute.xlu1 %4706  ;;  %v14570_v34 = vld [vmem:[#allocation285_spill] sm:$0xff] }
 0x7c9   : > { %v1979_v3 = vmul.f32 %v10246_v37, %v14561_v20  ;;  %v924_v60 = vadd.f32 %v892_v44, %v731_v40  ;;  %v1371_v53 = vadd.f32 %v1339_v56, %v1178_v61  ;;  %v2459_v28 = vadd.f32 %v10398_v49, %v2201_v33  ;;  %5060 = vperm.xlu1 %7029, %v14563_v13   ;;  %v14565_v30 = vld [vmem:[#allocation358_spill] sm:$0xff]  ;;  %v14567_v33 = vld [vmem:[#allocation631_spill] sm:$0xff] }
 0x7ca   : > { %v2172_v32 = vmul.f32 %v10249_v38, %v14562_v14  ;;  %v3482_v2 = vadd.f32 %v3450_v12, %v3289_v10  ;;  %v3929_v50 = vadd.f32 %v3897_v16, %v3736_v6  ;;  %v4090_v31 = vmul.f32 %v10539_v54, %v3999_v26  ;;  %14564 = vst [vmem:[#allocation93_spill] sm:$0xff] %v10592_v7  ;;  %v14566_v61 = vld [vmem:[#allocation514_spill] sm:$0xff]  ;;  %v14568_v6 = vld [vmem:[#allocation609_spill] sm:$0xff]  ;;  %v10605_v56 = vpop.permute.xlu2 %4845 }
 0x7cb   : > { %v2620_v29 = vmul.f32 %v10350_v17, %v14565_v30  ;;  %v1152_v59 = vadd.f32 %v10117_v8, %v895_v9  ;;  %v868_v49 = vmul.f32 %v10024_v58, %v14566_v61  ;;  %v1564_v44 = vadd.f32 %v1532_v25, %v1371_v53  ;;  %14569 = vst [vmem:[#allocation526_spill] sm:$0xff] %v10605_v56  ;;  %v14571_v9 = vld [vmem:[#allocation385_spill] sm:$0xff]  ;;  %v14572_v10 = vld [vmem:[#allocation538_spill] sm:$0xff]  ;;  %v7209_v30 = vld [vmem:[%s7347_s29 + $0x170] sm:$0xff] }
 0x7cc   : > { %v2011_v36 = vadd.f32 %v1979_v3, %v1818_v19  ;;  %v3099_v39 = vadd.f32 %v10431_v45, %v2842_v52  ;;  %v2813_v12 = vmul.f32 %v10355_v11, %v14568_v6  ;;  %v10603_v40 = vadd.f32 %v4090_v31, %v3929_v50  ;;  %v14573_v3 = vld [vmem:[#allocation646_spill] sm:$0xff]  ;;  %v14574_v26 = vld [vmem:[#allocation309_spill] sm:$0xff]  ;;  %v14576_v61 = vld [vmem:[#allocation563_spill] sm:$0xff] }
 0x7cd   : > { %5064 = vperm.xlu2 %7028, %v14567_v33   ;;  %v1313_v8 = vmul.f32 %v10144_v55, %v14570_v34  ;;  %v3260_v16 = vmul.f32 %v10448_v23, %v14571_v9  ;;  %v1181_v25 = vadd.f32 %v10308_v24, %v924_v60  ;;  %v1506_v19 = vmul.f32 %v10147_v1, %v14572_v10  ;;  %v14575_v24 = vld [vmem:[#allocation412_spill] sm:$0xff]  ;;  %v14578_v6 = vld [vmem:[#allocation589_spill] sm:$0xff]  ;;  %v14680_v56 = vld [vmem:[#allocation26_spill] sm:$0xff] }
 0x7ce   : > { %v2204_v45 = vadd.f32 %v2172_v32, %v2011_v36  ;;  %v2652_v52 = vadd.f32 %v2620_v29, %v2459_v28  ;;  %v3739_v20 = vadd.f32 %v10491_v15, %v3482_v2  ;;  %v3453_v53 = vmul.f32 %v10451_v27, %v14573_v3  ;;  %v14577_v2 = vld [vmem:[#allocation334_spill] sm:$0xff] }
 0x7cf   : > { %v1342_v14 = vmul.f32 %v10144_v55, %v14574_v26  ;;  %v900_v50 = vadd.f32 %v868_v49, %v707_v35  ;;  %v1345_v31 = vadd.f32 %v1313_v8, %v1152_v59  ;;  %v1821_v13 = vadd.f32 %v10367_v18, %v1564_v44  ;;  %4702 = vperm.xlu0 %7042, %v7209_v30   ;;  %v4011_v59 = vpop.permute.xlu0 %4010  ;;  %v14579_v8 = vld [vmem:[#allocation634_spill] sm:$0xff] }
 0x7d0   : > { %v3900_v60 = vmul.f32 %v10524_v47, %v14575_v24  ;;  %v1535_v28 = vmul.f32 %v10147_v1, %v14576_v61  ;;  %v2845_v32 = vadd.f32 %v2813_v12, %v2652_v52  ;;  %v3292_v15 = vadd.f32 %v3260_v16, %v3099_v39  ;;  %v10632_v9 = vpop.permute.xlu1 %4718  ;;  %v14581_v39 = vld [vmem:[#allocation153_spill] sm:$0xff]  ;;  %v14583_v52 = vld [vmem:[#allocation635_spill] sm:$0xff]  ;;  %v14588_v24 = vld [vmem:[#allocation388_spill] sm:$0xff] }
 0x7d1   : > { %v1982_v29 = vmul.f32 %v10246_v37, %v14577_v2  ;;  %v1538_v33 = vadd.f32 %v1506_v19, %v1345_v31  ;;  %v1374_v36 = vadd.f32 %v1342_v14, %v1181_v25  ;;  %v2175_v35 = vmul.f32 %v10249_v38, %v14578_v6  ;;  %5072 = vperm.xlu1 %7029, %v14579_v8   ;;  %v14582_v16 = vld [vmem:[#allocation361_spill] sm:$0xff]  ;;  %v14586_v14 = vld [vmem:[#allocation288_spill] sm:$0xff]  ;;  %v14590_v2 = vld [vmem:[#allocation311_spill] sm:$0xff] }
 0x7d2   : > { %v2462_v18 = vadd.f32 %v10406_v48, %v2204_v45  ;;  %v3485_v49 = vadd.f32 %v3453_v53, %v3292_v15  ;;  %v3932_v44 = vadd.f32 %v3900_v60, %v3739_v20  ;;  %v4093_v34 = vmul.f32 %v10539_v54, %v4011_v59  ;;  %14580 = vst [vmem:[#allocation96_spill] sm:$0xff] %v10632_v9  ;;  %v14584_v20 = vld [vmem:[#allocation612_spill] sm:$0xff]  ;;  %v10645_v26 = vpop.permute.xlu2 %4860  ;;  %v7210_v6 = vld [vmem:[%s7347_s29 + $0x198] sm:$0xff] }
 0x7d3   : > { %v3710_v12 = vmul.f32 %v10462_v57, %v14581_v39  ;;  %v2623_v25 = vmul.f32 %v10350_v17, %v14582_v16  ;;  %v1157_v10 = vadd.f32 %v10134_v46, %v900_v50  ;;  %v2014_v19 = vadd.f32 %v1982_v29, %v1821_v13  ;;  %14585 = vst [vmem:[#allocation99_spill] sm:$0xff] %v10645_v26  ;;  %v14587_v46 = vld [vmem:[#allocation541_spill] sm:$0xff]  ;;  %v14669_v26 = vld [vmem:[#allocation12_spill] sm:$0xff] }
 0x7d4   : > { %v1567_v48 = vadd.f32 %v1535_v28, %v1374_v36  ;;  %v3102_v45 = vadd.f32 %v10459_v62, %v2845_v32  ;;  %v2816_v3 = vmul.f32 %v10355_v11, %v14584_v20  ;;  %v10643_v53 = vadd.f32 %v4093_v34, %v3932_v44  ;;  %v14589_v32 = vld [vmem:[#allocation129_spill] sm:$0xff] }
 0x7d5   : > { %5076 = vperm.xlu2 %7028, %v14583_v52   ;;  %v1318_v31 = vmul.f32 %v10144_v55, %v14586_v14  ;;  %v1795_v30 = vadd.f32 %v10312_v0, %v1538_v33  ;;  %v1511_v50 = vmul.f32 %v10147_v1, %v14587_v46  ;;  %v2207_v13 = vadd.f32 %v2175_v35, %v2014_v19  ;;  %v14591_v0 = vld [vmem:[#allocation566_spill] sm:$0xff]  ;;  %v14592_v35 = vld [vmem:[#allocation415_spill] sm:$0xff] }
 0x7d6   : > { %v3263_v62 = vmul.f32 %v10448_v23, %v14588_v24  ;;  %v2655_v60 = vadd.f32 %v2623_v25, %v2462_v18  ;;  %v3742_v61 = vadd.f32 %v3710_v12, %v3485_v49  ;;  %v3456_v28 = vmul.f32 %v10451_v27, %v10092_v21  ;;  %v14593_v21 = vld [vmem:[#allocation337_spill] sm:$0xff]  ;;  %v14594_v12 = vld [vmem:[#allocation523_spill] sm:$0xff]  ;;  %v14601_v24 = vld [vmem:[#allocation640_spill] sm:$0xff] }
 0x7d7   : > { %v3073_v15 = vmul.f32 %v10392_v22, %v14589_v32  ;;  %v1956_v29 = vmul.f32 %v10246_v37, %v14590_v2  ;;  %v1350_v36 = vadd.f32 %v1318_v31, %v1157_v10  ;;  %v2149_v33 = vmul.f32 %v10249_v38, %v14591_v0  ;;  %4714 = vperm.xlu0 %7042, %v7210_v6   ;;  %v4023_v25 = vpop.permute.xlu0 %4022  ;;  %v14595_v10 = vld [vmem:[#allocation591_spill] sm:$0xff]  ;;  %v14606_v6 = vld [vmem:[#allocation78_spill] sm:$0xff] }
 0x7d8   : > { %v3903_v59 = vmul.f32 %v10524_v47, %v14592_v35  ;;  %v1824_v18 = vadd.f32 %v10371_v63, %v1567_v48  ;;  %v2848_v49 = vadd.f32 %v2816_v3, %v2655_v60  ;;  %v3295_v44 = vadd.f32 %v3263_v62, %v3102_v45  ;;  %v14596_v31 = vld [vmem:[#allocation639_spill] sm:$0xff]  ;;  %v14598_v48 = vld [vmem:[#allocation16_spill] sm:$0xff]  ;;  %v10680_v62 = vpop.permute.xlu1 %4830  ;;  %v14607_v35 = vld [vmem:[#allocation41_spill] sm:$0xff] }
 0x7d9   : > { %v1985_v34 = vmul.f32 %v10246_v37, %v14593_v21  ;;  %v1543_v8 = vadd.f32 %v1511_v50, %v1350_v36  ;;  %v1988_v39 = vadd.f32 %v1956_v29, %v1795_v30  ;;  %v2465_v16 = vadd.f32 %v14594_v12, %v2207_v13  ;;  %5084 = vperm.xlu1 %7029, %v14596_v31   ;;  %v14597_v63 = vld [vmem:[#allocation51_spill] sm:$0xff]  ;;  %v14599_v3 = vld [vmem:[#allocation156_spill] sm:$0xff]  ;;  %v14605_v36 = vld [vmem:[#allocation46_spill] sm:$0xff] }
 0x7da   : > { %v2178_v19 = vmul.f32 %v10249_v38, %v14595_v10  ;;  %v3488_v52 = vadd.f32 %v3456_v28, %v3295_v44  ;;  %v3935_v20 = vadd.f32 %v3903_v59, %v3742_v61  ;;  %v4096_v14 = vmul.f32 %v10539_v54, %v4023_v25  ;;  %v14600_v50 = vld [vmem:[#allocation364_spill] sm:$0xff]  ;;  %14602 = vst [vmem:[#allocation102_spill] sm:$0xff] %v10680_v62  ;;  %v14603_v28 = vld [vmem:[#allocation615_spill] sm:$0xff]  ;;  %v10686_v29 = vpop.permute.xlu2 %4875  ;;  %v14611_v10 = vld [vmem:[#allocation105_spill] sm:$0xff] }
 0x7db   : > { %v1768_v45 = vmul.f32 %v14598_v48, %v14597_v63  ;;  %v3713_v46 = vmul.f32 %v10462_v57, %v14599_v3  ;;  %v2626_v30 = vmul.f32 %v10350_v17, %v14600_v50  ;;  %v2181_v13 = vadd.f32 %v2149_v33, %v1988_v39  ;;  %14604 = vst [vmem:[#allocation114_spill] sm:$0xff] %v10686_v29  ;;  %v14608_v59 = vld [vmem:[#allocation391_spill] sm:$0xff]  ;;  %v7211_v3 = vld [vmem:[%s7347_s29 + $0x39] sm:$0xff] }
 0x7dc   : > { %v2017_v60 = vadd.f32 %v1985_v34, %v1824_v18  ;;  %v3105_v61 = vadd.f32 %v3073_v15, %v2848_v49  ;;  %v2819_v32 = vmul.f32 %v10355_v11, %v14603_v28  ;;  %v10684_v2 = vadd.f32 %v4096_v14, %v3935_v20  ;;  %v14609_v34 = vld [vmem:[#allocation15_spill] sm:$0xff]  ;;  %v14612_v14 = vld [vmem:[#allocation314_spill] sm:$0xff]  ;;  %v14668_v62 = vld [vmem:[#allocation165_spill] sm:$0xff] }
 0x7dd   : > { %5088 = vperm.xlu2 %7028, %v14601_v24   ;;  %v697_v0 = vmul.f32 %v9977_v43, %v14605_v36  ;;  %v2407_v33 = vmul.f32 %v14607_v35, %v14606_v6  ;;  %v3266_v44 = vmul.f32 %v10448_v23, %v14608_v59  ;;  %v1800_v21 = vadd.f32 %v1768_v45, %v1543_v8  ;;  %v14610_v12 = vld [vmem:[#allocation47_spill] sm:$0xff]  ;;  %v14613_v50 = vld [vmem:[#allocation418_spill] sm:$0xff]  ;;  %v14616_v24 = vld [vmem:[#allocation340_spill] sm:$0xff] }
 0x7de   : > { %v2210_v18 = vadd.f32 %v2178_v19, %v2017_v60  ;;  %v2658_v15 = vadd.f32 %v2626_v30, %v2465_v16  ;;  %v3745_v49 = vadd.f32 %v3713_v46, %v3488_v52  ;;  %v3459_v39 = vmul.f32 %v10451_v27, %v14609_v34  ;;  %v14614_v16 = vld [vmem:[#allocation569_spill] sm:$0xff]  ;;  %v14615_v46 = vld [vmem:[#allocation132_spill] sm:$0xff]  ;;  %v14617_v36 = vld [vmem:[#allocation594_spill] sm:$0xff] }
 0x7df   : > { %v867_v25 = vmul.f32 %v10024_v58, %v14610_v12  ;;  %v2436_v20 = vmul.f32 %v14607_v35, %v14611_v10  ;;  %v1961_v31 = vmul.f32 %v10246_v37, %v14612_v14  ;;  %v2439_v63 = vadd.f32 %v2407_v33, %v2181_v13  ;;  %5241 = vperm.xlu0 %7042, %v7211_v3   ;;  %v4035_v6 = vpop.permute.xlu0 %4034  ;;  %v14618_v10 = vld [vmem:[#allocation644_spill] sm:$0xff]  ;;  %v14621_v14 = vld [vmem:[#allocation367_spill] sm:$0xff]  ;;  %v14622_v3 = vld [vmem:[#allocation645_spill] sm:$0xff] }
 0x7e0   : > { %v3906_v8 = vmul.f32 %v10524_v47, %v14613_v50  ;;  %v2154_v19 = vmul.f32 %v10249_v38, %v14614_v16  ;;  %v2851_v52 = vadd.f32 %v2819_v32, %v2658_v15  ;;  %v3298_v45 = vadd.f32 %v3266_v44, %v3105_v61  ;;  %v14619_v32 = vld [vmem:[#allocation49_spill] sm:$0xff]  ;;  %v14620_v44 = vld [vmem:[#allocation159_spill] sm:$0xff]  ;;  %v10722_v50 = vpop.permute.xlu1 %4840 }
 0x7e1   : > { %v3076_v30 = vmul.f32 %v10392_v22, %v14615_v46  ;;  %v2600_v60 = vmul.f32 %v10350_v17, %v14616_v24  ;;  %v1993_v28 = vadd.f32 %v1961_v31, %v1800_v21  ;;  %v2793_v13 = vmul.f32 %v10355_v11, %v14617_v36  ;;  %5096 = vperm.xlu1 %7029, %v14618_v10   ;;  %v14626_v16 = vld [vmem:[#allocation5_spill] sm:$0xff]  ;;  %v14627_v46 = vld [vmem:[#allocation11_spill] sm:$0xff] }
 0x7e2   : > { %v2468_v33 = vadd.f32 %v2436_v20, %v2210_v18  ;;  %v3491_v59 = vadd.f32 %v3459_v39, %v3298_v45  ;;  %v3938_v34 = vadd.f32 %v3906_v8, %v3745_v49  ;;  %v4099_v12 = vmul.f32 %v10539_v54, %v4035_v6  ;;  %14623 = vst [vmem:[#allocation298_spill] sm:$0xff] %v10722_v50  ;;  %v14624_v39 = vld [vmem:[#allocation618_spill] sm:$0xff]  ;;  %v14630_v6 = vld [vmem:[#allocation27_spill] sm:$0xff] }
 0x7e3   : > { %v700_v61 = vmul.f32 %v9977_v43, %v14619_v32  ;;  %v3716_v15 = vmul.f32 %v10462_v57, %v14620_v44  ;;  %v2629_v21 = vmul.f32 %v10350_v17, %v14621_v14  ;;  %v2632_v31 = vadd.f32 %v2600_v60, %v2439_v63  ;;  %v10728_v43 = vpop.permute.xlu2 %4890  ;;  %v14628_v63 = vld [vmem:[#allocation81_spill] sm:$0xff]  ;;  %v14634_v14 = vld [vmem:[#allocation108_spill] sm:$0xff] }
 0x7e4   : > { %v2186_v18 = vadd.f32 %v2154_v19, %v1993_v28  ;;  %v3108_v49 = vadd.f32 %v3076_v30, %v2851_v52  ;;  %v2822_v20 = vmul.f32 %v10355_v11, %v14624_v39  ;;  %v10726_v8 = vadd.f32 %v4099_v12, %v3938_v34  ;;  %14625 = vst [vmem:[#allocation551_spill] sm:$0xff] %v10728_v43  ;;  %v14629_v19 = vld [vmem:[#allocation394_spill] sm:$0xff]  ;;  %v14636_v39 = vld [vmem:[#allocation53_spill] sm:$0xff] }
 0x7e5   : > { %5100 = vperm.xlu2 %7028, %v14622_v3   ;;  %v10731_v45 = vadd.f32 %v697_v0, %v14626_v16  ;;  %v10734_v24 = vadd.f32 %v867_v25, %v14627_v46  ;;  %v2412_v60 = vmul.f32 %v14607_v35, %v14628_v63  ;;  %v2825_v36 = vadd.f32 %v2793_v13, %v2632_v31  ;;  %v14631_v12 = vld [vmem:[#allocation6_spill] sm:$0xff]  ;;  %v14633_v25 = vld [vmem:[#allocation52_spill] sm:$0xff]  ;;  %v14635_v3 = vld [vmem:[#allocation421_spill] sm:$0xff] }
 0x7e6   : > { %v3269_v52 = vmul.f32 %v10448_v23, %v14629_v19  ;;  %v2661_v30 = vadd.f32 %v2629_v21, %v2468_v33  ;;  %v3748_v28 = vadd.f32 %v3716_v15, %v3491_v59  ;;  %v3462_v34 = vmul.f32 %v10451_v27, %v14630_v6  ;;  %v14632_v0 = vld [vmem:[#allocation50_spill] sm:$0xff]  ;;  %v14637_v16 = vld [vmem:[#allocation135_spill] sm:$0xff] }
 0x7e7   : > { %v10743_v10 = vadd.f32 %v700_v61, %v14631_v12  ;;  %v870_v32 = vmul.f32 %v10024_v58, %v14632_v0  ;;  %v864_v44 = vmul.f32 %v10024_v58, %v14633_v25  ;;  %v3050_v13 = vmul.f32 %v10392_v22, %v14634_v14  ;;  %v7212_v31 = vld [vmem:[%s7347_s29 + $0x79] sm:$0xff]  ;;  %v14638_v63 = vld [vmem:[#allocation343_spill] sm:$0xff]  ;;  %v4047_v12 = vpop.permute.xlu0 %4046 }
 0x7e8   : > { %5261 = vperm.xlu0 %7042, %v7212_v31   ;;  %v3909_v33 = vmul.f32 %v10524_v47, %v14635_v3  ;;  %v2444_v59 = vadd.f32 %v2412_v60, %v2186_v18  ;;  %v2854_v15 = vadd.f32 %v2822_v20, %v2661_v30  ;;  %v3301_v21 = vadd.f32 %v3269_v52, %v3108_v49  ;;  %v14639_v0 = vld [vmem:[#allocation597_spill] sm:$0xff]  ;;  %v14640_v20 = vld [vmem:[#allocation2_spill] sm:$0xff]  ;;  %v14641_v49 = vld [vmem:[#allocation55_spill] sm:$0xff] }
 0x7e9   : > { %v873_v61 = vmul.f32 %v10024_v58, %v14636_v39  ;;  %v3079_v46 = vmul.f32 %v10392_v22, %v14637_v16  ;;  %v2605_v19 = vmul.f32 %v10350_v17, %v14638_v63  ;;  %v3082_v6 = vadd.f32 %v3050_v13, %v2825_v36  ;;  %5108 = vperm.xlu1 %7029, %v14640_v20   ;;  %v14642_v52 = vld [vmem:[#allocation56_spill] sm:$0xff]  ;;  %v14643_v3 = vld [vmem:[#allocation162_spill] sm:$0xff] }
 0x7ea   : > { %v2798_v25 = vmul.f32 %v10355_v11, %v14639_v0  ;;  %v3494_v14 = vadd.f32 %v3462_v34, %v3301_v21  ;;  %v3941_v31 = vadd.f32 %v3909_v33, %v3748_v28  ;;  %v4102_v18 = vmul.f32 %v10539_v54, %v4047_v12  ;;  %v14644_v36 = vld [vmem:[#allocation370_spill] sm:$0xff]  ;;  %v14645_v16 = vld [vmem:[#allocation4_spill] sm:$0xff]  ;;  %v10773_v34 = vpop.permute.xlu1 %4855 }
 0x7eb   : > { %v866_v60 = vmul.f32 %v10024_v58, %v14641_v49  ;;  %v876_v30 = vmul.f32 %v10024_v58, %v14642_v52  ;;  %v3719_v39 = vmul.f32 %v10462_v57, %v14643_v3  ;;  %v3243_v13 = vmul.f32 %v10448_v23, %v14644_v36  ;;  %14646 = vst [vmem:[#allocation117_spill] sm:$0xff] %v10773_v34  ;;  %v14647_v21 = vld [vmem:[#allocation622_spill] sm:$0xff]  ;;  %v10779_v0 = vpop.permute.xlu2 %4905  ;;  %v14650_v52 = vld [vmem:[#allocation17_spill] sm:$0xff] }
 0x7ec   : > { %v2637_v28 = vadd.f32 %v2605_v19, %v2444_v59  ;;  %v3111_v33 = vadd.f32 %v3079_v46, %v2854_v15  ;;  %v3436_v63 = vmul.f32 %v10451_v27, %v14647_v21  ;;  %v10777_v12 = vadd.f32 %v4102_v18, %v3941_v31  ;;  %14648 = vst [vmem:[#allocation120_spill] sm:$0xff] %v10779_v0  ;;  %v14649_v20 = vld [vmem:[#allocation14_spill] sm:$0xff]  ;;  %v14651_v36 = vld [vmem:[#allocation9_spill] sm:$0xff]  ;;  %v14654_v18 = vld [vmem:[#allocation19_spill] sm:$0xff] }
 0x7ed   : > { %5112 = vperm.xlu2 %7028, %v14645_v16   ;;  %v10782_v49 = vadd.f32 %v870_v32, %v14649_v20  ;;  %v10785_v3 = vadd.f32 %v864_v44, %v14650_v52  ;;  %v10788_v16 = vadd.f32 %v873_v61, %v14651_v36  ;;  %v14652_v34 = vld [vmem:[#allocation397_spill] sm:$0xff]  ;;  %v3275_v46 = vadd.f32 %v3243_v13, %v3082_v6  ;;  %v14653_v21 = vld [vmem:[#allocation42_spill] sm:$0xff]  ;;  %v14657_v61 = vld [vmem:[#allocation59_spill] sm:$0xff] }
 0x7ee   : > { %v3272_v59 = vmul.f32 %v10448_v23, %v14652_v34  ;;  %v2830_v15 = vadd.f32 %v2798_v25, %v2637_v28  ;;  %v3751_v19 = vadd.f32 %v3719_v39, %v3494_v14  ;;  %v3465_v31 = vmul.f32 %v10451_v27, %v14653_v21  ;;  %v14655_v32 = vld [vmem:[#allocation10_spill] sm:$0xff]  ;;  %v14658_v25 = vld [vmem:[#allocation111_spill] sm:$0xff]  ;;  %v14659_v14 = vld [vmem:[#allocation424_spill] sm:$0xff] }
 0x7ef   : > { %v10795_v0 = vadd.f32 %v866_v60, %v14654_v18  ;;  %v10798_v20 = vadd.f32 %v876_v30, %v14655_v32  ;;  %v14656_v44 = vld [vmem:[#allocation58_spill] sm:$0xff]  ;;  %v879_v36 = vmul.f32 %v10024_v58, %v14657_v61  ;;  %v3055_v6 = vmul.f32 %v10392_v22, %v14658_v25  ;;  %v14660_v34 = vld [vmem:[#allocation61_spill] sm:$0xff]  ;;  %v14662_v18 = vld [vmem:[#allocation64_spill] sm:$0xff]  ;;  %v4059_v61 = vpop.permute.xlu0 %4058 }
 0x7f0   : > { %v869_v52 = vmul.f32 %v10024_v58, %v14656_v44  ;;  %v7213_v43 = vld [vmem:[%s7347_s29 + $0x99] sm:$0xff]  ;;  %v3912_v39 = vmul.f32 %v10524_v47, %v14659_v14  ;;  %v3468_v13 = vadd.f32 %v3436_v63, %v3275_v46  ;;  %v3304_v60 = vadd.f32 %v3272_v59, %v3111_v33  ;;  %v14664_v63 = vld [vmem:[#allocation20_spill] sm:$0xff] }
 0x7f1   : > { %5273 = vperm.xlu0 %7042, %v7213_v43   ;;  %v872_v30 = vmul.f32 %v10024_v58, %v14660_v34  ;;  %v14661_v28 = vld [vmem:[#allocation62_spill] sm:$0xff]  ;;  %v875_v32 = vmul.f32 %v10024_v58, %v14662_v18  ;;  %v3087_v50 = vadd.f32 %v3055_v6, %v2830_v15  ;;  %v4105_v14 = vmul.f32 %v10539_v54, %v4059_v61  ;;  %v14666_v46 = vld [vmem:[#allocation65_spill] sm:$0xff]  ;;  %v14697_v22 = vld [vmem:[#allocation32_spill] sm:$0xff] }
 0x7f2   : > { %v882_v21 = vmul.f32 %v10024_v58, %v14661_v28  ;;  %v14663_v44 = vld [vmem:[#allocation138_spill] sm:$0xff]  ;;  %v3497_v25 = vadd.f32 %v3465_v31, %v3304_v60  ;;  %v3944_v29 = vadd.f32 %v3912_v39, %v3751_v19  ;;  %5120 = vperm.xlu1 %7029, %v14664_v63   ;;  %v885_v34 = vmul.f32 %v10024_v58, %v14666_v46  ;;  %v14667_v28 = vld [vmem:[#allocation67_spill] sm:$0xff]  ;;  %v10829_v15 = vpop.permute.xlu1 %4870  ;;  %v14671_v19 = vld [vmem:[#allocation373_spill] sm:$0xff] }
 0x7f3   : > { %v3693_v43 = vmul.f32 %v10462_v57, %v14663_v44  ;;  %v14665_v33 = vld [vmem:[#allocation22_spill] sm:$0xff]  ;;  %v878_v18 = vmul.f32 %v10024_v58, %v14667_v28  ;;  %v3722_v44 = vmul.f32 %v10462_v57, %v14668_v62  ;;  %14670 = vst [vmem:[#allocation123_spill] sm:$0xff] %v10829_v15  ;;  %v3248_v31 = vmul.f32 %v10448_v23, %v14671_v19  ;;  %v14672_v39 = vld [vmem:[#allocation627_spill] sm:$0xff]  ;;  %v10837_v61 = vpop.permute.xlu2 %4920  ;;  %v14674_v63 = vld [vmem:[#allocation13_spill] sm:$0xff] }
 0x7f4   : > { %v10820_v59 = vadd.f32 %v869_v52, %v14665_v33  ;;  %v3441_v52 = vmul.f32 %v10451_v27, %v14672_v39  ;;  %v10835_v60 = vadd.f32 %v4105_v14, %v3944_v29  ;;  %14673 = vst [vmem:[#allocation322_spill] sm:$0xff] %v10837_v61  ;;  %v10840_v33 = vadd.f32 %v879_v36, %v14674_v63  ;;  %v14675_v62 = vld [vmem:[#allocation23_spill] sm:$0xff]  ;;  %v14677_v15 = vld [vmem:[#allocation21_spill] sm:$0xff]  ;;  %v14681_v63 = vld [vmem:[#allocation28_spill] sm:$0xff] }
 0x7f5   : > { %5124 = vperm.xlu2 %7028, %v14669_v26   ;;  %v3725_v6 = vadd.f32 %v3693_v43, %v3468_v13  ;;  %v10843_v46 = vadd.f32 %v872_v30, %v14675_v62  ;;  %v14676_v26 = vld [vmem:[#allocation24_spill] sm:$0xff]  ;;  %v10849_v19 = vadd.f32 %v875_v32, %v14677_v15  ;;  %v3280_v39 = vadd.f32 %v3248_v31, %v3087_v50  ;;  %v14679_v14 = vld [vmem:[#allocation63_spill] sm:$0xff] }
 0x7f6   : > { %v10846_v28 = vadd.f32 %v882_v21, %v14676_v26  ;;  %v14678_v13 = vld [vmem:[#allocation400_spill] sm:$0xff]  ;;  %v3754_v29 = vadd.f32 %v3722_v44, %v3497_v25  ;;  %v4079_v9 = vmul.f32 %v10539_v54, %v14679_v14  ;;  %v10856_v36 = vadd.f32 %v885_v34, %v14680_v56  ;;  %v14683_v26 = vld [vmem:[#allocation70_spill] sm:$0xff]  ;;  %v14685_v25 = vld [vmem:[#allocation427_spill] sm:$0xff] }
 0x7f7   : > { %v3886_v43 = vmul.f32 %v10524_v47, %v14678_v13  ;;  %v10859_v30 = vadd.f32 %v878_v18, %v14681_v63  ;;  %v14682_v62 = vld [vmem:[#allocation68_spill] sm:$0xff]  ;;  %v881_v32 = vmul.f32 %v10024_v58, %v14683_v26  ;;  %v7214_v15 = vld [vmem:[%s7347_s29 + $0xc1] sm:$0xff]  ;;  %v10867_v50 = vperm.slane %v10513_v5, 2  ;;  %v14687_v13 = vld [vmem:[#allocation73_spill] sm:$0xff]  ;;  %v4071_v42 = vpop.permute.xlu0 %4070 }
 0x7f8   : > { %v888_v21 = vmul.f32 %v10024_v58, %v14682_v62  ;;  %v3915_v44 = vmul.f32 %v10524_v47, %v14685_v25  ;;  %v3473_v31 = vadd.f32 %v3441_v52, %v3280_v39  ;;  %v14686_v34 = vld [vmem:[#allocation71_spill] sm:$0xff]  ;;  %v884_v14 = vmul.f32 %v10024_v58, %v14687_v13  ;;  %v14688_v63 = vld [vmem:[#allocation74_spill] sm:$0xff]  ;;  %v14690_v26 = vld [vmem:[#allocation76_spill] sm:$0xff] }
 0x7f9   : > { %5285 = vperm.xlu0 %7042, %v7214_v15   ;;  %14684 = vst [vmem:[#allocation577_spill] sm:$0xff] %v10867_v50  ;;  %v3918_v56 = vadd.f32 %v3886_v43, %v3725_v6  ;;  %v891_v18 = vmul.f32 %v10024_v58, %v14686_v34  ;;  %v14689_v62 = vld [vmem:[#allocation3_spill] sm:$0xff]  ;;  %v887_v15 = vmul.f32 %v10024_v58, %v14690_v26  ;;  %v14693_v43 = vld [vmem:[#allocation29_spill] sm:$0xff]  ;;  %v14696_v26 = vld [vmem:[#allocation80_spill] sm:$0xff] }
 0x7fa   : > { %v1119_v7 = vmul.f32 %v14689_v62, %v14688_v63  ;;  %v3698_v61 = vmul.f32 %v10462_v57, %v14691_v41  ;;  %v3947_v25 = vadd.f32 %v3915_v44, %v3754_v29  ;;  %v4108_v6 = vmul.f32 %v10539_v54, %v4071_v42  ;;  %v14692_v52 = vld [vmem:[#allocation31_spill] sm:$0xff]  ;;  %v14694_v34 = vld [vmem:[#allocation77_spill] sm:$0xff]  ;;  %v10893_v41 = vpop.permute.xlu1 %4885  ;;  %v14707_v57 = vld [vmem:[#allocation40_spill] sm:$0xff] }
 0x7fb   : > { %v4111_v27 = vadd.f32 %v4079_v9, %v3918_v56  ;;  %5132 = vperm.xlu1 %7029, %v14692_v52   ;;  %v10884_v39 = vadd.f32 %v888_v21, %v14693_v43  ;;  %v1122_v13 = vmul.f32 %v14689_v62, %v14694_v34  ;;  %v14695_v63 = vld [vmem:[#allocation79_spill] sm:$0xff]  ;;  %v1124_v4 = vmul.f32 %v14689_v62, %v14696_v26  ;;  %v14699_v9 = vld [vmem:[#allocation168_spill] sm:$0xff]  ;;  %v10902_v56 = vpop.permute.xlu2 %4935  ;;  %v14703_v52 = vld [vmem:[#allocation34_spill] sm:$0xff] }
 0x7fc   : > { %v890_v23 = vmul.f32 %v10024_v58, %v14695_v63  ;;  %14698 = vst [vmem:[#allocation276_spill] sm:$0xff] %v10893_v41  ;;  %v4337_v42 = vmul.f32 %v10867_v50, %v14699_v9  ;;  %v10898_v29 = vperm.slane %v10513_v5, 3  ;;  %v3730_v21 = vadd.f32 %v3698_v61, %v3473_v31  ;;  %v14704_v34 = vld [vmem:[#allocation35_spill] sm:$0xff]  ;;  %v14706_v41 = vld [vmem:[#allocation37_spill] sm:$0xff] }
 0x7fd   : > { %5136 = vperm.xlu2 %7028, %v14697_v22   ;;  %v10900_v44 = vadd.f32 %v4108_v6, %v3947_v25  ;;  %14702 = vst [vmem:[#allocation529_spill] sm:$0xff] %v10902_v56  ;;  %v10905_v43 = vadd.f32 %v881_v32, %v14703_v52  ;;  %v10908_v63 = vadd.f32 %v891_v18, %v14704_v34  ;;  %v14705_v22 = vld [vmem:[#allocation33_spill] sm:$0xff]  ;;  %v14708_v61 = vld [vmem:[#allocation403_spill] sm:$0xff]  ;;  %v14709_v6 = vld [vmem:[#allocation574_spill] sm:$0xff] }
 0x7fe   : > { %14700 = vst [vmem:[#allocation349_spill] sm:$0xff] %v10898_v29  ;;  %v10911_v26 = vadd.f32 %v884_v14, %v14705_v22  ;;  %v10914_v9 = vadd.f32 %v1119_v7, %v14706_v41  ;;  %v10917_v11 = vadd.f32 %v887_v15, %v14707_v57  ;;  %v3891_v31 = vmul.f32 %v10524_v47, %v14708_v61  ;;  %v14710_v52 = vld [vmem:[#allocation54_spill] sm:$0xff]  ;;  %v14712_v41 = vld [vmem:[#allocation83_spill] sm:$0xff]  ;;  %v14717_v61 = vld [vmem:[#allocation88_spill] sm:$0xff] }
 0x7ff   : > { %14701 = vst [vmem:[#allocation126_spill] sm:$0xff] %v10900_v44  ;;  %v4369_v25 = vadd.f32 %v4337_v42, %v4111_v27  ;;  %v4084_v32 = vmul.f32 %v10539_v54, %v14709_v6  ;;  %v10924_v56 = vadd.f32 %v1122_v13, %v14710_v52  ;;  %v10927_v18 = vadd.f32 %v890_v23, %v10731_v45  ;;  %v14711_v7 = vld [vmem:[#allocation82_spill] sm:$0xff]  ;;  %v14715_v23 = vld [vmem:[#allocation85_spill] sm:$0xff]  ;;  %v14725_v44 = vld [vmem:[#allocation36_spill] sm:$0xff] }
 0x800   : > { %v10930_v14 = vadd.f32 %v1124_v4, %v10734_v24  ;;  %v893_v57 = vmul.f32 %v10024_v58, %v14711_v7  ;;  %v7215_v15 = vld [vmem:[%s7347_s29 + $0xe1] sm:$0xff]  ;;  %v1127_v27 = vmul.f32 %v14689_v62, %v14712_v41  ;;  %v10940_v13 = vperm.slane %v10513_v5, 4  ;;  %v14718_v6 = vld [vmem:[#allocation89_spill] sm:$0xff]  ;;  %v4599_v7 = vpop.permute.xlu0 %4598 }
 0x801   : > { %5297 = vperm.xlu0 %7042, %v7215_v15   ;;  %v14713_v42 = vld [vmem:[#allocation430_spill] sm:$0xff]  ;;  %v3923_v22 = vadd.f32 %v3891_v31, %v3730_v21  ;;  %v1121_v45 = vmul.f32 %v14689_v62, %v14715_v23  ;;  %v1123_v58 = vmul.f32 %v14689_v62, %v14717_v61  ;;  %v1133_v52 = vmul.f32 %v14689_v62, %v14718_v6  ;;  %v14719_v15 = vld [vmem:[#allocation91_spill] sm:$0xff]  ;;  %v14721_v23 = vld [vmem:[#allocation92_spill] sm:$0xff] }
 0x802   : > { %v4530_v34 = vmul.f32 %v10898_v29, %v14713_v42  ;;  %14714 = vst [vmem:[#allocation376_spill] sm:$0xff] %v10940_v13  ;;  %v14716_v4 = vld [vmem:[#allocation86_spill] sm:$0xff]  ;;  %v1126_v41 = vmul.f32 %v14689_v62, %v14719_v15  ;;  %v4723_v21 = vmul.f32 %v10940_v13, %v4599_v7  ;;  %v14720_v31 = vld [vmem:[#allocation43_spill] sm:$0xff]  ;;  %v1136_v54 = vmul.f32 %v14689_v62, %v14721_v23  ;;  %v14724_v6 = vld [vmem:[#allocation97_spill] sm:$0xff] }
 0x803   : > { %v1130_v24 = vmul.f32 %v14689_v62, %v14716_v4  ;;  %v4116_v42 = vadd.f32 %v4084_v32, %v3923_v22  ;;  %5144 = vperm.xlu1 %7029, %v14720_v31   ;;  %v14722_v4 = vld [vmem:[#allocation94_spill] sm:$0xff]  ;;  %v14723_v61 = vld [vmem:[#allocation95_spill] sm:$0xff]  ;;  %v1132_v35 = vmul.f32 %v14689_v62, %v14724_v6  ;;  %v10963_v32 = vpop.permute.xlu1 %4900  ;;  %v14728_v22 = vld [vmem:[#allocation100_spill] sm:$0xff]  ;;  %v1153_v6 = vadd.f32 %v1121_v45, %v10785_v3 }
 0x804   : > { %v4562_v5 = vadd.f32 %v4530_v34, %v4369_v25  ;;  %v1129_v47 = vmul.f32 %v14689_v62, %v14722_v4  ;;  %v1139_v17 = vmul.f32 %v14689_v62, %v14723_v61  ;;  %14726 = vst [vmem:[#allocation258_spill] sm:$0xff] %v10963_v32  ;;  %v14727_v25 = vld [vmem:[#allocation98_spill] sm:$0xff]  ;;  %v1135_v7 = vmul.f32 %v14689_v62, %v14728_v22  ;;  %v14729_v15 = vld [vmem:[#allocation171_spill] sm:$0xff]  ;;  %v10973_v4 = vpop.permute.xlu2 %4950  ;;  %v14737_v45 = vld [vmem:[#allocation109_spill] sm:$0xff] }
 0x805   : > { %5148 = vperm.xlu2 %7028, %v14725_v44   ;;  %v1142_v34 = vmul.f32 %v14689_v62, %v14727_v25  ;;  %v4342_v31 = vmul.f32 %v10867_v50, %v14729_v15  ;;  %14730 = vst [vmem:[#allocation300_spill] sm:$0xff] %v10973_v4  ;;  %v925_v61 = vadd.f32 %v893_v57, %v10743_v10 }
 0x806   : > { %v10971_v23 = vadd.f32 %v4723_v21, %v4562_v5  ;;  %v1159_v44 = vadd.f32 %v1127_v27, %v10782_v49  ;;  %v1162_v32 = vadd.f32 %v1130_v24, %v10788_v16  ;;  %v10980_v25 = vadd.f32 %v1123_v58, %v10795_v0  ;;  %v7216_v0 = vld [vmem:[%s7347_s29 + $0x109] sm:$0xff]  ;;  %v14738_v58 = vld [vmem:[#allocation110_spill] sm:$0xff] }
 0x807   : > { %v10983_v22 = vadd.f32 %v1133_v52, %v10798_v20  ;;  %v10986_v15 = vadd.f32 %v1126_v41, %v10820_v59  ;;  %v4374_v5 = vadd.f32 %v4342_v31, %v4116_v42  ;;  %v10989_v21 = vadd.f32 %v1136_v54, %v10840_v33  ;;  %v14731_v59 = vld [vmem:[#allocation101_spill] sm:$0xff] }
 0x808   : > { %v10992_v10 = vadd.f32 %v1129_v47, %v10843_v46  ;;  %v10995_v49 = vadd.f32 %v1139_v17, %v10846_v28  ;;  %v10998_v3 = vadd.f32 %v1132_v35, %v10849_v19  ;;  %v11002_v16 = vadd.f32 %v1142_v34, %v10856_v36  ;;  %v14732_v33 = vld [vmem:[#allocation433_spill] sm:$0xff]  ;;  %v14733_v46 = vld [vmem:[#allocation103_spill] sm:$0xff]  ;;  %v14734_v28 = vld [vmem:[#allocation104_spill] sm:$0xff] }
 0x809   : > { %5309 = vperm.xlu0 %7042, %v7216_v0   ;;  %v11005_v20 = vadd.f32 %v1135_v7, %v10859_v30  ;;  %v1145_v54 = vmul.f32 %v14689_v62, %v14731_v59  ;;  %v4535_v47 = vmul.f32 %v10898_v29, %v14732_v33  ;;  %v1138_v17 = vmul.f32 %v14689_v62, %v14733_v46  ;;  %v14735_v19 = vld [vmem:[#allocation106_spill] sm:$0xff]  ;;  %v14736_v36 = vld [vmem:[#allocation107_spill] sm:$0xff]  ;;  %v4619_v30 = vpop.permute.xlu0 %4618  ;;  %v14739_v34 = vld [vmem:[#allocation57_spill] sm:$0xff] }
 0x80a   : > { %v1148_v35 = vmul.f32 %v14689_v62, %v14734_v28  ;;  %v1141_v57 = vmul.f32 %v14689_v62, %v14735_v19  ;;  %v1312_v27 = vmul.f32 %v10144_v55, %v14736_v36  ;;  %v1144_v24 = vmul.f32 %v14689_v62, %v14737_v45  ;;  %v14740_v7 = vld [vmem:[#allocation112_spill] sm:$0xff]  ;;  %v14741_v0 = vld [vmem:[#allocation113_spill] sm:$0xff]  ;;  %v14742_v33 = vld [vmem:[#allocation115_spill] sm:$0xff] }
 0x80b   : > { %v1315_v52 = vmul.f32 %v10144_v55, %v14738_v58  ;;  %v4567_v41 = vadd.f32 %v4535_v47, %v4374_v5  ;;  %v4728_v42 = vmul.f32 %v10940_v13, %v4619_v30  ;;  %5156 = vperm.xlu1 %7029, %v14739_v34   ;;  %v1147_v31 = vmul.f32 %v14689_v62, %v14740_v7  ;;  %v14743_v28 = vld [vmem:[#allocation116_spill] sm:$0xff]  ;;  %v11034_v45 = vpop.permute.xlu1 %4915  ;;  %v14746_v5 = vld [vmem:[#allocation118_spill] sm:$0xff]  ;;  %v14747_v30 = vld [vmem:[#allocation119_spill] sm:$0xff] }
 0x80c   : > { %v1317_v59 = vmul.f32 %v10144_v55, %v14741_v0  ;;  %v1150_v46 = vmul.f32 %v14689_v62, %v14742_v33  ;;  %v1320_v19 = vmul.f32 %v10144_v55, %v14743_v28  ;;  %v14744_v36 = vld [vmem:[#allocation60_spill] sm:$0xff]  ;;  %14745 = vst [vmem:[#allocation554_spill] sm:$0xff] %v11034_v45  ;;  %v1314_v47 = vmul.f32 %v10144_v55, %v14746_v5  ;;  %v14748_v34 = vld [vmem:[#allocation174_spill] sm:$0xff]  ;;  %v11044_v62 = vpop.permute.xlu2 %4965 }
 0x80d   : > { %5160 = vperm.xlu2 %7028, %v14744_v36   ;;  %v1323_v58 = vmul.f32 %v10144_v55, %v14747_v30  ;;  %v4345_v7 = vmul.f32 %v10867_v50, %v14748_v34  ;;  %v11042_v0 = vadd.f32 %v4728_v42, %v4567_v41  ;;  %14749 = vst [vmem:[#allocation144_spill] sm:$0xff] %v11044_v62 }
 0x80e   : > { %v1177_v33 = vadd.f32 %v1145_v54, %v10884_v39  ;;  %v1170_v28 = vadd.f32 %v1138_v17, %v10905_v43  ;;  %v1180_v36 = vadd.f32 %v1148_v35, %v10908_v63  ;;  %v1173_v45 = vadd.f32 %v1141_v57, %v10911_v26  ;;  %v7217_v26 = vld [vmem:[%s7347_s29 + $0x129] sm:$0xff]  ;;  %v14752_v17 = vld [vmem:[#allocation122_spill] sm:$0xff] }
 0x80f   : > { %v11051_v5 = vadd.f32 %v1312_v27, %v10914_v9  ;;  %v11054_v30 = vadd.f32 %v1144_v24, %v10917_v11  ;;  %v11057_v34 = vadd.f32 %v1315_v52, %v10924_v56  ;;  %v4377_v41 = vadd.f32 %v4345_v7, %v10563_v51  ;;  %v14750_v56 = vld [vmem:[#allocation121_spill] sm:$0xff]  ;;  %v14751_v51 = vld [vmem:[#allocation436_spill] sm:$0xff]  ;;  %v14755_v27 = vld [vmem:[#allocation127_spill] sm:$0xff] }
 0x810   : > { %v11061_v42 = vadd.f32 %v1147_v31, %v10927_v18  ;;  %v11064_v39 = vadd.f32 %v1317_v59, %v10930_v14  ;;  %v11066_v43 = vadd.f32 %v1150_v46, %v925_v61  ;;  %v11068_v63 = vadd.f32 %v1320_v19, %v1159_v44  ;;  %v14753_v35 = vld [vmem:[#allocation124_spill] sm:$0xff]  ;;  %v14754_v44 = vld [vmem:[#allocation125_spill] sm:$0xff]  ;;  %v14757_v31 = vld [vmem:[#allocation130_spill] sm:$0xff] }
 0x811   : > { %5321 = vperm.xlu0 %7042, %v7217_v26   ;;  %v11071_v9 = vadd.f32 %v1314_v47, %v1153_v6  ;;  %v11073_v11 = vadd.f32 %v1323_v58, %v1162_v32  ;;  %v1316_v54 = vmul.f32 %v10144_v55, %v14750_v56  ;;  %v4538_v18 = vmul.f32 %v10898_v29, %v14751_v51  ;;  %v4631_v32 = vpop.permute.xlu0 %4630  ;;  %v14756_v24 = vld [vmem:[#allocation128_spill] sm:$0xff]  ;;  %v14758_v47 = vld [vmem:[#allocation319_spill] sm:$0xff]  ;;  %v14760_v26 = vld [vmem:[#allocation133_spill] sm:$0xff] }
 0x812   : > { %v1326_v14 = vmul.f32 %v10144_v55, %v14752_v17  ;;  %v1319_v61 = vmul.f32 %v10144_v55, %v14753_v35  ;;  %v1329_v57 = vmul.f32 %v10144_v55, %v14754_v44  ;;  %v1322_v6 = vmul.f32 %v10144_v55, %v14755_v27  ;;  %v14759_v58 = vld [vmem:[#allocation131_spill] sm:$0xff]  ;;  %v14761_v51 = vld [vmem:[#allocation134_spill] sm:$0xff]  ;;  %v14762_v35 = vld [vmem:[#allocation136_spill] sm:$0xff] }
 0x813   : > { %v1332_v52 = vmul.f32 %v10144_v55, %v14756_v24  ;;  %v1325_v59 = vmul.f32 %v10144_v55, %v14757_v31  ;;  %v4570_v46 = vadd.f32 %v4538_v18, %v4377_v41  ;;  %v4731_v19 = vmul.f32 %v10940_v13, %v4631_v32  ;;  %5168 = vperm.xlu1 %7029, %v14758_v47   ;;  %v11102_v24 = vpop.permute.xlu1 %4930  ;;  %v14765_v41 = vld [vmem:[#allocation137_spill] sm:$0xff]  ;;  %v14766_v32 = vld [vmem:[#allocation139_spill] sm:$0xff] }
 0x814   : > { %v1335_v7 = vmul.f32 %v10144_v55, %v14759_v58  ;;  %v1328_v56 = vmul.f32 %v10144_v55, %v14760_v26  ;;  %v1338_v17 = vmul.f32 %v10144_v55, %v14761_v51  ;;  %v1331_v44 = vmul.f32 %v10144_v55, %v14762_v35  ;;  %14764 = vst [vmem:[#allocation147_spill] sm:$0xff] %v11102_v24  ;;  %v14767_v47 = vld [vmem:[#allocation177_spill] sm:$0xff] }
 0x815   : > { %v14763_v27 = vmov 2   ;;  %v1341_v18 = vmul.f32 %v10144_v55, %v14765_v41  ;;  %v1334_v31 = vmul.f32 %v10144_v55, %v14766_v32  ;;  %v4348_v58 = vmul.f32 %v10867_v50, %v14767_v47  ;;  %v7218_v51 = vld [vmem:[%s7347_s29 + $0x31] sm:$0xff] }
 0x816   : > { %7030 = vset.pattern.permute.xlu2 %v14763_v27  ;;  %v11110_v26 = vadd.f32 %v4731_v19, %v4570_v46  ;;  %v1348_v35 = vadd.f32 %v1316_v54, %v10980_v25  ;;  %v1358_v62 = vadd.f32 %v1326_v14, %v10983_v22  ;;  %v1351_v24 = vadd.f32 %v1319_v61, %v10986_v15  ;;  %v7219_v54 = vld [vmem:[%s7347_s29 + $0x151] sm:$0xff]  ;;  %v14771_v61 = vld [vmem:[#allocation142_spill] sm:$0xff] }
 0x817   : > { %5237 = vperm.xlu2 %7030, %v7218_v51   ;;  %v1361_v4 = vadd.f32 %v1329_v57, %v10989_v21  ;;  %v11117_v41 = vpop.permute.xlu2 %5044  ;;  %v11120_v32 = vadd.f32 %v1322_v6, %v10992_v10  ;;  %v11123_v47 = vadd.f32 %v1332_v52, %v10995_v49  ;;  %v11126_v46 = vadd.f32 %v1325_v59, %v10998_v3  ;;  %v14769_v21 = vld [vmem:[#allocation140_spill] sm:$0xff]  ;;  %v14773_v6 = vld [vmem:[#allocation145_spill] sm:$0xff]  ;;  %v14774_v59 = vld [vmem:[#allocation146_spill] sm:$0xff] }
 0x818   : > { %14768 = vst [vmem:[#allocation150_spill] sm:$0xff] %v11117_v41  ;;  %v4380_v19 = vadd.f32 %v4348_v58, %v10603_v40  ;;  %v11130_v25 = vadd.f32 %v1335_v7, %v11002_v16  ;;  %v11133_v22 = vadd.f32 %v1328_v56, %v11005_v20  ;;  %v11135_v15 = vadd.f32 %v1338_v17, %v1177_v33  ;;  %v14770_v40 = vld [vmem:[#allocation439_spill] sm:$0xff]  ;;  %v14775_v7 = vld [vmem:[#allocation148_spill] sm:$0xff]  ;;  %v14776_v56 = vld [vmem:[#allocation149_spill] sm:$0xff] }
 0x819   : > { %v1505_v10 = vmul.f32 %v10147_v1, %v14769_v21  ;;  %5333 = vperm.xlu0 %7042, %v7219_v54   ;;  %v11140_v49 = vadd.f32 %v1331_v44, %v1170_v28  ;;  %v11142_v14 = vadd.f32 %v1341_v18, %v1180_v36  ;;  %v11144_v3 = vadd.f32 %v1334_v31, %v1173_v45  ;;  %v14772_v33 = vld [vmem:[#allocation143_spill] sm:$0xff]  ;;  %v4643_v36 = vpop.permute.xlu0 %4642  ;;  %v14778_v21 = vld [vmem:[#allocation152_spill] sm:$0xff]  ;;  %v14833_v41 = vld [vmem:[#allocation198_spill] sm:$0xff] }
 0x81a   : > { %v4541_v16 = vmul.f32 %v10898_v29, %v14770_v40  ;;  %v1337_v20 = vmul.f32 %v10144_v55, %v14771_v61  ;;  %v1508_v57 = vmul.f32 %v10147_v1, %v14772_v33  ;;  %v1340_v52 = vmul.f32 %v10144_v55, %v14773_v6  ;;  %v14777_v58 = vld [vmem:[#allocation151_spill] sm:$0xff]  ;;  %v14779_v40 = vld [vmem:[#allocation154_spill] sm:$0xff]  ;;  %v14782_v6 = vld [vmem:[#allocation157_spill] sm:$0xff] }
 0x81b   : > { %v1510_v28 = vmul.f32 %v10147_v1, %v14774_v59  ;;  %v1343_v45 = vmul.f32 %v10144_v55, %v14775_v7  ;;  %v1513_v17 = vmul.f32 %v10147_v1, %v14776_v56  ;;  %v4734_v18 = vmul.f32 %v10940_v13, %v4643_v36  ;;  %7031 = vset.pattern.permute.xlu1 %v14763_v27  ;;  %v7220_v61 = vld [vmem:[%s7347_s29 + $0x49] sm:$0xff]  ;;  %v11172_v33 = vpop.permute.xlu1 %4945  ;;  %v7221_v7 = vld [vmem:[%s7347_s29 + $0x51] sm:$0xff] }
 0x81c   : > { %v4573_v44 = vadd.f32 %v4541_v16, %v4380_v19  ;;  %v11163_v31 = vadd.f32 %v1505_v10, %v11051_v5  ;;  %v1507_v51 = vmul.f32 %v10147_v1, %v14777_v58  ;;  %v1516_v54 = vmul.f32 %v10147_v1, %v14778_v21  ;;  %5245 = vperm.xlu1 %7031, %v7220_v61   ;;  %v14781_v19 = vld [vmem:[#allocation155_spill] sm:$0xff]  ;;  %v14783_v10 = vld [vmem:[#allocation180_spill] sm:$0xff]  ;;  %v14852_v27 = vld [vmem:[#allocation221_spill] sm:$0xff] }
 0x81d   : > { %v1509_v55 = vmul.f32 %v10147_v1, %v14779_v40  ;;  %14780 = vst [vmem:[#allocation325_spill] sm:$0xff] %v11172_v33  ;;  %v1519_v16 = vmul.f32 %v10147_v1, %v14781_v19  ;;  %v1512_v5 = vmul.f32 %v10147_v1, %v14782_v6  ;;  %v4351_v59 = vmul.f32 %v10867_v50, %v14783_v10  ;;  %v14784_v40 = vld [vmem:[#allocation158_spill] sm:$0xff]  ;;  %v7229_v33 = vld [vmem:[%s7347_s29 + $0xa9] sm:$0xff] }
 0x81e   : > { %v11180_v36 = vadd.f32 %v4734_v18, %v4573_v44  ;;  %v1369_v56 = vadd.f32 %v1337_v20, %v11054_v30  ;;  %v1540_v58 = vadd.f32 %v1508_v57, %v11057_v34  ;;  %v1372_v21 = vadd.f32 %v1340_v52, %v11061_v42  ;;  %v14786_v20 = vld [vmem:[#allocation160_spill] sm:$0xff]  ;;  %v14787_v52 = vld [vmem:[#allocation161_spill] sm:$0xff] }
 0x81f   : > { %5249 = vperm.xlu2 %7030, %v7221_v7   ;;  %v1522_v61 = vmul.f32 %v10147_v1, %v14784_v40  ;;  %v11188_v19 = vpop.permute.xlu2 %5056  ;;  %v11191_v6 = vadd.f32 %v1510_v28, %v11064_v39  ;;  %v11194_v44 = vadd.f32 %v1343_v45, %v11066_v43  ;;  %v11197_v18 = vadd.f32 %v1513_v17, %v11068_v63  ;;  %v7222_v28 = vld [vmem:[%s7347_s29 + $0x171] sm:$0xff]  ;;  %v14789_v17 = vld [vmem:[#allocation163_spill] sm:$0xff] }
 0x820   : > { %14785 = vst [vmem:[#allocation580_spill] sm:$0xff] %v11188_v19  ;;  %v4383_v30 = vadd.f32 %v4351_v59, %v10643_v53  ;;  %v11201_v34 = vadd.f32 %v1507_v51, %v11071_v9  ;;  %v11204_v42 = vadd.f32 %v1516_v54, %v11073_v11  ;;  %v1515_v57 = vmul.f32 %v10147_v1, %v14786_v20  ;;  %v14788_v9 = vld [vmem:[#allocation442_spill] sm:$0xff]  ;;  %v14790_v54 = vld [vmem:[#allocation164_spill] sm:$0xff] }
 0x821   : > { %v1525_v39 = vmul.f32 %v10147_v1, %v14787_v52  ;;  %5345 = vperm.xlu0 %7042, %v7222_v28   ;;  %v11211_v43 = vadd.f32 %v1509_v55, %v1348_v35  ;;  %v11213_v63 = vadd.f32 %v1519_v16, %v1358_v62  ;;  %v11215_v53 = vadd.f32 %v1512_v5, %v1351_v24  ;;  %v14791_v59 = vld [vmem:[#allocation166_spill] sm:$0xff]  ;;  %v4655_v55 = vpop.permute.xlu0 %4654  ;;  %v14792_v62 = vld [vmem:[#allocation167_spill] sm:$0xff]  ;;  %v14793_v16 = vld [vmem:[#allocation169_spill] sm:$0xff] }
 0x822   : > { %v4544_v45 = vmul.f32 %v10898_v29, %v14788_v9  ;;  %v11219_v11 = vadd.f32 %v1522_v61, %v1361_v4  ;;  %v1518_v51 = vmul.f32 %v10147_v1, %v14789_v17  ;;  %v1528_v10 = vmul.f32 %v10147_v1, %v14790_v54  ;;  %v14794_v20 = vld [vmem:[#allocation170_spill] sm:$0xff]  ;;  %v14795_v28 = vld [vmem:[#allocation172_spill] sm:$0xff] }
 0x823   : > { %v1521_v35 = vmul.f32 %v10147_v1, %v14791_v59  ;;  %v1531_v24 = vmul.f32 %v10147_v1, %v14792_v62  ;;  %v1524_v5 = vmul.f32 %v10147_v1, %v14793_v16  ;;  %v4737_v4 = vmul.f32 %v10940_v13, %v4655_v55  ;;  %v7223_v17 = vld [vmem:[%s7347_s29 + $0x61] sm:$0xff]  ;;  %v11243_v54 = vpop.permute.xlu1 %4960  ;;  %v14797_v59 = vld [vmem:[#allocation173_spill] sm:$0xff]  ;;  %v7224_v55 = vld [vmem:[%s7347_s29 + $0x69] sm:$0xff] }
 0x824   : > { %v4576_v7 = vadd.f32 %v4544_v45, %v4383_v30  ;;  %v11233_v40 = vadd.f32 %v1515_v57, %v11120_v32  ;;  %v11236_v61 = vadd.f32 %v1525_v39, %v11123_v47  ;;  %v1534_v52 = vmul.f32 %v10147_v1, %v14794_v20  ;;  %5253 = vperm.xlu1 %7031, %v7223_v17   ;;  %v14798_v45 = vld [vmem:[#allocation175_spill] sm:$0xff]  ;;  %v14800_v20 = vld [vmem:[#allocation176_spill] sm:$0xff]  ;;  %v14801_v17 = vld [vmem:[#allocation178_spill] sm:$0xff] }
 0x825   : > { %v1527_v9 = vmul.f32 %v10147_v1, %v14795_v28  ;;  %14796 = vst [vmem:[#allocation261_spill] sm:$0xff] %v11243_v54  ;;  %v1762_v30 = vmul.f32 %v14598_v48, %v14797_v59  ;;  %v1530_v32 = vmul.f32 %v10147_v1, %v14798_v45  ;;  %v14799_v57 = vld [vmem:[#allocation183_spill] sm:$0xff]  ;;  %v11255_v62 = vadd.f32 %v1518_v51, %v11126_v46  ;;  %v14830_v54 = vld [vmem:[#allocation205_spill] sm:$0xff]  ;;  %v14832_v19 = vld [vmem:[#allocation208_spill] sm:$0xff] }
 0x826   : > { %v4354_v47 = vmul.f32 %v10867_v50, %v14799_v57  ;;  %v11251_v39 = vadd.f32 %v4737_v4, %v4576_v7  ;;  %v11258_v16 = vadd.f32 %v1528_v10, %v11130_v25  ;;  %v1765_v28 = vmul.f32 %v14598_v48, %v14800_v20  ;;  %v14803_v57 = vld [vmem:[#allocation179_spill] sm:$0xff]  ;;  %v14804_v20 = vld [vmem:[#allocation181_spill] sm:$0xff] }
 0x827   : > { %5257 = vperm.xlu2 %7030, %v7224_v55   ;;  %v1533_v59 = vmul.f32 %v10147_v1, %v14801_v17  ;;  %v11264_v45 = vpop.permute.xlu2 %5064  ;;  %v11267_v7 = vadd.f32 %v1521_v35, %v11133_v22  ;;  %v11270_v4 = vadd.f32 %v1531_v24, %v11135_v15  ;;  %v11273_v46 = vadd.f32 %v1524_v5, %v11140_v49  ;;  %v7225_v35 = vld [vmem:[%s7347_s29 + $0x199] sm:$0xff]  ;;  %v14810_v17 = vld [vmem:[#allocation188_spill] sm:$0xff] }
 0x828   : > { %14802 = vst [vmem:[#allocation279_spill] sm:$0xff] %v11264_v45  ;;  %v4386_v25 = vadd.f32 %v4354_v47, %v10684_v2  ;;  %v11277_v51 = vadd.f32 %v1534_v52, %v11142_v14  ;;  %v11280_v10 = vadd.f32 %v1527_v9, %v11144_v3  ;;  %v1767_v55 = vmul.f32 %v14598_v48, %v14803_v57  ;;  %v14805_v2 = vld [vmem:[#allocation182_spill] sm:$0xff]  ;;  %v14806_v24 = vld [vmem:[#allocation445_spill] sm:$0xff]  ;;  %v14807_v9 = vld [vmem:[#allocation184_spill] sm:$0xff] }
 0x829   : > { %v1536_v22 = vmul.f32 %v10147_v1, %v14804_v20  ;;  %5357 = vperm.xlu0 %7042, %v7225_v35   ;;  %v11288_v15 = vadd.f32 %v1762_v30, %v11163_v31  ;;  %v11290_v49 = vadd.f32 %v1530_v32, %v1369_v56  ;;  %v1770_v14 = vmul.f32 %v14598_v48, %v14805_v2  ;;  %v14808_v47 = vld [vmem:[#allocation185_spill] sm:$0xff]  ;;  %v4667_v30 = vpop.permute.xlu0 %4666  ;;  %v14809_v56 = vld [vmem:[#allocation187_spill] sm:$0xff] }
 0x82a   : > { %v4547_v3 = vmul.f32 %v10898_v29, %v14806_v24  ;;  %v11296_v5 = vadd.f32 %v1765_v28, %v1540_v58  ;;  %v11298_v52 = vadd.f32 %v1533_v59, %v1372_v21  ;;  %v1764_v1 = vmul.f32 %v14598_v48, %v14807_v9  ;;  %v14811_v59 = vld [vmem:[#allocation190_spill] sm:$0xff]  ;;  %v14812_v2 = vld [vmem:[#allocation191_spill] sm:$0xff] }
 0x82b   : > { %v1773_v31 = vmul.f32 %v14598_v48, %v14808_v47  ;;  %v1766_v32 = vmul.f32 %v14598_v48, %v14809_v56  ;;  %v1776_v57 = vmul.f32 %v14598_v48, %v14810_v17  ;;  %v4740_v58 = vmul.f32 %v10940_v13, %v4667_v30  ;;  %v7226_v9 = vld [vmem:[%s7347_s29 + $0x81] sm:$0xff]  ;;  %v11320_v47 = vpop.permute.xlu1 %4975  ;;  %v7228_v30 = vld [vmem:[%s7347_s29 + $0x91] sm:$0xff] }
 0x82c   : > { %v4579_v20 = vadd.f32 %v4547_v3, %v4386_v25  ;;  %v11310_v21 = vadd.f32 %v1767_v55, %v11191_v6  ;;  %v11313_v28 = vadd.f32 %v1536_v22, %v11194_v44  ;;  %v1769_v35 = vmul.f32 %v14598_v48, %v14811_v59  ;;  %5265 = vperm.xlu1 %7031, %v7226_v9   ;;  %v14814_v3 = vld [vmem:[#allocation186_spill] sm:$0xff]  ;;  %v11330_v44 = vld [vmem:[%s13638_s1 + $0x10] sm:$0xff]  ;;  %v14817_v17 = vld [vmem:[#allocation193_spill] sm:$0xff] }
 0x82d   : > { %v1779_v24 = vmul.f32 %v14598_v48, %v14812_v2  ;;  %14813 = vst [vmem:[#allocation621_spill] sm:$0xff] %v11320_v47  ;;  %v11323_v25 = vadd.f32 %v1770_v14, %v11197_v18  ;;  %v4357_v6 = vmul.f32 %v10867_v50, %v14814_v3  ;;  %v11333_v55 = vperm.slane %v11330_v44, 5  ;;  %v11339_v56 = vld [vmem:[%s7347_s29 + $0x32] sm:$0xff]  ;;  %v14818_v2 = vld [vmem:[#allocation194_spill] sm:$0xff]  ;;  %v14829_v45 = vld [vmem:[#allocation195_spill] sm:$0xff] }
 0x82e   : > { %v11335_v22 = vadd.f32 %v4740_v58, %v4579_v20  ;;  %v11342_v18 = vadd.f32 %v1764_v1, %v11201_v34  ;;  %v11345_v14 = vadd.f32 %v1773_v31, %v11204_v42  ;;  %v1772_v59 = vmul.f32 %v14598_v48, %v14817_v17  ;;  %v14821_v17 = vld [vmem:[#allocation196_spill] sm:$0xff] }
 0x82f   : > { %14815 = vst [vmem:[#allocation352_spill] sm:$0xff] %v11333_v55  ;;  %5269 = vperm.xlu2 %7030, %v7228_v30   ;;  %v1782_v9 = vmul.f32 %v14598_v48, %v14818_v2  ;;  %v11351_v3 = vpop.permute.xlu2 %5076  ;;  %v11354_v20 = vadd.f32 %v1766_v32, %v11211_v43  ;;  %v11357_v58 = vadd.f32 %v1776_v57, %v11213_v63  ;;  %v14820_v30 = vld [vmem:[#allocation189_spill] sm:$0xff]  ;;  %v14823_v63 = vld [vmem:[#allocation192_spill] sm:$0xff]  ;;  %v14824_v57 = vld [vmem:[#allocation199_spill] sm:$0xff] }
 0x830   : > { %14816 = vst [vmem:[#allocation603_spill] sm:$0xff] %v11335_v22  ;;  %v4360_v34 = vmul.f32 %v10867_v50, %v14820_v30  ;;  %v4389_v42 = vadd.f32 %v4357_v6, %v10726_v8  ;;  %v11363_v1 = vadd.f32 %v1769_v35, %v11215_v53  ;;  %v11366_v31 = vadd.f32 %v1779_v24, %v11219_v11  ;;  %v14825_v53 = vld [vmem:[#allocation200_spill] sm:$0xff]  ;;  %v14827_v30 = vld [vmem:[#allocation202_spill] sm:$0xff] }
 0x831   : > { %14819 = vst [vmem:[#allocation379_spill] sm:$0xff] %v11351_v3  ;;  %v1775_v2 = vmul.f32 %v14598_v48, %v14821_v17  ;;  %v14822_v3 = vld [vmem:[#allocation197_spill] sm:$0xff]  ;;  %5880 = vperm.xlu0 %7042, %v11339_v56   ;;  %v11375_v32 = vmul.f32 %v10867_v50, %v14823_v63  ;;  %v1778_v8 = vmul.f32 %v14598_v48, %v14824_v57  ;;  %v14826_v35 = vld [vmem:[#allocation448_spill] sm:$0xff]  ;;  %v14828_v63 = vld [vmem:[#allocation203_spill] sm:$0xff]  ;;  %v4679_v57 = vpop.permute.xlu0 %4678 }
 0x832   : > { %v1785_v43 = vmul.f32 %v14598_v48, %v14822_v3  ;;  %v1788_v11 = vmul.f32 %v14598_v48, %v14825_v53  ;;  %v4550_v24 = vmul.f32 %v10898_v29, %v14826_v35  ;;  %v11384_v6 = vadd.f32 %v1772_v59, %v11233_v40 }
 0x833   : > { %v11387_v3 = vadd.f32 %v1782_v9, %v11236_v61  ;;  %v1781_v17 = vmul.f32 %v14598_v48, %v14827_v30  ;;  %v1791_v47 = vmul.f32 %v14598_v48, %v14828_v63  ;;  %v11395_v53 = vmul.f32 %v10867_v50, %v14829_v45  ;;  %v14831_v30 = vld [vmem:[#allocation206_spill] sm:$0xff] }
 0x834   : > { %v1784_v35 = vmul.f32 %v14598_v48, %v14830_v54  ;;  %v4582_v40 = vadd.f32 %v4550_v24, %v4389_v42  ;;  %v4743_v61 = vmul.f32 %v10940_v13, %v4679_v57  ;;  %v11401_v59 = vadd.f32 %v1775_v2, %v11255_v62  ;;  %5277 = vperm.xlu1 %7031, %v7229_v33   ;;  %v7230_v2 = vld [vmem:[%s7347_s29 + $0xb1] sm:$0xff] }
 0x835   : > { %v11404_v9 = vadd.f32 %v1785_v43, %v11258_v16  ;;  %v1955_v63 = vmul.f32 %v10246_v37, %v14831_v30  ;;  %v1787_v45 = vmul.f32 %v14598_v48, %v14832_v19  ;;  %v11413_v54 = vmul.f32 %v11333_v55, %v14833_v41  ;;  %v11424_v43 = vpop.permute.xlu1 %5052  ;;  %v11427_v24 = vld [vmem:[%s7347_s29 + $0x6a] sm:$0xff]  ;;  %v14837_v19 = vld [vmem:[#allocation201_spill] sm:$0xff] }
 0x836   : > { %v11416_v42 = vadd.f32 %v1778_v8, %v11267_v7  ;;  %v11419_v62 = vadd.f32 %v1788_v11, %v11270_v4  ;;  %v11421_v16 = vadd.f32 %v4743_v61, %v4582_v40  ;;  %14835 = vst [vmem:[#allocation636_spill] sm:$0xff] %v11424_v43  ;;  %v11431_v33 = vmul.f32 %v11333_v55, %v14837_v19  ;;  %v14838_v4 = vld [vmem:[#allocation209_spill] sm:$0xff]  ;;  %v14840_v57 = vld [vmem:[#allocation204_spill] sm:$0xff]  ;;  %v14841_v30 = vld [vmem:[#allocation211_spill] sm:$0xff] }
 0x837   : > { %5281 = vperm.xlu2 %7030, %v7230_v2   ;;  %14836 = vst [vmem:[#allocation303_spill] sm:$0xff] %v11427_v24  ;;  %v11434_v41 = vadd.f32 %v1781_v17, %v11273_v46  ;;  %v11437_v7 = vadd.f32 %v1791_v47, %v11277_v51  ;;  %v1958_v8 = vmul.f32 %v10246_v37, %v14838_v4  ;;  %v11441_v11 = vpop.permute.xlu2 %5088  ;;  %v14842_v47 = vld [vmem:[#allocation207_spill] sm:$0xff]  ;;  %v14843_v4 = vld [vmem:[#allocation212_spill] sm:$0xff] }
 0x838   : > { %14834 = vst [vmem:[#allocation532_spill] sm:$0xff] %v11421_v16  ;;  %v11445_v40 = vmul.f32 %v11333_v55, %v14840_v57  ;;  %v11448_v61 = vadd.f32 %v1784_v35, %v11280_v10  ;;  %v1790_v2 = vmul.f32 %v14598_v48, %v14841_v30  ;;  %v4392_v46 = vadd.f32 %v4360_v34, %v10777_v12  ;;  %v14844_v10 = vld [vmem:[#allocation210_spill] sm:$0xff]  ;;  %v14847_v34 = vld [vmem:[#allocation215_spill] sm:$0xff]  ;;  %v14853_v16 = vld [vmem:[#allocation213_spill] sm:$0xff] }
 0x839   : > { %14839 = vst [vmem:[#allocation406_spill] sm:$0xff] %v11441_v11  ;;  %v11454_v51 = vadd.f32 %v1955_v63, %v11288_v15  ;;  %v11458_v17 = vmul.f32 %v11333_v55, %v14842_v47  ;;  %v11461_v19 = vadd.f32 %v1787_v45, %v11290_v49  ;;  %v1960_v57 = vmul.f32 %v10246_v37, %v14843_v4  ;;  %v14846_v12 = vld [vmem:[#allocation214_spill] sm:$0xff]  ;;  %v280_v49 = vld [vmem:[%s13638_s1 + $0x18] sm:$0x7]  ;;  %v14848_v45 = vld [vmem:[#allocation451_spill] sm:$0xff]  ;;  %v4691_v43 = vpop.permute.xlu0 %4690 }
 0x83a   : > { %5900 = vperm.xlu0 %7042, %v11427_v24   ;;  %v11468_v35 = vmul.f32 %v11333_v55, %v14844_v10  ;;  %v1793_v15 = vmul.f32 %v14598_v48, %v14846_v12  ;;  %v1963_v63 = vmul.f32 %v10246_v37, %v14847_v34  ;;  %v4553_v30 = vmul.f32 %v10898_v29, %v14848_v45  ;;  %v14849_v4 = vld [vmem:[#allocation217_spill] sm:$0xff]  ;;  %v14850_v11 = vld [vmem:[#allocation218_spill] sm:$0xff]  ;;  %v14851_v12 = vld [vmem:[#allocation220_spill] sm:$0xff] }
 0x83b   : > { %v11480_v47 = vadd.f32 %v1958_v8, %v11296_v5  ;;  %v1957_v10 = vmul.f32 %v10246_v37, %v14849_v4  ;;  %v1966_v48 = vmul.f32 %v10246_v37, %v14850_v11  ;;  %v1959_v34 = vmul.f32 %v10246_v37, %v14851_v12  ;;  %v14855_v12 = vld [vmem:[#allocation223_spill] sm:$0xff] }
 0x83c   : > { %14845 = vst [vmem:[#allocation557_spill] sm:$0xff] %v11468_v35  ;;  %v11489_v50 = vadd.f32 %v1790_v2, %v11298_v52  ;;  %v1969_v45 = vmul.f32 %v10246_v37, %v14852_v27  ;;  %v4585_v5 = vadd.f32 %v4553_v30, %v4392_v46  ;;  %v4746_v8 = vmul.f32 %v10940_v13, %v4691_v43  ;;  %v7231_v52 = vld [vmem:[%s7347_s29 + $0xc9] sm:$0xff] }
 0x83d   : > { %v11495_v4 = vadd.f32 %v1960_v57, %v11310_v21  ;;  %v11499_v11 = vmul.f32 %v11333_v55, %v14853_v16  ;;  %v1962_v24 = vmul.f32 %v10246_v37, %v14855_v12  ;;  %v11503_v22 = vperm.slane %v280_v49, 0  ;;  %5289 = vperm.xlu1 %7031, %v7231_v52   ;;  %v14857_v43 = vld [vmem:[#allocation216_spill] sm:$0xff]  ;;  %v7232_v16 = vld [vmem:[%s7347_s29 + $0xd9] sm:$0xff]  ;;  %v11519_v57 = vpop.permute.xlu1 %5060 }
 0x83e   : > { %v11507_v27 = vadd.f32 %v1793_v15, %v11313_v28  ;;  %v11510_v2 = vadd.f32 %v1963_v63, %v11323_v25  ;;  %v11514_v21 = vmul.f32 %v11333_v55, %v14857_v43  ;;  %v11516_v46 = vadd.f32 %v4746_v8, %v4585_v5  ;;  %14860 = vst [vmem:[#allocation355_spill] sm:$0xff] %v11519_v57  ;;  %v11522_v49 = vld [vmem:[%s7347_s29 + $0x92] sm:$0xff]  ;;  %v14862_v25 = vld [vmem:[#allocation219_spill] sm:$0xff]  ;;  %v14865_v12 = vld [vmem:[#allocation222_spill] sm:$0xff] }
 0x83f   : > { %14854 = vst [vmem:[#allocation328_spill] sm:$0xff] %v11499_v11  ;;  %5293 = vperm.xlu2 %7030, %v7232_v16   ;;  %v11525_v30 = vadd.f32 %v1957_v10, %v11342_v18  ;;  %v11528_v28 = vadd.f32 %v1966_v48, %v11345_v14  ;;  %v11532_v15 = vmul.f32 %v11333_v55, %v14862_v25  ;;  %v11537_v5 = vpop.permute.xlu2 %5100  ;;  %v14867_v18 = vld [vmem:[#allocation224_spill] sm:$0xff]  ;;  %v14870_v43 = vld [vmem:[#allocation226_spill] sm:$0xff]  ;;  %v14872_v25 = vld [vmem:[#allocation229_spill] sm:$0xff] }
 0x840   : > { %14856 = vst [vmem:[#allocation583_spill] sm:$0xff] %v11503_v22  ;;  %v11535_v63 = vadd.f32 %v1959_v34, %v11354_v20  ;;  %v11540_v8 = vadd.f32 %v1969_v45, %v11357_v58  ;;  %v11544_v52 = vmul.f32 %v11333_v55, %v14865_v12  ;;  %v1972_v14 = vmul.f32 %v10246_v37, %v14867_v18  ;;  %v14868_v20 = vld [vmem:[#allocation225_spill] sm:$0xff]  ;;  %v14871_v45 = vld [vmem:[#allocation227_spill] sm:$0xff]  ;;  %v14873_v18 = vld [vmem:[#allocation230_spill] sm:$0xff] }
 0x841   : > { %14858 = vst [vmem:[#allocation625_spill] sm:$0xff] %v11514_v21  ;;  %v4395_v10 = vadd.f32 %v11375_v32, %v10835_v60  ;;  %v11551_v48 = vadd.f32 %v1962_v24, %v11363_v1  ;;  %v11555_v34 = vmul.f32 %v11333_v55, %v14868_v20  ;;  %v1965_v58 = vmul.f32 %v10246_v37, %v14870_v43  ;;  %v14874_v1 = vld [vmem:[#allocation232_spill] sm:$0xff]  ;;  %v14875_v24 = vld [vmem:[#allocation454_spill] sm:$0xff]  ;;  %v14877_v57 = vld [vmem:[#allocation235_spill] sm:$0xff] }
 0x842   : > { %14859 = vst [vmem:[#allocation282_spill] sm:$0xff] %v11516_v46  ;;  %v1975_v16 = vmul.f32 %v10246_v37, %v14871_v45  ;;  %5912 = vperm.xlu0 %7042, %v11522_v49   ;;  %v1968_v12 = vmul.f32 %v10246_v37, %v14872_v25  ;;  %v1978_v60 = vmul.f32 %v10246_v37, %v14873_v18  ;;  %v14878_v22 = vld [vmem:[#allocation236_spill] sm:$0xff]  ;;  %v14879_v25 = vld [vmem:[#allocation238_spill] sm:$0xff]  ;;  %v4703_v18 = vpop.permute.xlu0 %4702 }
 0x843   : > { %14861 = vst [vmem:[#allocation511_spill] sm:$0xff] %v11522_v49  ;;  %v1971_v32 = vmul.f32 %v10246_v37, %v14874_v1  ;;  %v4556_v20 = vmul.f32 %v10898_v29, %v14875_v24  ;;  %v1974_v45 = vmul.f32 %v10246_v37, %v14877_v57  ;;  %v1984_v55 = vmul.f32 %v10246_v37, %v14878_v22  ;;  %v14882_v21 = vld [vmem:[#allocation242_spill] sm:$0xff]  ;;  %v7233_v11 = vld [vmem:[%s7347_s29 + $0xf1] sm:$0xff] }
 0x844   : > { %14863 = vst [vmem:[#allocation626_spill] sm:$0xff] %v11532_v15  ;;  %v14881_v15 = vld [vmem:[#allocation241_spill] sm:$0xff]  ;;  %v2004_v57 = vadd.f32 %v1972_v14, %v11366_v31  ;;  %v1997_v49 = vadd.f32 %v1965_v58, %v11384_v6  ;;  %v2007_v22 = vadd.f32 %v1975_v16, %v11387_v3  ;;  %v11591_v35 = vadd.f32 %v1978_v60, %v11404_v9  ;;  %v14886_v16 = vld [vmem:[#allocation126_spill] sm:$0xff] }
 0x845   : > { %14864 = vst [vmem:[#allocation606_spill] sm:$0xff] %v11537_v5  ;;  %v14876_v5 = vld [vmem:[#allocation233_spill] sm:$0xff]  ;;  %v1980_v24 = vmul.f32 %v10246_v37, %v14881_v15  ;;  %v4588_v46 = vadd.f32 %v4556_v20, %v4395_v10  ;;  %5301 = vperm.xlu1 %7031, %v7233_v11   ;;  %v14883_v15 = vld [vmem:[#allocation244_spill] sm:$0xff]  ;;  %v11598_v6 = vpop.permute.xlu1 %5072  ;;  %v11613_v9 = vadd.f32 %v1984_v55, %v11437_v7  ;;  %v14888_v7 = vld [vmem:[#allocation247_spill] sm:$0xff] }
 0x846   : > { %14866 = vst [vmem:[#allocation647_spill] sm:$0xff] %v11544_v52  ;;  %v1981_v43 = vmul.f32 %v10246_v37, %v14876_v5  ;;  %v14880_v52 = vld [vmem:[#allocation239_spill] sm:$0xff]  ;;  %v4749_v5 = vmul.f32 %v10940_v13, %v4703_v18  ;;  %v1983_v10 = vmul.f32 %v10246_v37, %v14883_v15  ;;  %v7234_v31 = vld [vmem:[%s7347_s29 + $0xf9] sm:$0xff]  ;;  %v1986_v60 = vmul.f32 %v10246_v37, %v14888_v7 }
 0x847   : > { %14869 = vst [vmem:[#allocation535_spill] sm:$0xff] %v11555_v34  ;;  %v1977_v34 = vmul.f32 %v10246_v37, %v14879_v25  ;;  %v2148_v1 = vmul.f32 %v10249_v38, %v14880_v52  ;;  %v2151_v25 = vmul.f32 %v10249_v38, %v14882_v21  ;;  %v2000_v52 = vadd.f32 %v1968_v12, %v11401_v59  ;;  %v11601_v3 = vld [vmem:[%s7347_s29 + $0xb2] sm:$0xff] }
 0x848   : > { %v11595_v20 = vadd.f32 %v4749_v5, %v4588_v46  ;;  %5305 = vperm.xlu2 %7030, %v7234_v31   ;;  %14884 = vst [vmem:[#allocation382_spill] sm:$0xff] %v11598_v6  ;;  %v11604_v21 = vadd.f32 %v1971_v32, %v11416_v42  ;;  %v11607_v11 = vadd.f32 %v1981_v43, %v11419_v62  ;;  %v11615_v46 = vpop.permute.xlu2 %5112  ;;  %v14887_v12 = vld [vmem:[#allocation245_spill] sm:$0xff]  ;;  %v14891_v32 = vld [vmem:[#allocation251_spill] sm:$0xff]  ;;  %v14895_v5 = vld [vmem:[#allocation256_spill] sm:$0xff] }
 0x849   : > { %v11610_v59 = vadd.f32 %v1974_v45, %v11434_v41  ;;  %14885 = vst [vmem:[#allocation641_spill] sm:$0xff] %v11615_v46  ;;  %v11618_v14 = vadd.f32 %v1977_v34, %v11448_v61  ;;  %v11621_v58 = vadd.f32 %v2148_v1, %v11454_v51  ;;  %v11624_v42 = vadd.f32 %v1980_v24, %v11461_v19  ;;  %v14889_v61 = vld [vmem:[#allocation248_spill] sm:$0xff]  ;;  %v14890_v19 = vld [vmem:[#allocation250_spill] sm:$0xff]  ;;  %v14892_v43 = vld [vmem:[#allocation457_spill] sm:$0xff] }
 0x84a   : > { %v4398_v62 = vadd.f32 %v11395_v53, %v14886_v16  ;;  %v11629_v41 = vadd.f32 %v2151_v25, %v11480_v47  ;;  %v2153_v55 = vmul.f32 %v10249_v38, %v14887_v12  ;;  %v2156_v34 = vmul.f32 %v10249_v38, %v14889_v61  ;;  %5924 = vperm.xlu0 %7042, %v11601_v3   ;;  %v14893_v18 = vld [vmem:[#allocation253_spill] sm:$0xff]  ;;  %v14894_v1 = vld [vmem:[#allocation254_spill] sm:$0xff]  ;;  %v14897_v31 = vld [vmem:[#allocation259_spill] sm:$0xff] }
 0x84b   : > { %v11639_v51 = vadd.f32 %v1983_v10, %v11489_v50  ;;  %v2150_v53 = vmul.f32 %v10249_v38, %v14890_v19  ;;  %v2159_v47 = vmul.f32 %v10249_v38, %v14891_v32  ;;  %v4559_v45 = vmul.f32 %v10898_v29, %v14892_v43  ;;  %v14896_v25 = vld [vmem:[#allocation257_spill] sm:$0xff]  ;;  %v4715_v10 = vpop.permute.xlu0 %4714  ;;  %v14898_v12 = vld [vmem:[#allocation260_spill] sm:$0xff] }
 0x84c   : > { %v2152_v37 = vmul.f32 %v10249_v38, %v14893_v18  ;;  %v2162_v24 = vmul.f32 %v10249_v38, %v14894_v1  ;;  %v2155_v50 = vmul.f32 %v10249_v38, %v14895_v5  ;;  %v2165_v15 = vmul.f32 %v10249_v38, %v14896_v25  ;;  %v14899_v1 = vld [vmem:[#allocation262_spill] sm:$0xff]  ;;  %v7235_v25 = vld [vmem:[%s7347_s29 + $0x111] sm:$0xff] }
 0x84d   : > { %v2158_v16 = vmul.f32 %v10249_v38, %v14897_v31  ;;  %v2168_v7 = vmul.f32 %v10249_v38, %v14898_v12  ;;  %v4591_v61 = vadd.f32 %v4559_v45, %v4398_v62  ;;  %v4752_v19 = vmul.f32 %v10940_v13, %v4715_v10  ;;  %5313 = vperm.xlu1 %7031, %v7235_v25   ;;  %v14912_v25 = vld [vmem:[#allocation272_spill] sm:$0xff]  ;;  %v7237_v29 = vld [vmem:[%s7347_s29 + $0x139] sm:$0xff] }
 0x84e   : > { %v2185_v32 = vadd.f32 %v2153_v55, %v11495_v4  ;;  %v2018_v43 = vadd.f32 %v1986_v60, %v11507_v27  ;;  %v2188_v18 = vadd.f32 %v2156_v34, %v11510_v2  ;;  %v2161_v5 = vmul.f32 %v10249_v38, %v14899_v1  ;;  %v7236_v4 = vld [vmem:[%s7347_s29 + $0x121] sm:$0xff]  ;;  %v11676_v27 = vpop.permute.xlu1 %5084 }
 0x84f   : > { %v2182_v31 = vadd.f32 %v2150_v53, %v11525_v30  ;;  %v11668_v46 = vadd.f32 %v2159_v47, %v11528_v28  ;;  %v11671_v62 = vperm.slane %v11330_v44, 6  ;;  %v11673_v45 = vadd.f32 %v4752_v19, %v4591_v61  ;;  %14900 = vst [vmem:[#allocation306_spill] sm:$0xff] %v11676_v27  ;;  %v11679_v2 = vld [vmem:[%s7347_s29 + $0xda] sm:$0xff]  ;;  %v14911_v1 = vld [vmem:[#allocation271_spill] sm:$0xff] }
 0x850   : > { %5317 = vperm.xlu2 %7030, %v7236_v4   ;;  %v11682_v55 = vadd.f32 %v2152_v37, %v11535_v63  ;;  %v11685_v60 = vadd.f32 %v2162_v24, %v11540_v8  ;;  %v11688_v30 = vadd.f32 %v2155_v50, %v11551_v48  ;;  %v11690_v28 = vadd.f32 %v2165_v15, %v2004_v57  ;;  %v11692_v34 = vpop.permute.xlu2 %5124  ;;  %v14902_v8 = vld [vmem:[#allocation263_spill] sm:$0xff]  ;;  %v14903_v24 = vld [vmem:[#allocation264_spill] sm:$0xff]  ;;  %v14904_v50 = vld [vmem:[#allocation265_spill] sm:$0xff] }
 0x851   : > { %14901 = vst [vmem:[#allocation560_spill] sm:$0xff] %v11692_v34  ;;  %v11694_v53 = vadd.f32 %v2158_v16, %v1997_v49  ;;  %v11696_v47 = vadd.f32 %v2168_v7, %v2007_v22  ;;  %v5012_v10 = vadd.f32 %v11413_v54, %v10971_v23  ;;  %v11701_v63 = vperm.slane %v11330_v44, 7  ;;  %v14905_v22 = vld [vmem:[#allocation266_spill] sm:$0xff]  ;;  %v14906_v23 = vld [vmem:[#allocation267_spill] sm:$0xff]  ;;  %v14907_v54 = vld [vmem:[#allocation268_spill] sm:$0xff] }
 0x852   : > { %v11703_v37 = vadd.f32 %v2161_v5, %v2000_v52  ;;  %v2171_v48 = vmul.f32 %v10249_v38, %v14902_v8  ;;  %v2164_v57 = vmul.f32 %v10249_v38, %v14903_v24  ;;  %v2174_v49 = vmul.f32 %v10249_v38, %v14904_v50  ;;  %5936 = vperm.xlu0 %7042, %v11679_v2   ;;  %v14908_v16 = vld [vmem:[#allocation460_spill] sm:$0xff]  ;;  %v14909_v7 = vld [vmem:[#allocation269_spill] sm:$0xff]  ;;  %v14913_v8 = vld [vmem:[#allocation274_spill] sm:$0xff] }
 0x853   : > { %v2167_v15 = vmul.f32 %v10249_v38, %v14905_v22  ;;  %v2177_v44 = vmul.f32 %v10249_v38, %v14906_v23  ;;  %v2170_v52 = vmul.f32 %v10249_v38, %v14907_v54  ;;  %v5173_v12 = vmul.f32 %v11671_v62, %v14908_v16  ;;  %v14910_v61 = vld [vmem:[#allocation41_spill] sm:$0xff]  ;;  %v5242_v50 = vpop.permute.xlu0 %5241  ;;  %v14914_v22 = vld [vmem:[#allocation275_spill] sm:$0xff] }
 0x854   : > { %v2406_v19 = vmul.f32 %v14910_v61, %v14909_v7  ;;  %v2173_v5 = vmul.f32 %v10249_v38, %v14911_v1  ;;  %v2409_v4 = vmul.f32 %v14910_v61, %v14912_v25  ;;  %v2176_v24 = vmul.f32 %v10249_v38, %v14913_v8  ;;  %v14915_v54 = vld [vmem:[#allocation277_spill] sm:$0xff]  ;;  %v14916_v25 = vld [vmem:[#allocation278_spill] sm:$0xff]  ;;  %v14917_v8 = vld [vmem:[#allocation280_spill] sm:$0xff] }
 0x855   : > { %v2411_v23 = vmul.f32 %v14910_v61, %v14914_v22  ;;  %v2179_v16 = vmul.f32 %v10249_v38, %v14915_v54  ;;  %v5205_v27 = vadd.f32 %v5173_v12, %v5012_v10  ;;  %v5366_v7 = vmul.f32 %v11701_v63, %v5242_v50  ;;  %5325 = vperm.xlu1 %7031, %v7237_v29   ;;  %v7238_v50 = vld [vmem:[%s7347_s29 + $0x141] sm:$0xff]  ;;  %v14929_v54 = vld [vmem:[#allocation292_spill] sm:$0xff] }
 0x856   : > { %v2203_v1 = vadd.f32 %v2171_v48, %v11591_v35  ;;  %v2196_v6 = vadd.f32 %v2164_v57, %v11604_v21  ;;  %v2414_v34 = vmul.f32 %v14910_v61, %v14916_v25  ;;  %v2408_v13 = vmul.f32 %v14910_v61, %v14917_v8  ;;  %v11746_v35 = vpop.permute.xlu1 %5096  ;;  %v11749_v21 = vld [vmem:[%s7347_s29 + $0xfa] sm:$0xff] }
 0x857   : > { %v2206_v22 = vadd.f32 %v2174_v49, %v11607_v11  ;;  %v2199_v38 = vadd.f32 %v2167_v15, %v11610_v59  ;;  %v2209_v10 = vadd.f32 %v2177_v44, %v11613_v9  ;;  %v11743_v12 = vadd.f32 %v5366_v7, %v5205_v27  ;;  %14919 = vst [vmem:[#allocation331_spill] sm:$0xff] %v11746_v35  ;;  %v14921_v44 = vld [vmem:[#allocation283_spill] sm:$0xff]  ;;  %v14930_v25 = vld [vmem:[#allocation293_spill] sm:$0xff] }
 0x858   : > { %5329 = vperm.xlu2 %7030, %v7238_v50   ;;  %v2202_v48 = vadd.f32 %v2170_v52, %v11618_v14  ;;  %v11753_v57 = vadd.f32 %v2406_v19, %v11621_v58  ;;  %v11756_v29 = vadd.f32 %v2173_v5, %v11624_v42  ;;  %v11759_v11 = vadd.f32 %v2409_v4, %v11629_v41  ;;  %v11761_v59 = vpop.permute.xlu2 %5136  ;;  %v14920_v42 = vld [vmem:[#allocation281_spill] sm:$0xff]  ;;  %v14924_v5 = vld [vmem:[#allocation287_spill] sm:$0xff]  ;;  %v14931_v50 = vld [vmem:[#allocation294_spill] sm:$0xff] }
 0x859   : > { %14918 = vst [vmem:[#allocation409_spill] sm:$0xff] %v11743_v12  ;;  %v11764_v9 = vadd.f32 %v2176_v24, %v11639_v51  ;;  %v11766_v27 = vadd.f32 %v2411_v23, %v2185_v32  ;;  %v11768_v49 = vadd.f32 %v2179_v16, %v2018_v43  ;;  %v5017_v14 = vadd.f32 %v11431_v33, %v11042_v0  ;;  %v14922_v51 = vld [vmem:[#allocation284_spill] sm:$0xff]  ;;  %v14923_v43 = vld [vmem:[#allocation286_spill] sm:$0xff]  ;;  %v14928_v24 = vld [vmem:[#allocation291_spill] sm:$0xff] }
 0x85a   : > { %v11772_v58 = vadd.f32 %v2414_v34, %v2188_v18  ;;  %v11774_v15 = vadd.f32 %v2408_v13, %v2182_v31  ;;  %v2417_v41 = vmul.f32 %v14910_v61, %v14920_v42  ;;  %v2410_v52 = vmul.f32 %v14910_v61, %v14921_v44  ;;  %5948 = vperm.xlu0 %7042, %v11749_v21   ;;  %v14925_v13 = vld [vmem:[#allocation463_spill] sm:$0xff]  ;;  %v14926_v18 = vld [vmem:[#allocation289_spill] sm:$0xff]  ;;  %v14927_v34 = vld [vmem:[#allocation290_spill] sm:$0xff] }
 0x85b   : > { %v2420_v32 = vmul.f32 %v14910_v61, %v14922_v51  ;;  %v2413_v19 = vmul.f32 %v14910_v61, %v14923_v43  ;;  %v2423_v0 = vmul.f32 %v14910_v61, %v14924_v5  ;;  %v5178_v33 = vmul.f32 %v11671_v62, %v14925_v13  ;;  %v5262_v7 = vpop.permute.xlu0 %5261  ;;  %v14932_v13 = vld [vmem:[#allocation296_spill] sm:$0xff]  ;;  %v14934_v12 = vld [vmem:[#allocation299_spill] sm:$0xff] }
 0x85c   : > { %v2416_v31 = vmul.f32 %v14910_v61, %v14926_v18  ;;  %v2426_v4 = vmul.f32 %v14910_v61, %v14927_v34  ;;  %v2419_v23 = vmul.f32 %v14910_v61, %v14928_v24  ;;  %v2429_v16 = vmul.f32 %v14910_v61, %v14929_v54  ;;  %v14933_v34 = vld [vmem:[#allocation297_spill] sm:$0xff] }
 0x85d   : > { %v2422_v8 = vmul.f32 %v14910_v61, %v14930_v25  ;;  %v2432_v42 = vmul.f32 %v14910_v61, %v14931_v50  ;;  %v5210_v44 = vadd.f32 %v5178_v33, %v5017_v14  ;;  %v5371_v51 = vmul.f32 %v11701_v63, %v5262_v7  ;;  %v7239_v54 = vld [vmem:[%s7347_s29 + $0x159] sm:$0xff] }
 0x85e   : > { %v2449_v43 = vadd.f32 %v2417_v41, %v11668_v46  ;;  %v2442_v5 = vadd.f32 %v2410_v52, %v11682_v55  ;;  %v2425_v18 = vmul.f32 %v14910_v61, %v14932_v13  ;;  %v2435_v24 = vmul.f32 %v14910_v61, %v14933_v34  ;;  %5337 = vperm.xlu1 %7031, %v7239_v54   ;;  %v7240_v46 = vld [vmem:[%s7347_s29 + $0x169] sm:$0xff]  ;;  %v11816_v55 = vpop.permute.xlu1 %5108  ;;  %v11819_v41 = vld [vmem:[%s7347_s29 + $0x112] sm:$0xff] }
 0x85f   : > { %v2452_v25 = vadd.f32 %v2420_v32, %v11685_v60  ;;  %v2445_v50 = vadd.f32 %v2413_v19, %v11688_v30  ;;  %v2428_v14 = vmul.f32 %v14910_v61, %v14934_v12  ;;  %v11813_v33 = vadd.f32 %v5371_v51, %v5210_v44  ;;  %14936 = vst [vmem:[#allocation630_spill] sm:$0xff] %v11816_v55  ;;  %v14946_v51 = vld [vmem:[#allocation310_spill] sm:$0xff]  ;;  %v14948_v54 = vld [vmem:[#allocation313_spill] sm:$0xff] }
 0x860   : > { %5341 = vperm.xlu2 %7030, %v7240_v46   ;;  %v2455_v52 = vadd.f32 %v2423_v0, %v11690_v28  ;;  %v2448_v7 = vadd.f32 %v2416_v31, %v11694_v53  ;;  %v11824_v13 = vadd.f32 %v2426_v4, %v11696_v47  ;;  %v11827_v60 = vadd.f32 %v2419_v23, %v11703_v37  ;;  %v11829_v30 = vpop.permute.xlu2 %5148  ;;  %v14938_v47 = vld [vmem:[#allocation301_spill] sm:$0xff]  ;;  %v14939_v0 = vld [vmem:[#allocation44_spill] sm:$0xff]  ;;  %v14940_v37 = vld [vmem:[#allocation302_spill] sm:$0xff] }
 0x861   : > { %14935 = vst [vmem:[#allocation586_spill] sm:$0xff] %v11813_v33  ;;  %v11831_v12 = vadd.f32 %v2429_v16, %v2203_v1  ;;  %v11833_v32 = vadd.f32 %v2422_v8, %v2196_v6  ;;  %v11835_v19 = vadd.f32 %v2432_v42, %v2206_v22  ;;  %v5020_v44 = vadd.f32 %v11445_v40, %v11110_v26  ;;  %v14941_v6 = vld [vmem:[#allocation304_spill] sm:$0xff]  ;;  %v14942_v23 = vld [vmem:[#allocation305_spill] sm:$0xff]  ;;  %v14943_v40 = vld [vmem:[#allocation466_spill] sm:$0xff] }
 0x862   : > { %v11839_v28 = vadd.f32 %v2425_v18, %v2199_v38  ;;  %v11841_v53 = vadd.f32 %v2435_v24, %v2209_v10  ;;  %v2599_v31 = vmul.f32 %v14939_v0, %v14938_v47  ;;  %v2431_v4 = vmul.f32 %v14910_v61, %v14940_v37  ;;  %5956 = vperm.xlu0 %7042, %v11819_v41   ;;  %v14944_v10 = vld [vmem:[#allocation307_spill] sm:$0xff]  ;;  %v14945_v8 = vld [vmem:[#allocation308_spill] sm:$0xff]  ;;  %v14952_v33 = vld [vmem:[#allocation318_spill] sm:$0xff] }
 0x863   : > { %v11848_v1 = vadd.f32 %v2428_v14, %v2202_v48  ;;  %v2602_v22 = vmul.f32 %v14939_v0, %v14941_v6  ;;  %v2434_v26 = vmul.f32 %v14910_v61, %v14942_v23  ;;  %v5181_v38 = vmul.f32 %v11671_v62, %v14943_v40  ;;  %v14947_v18 = vld [vmem:[#allocation312_spill] sm:$0xff]  ;;  %v5274_v24 = vpop.permute.xlu0 %5273  ;;  %v14949_v46 = vld [vmem:[#allocation315_spill] sm:$0xff] }
 0x864   : > { %14937 = vst [vmem:[#allocation358_spill] sm:$0xff] %v11839_v28  ;;  %v2604_v16 = vmul.f32 %v14939_v0, %v14944_v10  ;;  %v2437_v42 = vmul.f32 %v14910_v61, %v14945_v8  ;;  %v2607_v48 = vmul.f32 %v14939_v0, %v14946_v51  ;;  %v2601_v34 = vmul.f32 %v14939_v0, %v14947_v18  ;;  %v14950_v40 = vld [vmem:[#allocation316_spill] sm:$0xff]  ;;  %v14951_v8 = vld [vmem:[#allocation317_spill] sm:$0xff]  ;;  %v7241_v18 = vld [vmem:[%s7347_s29 + $0x181] sm:$0xff] }
 0x865   : > { %v2610_v14 = vmul.f32 %v14939_v0, %v14948_v54  ;;  %v2603_v47 = vmul.f32 %v14939_v0, %v14949_v46  ;;  %v5213_v37 = vadd.f32 %v5181_v38, %v5020_v44  ;;  %v5374_v6 = vmul.f32 %v11701_v63, %v5274_v24  ;;  %v14953_v44 = vld [vmem:[#allocation320_spill] sm:$0xff] }
 0x866   : > { %v2631_v61 = vadd.f32 %v2599_v31, %v11753_v57  ;;  %v2463_v23 = vadd.f32 %v2431_v4, %v11756_v29  ;;  %v2613_v10 = vmul.f32 %v14939_v0, %v14950_v40  ;;  %v2606_v51 = vmul.f32 %v14939_v0, %v14951_v8  ;;  %5349 = vperm.xlu1 %7031, %v7241_v18   ;;  %v7242_v57 = vld [vmem:[%s7347_s29 + $0x189] sm:$0xff]  ;;  %v11884_v29 = vpop.permute.xlu1 %5120 }
 0x867   : > { %v2634_v54 = vadd.f32 %v2602_v22, %v11759_v11  ;;  %v2616_v46 = vmul.f32 %v14939_v0, %v14952_v33  ;;  %v2609_v38 = vmul.f32 %v14939_v0, %v14953_v44  ;;  %v11881_v24 = vadd.f32 %v5374_v6, %v5213_v37  ;;  %14955 = vst [vmem:[#allocation631_spill] sm:$0xff] %v11884_v29  ;;  %v11887_v31 = vld [vmem:[%s7347_s29 + $0x122] sm:$0xff] }
 0x868   : > { %5353 = vperm.xlu2 %7030, %v7242_v57   ;;  %v2466_v4 = vadd.f32 %v2434_v26, %v11764_v9  ;;  %v2636_v40 = vadd.f32 %v2604_v16, %v11766_v27  ;;  %v2469_v11 = vadd.f32 %v2437_v42, %v11768_v49  ;;  %v11893_v22 = vadd.f32 %v2607_v48, %v11772_v58  ;;  %v11895_v33 = vpop.permute.xlu2 %5160  ;;  %v14956_v49 = vld [vmem:[#allocation321_spill] sm:$0xff]  ;;  %v14957_v26 = vld [vmem:[#allocation323_spill] sm:$0xff] }
 0x869   : > { %14954 = vst [vmem:[#allocation514_spill] sm:$0xff] %v11881_v24  ;;  %v11898_v37 = vadd.f32 %v2601_v34, %v11774_v15  ;;  %v11900_v6 = vadd.f32 %v2610_v14, %v2449_v43  ;;  %v11902_v8 = vadd.f32 %v2603_v47, %v2442_v5  ;;  %v5023_v18 = vadd.f32 %v11458_v17, %v11180_v36  ;;  %v14958_v5 = vld [vmem:[#allocation324_spill] sm:$0xff]  ;;  %v14959_v17 = vld [vmem:[#allocation469_spill] sm:$0xff]  ;;  %v14961_v48 = vld [vmem:[#allocation327_spill] sm:$0xff] }
 0x86a   : > { %v11906_v9 = vadd.f32 %v2613_v10, %v2452_v25  ;;  %v11908_v27 = vadd.f32 %v2606_v51, %v2445_v50  ;;  %v2619_v58 = vmul.f32 %v14939_v0, %v14956_v49  ;;  %v2612_v16 = vmul.f32 %v14939_v0, %v14957_v26  ;;  %5960 = vperm.xlu0 %7042, %v11887_v31   ;;  %v14960_v50 = vld [vmem:[#allocation326_spill] sm:$0xff]  ;;  %v14964_v51 = vld [vmem:[#allocation333_spill] sm:$0xff]  ;;  %v14969_v29 = vld [vmem:[#allocation339_spill] sm:$0xff] }
 0x86b   : > { %v11915_v15 = vadd.f32 %v2616_v46, %v2455_v52  ;;  %v11917_v43 = vadd.f32 %v2609_v38, %v2448_v7  ;;  %v2622_v36 = vmul.f32 %v14939_v0, %v14958_v5  ;;  %v5184_v25 = vmul.f32 %v11671_v62, %v14959_v17  ;;  %v14962_v14 = vld [vmem:[#allocation330_spill] sm:$0xff]  ;;  %v14963_v52 = vld [vmem:[#allocation332_spill] sm:$0xff]  ;;  %v5286_v10 = vpop.permute.xlu0 %5285  ;;  %v14965_v46 = vld [vmem:[#allocation39_spill] sm:$0xff] }
 0x86c   : > { %v2615_v42 = vmul.f32 %v14939_v0, %v14960_v50  ;;  %v2625_v34 = vmul.f32 %v14939_v0, %v14961_v48  ;;  %v2628_v47 = vmul.f32 %v14939_v0, %v14962_v14  ;;  %v2621_v7 = vmul.f32 %v14939_v0, %v14963_v52  ;;  %v14966_v38 = vld [vmem:[#allocation335_spill] sm:$0xff]  ;;  %v14967_v50 = vld [vmem:[#allocation336_spill] sm:$0xff]  ;;  %v14968_v14 = vld [vmem:[#allocation338_spill] sm:$0xff] }
 0x86d   : > { %v2792_v44 = vmul.f32 %v14965_v46, %v14964_v51  ;;  %v2624_v57 = vmul.f32 %v14939_v0, %v14966_v38  ;;  %v5216_v49 = vadd.f32 %v5184_v25, %v5023_v18  ;;  %v5377_v26 = vmul.f32 %v11701_v63, %v5286_v10  ;;  %v7243_v24 = vld [vmem:[%s7347_s29 + $0x1a1] sm:$0xff]  ;;  %v14970_v25 = vld [vmem:[#allocation341_spill] sm:$0xff] }
 0x86e   : > { %v2651_v5 = vadd.f32 %v2619_v58, %v11824_v13  ;;  %v11938_v17 = vadd.f32 %v2612_v16, %v11827_v60  ;;  %v2795_v48 = vmul.f32 %v14965_v46, %v14967_v50  ;;  %v2627_v52 = vmul.f32 %v14939_v0, %v14968_v14  ;;  %5361 = vperm.xlu1 %7031, %v7243_v24   ;;  %v11953_v58 = vpop.permute.xlu1 %5132  ;;  %v14973_v24 = vld [vmem:[#allocation329_spill] sm:$0xff] }
 0x86f   : > { %v2654_v51 = vadd.f32 %v2622_v36, %v11831_v12  ;;  %v2797_v18 = vmul.f32 %v14965_v46, %v14969_v29  ;;  %v2630_v10 = vmul.f32 %v14939_v0, %v14970_v25  ;;  %v11950_v13 = vadd.f32 %v5377_v26, %v5216_v49  ;;  %v14975_v50 = vld [vmem:[#allocation557_spill] sm:$0xff] }
 0x870   : > { %v14972_v60 = vmov 0   ;;  %v2647_v16 = vadd.f32 %v2615_v42, %v11833_v32  ;;  %v2657_v38 = vadd.f32 %v2625_v34, %v11835_v19  ;;  %v11959_v12 = vmul.f32 %v14939_v0, %v14973_v24  ;;  %v14977_v34 = vld [vmem:[#allocation344_spill] sm:$0xff]  ;;  %v14983_v24 = vld [vmem:[#allocation351_spill] sm:$0xff] }
 0x871   : > { %14971 = vst [vmem:[#allocation609_spill] sm:$0xff] %v11950_v13  ;;  %7032 = vset.pattern.permute.xlu2 %v14972_v60  ;;  %v2660_v29 = vadd.f32 %v2628_v47, %v11841_v53  ;;  %v11964_v36 = vadd.f32 %v2621_v7, %v11848_v1  ;;  %v11966_v49 = vadd.f32 %v2792_v44, %v2631_v61  ;;  %v11972_v42 = vpop.permute.xlu2 %5237  ;;  %v14976_v53 = vld [vmem:[#allocation342_spill] sm:$0xff]  ;;  %v7244_v61 = vld [vmem:[%s7347_s29 + $0x152] sm:$0xff]  ;;  %v14980_v44 = vld [vmem:[#allocation347_spill] sm:$0xff] }
 0x872   : > { %14974 = vst [vmem:[#allocation285_spill] sm:$0xff] %v11959_v12  ;;  %5463 = vperm.xlu2 %7032, %v11339_v56   ;;  %v11968_v26 = vadd.f32 %v2624_v57, %v2463_v23  ;;  %v5026_v32 = vadd.f32 %v14975_v50, %v11251_v39  ;;  %v11974_v19 = vadd.f32 %v2795_v48, %v2634_v54  ;;  %v14978_v39 = vld [vmem:[#allocation345_spill] sm:$0xff]  ;;  %v14979_v54 = vld [vmem:[#allocation472_spill] sm:$0xff] }
 0x873   : > { %v11976_v0 = vadd.f32 %v2627_v52, %v2466_v4  ;;  %v2800_v56 = vmul.f32 %v14965_v46, %v14976_v53  ;;  %v2794_v1 = vmul.f32 %v14965_v46, %v14977_v34  ;;  %5976 = vperm.xlu0 %7042, %v7244_v61   ;;  %v11983_v23 = vadd.f32 %v2797_v18, %v2636_v40  ;;  %v14981_v48 = vld [vmem:[#allocation348_spill] sm:$0xff]  ;;  %v14982_v52 = vld [vmem:[#allocation350_spill] sm:$0xff]  ;;  %v14988_v13 = vld [vmem:[#allocation357_spill] sm:$0xff] }
 0x874   : > { %v11985_v47 = vadd.f32 %v2630_v10, %v2469_v11  ;;  %v2803_v7 = vmul.f32 %v14965_v46, %v14978_v39  ;;  %v5187_v4 = vmul.f32 %v11671_v62, %v14979_v54  ;;  %v2796_v57 = vmul.f32 %v14965_v46, %v14980_v44  ;;  %v5298_v11 = vpop.permute.xlu0 %5297  ;;  %v12000_v18 = vld [vmem:[%s7347_s29 + $0x4a] sm:$0xff]  ;;  %v14984_v10 = vld [vmem:[#allocation353_spill] sm:$0xff]  ;;  %v14985_v53 = vld [vmem:[#allocation354_spill] sm:$0xff] }
 0x875   : > { %v2806_v14 = vmul.f32 %v14965_v46, %v14981_v48  ;;  %v2799_v25 = vmul.f32 %v14965_v46, %v14982_v52  ;;  %v2809_v40 = vmul.f32 %v14965_v46, %v14983_v24  ;;  %v2802_v50 = vmul.f32 %v14965_v46, %v14984_v10  ;;  %v12008_v54 = vld [vmem:[%s7347_s29 + $0x52] sm:$0xff] }
 0x876   : > { %v2812_v34 = vmul.f32 %v14965_v46, %v14985_v53  ;;  %v5219_v61 = vadd.f32 %v5187_v4, %v5026_v32  ;;  %v5380_v39 = vmul.f32 %v11701_v63, %v5298_v11  ;;  %14986 = vst [vmem:[#allocation385_spill] sm:$0xff] %v12008_v54  ;;  %v2832_v44 = vadd.f32 %v2800_v56, %v11893_v22  ;;  %v14987_v52 = vld [vmem:[#allocation356_spill] sm:$0xff]  ;;  %v14989_v53 = vld [vmem:[#allocation359_spill] sm:$0xff]  ;;  %v12025_v22 = vpop.permute.xlu1 %5144 }
 0x877   : > { %v2826_v48 = vadd.f32 %v2794_v1, %v11898_v37  ;;  %v2805_v24 = vmul.f32 %v14965_v46, %v14987_v52  ;;  %v2815_v55 = vmul.f32 %v14965_v46, %v14988_v13  ;;  %7033 = vset.pattern.permute.xlu1 %v14972_v60  ;;  %v2835_v10 = vadd.f32 %v2803_v7, %v11900_v6  ;;  %v14990_v4 = vld [vmem:[#allocation360_spill] sm:$0xff]  ;;  %v14992_v6 = vld [vmem:[#allocation363_spill] sm:$0xff] }
 0x878   : > { %v2808_v32 = vmul.f32 %v14965_v46, %v14989_v53  ;;  %v2818_v11 = vmul.f32 %v14965_v46, %v14990_v4  ;;  %v12022_v35 = vadd.f32 %v5380_v39, %v5219_v61  ;;  %5473 = vperm.xlu1 %7033, %v12000_v18   ;;  %v2828_v37 = vadd.f32 %v2796_v57, %v11902_v8  ;;  %v14993_v39 = vld [vmem:[#allocation603_spill] sm:$0xff]  ;;  %v14994_v52 = vld [vmem:[#allocation328_spill] sm:$0xff]  ;;  %v14995_v57 = vld [vmem:[#allocation365_spill] sm:$0xff] }
 0x879   : > { %v2838_v13 = vadd.f32 %v2806_v14, %v11906_v9  ;;  %v2831_v60 = vadd.f32 %v2799_v25, %v11908_v27  ;;  %v2821_v56 = vmul.f32 %v14965_v46, %v14992_v6  ;;  %v2841_v1 = vadd.f32 %v2809_v40, %v11915_v15  ;;  %v12041_v8 = vpop.permute.xlu2 %5249  ;;  %v14996_v15 = vld [vmem:[#allocation366_spill] sm:$0xff]  ;;  %v14997_v25 = vld [vmem:[#allocation48_spill] sm:$0xff]  ;;  %v15000_v6 = vld [vmem:[#allocation475_spill] sm:$0xff] }
 0x87a   : > { %14991 = vst [vmem:[#allocation538_spill] sm:$0xff] %v12022_v35  ;;  %5478 = vperm.xlu2 %7032, %v12008_v54   ;;  %v12035_v7 = vadd.f32 %v2802_v50, %v11917_v43  ;;  %v12037_v61 = vadd.f32 %v2812_v34, %v2651_v5  ;;  %v5029_v53 = vadd.f32 %v14994_v52, %v14993_v39  ;;  %v7245_v40 = vld [vmem:[%s7347_s29 + $0x172] sm:$0xff]  ;;  %v15002_v39 = vld [vmem:[#allocation371_spill] sm:$0xff] }
 0x87b   : > { %v12044_v9 = vadd.f32 %v2805_v24, %v11938_v17  ;;  %v12046_v27 = vadd.f32 %v2815_v55, %v2654_v51  ;;  %v2814_v14 = vmul.f32 %v14965_v46, %v14995_v57  ;;  %v3049_v43 = vmul.f32 %v14997_v25, %v14996_v15  ;;  %5988 = vperm.xlu0 %7042, %v7245_v40   ;;  %v14999_v34 = vld [vmem:[#allocation368_spill] sm:$0xff]  ;;  %v15001_v51 = vld [vmem:[#allocation369_spill] sm:$0xff]  ;;  %v15006_v40 = vld [vmem:[#allocation375_spill] sm:$0xff] }
 0x87c   : > { %v12053_v5 = vadd.f32 %v2808_v32, %v2647_v16  ;;  %v12055_v50 = vadd.f32 %v2818_v11, %v2657_v38  ;;  %v2817_v4 = vmul.f32 %v14965_v46, %v14999_v34  ;;  %v5190_v17 = vmul.f32 %v11671_v62, %v15000_v6  ;;  %v15003_v57 = vld [vmem:[#allocation372_spill] sm:$0xff]  ;;  %v5310_v32 = vpop.permute.xlu0 %5309  ;;  %v12070_v38 = vld [vmem:[%s7347_s29 + $0x62] sm:$0xff] }
 0x87d   : > { %v12061_v55 = vadd.f32 %v2821_v56, %v2660_v29  ;;  %v3052_v24 = vmul.f32 %v14997_v25, %v15001_v51  ;;  %v2820_v52 = vmul.f32 %v14965_v46, %v15002_v39  ;;  %v3054_v16 = vmul.f32 %v14997_v25, %v15003_v57  ;;  %15004 = vst [vmem:[#allocation309_spill] sm:$0xff] %v12070_v38  ;;  %v15005_v11 = vld [vmem:[#allocation374_spill] sm:$0xff]  ;;  %v15007_v39 = vld [vmem:[#allocation377_spill] sm:$0xff]  ;;  %v15033_v54 = vld [vmem:[#allocation404_spill] sm:$0xff] }
 0x87e   : > { %14998 = vst [vmem:[#allocation646_spill] sm:$0xff] %v12053_v5  ;;  %v2823_v15 = vmul.f32 %v14965_v46, %v15005_v11  ;;  %v3057_v34 = vmul.f32 %v14997_v25, %v15006_v40  ;;  %v5222_v29 = vadd.f32 %v5190_v17, %v5029_v53  ;;  %v5383_v56 = vmul.f32 %v11701_v63, %v5310_v32  ;;  %v15008_v57 = vld [vmem:[#allocation378_spill] sm:$0xff]  ;;  %v15009_v5 = vld [vmem:[#allocation380_spill] sm:$0xff]  ;;  %v15010_v46 = vld [vmem:[#allocation381_spill] sm:$0xff] }
 0x87f   : > { %v2846_v6 = vadd.f32 %v2814_v14, %v11964_v36  ;;  %v3081_v51 = vadd.f32 %v3049_v43, %v11966_v49  ;;  %v3051_v35 = vmul.f32 %v14997_v25, %v15007_v39  ;;  %v3060_v12 = vmul.f32 %v14997_v25, %v15008_v57  ;;  %v12091_v36 = vpop.permute.xlu1 %5156  ;;  %v15013_v43 = vld [vmem:[#allocation383_spill] sm:$0xff]  ;;  %v15017_v39 = vld [vmem:[#allocation625_spill] sm:$0xff]  ;;  %v15019_v57 = vld [vmem:[#allocation386_spill] sm:$0xff] }
 0x880   : > { %v2849_v28 = vadd.f32 %v2817_v4, %v11968_v26  ;;  %v3053_v11 = vmul.f32 %v14997_v25, %v15009_v5  ;;  %v3063_v53 = vmul.f32 %v14997_v25, %v15010_v46  ;;  %v12088_v17 = vadd.f32 %v5383_v56, %v5222_v29  ;;  %5483 = vperm.xlu1 %7033, %v12070_v38   ;;  %v15014_v26 = vld [vmem:[#allocation384_spill] sm:$0xff]  ;;  %v15015_v5 = vld [vmem:[#allocation303_spill] sm:$0xff] }
 0x881   : > { %15012 = vst [vmem:[#allocation563_spill] sm:$0xff] %v12091_v36  ;;  %v3084_v49 = vadd.f32 %v3052_v24, %v11974_v19  ;;  %v2852_v14 = vadd.f32 %v2820_v52, %v11976_v0  ;;  %v3056_v32 = vmul.f32 %v14997_v25, %v15013_v43  ;;  %v3066_v4 = vmul.f32 %v14997_v25, %v15014_v26  ;;  %v15016_v56 = vld [vmem:[#allocation532_spill] sm:$0xff]  ;;  %v12106_v24 = vpop.permute.xlu2 %5257  ;;  %v15020_v26 = vld [vmem:[#allocation387_spill] sm:$0xff]  ;;  %v15032_v36 = vld [vmem:[#allocation402_spill] sm:$0xff] }
 0x882   : > { %15011 = vst [vmem:[#allocation412_spill] sm:$0xff] %v12088_v17  ;;  %5488 = vperm.xlu2 %7032, %v15015_v5   ;;  %v3086_v46 = vadd.f32 %v3054_v16, %v11983_v23  ;;  %v2855_v40 = vadd.f32 %v2823_v15, %v11985_v47  ;;  %v12102_v29 = vadd.f32 %v3057_v34, %v2832_v44  ;;  %v15021_v23 = vmov 1   ;;  %v15022_v16 = vld [vmem:[#allocation389_spill] sm:$0xff]  ;;  %v15023_v34 = vld [vmem:[#allocation478_spill] sm:$0xff] }
 0x883   : > { %v5032_v19 = vadd.f32 %v15017_v39, %v15016_v56  ;;  %15018 = vst [vmem:[#allocation334_spill] sm:$0xff] %v12106_v24  ;;  %v3083_v0 = vadd.f32 %v3051_v35, %v2826_v48  ;;  %v12108_v52 = vadd.f32 %v3060_v12, %v2835_v10  ;;  %v3059_v43 = vmul.f32 %v14997_v25, %v15019_v57  ;;  %v7246_v12 = vld [vmem:[%s7347_s29 + $0x19a] sm:$0xff] }
 0x884   : > { %v3069_v5 = vmul.f32 %v14997_v25, %v15020_v26  ;;  %7050 = vset.pattern.permute.xlu0 %v15021_v23  ;;  %v12115_v47 = vadd.f32 %v3053_v11, %v2828_v37  ;;  %v12117_v44 = vadd.f32 %v3063_v53, %v2838_v13  ;;  %v3062_v15 = vmul.f32 %v14997_v25, %v15022_v16  ;;  %v15024_v56 = vld [vmem:[#allocation390_spill] sm:$0xff]  ;;  %v15025_v57 = vld [vmem:[#allocation393_spill] sm:$0xff]  ;;  %v5322_v13 = vpop.permute.xlu0 %5321  ;;  %v15027_v53 = vld [vmem:[#allocation396_spill] sm:$0xff] }
 0x885   : > { %v5193_v35 = vmul.f32 %v11671_v62, %v15023_v34  ;;  %5807 = vperm.xlu0 %7050, %v7246_v12   ;;  %v12124_v48 = vadd.f32 %v3056_v32, %v2831_v60  ;;  %v12126_v10 = vadd.f32 %v3066_v4, %v2841_v1  ;;  %v3072_v39 = vmul.f32 %v14997_v25, %v15024_v56  ;;  %v12133_v11 = vld [vmem:[%s7347_s29 + $0x82] sm:$0xff]  ;;  %v15030_v56 = vld [vmem:[#allocation84_spill] sm:$0xff] }
 0x886   : > { %v3075_v37 = vmul.f32 %v14997_v25, %v15025_v57  ;;  %15026 = vst [vmem:[#allocation589_spill] sm:$0xff] %v12133_v11  ;;  %v3078_v26 = vmul.f32 %v14997_v25, %v15027_v53  ;;  %v15028_v16 = vld [vmem:[#allocation398_spill] sm:$0xff]  ;;  %v5386_v60 = vmul.f32 %v11701_v63, %v5322_v13  ;;  %v3091_v1 = vadd.f32 %v3059_v43, %v12035_v7  ;;  %v15029_v4 = vld [vmem:[#allocation399_spill] sm:$0xff]  ;;  %v15031_v57 = vld [vmem:[#allocation401_spill] sm:$0xff] }
 0x887   : > { %v3071_v34 = vmul.f32 %v14997_v25, %v15028_v16  ;;  %v5225_v12 = vadd.f32 %v5193_v35, %v5032_v19  ;;  %v3101_v32 = vadd.f32 %v3069_v5, %v12037_v61  ;;  %v3242_v17 = vmul.f32 %v15030_v56, %v15029_v4  ;;  %v12154_v7 = vpop.permute.xlu1 %5168  ;;  %v15035_v43 = vld [vmem:[#allocation392_spill] sm:$0xff]  ;;  %v15037_v13 = vld [vmem:[#allocation405_spill] sm:$0xff]  ;;  %v15039_v16 = vld [vmem:[#allocation511_spill] sm:$0xff] }
 0x888   : > { %v3074_v38 = vmul.f32 %v14997_v25, %v15031_v57  ;;  %v3094_v24 = vadd.f32 %v3062_v15, %v12044_v9  ;;  %v3245_v53 = vmul.f32 %v15030_v56, %v15032_v36  ;;  %v3077_v19 = vmul.f32 %v14997_v25, %v15033_v54  ;;  %5498 = vperm.xlu1 %7033, %v12133_v11   ;;  %v15038_v15 = vld [vmem:[#allocation407_spill] sm:$0xff]  ;;  %v15040_v4 = vld [vmem:[#allocation282_spill] sm:$0xff] }
 0x889   : > { %v12151_v35 = vadd.f32 %v5386_v60, %v5225_v12  ;;  %v3104_v61 = vadd.f32 %v3072_v39, %v12046_v27  ;;  %v12159_v5 = vmul.f32 %v14997_v25, %v15035_v43  ;;  %v3247_v9 = vmul.f32 %v15030_v56, %v15037_v13  ;;  %v15041_v57 = vld [vmem:[#allocation626_spill] sm:$0xff]  ;;  %v12170_v39 = vpop.permute.xlu2 %5269 }
 0x88a   : > { %v3080_v36 = vmul.f32 %v14997_v25, %v15038_v15  ;;  %5503 = vperm.xlu2 %7032, %v15039_v16   ;;  %v3107_v54 = vadd.f32 %v3075_v37, %v12055_v50  ;;  %v3110_v12 = vadd.f32 %v3078_v26, %v12061_v55  ;;  %v3103_v60 = vadd.f32 %v3071_v34, %v2846_v6  ;;  %v15044_v11 = vld [vmem:[#allocation410_spill] sm:$0xff]  ;;  %v15045_v50 = vld [vmem:[#allocation411_spill] sm:$0xff]  ;;  %v15046_v6 = vld [vmem:[#allocation481_spill] sm:$0xff] }
 0x88b   : > { %15034 = vst [vmem:[#allocation634_spill] sm:$0xff] %v12151_v35  ;;  %v5035_v27 = vadd.f32 %v15041_v57, %v15040_v4  ;;  %v3274_v43 = vadd.f32 %v3242_v17, %v3081_v51  ;;  %v3106_v35 = vadd.f32 %v3074_v38, %v2849_v28  ;;  %v3244_v15 = vmul.f32 %v15030_v56, %v15044_v11  ;;  %v15048_v51 = vld [vmem:[#allocation413_spill] sm:$0xff]  ;;  %v15049_v38 = vld [vmem:[#allocation414_spill] sm:$0xff]  ;;  %v12186_v11 = vld [vmem:[%s7347_s29 + $0xaa] sm:$0xff] }
 0x88c   : > { %15036 = vst [vmem:[#allocation153_spill] sm:$0xff] %v12159_v5  ;;  %v15043_v5 = vld [vmem:[#allocation408_spill] sm:$0xff]  ;;  %v3277_v16 = vadd.f32 %v3245_v53, %v3084_v49  ;;  %v3109_v25 = vadd.f32 %v3077_v19, %v2852_v14  ;;  %v3253_v55 = vmul.f32 %v15030_v56, %v15045_v50  ;;  %v5196_v37 = vmul.f32 %v11671_v62, %v15046_v6  ;;  %v15052_v53 = vld [vmem:[#allocation417_spill] sm:$0xff] }
 0x88d   : > { %15042 = vst [vmem:[#allocation361_spill] sm:$0xff] %v12170_v39  ;;  %v3250_v13 = vmul.f32 %v15030_v56, %v15043_v5  ;;  %v15047_v26 = vmov 2   ;;  %v3279_v34 = vadd.f32 %v3247_v9, %v3086_v46  ;;  %v3112_v4 = vadd.f32 %v3080_v36, %v2855_v40  ;;  %v5334_v5 = vpop.permute.xlu0 %5333  ;;  %v15051_v49 = vld [vmem:[#allocation416_spill] sm:$0xff]  ;;  %v15053_v9 = vld [vmem:[#allocation419_spill] sm:$0xff] }
 0x88e   : > { %7053 = vset.pattern.permute.xlu0 %v15047_v26  ;;  %v3246_v28 = vmul.f32 %v15030_v56, %v15048_v51  ;;  %v3256_v17 = vmul.f32 %v15030_v56, %v15049_v38  ;;  %15050 = vst [vmem:[#allocation635_spill] sm:$0xff] %v12186_v11  ;;  %v3249_v14 = vmul.f32 %v15030_v56, %v15051_v49  ;;  %v15054_v6 = vld [vmem:[#allocation420_spill] sm:$0xff]  ;;  %v15055_v26 = vld [vmem:[#allocation422_spill] sm:$0xff]  ;;  %v15056_v39 = vld [vmem:[#allocation423_spill] sm:$0xff] }
 0x88f   : > { %v3259_v19 = vmul.f32 %v15030_v56, %v15052_v53  ;;  %v5228_v57 = vadd.f32 %v5196_v37, %v5035_v27  ;;  %v5389_v50 = vmul.f32 %v11701_v63, %v5334_v5  ;;  %v3282_v46 = vadd.f32 %v3250_v13, %v12102_v29  ;;  %v15058_v13 = vld [vmem:[#allocation426_spill] sm:$0xff]  ;;  %v15059_v37 = vld [vmem:[#allocation429_spill] sm:$0xff]  ;;  %v15060_v5 = vld [vmem:[#allocation431_spill] sm:$0xff] }
 0x890   : > { %v3276_v40 = vadd.f32 %v3244_v15, %v3083_v0  ;;  %v3252_v36 = vmul.f32 %v15030_v56, %v15053_v9  ;;  %v3262_v51 = vmul.f32 %v15030_v56, %v15054_v6  ;;  %v3285_v38 = vadd.f32 %v3253_v55, %v12108_v52  ;;  %5513 = vperm.xlu1 %7033, %v12186_v11   ;;  %v12213_v55 = vpop.permute.xlu1 %5245  ;;  %v15063_v9 = vld [vmem:[#allocation432_spill] sm:$0xff]  ;;  %v15064_v6 = vld [vmem:[#allocation295_spill] sm:$0xff] }
 0x891   : > { %v3255_v49 = vmul.f32 %v15030_v56, %v15055_v26  ;;  %v3265_v53 = vmul.f32 %v15030_v56, %v15056_v39  ;;  %v12203_v27 = vadd.f32 %v5389_v50, %v5228_v57  ;;  %v3278_v29 = vadd.f32 %v3246_v28, %v12115_v47  ;;  %v15061_v47 = vld [vmem:[#allocation647_spill] sm:$0xff]  ;;  %v12221_v28 = vpop.permute.xlu2 %5281 }
 0x892   : > { %v3288_v0 = vadd.f32 %v3256_v17, %v12117_v44  ;;  %v3268_v15 = vmul.f32 %v15030_v56, %v15058_v13  ;;  %v3271_v52 = vmul.f32 %v15030_v56, %v15059_v37  ;;  %5518 = vperm.xlu2 %7032, %v11601_v3   ;;  %v3281_v39 = vadd.f32 %v3249_v14, %v12124_v48  ;;  %v15065_v13 = vld [vmem:[#allocation434_spill] sm:$0xff]  ;;  %v15067_v14 = vld [vmem:[#allocation435_spill] sm:$0xff] }
 0x893   : > { %15057 = vst [vmem:[#allocation612_spill] sm:$0xff] %v12203_v27  ;;  %v3291_v26 = vadd.f32 %v3259_v19, %v12126_v10  ;;  %v3264_v57 = vmul.f32 %v15030_v56, %v15060_v5  ;;  %v5038_v44 = vadd.f32 %v15061_v47, %v11595_v20  ;;  %v3284_v17 = vadd.f32 %v3252_v36, %v3091_v1  ;;  %v15068_v5 = vld [vmem:[#allocation484_spill] sm:$0xff]  ;;  %v15069_v1 = vld [vmem:[#allocation437_spill] sm:$0xff]  ;;  %v15070_v36 = vld [vmem:[#allocation438_spill] sm:$0xff] }
 0x894   : > { %15062 = vst [vmem:[#allocation288_spill] sm:$0xff] %v12221_v28  ;;  %v3294_v50 = vadd.f32 %v3262_v51, %v3101_v32  ;;  %v3435_v3 = vmul.f32 %v15064_v6, %v15063_v9  ;;  %v3267_v37 = vmul.f32 %v15030_v56, %v15065_v13  ;;  %v12227_v48 = vadd.f32 %v3255_v49, %v3094_v24  ;;  %v12242_v24 = vld [vmem:[%s7347_s29 + $0xca] sm:$0xff] }
 0x895   : > { %v3297_v10 = vadd.f32 %v3265_v53, %v3104_v61  ;;  %v3438_v19 = vmul.f32 %v15064_v6, %v15067_v14  ;;  %v5199_v27 = vmul.f32 %v11671_v62, %v15068_v5  ;;  %v12233_v20 = vadd.f32 %v3268_v15, %v3107_v54  ;;  %v5346_v9 = vpop.permute.xlu0 %5345  ;;  %15071 = vst [vmem:[#allocation388_spill] sm:$0xff] %v12242_v24  ;;  %v15072_v49 = vld [vmem:[#allocation440_spill] sm:$0xff]  ;;  %v15074_v5 = vld [vmem:[#allocation453_spill] sm:$0xff]  ;;  %v15098_v11 = vld [vmem:[#allocation455_spill] sm:$0xff] }
 0x896   : > { %15066 = vst [vmem:[#allocation541_spill] sm:$0xff] %v12227_v48  ;;  %v12235_v47 = vadd.f32 %v3271_v52, %v3110_v12  ;;  %v3270_v32 = vmul.f32 %v15030_v56, %v15069_v1  ;;  %v3440_v51 = vmul.f32 %v15064_v6, %v15070_v36  ;;  %v12244_v61 = vadd.f32 %v3264_v57, %v3103_v60  ;;  %v15073_v52 = vld [vmem:[#allocation441_spill] sm:$0xff]  ;;  %v15075_v60 = vld [vmem:[#allocation443_spill] sm:$0xff]  ;;  %v15076_v48 = vld [vmem:[#allocation444_spill] sm:$0xff] }
 0x897   : > { %v3273_v53 = vmul.f32 %v15030_v56, %v15072_v49  ;;  %v5231_v13 = vadd.f32 %v5199_v27, %v5038_v44  ;;  %v5392_v54 = vmul.f32 %v11701_v63, %v5346_v9  ;;  %v12249_v15 = vadd.f32 %v3435_v3, %v3274_v43  ;;  %v15078_v3 = vld [vmem:[#allocation446_spill] sm:$0xff]  ;;  %v15119_v28 = vld [vmem:[#allocation352_spill] sm:$0xff] }
 0x898   : > { %v12251_v12 = vadd.f32 %v3267_v37, %v3106_v35  ;;  %v3443_v14 = vmul.f32 %v15064_v6, %v15073_v52  ;;  %v3455_v1 = vmul.f32 %v15064_v6, %v15074_v5  ;;  %v12257_v36 = vadd.f32 %v3438_v19, %v3277_v16  ;;  %5528 = vperm.xlu1 %7033, %v12242_v24   ;;  %v15079_v9 = vld [vmem:[#allocation486_spill] sm:$0xff]  ;;  %v15080_v16 = vld [vmem:[#allocation69_spill] sm:$0xff]  ;;  %v12275_v49 = vpop.permute.xlu1 %5253  ;;  %v15090_v24 = vld [vmem:[#allocation487_spill] sm:$0xff] }
 0x899   : > { %v3437_v57 = vmul.f32 %v15064_v6, %v15075_v60  ;;  %v3446_v27 = vmul.f32 %v15064_v6, %v15076_v48  ;;  %v12263_v44 = vadd.f32 %v5392_v54, %v5231_v13  ;;  %v12266_v35 = vadd.f32 %v3270_v32, %v3109_v25  ;;  %15081 = vst [vmem:[#allocation311_spill] sm:$0xff] %v12275_v49  ;;  %v15082_v48 = vld [vmem:[#allocation447_spill] sm:$0xff]  ;;  %v15083_v54 = vld [vmem:[#allocation449_spill] sm:$0xff]  ;;  %v15086_v60 = vld [vmem:[#allocation450_spill] sm:$0xff] }
 0x89a   : > { %v12268_v43 = vadd.f32 %v3440_v51, %v3279_v34  ;;  %v3439_v37 = vmul.f32 %v15064_v6, %v15078_v3  ;;  %v3712_v19 = vmul.f32 %v15080_v16, %v15079_v9  ;;  %5533 = vperm.xlu2 %7032, %v11679_v2   ;;  %v12277_v52 = vadd.f32 %v3273_v53, %v3112_v4  ;;  %v15084_v34 = vld [vmem:[#allocation535_spill] sm:$0xff]  ;;  %v12285_v51 = vpop.permute.xlu2 %5293  ;;  %v15087_v4 = vld [vmem:[#allocation518_spill] sm:$0xff] }
 0x89b   : > { %15077 = vst [vmem:[#allocation129_spill] sm:$0xff] %v12263_v44  ;;  %v3449_v13 = vmul.f32 %v15064_v6, %v15082_v48  ;;  %v3442_v25 = vmul.f32 %v15064_v6, %v15083_v54  ;;  %v5041_v32 = vadd.f32 %v15084_v34, %v11673_v45  ;;  %v12287_v5 = vadd.f32 %v3443_v14, %v3282_v46  ;;  %v15088_v53 = vld [vmem:[#allocation87_spill] sm:$0xff]  ;;  %v15089_v54 = vld [vmem:[#allocation452_spill] sm:$0xff] }
 0x89c   : > { %15085 = vst [vmem:[#allocation566_spill] sm:$0xff] %v12285_v51  ;;  %v3452_v2 = vmul.f32 %v15064_v6, %v15086_v60  ;;  %v3487_v3 = vadd.f32 %v3455_v1, %v3294_v50  ;;  %v3905_v9 = vmul.f32 %v15088_v53, %v15087_v4  ;;  %v12293_v44 = vadd.f32 %v3437_v57, %v3276_v40  ;;  %v15091_v46 = vld [vmem:[#allocation456_spill] sm:$0xff]  ;;  %v15092_v50 = vld [vmem:[#allocation547_spill] sm:$0xff]  ;;  %v15093_v1 = vld [vmem:[#allocation273_spill] sm:$0xff] }
 0x89d   : > { %v12295_v48 = vadd.f32 %v3446_v27, %v3285_v38  ;;  %v3445_v56 = vmul.f32 %v15064_v6, %v15089_v54  ;;  %v5202_v45 = vmul.f32 %v11671_v62, %v15090_v24  ;;  %v12301_v34 = vadd.f32 %v3439_v37, %v3278_v29  ;;  %v5358_v4 = vpop.permute.xlu0 %5357  ;;  %v12308_v40 = vld [vmem:[%s7347_s29 + $0xf2] sm:$0xff]  ;;  %v15095_v29 = vld [vmem:[#allocation459_spill] sm:$0xff] }
 0x89e   : > { %v3458_v14 = vmul.f32 %v15064_v6, %v15091_v46  ;;  %v3744_v60 = vadd.f32 %v3712_v19, %v3487_v3  ;;  %v4098_v51 = vmul.f32 %v15093_v1, %v15092_v50  ;;  %15094 = vst [vmem:[#allocation415_spill] sm:$0xff] %v12308_v40  ;;  %v12310_v38 = vadd.f32 %v3449_v13, %v3288_v0  ;;  %v15096_v19 = vld [vmem:[#allocation579_spill] sm:$0xff]  ;;  %v15097_v3 = vld [vmem:[#allocation577_spill] sm:$0xff] }
 0x89f   : > { %v12312_v57 = vadd.f32 %v3442_v25, %v3281_v39  ;;  %v5234_v27 = vadd.f32 %v5202_v45, %v5041_v32  ;;  %v5395_v54 = vmul.f32 %v11701_v63, %v5358_v4  ;;  %v12315_v24 = vadd.f32 %v3452_v2, %v3291_v26  ;;  %v15100_v39 = vld [vmem:[#allocation462_spill] sm:$0xff]  ;;  %v15102_v32 = vld [vmem:[#allocation489_spill] sm:$0xff]  ;;  %v15103_v45 = vld [vmem:[#allocation611_spill] sm:$0xff] }
 0x8a0   : > { %v3461_v37 = vmul.f32 %v15064_v6, %v15095_v29  ;;  %v3937_v46 = vadd.f32 %v3905_v9, %v3744_v60  ;;  %v4356_v49 = vmul.f32 %v15097_v3, %v15096_v19  ;;  %v12321_v50 = vadd.f32 %v3445_v56, %v3284_v17  ;;  %5543 = vperm.xlu1 %7033, %v12308_v40   ;;  %v15104_v60 = vld [vmem:[#allocation349_spill] sm:$0xff]  ;;  %v12337_v17 = vpop.permute.xlu1 %5265 }
 0x8a1   : > { %v12325_v0 = vmul.f32 %v15064_v6, %v15098_v11  ;;  %v3464_v13 = vmul.f32 %v15064_v6, %v15100_v39  ;;  %v12329_v25 = vadd.f32 %v5395_v54, %v5234_v27  ;;  %v3490_v26 = vadd.f32 %v3458_v14, %v3297_v10  ;;  %15105 = vst [vmem:[#allocation591_spill] sm:$0xff] %v12337_v17  ;;  %v15106_v11 = vld [vmem:[#allocation464_spill] sm:$0xff]  ;;  %v15107_v29 = vld [vmem:[#allocation465_spill] sm:$0xff]  ;;  %v15108_v54 = vld [vmem:[#allocation467_spill] sm:$0xff] }
 0x8a2   : > { %v3715_v2 = vmul.f32 %v15080_v16, %v15102_v32  ;;  %v4130_v9 = vadd.f32 %v4098_v51, %v3937_v46  ;;  %v4549_v56 = vmul.f32 %v15104_v60, %v15103_v45  ;;  %5548 = vperm.xlu2 %7032, %v11749_v21   ;;  %v3457_v4 = vmul.f32 %v15064_v6, %v15106_v11  ;;  %v15109_v14 = vld [vmem:[#allocation468_spill] sm:$0xff]  ;;  %v12347_v51 = vpop.permute.xlu2 %5305  ;;  %v15112_v45 = vld [vmem:[#allocation25_spill] sm:$0xff] }
 0x8a3   : > { %15099 = vst [vmem:[#allocation337_spill] sm:$0xff] %v12325_v0  ;;  %v3692_v27 = vmul.f32 %v15080_v16, %v15107_v29  ;;  %v3460_v10 = vmul.f32 %v15064_v6, %v15108_v54  ;;  %v3695_v19 = vmul.f32 %v15080_v16, %v15109_v14  ;;  %v3493_v46 = vadd.f32 %v3461_v37, %v12233_v20  ;;  %v15111_v39 = vld [vmem:[#allocation520_spill] sm:$0xff]  ;;  %v15114_v29 = vld [vmem:[#allocation470_spill] sm:$0xff]  ;;  %v15115_v0 = vld [vmem:[#allocation471_spill] sm:$0xff] }
 0x8a4   : > { %15101 = vst [vmem:[#allocation523_spill] sm:$0xff] %v12329_v25  ;;  %v3908_v21 = vmul.f32 %v15088_v53, %v15111_v39  ;;  %v4388_v32 = vadd.f32 %v4356_v49, %v4130_v9  ;;  %v15113_v25 = vld [vmem:[#allocation376_spill] sm:$0xff]  ;;  %v12355_v40 = vadd.f32 %v3464_v13, %v12235_v47  ;;  %v3463_v54 = vmul.f32 %v15064_v6, %v15114_v29  ;;  %v15116_v17 = vld [vmem:[#allocation473_spill] sm:$0xff]  ;;  %v15117_v37 = vld [vmem:[#allocation550_spill] sm:$0xff] }
 0x8a5   : > { %15110 = vst [vmem:[#allocation639_spill] sm:$0xff] %v12347_v51  ;;  %v4742_v11 = vmul.f32 %v15113_v25, %v15112_v45  ;;  %v3697_v14 = vmul.f32 %v15080_v16, %v15115_v0  ;;  %v3466_v51 = vmul.f32 %v15064_v6, %v15116_v17  ;;  %v3747_v20 = vadd.f32 %v3715_v2, %v3490_v26  ;;  %v15118_v9 = vld [vmem:[#allocation322_spill] sm:$0xff] }
 0x8a6   : > { %v4101_v39 = vmul.f32 %v15093_v1, %v15117_v37  ;;  %v4581_v49 = vadd.f32 %v4549_v56, %v4388_v32  ;;  %v4999_v45 = vmul.f32 %v15119_v28, %v15118_v9  ;;  %v12368_v47 = vadd.f32 %v3457_v4, %v12244_v61  ;;  %v15120_v2 = vld [vmem:[#allocation582_spill] sm:$0xff]  ;;  %v15121_v32 = vld [vmem:[#allocation560_spill] sm:$0xff] }
 0x8a7   : > { %v12371_v13 = vadd.f32 %v3692_v27, %v12249_v15  ;;  %v12374_v29 = vadd.f32 %v3460_v10, %v12251_v12  ;;  %v12377_v0 = vadd.f32 %v3695_v19, %v12257_v36  ;;  %v3940_v26 = vadd.f32 %v3908_v21, %v3747_v20  ;;  %v15122_v4 = vld [vmem:[#allocation492_spill] sm:$0xff]  ;;  %v15123_v27 = vld [vmem:[#allocation474_spill] sm:$0xff]  ;;  %v15128_v20 = vld [vmem:[#allocation479_spill] sm:$0xff] }
 0x8a8   : > { %v4359_v17 = vmul.f32 %v15097_v3, %v15120_v2  ;;  %v4774_v56 = vadd.f32 %v4742_v11, %v4581_v49  ;;  %v5192_v37 = vmul.f32 %v11671_v62, %v15121_v32  ;;  %v12384_v61 = vadd.f32 %v3463_v54, %v12266_v35  ;;  %5558 = vperm.xlu1 %7033, %v11819_v41   ;;  %v15124_v21 = vld [vmem:[#allocation614_spill] sm:$0xff]  ;;  %v15126_v54 = vld [vmem:[#allocation476_spill] sm:$0xff] }
 0x8a9   : > { %v12387_v15 = vadd.f32 %v3697_v14, %v12268_v43  ;;  %v12390_v12 = vadd.f32 %v3466_v51, %v12277_v52  ;;  %v3718_v36 = vmul.f32 %v15080_v16, %v15122_v4  ;;  %v3700_v10 = vmul.f32 %v15080_v16, %v15123_v27  ;;  %v12400_v43 = vpop.permute.xlu1 %5277  ;;  %v15127_v51 = vld [vmem:[#allocation477_spill] sm:$0xff]  ;;  %v15129_v49 = vld [vmem:[#allocation522_spill] sm:$0xff]  ;;  %v15131_v32 = vld [vmem:[#allocation480_spill] sm:$0xff] }
 0x8aa   : > { %v4133_v19 = vadd.f32 %v4101_v39, %v3940_v26  ;;  %v4552_v11 = vmul.f32 %v15104_v60, %v15124_v21  ;;  %v5031_v35 = vadd.f32 %v4999_v45, %v4774_v56  ;;  %5563 = vperm.xlu2 %7032, %v11887_v31   ;;  %15125 = vst [vmem:[#allocation51_spill] sm:$0xff] %v12400_v43  ;;  %v5318_v9 = vpop.permute.xlu2 %5317  ;;  %v15130_v45 = vld [vmem:[#allocation38_spill] sm:$0xff]  ;;  %v15135_v43 = vld [vmem:[#allocation529_spill] sm:$0xff] }
 0x8ab   : > { %v3694_v52 = vmul.f32 %v15080_v16, %v15126_v54  ;;  %v3703_v14 = vmul.f32 %v15080_v16, %v15127_v51  ;;  %v3696_v41 = vmul.f32 %v15080_v16, %v15128_v20  ;;  %v3911_v39 = vmul.f32 %v15088_v53, %v15129_v49  ;;  %v15132_v27 = vld [vmem:[#allocation482_spill] sm:$0xff]  ;;  %v15133_v54 = vld [vmem:[#allocation483_spill] sm:$0xff]  ;;  %v15134_v49 = vld [vmem:[#allocation553_spill] sm:$0xff] }
 0x8ac   : > { %v4391_v26 = vadd.f32 %v4359_v17, %v4133_v19  ;;  %v4745_v31 = vmul.f32 %v15113_v25, %v15130_v45  ;;  %v5224_v2 = vadd.f32 %v5192_v37, %v5031_v35  ;;  %v5385_v56 = vmul.f32 %v11701_v63, %v5318_v9  ;;  %v12426_v35 = vld [vmem:[%s7347_s29 + $0x13a] sm:$0xff] }
 0x8ad   : > { %v3706_v4 = vmul.f32 %v15080_v16, %v15131_v32  ;;  %v3699_v21 = vmul.f32 %v15080_v16, %v15132_v27  ;;  %v3709_v51 = vmul.f32 %v15080_v16, %v15133_v54  ;;  %v3750_v20 = vadd.f32 %v3718_v36, %v3493_v46  ;;  %15136 = vst [vmem:[#allocation16_spill] sm:$0xff] %v12426_v35  ;;  %v12441_v36 = vld [vmem:[%s7347_s29 + $0x142] sm:$0xff]  ;;  %v15144_v54 = vld [vmem:[#allocation500_spill] sm:$0xff] }
 0x8ae   : > { %v4104_v17 = vmul.f32 %v15093_v1, %v15134_v49  ;;  %v4584_v19 = vadd.f32 %v4552_v11, %v4391_v26  ;;  %v5002_v45 = vmul.f32 %v15119_v28, %v15135_v43  ;;  %v12423_v37 = vadd.f32 %v5385_v56, %v5224_v2  ;;  %15137 = vst [vmem:[#allocation156_spill] sm:$0xff] %v12441_v36  ;;  %v15138_v43 = vld [vmem:[#allocation585_spill] sm:$0xff] }
 0x8af   : > { %v12429_v9 = vadd.f32 %v3700_v10, %v12287_v5  ;;  %v12432_v32 = vadd.f32 %v3694_v52, %v12293_v44  ;;  %v12435_v27 = vadd.f32 %v3703_v14, %v12295_v48  ;;  %v12438_v46 = vadd.f32 %v3696_v41, %v12301_v34  ;;  %v15139_v34 = vld [vmem:[#allocation495_spill] sm:$0xff]  ;;  %v15140_v14 = vld [vmem:[#allocation485_spill] sm:$0xff] }
 0x8b0   : > { %v3943_v11 = vadd.f32 %v3911_v39, %v3750_v20  ;;  %v4362_v26 = vmul.f32 %v15097_v3, %v15138_v43  ;;  %v4777_v2 = vadd.f32 %v4745_v31, %v4584_v19  ;;  %v5195_v5 = vmul.f32 %v11671_v62, %v11761_v59  ;;  %5573 = vperm.xlu1 %7033, %v12426_v35   ;;  %v15141_v31 = vld [vmem:[#allocation617_spill] sm:$0xff]  ;;  %v15151_v35 = vld [vmem:[#allocation300_spill] sm:$0xff] }
 0x8b1   : > { %v12448_v10 = vadd.f32 %v3706_v4, %v12310_v38  ;;  %v12451_v44 = vadd.f32 %v3699_v21, %v12312_v57  ;;  %v12454_v48 = vadd.f32 %v3709_v51, %v12315_v24  ;;  %v3721_v52 = vmul.f32 %v15080_v16, %v15139_v34  ;;  %v12464_v57 = vpop.permute.xlu1 %5289  ;;  %v15142_v56 = vld [vmem:[#allocation497_spill] sm:$0xff]  ;;  %v15143_v4 = vld [vmem:[#allocation498_spill] sm:$0xff] }
 0x8b2   : > { %v3702_v41 = vmul.f32 %v15080_v16, %v15140_v14  ;;  %v4136_v39 = vadd.f32 %v4104_v17, %v3943_v11  ;;  %v4555_v59 = vmul.f32 %v15104_v60, %v15141_v31  ;;  %v5034_v38 = vadd.f32 %v5002_v45, %v4777_v2  ;;  %5578 = vperm.xlu2 %7032, %v12441_v36   ;;  %v15145_v20 = vld [vmem:[#allocation525_spill] sm:$0xff]  ;;  %v5330_v17 = vpop.permute.xlu2 %5329  ;;  %v15150_v36 = vld [vmem:[#allocation556_spill] sm:$0xff] }
 0x8b3   : > { %v3714_v24 = vmul.f32 %v15080_v16, %v15142_v56  ;;  %v3885_v21 = vmul.f32 %v15088_v53, %v15143_v4  ;;  %v3717_v51 = vmul.f32 %v15080_v16, %v15144_v54  ;;  %v3914_v49 = vmul.f32 %v15088_v53, %v15145_v20  ;;  %v15146_v11 = vld [vmem:[#allocation45_spill] sm:$0xff]  ;;  %v15148_v56 = vld [vmem:[#allocation503_spill] sm:$0xff]  ;;  %v15149_v54 = vld [vmem:[#allocation504_spill] sm:$0xff] }
 0x8b4   : > { %v4394_v19 = vadd.f32 %v4362_v26, %v4136_v39  ;;  %v4748_v45 = vmul.f32 %v15113_v25, %v15146_v11  ;;  %v5227_v43 = vadd.f32 %v5195_v5, %v5034_v38  ;;  %v5388_v2 = vmul.f32 %v11701_v63, %v5330_v17  ;;  %v15147_v14 = vld [vmem:[#allocation501_spill] sm:$0xff] }
 0x8b5   : > { %v3753_v34 = vadd.f32 %v3721_v52, %v12355_v40  ;;  %v3888_v31 = vmul.f32 %v15088_v53, %v15147_v14  ;;  %v3720_v4 = vmul.f32 %v15080_v16, %v15148_v56  ;;  %v3890_v20 = vmul.f32 %v15088_v53, %v15149_v54  ;;  %v12499_v14 = vld [vmem:[%s7347_s29 + $0x16a] sm:$0xff] }
 0x8b6   : > { %v4107_v26 = vmul.f32 %v15093_v1, %v15150_v36  ;;  %v4587_v39 = vadd.f32 %v4555_v59, %v4394_v19  ;;  %v5005_v5 = vmul.f32 %v15119_v28, %v15151_v35  ;;  %v12488_v38 = vadd.f32 %v5388_v2, %v5227_v43  ;;  %15152 = vst [vmem:[#allocation364_spill] sm:$0xff] %v12499_v14  ;;  %v15153_v59 = vld [vmem:[#allocation588_spill] sm:$0xff]  ;;  %v15158_v43 = vld [vmem:[#allocation509_spill] sm:$0xff]  ;;  %v15161_v54 = vld [vmem:[#allocation527_spill] sm:$0xff] }
 0x8b7   : > { %v12491_v40 = vadd.f32 %v3702_v41, %v12321_v50  ;;  %v3746_v52 = vadd.f32 %v3714_v24, %v12368_v47  ;;  %v3917_v17 = vadd.f32 %v3885_v21, %v12371_v13  ;;  %v12496_v11 = vadd.f32 %v3717_v51, %v12374_v29  ;;  %v15154_v13 = vld [vmem:[#allocation506_spill] sm:$0xff]  ;;  %v15155_v41 = vld [vmem:[#allocation507_spill] sm:$0xff] }
 0x8b8   : > { %v3946_v36 = vadd.f32 %v3914_v49, %v3753_v34  ;;  %v4365_v19 = vmul.f32 %v15097_v3, %v15153_v59  ;;  %v4780_v56 = vadd.f32 %v4748_v45, %v4587_v39  ;;  %v5198_v35 = vmul.f32 %v11671_v62, %v11829_v30  ;;  %v12516_v21 = vld [vmem:[%s7347_s29 + $0x15a] sm:$0xff]  ;;  %v15157_v49 = vld [vmem:[#allocation620_spill] sm:$0xff] }
 0x8b9   : > { %v12506_v50 = vadd.f32 %v3888_v31, %v12377_v0  ;;  %v12509_v47 = vadd.f32 %v3720_v4, %v12384_v61  ;;  %v3723_v29 = vmul.f32 %v15080_v16, %v15154_v13  ;;  %v3893_v24 = vmul.f32 %v15088_v53, %v15155_v41  ;;  %15156 = vst [vmem:[#allocation640_spill] sm:$0xff] %v12516_v21  ;;  %v12525_v61 = vpop.permute.xlu1 %5301  ;;  %v15159_v34 = vld [vmem:[#allocation510_spill] sm:$0xff]  ;;  %v15160_v4 = vld [vmem:[#allocation512_spill] sm:$0xff] }
 0x8ba   : > { %5588 = vperm.xlu1 %7033, %v12516_v21   ;;  %v12520_v51 = vadd.f32 %v3890_v20, %v12387_v15  ;;  %v4139_v30 = vadd.f32 %v4107_v26, %v3946_v36  ;;  %v4558_v0 = vmul.f32 %v15104_v60, %v15157_v49  ;;  %v5037_v45 = vadd.f32 %v5005_v5, %v4780_v56  ;;  %v5342_v26 = vpop.permute.xlu2 %5341  ;;  %v15162_v5 = vld [vmem:[#allocation548_spill] sm:$0xff] }
 0x8bb   : > { %5593 = vperm.xlu2 %7032, %v12499_v14   ;;  %v3887_v2 = vmul.f32 %v15088_v53, %v15158_v43  ;;  %v3896_v31 = vmul.f32 %v15088_v53, %v15159_v34  ;;  %v3889_v15 = vmul.f32 %v15088_v53, %v15160_v4  ;;  %v3907_v20 = vmul.f32 %v15088_v53, %v15161_v54  ;;  %v15163_v49 = vld [vmem:[#allocation528_spill] sm:$0xff]  ;;  %v15164_v34 = vld [vmem:[#allocation558_spill] sm:$0xff] }
 0x8bc   : > { %v4397_v39 = vadd.f32 %v4365_v19, %v4139_v30  ;;  %v4751_v36 = vmul.f32 %v15113_v25, %v15162_v5  ;;  %v5230_v59 = vadd.f32 %v5198_v35, %v5037_v45  ;;  %v5391_v56 = vmul.f32 %v11701_v63, %v5342_v26  ;;  %v15165_v19 = vld [vmem:[#allocation513_spill] sm:$0xff]  ;;  %v15166_v5 = vld [vmem:[#allocation144_spill] sm:$0xff] }
 0x8bd   : > { %v12539_v13 = vadd.f32 %v3723_v29, %v12390_v12  ;;  %v12542_v41 = vadd.f32 %v3893_v24, %v12429_v9  ;;  %v4078_v43 = vmul.f32 %v15093_v1, %v15163_v49  ;;  %v4100_v4 = vmul.f32 %v15093_v1, %v15164_v34  ;;  %v12555_v12 = vld [vmem:[%s7347_s29 + $0x182] sm:$0xff]  ;;  %v12565_v21 = vld [vmem:[%s7347_s29 + $0x18a] sm:$0xff] }
 0x8be   : > { %v3899_v30 = vmul.f32 %v15088_v53, %v15165_v19  ;;  %v4590_v54 = vadd.f32 %v4558_v0, %v4397_v39  ;;  %v5008_v35 = vmul.f32 %v15119_v28, %v15166_v5  ;;  %v12552_v45 = vadd.f32 %v5391_v56, %v5230_v59  ;;  %15167 = vst [vmem:[#allocation615_spill] sm:$0xff] %v12555_v12  ;;  %v15168_v24 = vld [vmem:[#allocation559_spill] sm:$0xff]  ;;  %v15169_v49 = vld [vmem:[#allocation590_spill] sm:$0xff] }
 0x8bf   : > { %v12558_v9 = vadd.f32 %v3887_v2, %v12432_v32  ;;  %v3939_v29 = vadd.f32 %v3907_v20, %v3746_v52  ;;  %v4336_v26 = vmul.f32 %v15097_v3, %v15168_v24  ;;  %v4358_v34 = vmul.f32 %v15097_v3, %v15169_v49  ;;  %15170 = vst [vmem:[#allocation46_spill] sm:$0xff] %v12565_v21  ;;  %v15171_v20 = vld [vmem:[#allocation592_spill] sm:$0xff]  ;;  %v15172_v19 = vld [vmem:[#allocation623_spill] sm:$0xff] }
 0x8c0   : > { %v12568_v0 = vadd.f32 %v3896_v31, %v12435_v27  ;;  %v12571_v39 = vadd.f32 %v3889_v15, %v12438_v46  ;;  %v4783_v59 = vadd.f32 %v4751_v36, %v4590_v54  ;;  %v5201_v32 = vmul.f32 %v11671_v62, %v11895_v33  ;;  %v15173_v31 = vld [vmem:[#allocation515_spill] sm:$0xff]  ;;  %v15174_v15 = vld [vmem:[#allocation530_spill] sm:$0xff]  ;;  %v15175_v54 = vld [vmem:[#allocation624_spill] sm:$0xff] }
 0x8c1   : > { %v4110_v2 = vadd.f32 %v4078_v43, %v3917_v17  ;;  %v4132_v52 = vadd.f32 %v4100_v4, %v3939_v29  ;;  %v4529_v56 = vmul.f32 %v15104_v60, %v15171_v20  ;;  %v4551_v5 = vmul.f32 %v15104_v60, %v15172_v19  ;;  %v12590_v36 = vpop.permute.xlu1 %5313  ;;  %v15177_v49 = vld [vmem:[#allocation531_spill] sm:$0xff]  ;;  %v15178_v19 = vld [vmem:[#allocation561_spill] sm:$0xff] }
 0x8c2   : > { %5603 = vperm.xlu1 %7033, %v12555_v12   ;;  %v12581_v27 = vadd.f32 %v3899_v30, %v12448_v10  ;;  %v12585_v46 = vmul.f32 %v15088_v53, %v15173_v31  ;;  %v3910_v33 = vmul.f32 %v15088_v53, %v15174_v15  ;;  %v5040_v17 = vadd.f32 %v5008_v35, %v4783_v59  ;;  %v15176_v10 = vld [vmem:[#allocation72_spill] sm:$0xff]  ;;  %v5354_v24 = vpop.permute.xlu2 %5353 }
 0x8c3   : > { %5608 = vperm.xlu2 %7032, %v12565_v21   ;;  %v4368_v43 = vadd.f32 %v4336_v26, %v4110_v2  ;;  %v4390_v4 = vadd.f32 %v4358_v34, %v4132_v52  ;;  %v4722_v29 = vmul.f32 %v15113_v25, %v15175_v54  ;;  %v4744_v30 = vmul.f32 %v15113_v25, %v15176_v10  ;;  %v15179_v34 = vld [vmem:[#allocation75_spill] sm:$0xff]  ;;  %v15181_v21 = vld [vmem:[#allocation562_spill] sm:$0xff] }
 0x8c4   : > { %v4081_v20 = vmul.f32 %v15093_v1, %v15177_v49  ;;  %v4103_v35 = vmul.f32 %v15093_v1, %v15178_v19  ;;  %v5233_v59 = vadd.f32 %v5201_v32, %v5040_v17  ;;  %v5394_v31 = vmul.f32 %v11701_v63, %v5354_v24  ;;  %v15180_v52 = vld [vmem:[#allocation147_spill] sm:$0xff]  ;;  %v15182_v49 = vld [vmem:[#allocation593_spill] sm:$0xff]  ;;  %v15184_v17 = vld [vmem:[#allocation150_spill] sm:$0xff] }
 0x8c5   : > { %v4561_v15 = vadd.f32 %v4529_v56, %v4368_v43  ;;  %v4583_v26 = vadd.f32 %v4551_v5, %v4390_v4  ;;  %v4979_v2 = vmul.f32 %v15119_v28, %v15179_v34  ;;  %v5001_v54 = vmul.f32 %v15119_v28, %v15180_v52  ;;  %v12613_v32 = vld [vmem:[%s7347_s29 + $0x1a2] sm:$0xff]  ;;  %v15186_v34 = vld [vmem:[#allocation628_spill] sm:$0xff]  ;;  %v15189_v52 = vld [vmem:[#allocation629_spill] sm:$0xff] }
 0x8c6   : > { %v3942_v10 = vadd.f32 %v3910_v33, %v12496_v11  ;;  %v4339_v12 = vmul.f32 %v15097_v3, %v15181_v21  ;;  %v4361_v14 = vmul.f32 %v15097_v3, %v15182_v49  ;;  %v12610_v19 = vadd.f32 %v5394_v31, %v5233_v59  ;;  %15183 = vst [vmem:[#allocation78_spill] sm:$0xff] %v12613_v32  ;;  %v15185_v24 = vld [vmem:[#allocation595_spill] sm:$0xff]  ;;  %v15187_v31 = vld [vmem:[#allocation533_spill] sm:$0xff] }
 0x8c7   : > { %v4754_v56 = vadd.f32 %v4722_v29, %v4561_v15  ;;  %v4776_v5 = vadd.f32 %v4744_v30, %v4583_v26  ;;  %v5172_v43 = vmul.f32 %v11671_v62, %v15184_v17  ;;  %v5194_v4 = vmul.f32 %v11671_v62, %v11953_v58  ;;  %v15188_v58 = vld [vmem:[#allocation534_spill] sm:$0xff] }
 0x8c8   : > { %v4113_v11 = vadd.f32 %v4081_v20, %v12506_v50  ;;  %v4135_v33 = vadd.f32 %v4103_v35, %v3942_v10  ;;  %v4532_v21 = vmul.f32 %v15104_v60, %v15185_v24  ;;  %v4554_v59 = vmul.f32 %v15104_v60, %v15186_v34  ;;  %v15190_v17 = vld [vmem:[#allocation346_spill] sm:$0xff]  ;;  %v15191_v24 = vld [vmem:[#allocation564_spill] sm:$0xff] }
 0x8c9   : > { %v3913_v29 = vmul.f32 %v15088_v53, %v15187_v31  ;;  %v5011_v30 = vadd.f32 %v4979_v2, %v4754_v56  ;;  %v5033_v15 = vadd.f32 %v5001_v54, %v4776_v5  ;;  %v5365_v26 = vmul.f32 %v11701_v63, %v11972_v42  ;;  %v5326_v49 = vpop.permute.xlu1 %5325  ;;  %v7248_v5 = vld [vmem:[%s7347_s29 + $0x32] sm:$0xff] }
 0x8ca   : > { %5618 = vperm.xlu1 %7033, %v12613_v32   ;;  %v4083_v50 = vmul.f32 %v15093_v1, %v15188_v58  ;;  %v4371_v20 = vadd.f32 %v4339_v12, %v4113_v11  ;;  %v4393_v35 = vadd.f32 %v4361_v14, %v4135_v33  ;;  %v4725_v10 = vmul.f32 %v15113_v25, %v15189_v52  ;;  %v15192_v11 = vld [vmem:[#allocation90_spill] sm:$0xff]  ;;  %v15193_v58 = vld [vmem:[#allocation325_spill] sm:$0xff] }
 0x8cb   : > { %7035 = vset.pattern.permute.xlu2 %v15021_v23  ;;  %v4747_v2 = vmul.f32 %v15113_v25, %v15190_v17  ;;  %v5204_v54 = vadd.f32 %v5172_v43, %v5011_v30  ;;  %v5226_v56 = vadd.f32 %v5194_v4, %v5033_v15  ;;  %v5387_v42 = vmul.f32 %v11701_v63, %v5326_v49  ;;  %v15194_v43 = vld [vmem:[#allocation583_spill] sm:$0xff]  ;;  %v15195_v15 = vld [vmem:[#allocation565_spill] sm:$0xff] }
 0x8cc   : > { %5687 = vperm.xlu2 %7035, %v7248_v5   ;;  %v4106_v34 = vmul.f32 %v15093_v1, %v15191_v24  ;;  %v4564_v12 = vadd.f32 %v4532_v21, %v4371_v20  ;;  %v4586_v14 = vadd.f32 %v4554_v59, %v4393_v35  ;;  %v4982_v33 = vmul.f32 %v15119_v28, %v15192_v11  ;;  %v5464_v31 = vpop.permute.xlu2 %5463  ;;  %v15196_v5 = vld [vmem:[#allocation596_spill] sm:$0xff] }
 0x8cd   : > { %v5004_v52 = vmul.f32 %v15119_v28, %v15193_v58  ;;  %v5397_v32 = vadd.f32 %v5365_v26, %v5204_v54  ;;  %v12644_v17 = vadd.f32 %v5387_v42, %v5226_v56  ;;  %v5622_v4 = vmul.f32 %v15194_v43, %v5464_v31  ;;  %v15197_v35 = vld [vmem:[#allocation580_spill] sm:$0xff] }
 0x8ce   : > { %v3945_v30 = vadd.f32 %v3913_v29, %v12509_v47  ;;  %v4341_v49 = vmul.f32 %v15097_v3, %v15195_v15  ;;  %v4364_v21 = vmul.f32 %v15097_v3, %v15196_v5  ;;  %v4757_v59 = vadd.f32 %v4725_v10, %v4564_v12  ;;  %v15198_v47 = vld [vmem:[#allocation598_spill] sm:$0xff]  ;;  %v15199_v11 = vld [vmem:[#allocation632_spill] sm:$0xff]  ;;  %v15203_v15 = vld [vmem:[#allocation93_spill] sm:$0xff] }
 0x8cf   : > { %v4779_v20 = vadd.f32 %v4747_v2, %v4586_v14  ;;  %v5175_v24 = vmul.f32 %v11671_v62, %v15197_v35  ;;  %v5197_v26 = vmul.f32 %v11671_v62, %v12025_v22  ;;  %v12656_v54 = vadd.f32 %v5622_v4, %v5397_v32  ;;  %v15200_v58 = vld [vmem:[#allocation536_spill] sm:$0xff]  ;;  %v15201_v22 = vld [vmem:[#allocation537_spill] sm:$0xff] }
 0x8d0   : > { %v4115_v56 = vadd.f32 %v4083_v50, %v12520_v51  ;;  %v4138_v42 = vadd.f32 %v4106_v34, %v3945_v30  ;;  %v4534_v29 = vmul.f32 %v15104_v60, %v15198_v47  ;;  %v4557_v31 = vmul.f32 %v15104_v60, %v15199_v11  ;;  %v15202_v34 = vld [vmem:[#allocation633_spill] sm:$0xff] }
 0x8d1   : > { %v3916_v10 = vmul.f32 %v15088_v53, %v15200_v58  ;;  %v5014_v2 = vadd.f32 %v4982_v33, %v4757_v59  ;;  %v5036_v12 = vadd.f32 %v5004_v52, %v4779_v20  ;;  %v5368_v14 = vmul.f32 %v11701_v63, %v12041_v8  ;;  %v5338_v30 = vpop.permute.xlu1 %5337  ;;  %v15204_v59 = vld [vmem:[#allocation385_spill] sm:$0xff]  ;;  %v15205_v20 = vld [vmem:[#allocation567_spill] sm:$0xff] }
 0x8d2   : > { %7036 = vset.pattern.permute.xlu1 %v15021_v23  ;;  %v4086_v51 = vmul.f32 %v15093_v1, %v15201_v22  ;;  %v4373_v32 = vadd.f32 %v4341_v49, %v4115_v56  ;;  %v4396_v50 = vadd.f32 %v4364_v21, %v4138_v42  ;;  %v4727_v4 = vmul.f32 %v15113_v25, %v15202_v34  ;;  %v15206_v56 = vld [vmem:[#allocation526_spill] sm:$0xff]  ;;  %v15209_v34 = vld [vmem:[#allocation599_spill] sm:$0xff] }
 0x8d3   : > { %5695 = vperm.xlu1 %7036, %v12000_v18   ;;  %v4750_v33 = vmul.f32 %v15113_v25, %v15203_v15  ;;  %v5207_v52 = vadd.f32 %v5175_v24, %v5014_v2  ;;  %v5229_v5 = vadd.f32 %v5197_v26, %v5036_v12  ;;  %v5390_v8 = vmul.f32 %v11701_v63, %v5338_v30  ;;  %v15207_v18 = vld [vmem:[#allocation261_spill] sm:$0xff]  ;;  %v15208_v2 = vld [vmem:[#allocation568_spill] sm:$0xff]  ;;  %v15211_v15 = vld [vmem:[#allocation563_spill] sm:$0xff] }
 0x8d4   : > { %5699 = vperm.xlu2 %7035, %v15204_v59   ;;  %v4109_v35 = vmul.f32 %v15093_v1, %v15205_v20  ;;  %v4566_v49 = vadd.f32 %v4534_v29, %v4373_v32  ;;  %v4589_v21 = vadd.f32 %v4557_v31, %v4396_v50  ;;  %v4984_v42 = vmul.f32 %v15119_v28, %v15206_v56  ;;  %v5479_v47 = vpop.permute.xlu2 %5478  ;;  %v15210_v50 = vld [vmem:[#allocation279_spill] sm:$0xff]  ;;  %v15213_v59 = vld [vmem:[#allocation637_spill] sm:$0xff]  ;;  %v15215_v56 = vld [vmem:[#allocation334_spill] sm:$0xff] }
 0x8d5   : > { %v5007_v11 = vmul.f32 %v15119_v28, %v15207_v18  ;;  %v5400_v58 = vadd.f32 %v5368_v14, %v5207_v52  ;;  %v12683_v22 = vadd.f32 %v5390_v8, %v5229_v5  ;;  %v5625_v24 = vmul.f32 %v15194_v43, %v5479_v47  ;;  %v15216_v18 = vld [vmem:[#allocation539_spill] sm:$0xff] }
 0x8d6   : > { %v3948_v26 = vadd.f32 %v3916_v10, %v12539_v13  ;;  %v4344_v12 = vmul.f32 %v15097_v3, %v15208_v2  ;;  %v4367_v29 = vmul.f32 %v15097_v3, %v15209_v34  ;;  %v4759_v31 = vadd.f32 %v4727_v4, %v4566_v49  ;;  %v15212_v13 = vld [vmem:[#allocation600_spill] sm:$0xff] }
 0x8d7   : > { %v4782_v32 = vadd.f32 %v4750_v33, %v4589_v21  ;;  %v5177_v30 = vmul.f32 %v11671_v62, %v15210_v50  ;;  %v5200_v14 = vmul.f32 %v11671_v62, %v15211_v15  ;;  %v12695_v52 = vadd.f32 %v5625_v24, %v5400_v58  ;;  %v15214_v4 = vld [vmem:[#allocation516_spill] sm:$0xff] }
 0x8d8   : > { %v4118_v5 = vadd.f32 %v4086_v51, %v12542_v41  ;;  %v4141_v8 = vadd.f32 %v4109_v35, %v3948_v26  ;;  %v4537_v10 = vmul.f32 %v15104_v60, %v15212_v13  ;;  %v4560_v20 = vmul.f32 %v15104_v60, %v15213_v59  ;;  %v15217_v35 = vld [vmem:[#allocation638_spill] sm:$0xff]  ;;  %v15218_v26 = vld [vmem:[#allocation309_spill] sm:$0xff]  ;;  %v15219_v34 = vld [vmem:[#allocation96_spill] sm:$0xff] }
 0x8d9   : > { %v3902_v33 = vmul.f32 %v15088_v53, %v15214_v4  ;;  %v5016_v49 = vadd.f32 %v4984_v42, %v4759_v31  ;;  %v5039_v21 = vadd.f32 %v5007_v11, %v4782_v32  ;;  %v5370_v47 = vmul.f32 %v11701_v63, %v15215_v56  ;;  %v5350_v2 = vpop.permute.xlu1 %5349  ;;  %v7249_v31 = vld [vmem:[%s7347_s29 + $0x6a] sm:$0xff]  ;;  %v15222_v4 = vld [vmem:[#allocation621_spill] sm:$0xff] }
 0x8da   : > { %v4080_v58 = vmul.f32 %v15093_v1, %v15216_v18  ;;  %v4376_v41 = vadd.f32 %v4344_v12, %v4118_v5  ;;  %v4399_v51 = vadd.f32 %v4367_v29, %v4141_v8  ;;  %v4730_v24 = vmul.f32 %v15113_v25, %v15217_v35  ;;  %v15220_v32 = vld [vmem:[#allocation540_spill] sm:$0xff]  ;;  %v15221_v5 = vld [vmem:[#allocation99_spill] sm:$0xff] }
 0x8db   : > { %5703 = vperm.xlu1 %7036, %v15218_v26   ;;  %v4753_v50 = vmul.f32 %v15113_v25, %v15219_v34  ;;  %v5209_v15 = vadd.f32 %v5177_v30, %v5016_v49  ;;  %v5232_v42 = vadd.f32 %v5200_v14, %v5039_v21  ;;  %v5393_v11 = vmul.f32 %v11701_v63, %v5350_v2  ;;  %v15223_v49 = vld [vmem:[#allocation570_spill] sm:$0xff]  ;;  %v15225_v26 = vld [vmem:[#allocation379_spill] sm:$0xff] }
 0x8dc   : > { %5707 = vperm.xlu2 %7035, %v7249_v31   ;;  %v4089_v13 = vmul.f32 %v15093_v1, %v15220_v32  ;;  %v4569_v12 = vadd.f32 %v4537_v10, %v4376_v41  ;;  %v4592_v29 = vadd.f32 %v4560_v20, %v4399_v51  ;;  %v4987_v8 = vmul.f32 %v15119_v28, %v15221_v5  ;;  %v5489_v59 = vpop.permute.xlu2 %5488  ;;  %v15224_v20 = vld [vmem:[#allocation571_spill] sm:$0xff] }
 0x8dd   : > { %v5010_v56 = vmul.f32 %v15119_v28, %v15222_v4  ;;  %v5402_v18 = vadd.f32 %v5370_v47, %v5209_v15  ;;  %v12721_v35 = vadd.f32 %v5393_v11, %v5232_v42  ;;  %v5627_v30 = vmul.f32 %v15194_v43, %v5489_v59  ;;  %v15227_v11 = vld [vmem:[#allocation602_spill] sm:$0xff]  ;;  %v15231_v59 = vld [vmem:[#allocation589_spill] sm:$0xff] }
 0x8de   : > { %v12726_v14 = vadd.f32 %v12585_v46, %v12451_v44  ;;  %v4338_v10 = vmul.f32 %v15097_v3, %v15223_v49  ;;  %v4347_v21 = vmul.f32 %v15097_v3, %v15224_v20  ;;  %v4762_v41 = vadd.f32 %v4730_v24, %v4569_v12  ;;  %v15226_v46 = vld [vmem:[#allocation601_spill] sm:$0xff]  ;;  %v15233_v49 = vld [vmem:[#allocation543_spill] sm:$0xff] }
 0x8df   : > { %v4785_v51 = vadd.f32 %v4753_v50, %v4592_v29  ;;  %v5180_v2 = vmul.f32 %v11671_v62, %v15225_v26  ;;  %v5203_v47 = vmul.f32 %v11671_v62, %v12154_v7  ;;  %v12736_v34 = vadd.f32 %v5627_v30, %v5402_v18  ;;  %v15228_v12 = vld [vmem:[#allocation361_spill] sm:$0xff]  ;;  %v15229_v29 = vld [vmem:[#allocation542_spill] sm:$0xff]  ;;  %v15232_v18 = vld [vmem:[#allocation643_spill] sm:$0xff] }
 0x8e0   : > { %v4112_v15 = vadd.f32 %v4080_v58, %v12558_v9  ;;  %v4121_v44 = vadd.f32 %v4089_v13, %v12568_v0  ;;  %v4531_v42 = vmul.f32 %v15104_v60, %v15226_v46  ;;  %v4540_v24 = vmul.f32 %v15104_v60, %v15227_v11  ;;  %v15230_v13 = vld [vmem:[#allocation642_spill] sm:$0xff]  ;;  %v7250_v30 = vld [vmem:[%s7347_s29 + $0x92] sm:$0xff] }
 0x8e1   : > { %v12745_v50 = vadd.f32 %v3902_v33, %v12454_v48  ;;  %v5019_v31 = vadd.f32 %v4987_v8, %v4762_v41  ;;  %v5042_v32 = vadd.f32 %v5010_v56, %v4785_v51  ;;  %v5373_v7 = vmul.f32 %v11701_v63, %v15228_v12  ;;  %v5362_v4 = vpop.permute.xlu1 %5361  ;;  %v15234_v41 = vld [vmem:[#allocation102_spill] sm:$0xff] }
 0x8e2   : > { %v4082_v9 = vmul.f32 %v15093_v1, %v15229_v29  ;;  %v4370_v58 = vadd.f32 %v4338_v10, %v4112_v15  ;;  %v4379_v0 = vadd.f32 %v4347_v21, %v4121_v44  ;;  %v4724_v5 = vmul.f32 %v15113_v25, %v15230_v13  ;;  %v15235_v15 = vld [vmem:[#allocation114_spill] sm:$0xff] }
 0x8e3   : > { %5715 = vperm.xlu1 %7036, %v15231_v59   ;;  %v4733_v48 = vmul.f32 %v15113_v25, %v15232_v18  ;;  %v5212_v33 = vadd.f32 %v5180_v2, %v5019_v31  ;;  %v5235_v8 = vadd.f32 %v5203_v47, %v5042_v32  ;;  %v5396_v56 = vmul.f32 %v11701_v63, %v5362_v4  ;;  %v15236_v47 = vld [vmem:[#allocation517_spill] sm:$0xff]  ;;  %v15237_v32 = vld [vmem:[#allocation572_spill] sm:$0xff]  ;;  %v15240_v59 = vld [vmem:[#allocation406_spill] sm:$0xff] }
 0x8e4   : > { %5719 = vperm.xlu2 %7035, %v7250_v30   ;;  %v4092_v20 = vmul.f32 %v15093_v1, %v15233_v49  ;;  %v4563_v10 = vadd.f32 %v4531_v42, %v4370_v58  ;;  %v4572_v21 = vadd.f32 %v4540_v24, %v4379_v0  ;;  %v4981_v51 = vmul.f32 %v15119_v28, %v15234_v41  ;;  %v5504_v26 = vpop.permute.xlu2 %5503  ;;  %v15238_v24 = vld [vmem:[#allocation636_spill] sm:$0xff]  ;;  %v15239_v58 = vld [vmem:[#allocation573_spill] sm:$0xff] }
 0x8e5   : > { %v4990_v44 = vmul.f32 %v15119_v28, %v15235_v15  ;;  %v5405_v46 = vadd.f32 %v5373_v7, %v5212_v33  ;;  %v12764_v11 = vadd.f32 %v5396_v56, %v5235_v8  ;;  %v5630_v2 = vmul.f32 %v15194_v43, %v5504_v26  ;;  %v15241_v33 = vld [vmem:[#allocation604_spill] sm:$0xff]  ;;  %v15242_v49 = vld [vmem:[#allocation605_spill] sm:$0xff] }
 0x8e6   : > { %v3895_v31 = vmul.f32 %v15088_v53, %v15236_v47  ;;  %v4340_v12 = vmul.f32 %v15097_v3, %v15237_v32  ;;  %v4756_v42 = vadd.f32 %v4724_v5, %v4563_v10  ;;  %v5174_v29 = vmul.f32 %v11671_v62, %v15238_v24  ;;  %v15244_v26 = vld [vmem:[#allocation544_spill] sm:$0xff]  ;;  %v15248_v47 = vld [vmem:[#allocation649_spill] sm:$0xff] }
 0x8e7   : > { %v4350_v0 = vmul.f32 %v15097_v3, %v15239_v58  ;;  %v4765_v13 = vadd.f32 %v4733_v48, %v4572_v21  ;;  %v5183_v7 = vmul.f32 %v11671_v62, %v15240_v59  ;;  %v12777_v4 = vadd.f32 %v5630_v2, %v5405_v46  ;;  %v15243_v21 = vld [vmem:[#allocation288_spill] sm:$0xff]  ;;  %v15246_v2 = vld [vmem:[#allocation635_spill] sm:$0xff] }
 0x8e8   : > { %v4114_v18 = vadd.f32 %v4082_v9, %v12571_v39  ;;  %v4533_v8 = vmul.f32 %v15104_v60, %v15241_v33  ;;  %v5013_v56 = vadd.f32 %v4981_v51, %v4756_v42  ;;  %v5367_v5 = vmul.f32 %v11701_v63, %v12213_v55  ;;  %v15245_v15 = vld [vmem:[#allocation648_spill] sm:$0xff]  ;;  %v15247_v55 = vld [vmem:[#allocation545_spill] sm:$0xff] }
 0x8e9   : > { %v4124_v30 = vadd.f32 %v4092_v20, %v12581_v27  ;;  %v4543_v48 = vmul.f32 %v15104_v60, %v15242_v49  ;;  %v5022_v10 = vadd.f32 %v4990_v44, %v4765_v13  ;;  %v5376_v41 = vmul.f32 %v11701_v63, %v15243_v21  ;;  %v7251_v42 = vld [vmem:[%s7347_s29 + $0xb2] sm:$0xff]  ;;  %v15249_v13 = vld [vmem:[#allocation298_spill] sm:$0xff]  ;;  %v15251_v21 = vld [vmem:[#allocation575_spill] sm:$0xff] }
 0x8ea   : > { %v4085_v39 = vmul.f32 %v15093_v1, %v15244_v26  ;;  %v4372_v9 = vadd.f32 %v4340_v12, %v4114_v18  ;;  %v4726_v46 = vmul.f32 %v15113_v25, %v15245_v15  ;;  %v5206_v51 = vadd.f32 %v5174_v29, %v5013_v56  ;;  %v5474_v24 = vpop.permute.xlu1 %5473  ;;  %v15250_v56 = vld [vmem:[#allocation551_spill] sm:$0xff] }
 0x8eb   : > { %5727 = vperm.xlu1 %7036, %v15246_v2   ;;  %v4095_v27 = vmul.f32 %v15093_v1, %v15247_v55  ;;  %v4382_v20 = vadd.f32 %v4350_v0, %v4124_v30  ;;  %v4736_v44 = vmul.f32 %v15113_v25, %v15248_v47  ;;  %v5215_v32 = vadd.f32 %v5183_v7, %v5022_v10  ;;  %v15252_v26 = vld [vmem:[#allocation355_spill] sm:$0xff] }
 0x8ec   : > { %5731 = vperm.xlu2 %7035, %v7251_v42   ;;  %v4565_v58 = vadd.f32 %v4533_v8, %v4372_v9  ;;  %v4983_v12 = vmul.f32 %v15119_v28, %v15249_v13  ;;  %v5399_v59 = vadd.f32 %v5367_v5, %v5206_v51  ;;  %v5624_v29 = vmul.f32 %v15194_v43, %v5474_v24  ;;  %v5519_v18 = vpop.permute.xlu2 %5518  ;;  %v15253_v5 = vld [vmem:[#allocation576_spill] sm:$0xff] }
 0x8ed   : > { %v4575_v33 = vadd.f32 %v4543_v48, %v4382_v20  ;;  %v4993_v49 = vmul.f32 %v15119_v28, %v15250_v56  ;;  %v5408_v0 = vadd.f32 %v5376_v41, %v5215_v32  ;;  %v5633_v30 = vmul.f32 %v15194_v43, %v5519_v18  ;;  %v15254_v48 = vld [vmem:[#allocation606_spill] sm:$0xff]  ;;  %v15255_v20 = vld [vmem:[#allocation607_spill] sm:$0xff] }
 0x8ee   : > { %v4343_v7 = vmul.f32 %v15097_v3, %v15251_v21  ;;  %v4758_v10 = vadd.f32 %v4726_v46, %v4565_v58  ;;  %v5176_v8 = vmul.f32 %v11671_v62, %v15252_v26  ;;  %v12809_v9 = vadd.f32 %v5624_v29, %v5399_v59  ;;  %v15256_v32 = vld [vmem:[#allocation311_spill] sm:$0xff]  ;;  %v15257_v58 = vld [vmem:[#allocation608_spill] sm:$0xff]  ;;  %v15258_v59 = vld [vmem:[#allocation566_spill] sm:$0xff] }
 0x8ef   : > { %v4353_v15 = vmul.f32 %v15097_v3, %v15253_v5  ;;  %v4768_v51 = vadd.f32 %v4736_v44, %v4575_v33  ;;  %v5186_v2 = vmul.f32 %v11671_v62, %v15254_v48  ;;  %v12815_v55 = vadd.f32 %v5633_v30, %v5408_v0  ;;  %v15261_v0 = vld [vmem:[#allocation546_spill] sm:$0xff] }
 0x8f0   : > { %v4117_v41 = vadd.f32 %v4085_v39, %v12726_v14  ;;  %v4536_v47 = vmul.f32 %v15104_v60, %v15255_v20  ;;  %v5015_v46 = vadd.f32 %v4983_v12, %v4758_v10  ;;  %v5369_v42 = vmul.f32 %v11701_v63, %v15256_v32  ;;  %v15259_v39 = vld [vmem:[#allocation7_spill] sm:$0xff]  ;;  %v15260_v12 = vld [vmem:[#allocation388_spill] sm:$0xff]  ;;  %v7252_v10 = vld [vmem:[%s7347_s29 + $0xda] sm:$0xff] }
 0x8f1   : > { %v4127_v24 = vadd.f32 %v4095_v27, %v12745_v50  ;;  %v4546_v44 = vmul.f32 %v15104_v60, %v15257_v58  ;;  %v5025_v13 = vadd.f32 %v4993_v49, %v4768_v51  ;;  %v5379_v29 = vmul.f32 %v11701_v63, %v15258_v59  ;;  %v15262_v27 = vld [vmem:[#allocation8_spill] sm:$0xff]  ;;  %v15265_v32 = vld [vmem:[#allocation578_spill] sm:$0xff] }
 0x8f2   : > { %v3927_v18 = vadd.f32 %v3895_v31, %v12491_v40  ;;  %v4375_v14 = vadd.f32 %v4343_v7, %v4117_v41  ;;  %v4729_v33 = vmul.f32 %v15113_v25, %v15259_v39  ;;  %v5208_v56 = vadd.f32 %v5176_v8, %v5015_v46  ;;  %v5484_v26 = vpop.permute.xlu1 %5483  ;;  %v15263_v40 = vld [vmem:[#allocation117_spill] sm:$0xff]  ;;  %v15264_v41 = vld [vmem:[#allocation120_spill] sm:$0xff]  ;;  %v15266_v58 = vld [vmem:[#allocation382_spill] sm:$0xff] }
 0x8f3   : > { %5739 = vperm.xlu1 %7036, %v15260_v12   ;;  %v4088_v30 = vmul.f32 %v15093_v1, %v15261_v0  ;;  %v4385_v50 = vadd.f32 %v4353_v15, %v4127_v24  ;;  %v4739_v21 = vmul.f32 %v15113_v25, %v15262_v27  ;;  %v5218_v49 = vadd.f32 %v5186_v2, %v5025_v13  ;;  %v15269_v12 = vld [vmem:[#allocation610_spill] sm:$0xff] }
 0x8f4   : > { %5743 = vperm.xlu2 %7035, %v7252_v10   ;;  %v4568_v5 = vadd.f32 %v4536_v47, %v4375_v14  ;;  %v4986_v31 = vmul.f32 %v15119_v28, %v15263_v40  ;;  %v5401_v7 = vadd.f32 %v5369_v42, %v5208_v56  ;;  %v5626_v8 = vmul.f32 %v15194_v43, %v5484_v26  ;;  %v5534_v51 = vpop.permute.xlu2 %5533  ;;  %v15267_v42 = vld [vmem:[#allocation488_spill] sm:$0xff]  ;;  %v15272_v10 = vld [vmem:[#allocation337_spill] sm:$0xff] }
 0x8f5   : > { %v4578_v48 = vadd.f32 %v4546_v44, %v4385_v50  ;;  %v4996_v20 = vmul.f32 %v15119_v28, %v15264_v41  ;;  %v5411_v15 = vadd.f32 %v5379_v29, %v5218_v49  ;;  %v5636_v46 = vmul.f32 %v15194_v43, %v5534_v51  ;;  %v15268_v44 = vld [vmem:[#allocation641_spill] sm:$0xff]  ;;  %v15270_v50 = vld [vmem:[#allocation591_spill] sm:$0xff]  ;;  %v15275_v51 = vld [vmem:[#allocation646_spill] sm:$0xff] }
 0x8f6   : > { %v4346_v2 = vmul.f32 %v15097_v3, %v15265_v32  ;;  %v4761_v24 = vadd.f32 %v4729_v33, %v4568_v5  ;;  %v5179_v47 = vmul.f32 %v11671_v62, %v15266_v58  ;;  %v12846_v13 = vadd.f32 %v5626_v8, %v5401_v7  ;;  %v15271_v49 = vld [vmem:[#allocation541_spill] sm:$0xff]  ;;  %v15273_v5 = vld [vmem:[#allocation519_spill] sm:$0xff]  ;;  %v15277_v41 = vld [vmem:[#allocation18_spill] sm:$0xff] }
 0x8f7   : > { %v3705_v59 = vmul.f32 %v15080_v16, %v15267_v42  ;;  %v4771_v14 = vadd.f32 %v4739_v21, %v4578_v48  ;;  %v5189_v39 = vmul.f32 %v11671_v62, %v15268_v44  ;;  %v12852_v56 = vadd.f32 %v5636_v46, %v5411_v15  ;;  %v15274_v7 = vld [vmem:[#allocation639_spill] sm:$0xff]  ;;  %v15279_v32 = vld [vmem:[#allocation425_spill] sm:$0xff] }
 0x8f8   : > { %v4120_v29 = vadd.f32 %v4088_v30, %v3927_v18  ;;  %v4539_v0 = vmul.f32 %v15104_v60, %v15269_v12  ;;  %v5018_v33 = vadd.f32 %v4986_v31, %v4761_v24  ;;  %v5372_v27 = vmul.f32 %v11701_v63, %v15270_v50  ;;  %v15276_v18 = vld [vmem:[#allocation153_spill] sm:$0xff]  ;;  %v15278_v46 = vld [vmem:[#allocation415_spill] sm:$0xff]  ;;  %v15280_v24 = vld [vmem:[#allocation84_spill] sm:$0xff] }
 0x8f9   : > { %v3480_v26 = vadd.f32 %v15272_v10, %v15271_v49  ;;  %v3898_v21 = vmul.f32 %v15088_v53, %v15273_v5  ;;  %v5028_v40 = vadd.f32 %v4996_v20, %v4771_v14  ;;  %v5382_v8 = vmul.f32 %v11701_v63, %v15274_v7  ;;  %v15281_v44 = vld [vmem:[#allocation549_spill] sm:$0xff]  ;;  %v15282_v10 = vld [vmem:[#allocation123_spill] sm:$0xff]  ;;  %v15283_v5 = vld [vmem:[#allocation458_spill] sm:$0xff] }
 0x8fa   : > { %v3097_v30 = vadd.f32 %v15276_v18, %v15275_v51  ;;  %v4378_v48 = vadd.f32 %v4346_v2, %v4120_v29  ;;  %v4732_v31 = vmul.f32 %v15113_v25, %v15277_v41  ;;  %v5211_v15 = vadd.f32 %v5179_v47, %v5018_v33  ;;  %v7253_v12 = vld [vmem:[%s7347_s29 + $0xfa] sm:$0xff]  ;;  %v5499_v50 = vpop.permute.xlu1 %5498 }
 0x8fb   : > { %5751 = vperm.xlu1 %7036, %v15278_v46   ;;  %v3258_v58 = vmul.f32 %v15280_v24, %v15279_v32  ;;  %v3737_v42 = vadd.f32 %v3705_v59, %v3480_v26  ;;  %v4091_v20 = vmul.f32 %v15093_v1, %v15281_v44  ;;  %v5221_v14 = vadd.f32 %v5189_v39, %v5028_v40  ;;  %v15284_v18 = vld [vmem:[#allocation581_spill] sm:$0xff]  ;;  %v15285_v41 = vld [vmem:[#allocation306_spill] sm:$0xff]  ;;  %v15288_v44 = vld [vmem:[#allocation491_spill] sm:$0xff] }
 0x8fc   : > { %5755 = vperm.xlu2 %7035, %v7253_v12   ;;  %v4571_v49 = vadd.f32 %v4539_v0, %v4378_v48  ;;  %v4989_v2 = vmul.f32 %v15119_v28, %v15282_v10  ;;  %v5404_v29 = vadd.f32 %v5372_v27, %v5211_v15  ;;  %v5629_v47 = vmul.f32 %v15194_v43, %v5499_v50  ;;  %v5549_v33 = vpop.permute.xlu2 %5548  ;;  %v15286_v27 = vld [vmem:[#allocation362_spill] sm:$0xff]  ;;  %v15287_v15 = vld [vmem:[#allocation39_spill] sm:$0xff] }
 0x8fd   : > { %v3451_v7 = vmul.f32 %v15064_v6, %v15283_v5  ;;  %v3930_v51 = vadd.f32 %v3898_v21, %v3737_v42  ;;  %v5414_v59 = vadd.f32 %v5382_v8, %v5221_v14  ;;  %v5639_v26 = vmul.f32 %v15194_v43, %v5549_v33  ;;  %v15289_v14 = vld [vmem:[#allocation613_spill] sm:$0xff]  ;;  %v15290_v50 = vld [vmem:[#allocation51_spill] sm:$0xff]  ;;  %v15291_v10 = vld [vmem:[#allocation358_spill] sm:$0xff] }
 0x8fe   : > { %v4349_v39 = vmul.f32 %v15097_v3, %v15284_v18  ;;  %v4764_v40 = vadd.f32 %v4732_v31, %v4571_v49  ;;  %v5182_v0 = vmul.f32 %v11671_v62, %v15285_v41  ;;  %v12884_v48 = vadd.f32 %v5629_v47, %v5404_v29  ;;  %v15292_v29 = vld [vmem:[#allocation285_spill] sm:$0xff]  ;;  %v15293_v33 = vld [vmem:[#allocation395_spill] sm:$0xff]  ;;  %v15294_v5 = vld [vmem:[#allocation48_spill] sm:$0xff] }
 0x8ff   : > { %v2811_v46 = vmul.f32 %v15287_v15, %v15286_v27  ;;  %v3290_v32 = vadd.f32 %v3258_v58, %v3097_v30  ;;  %v3708_v21 = vmul.f32 %v15080_v16, %v15288_v44  ;;  %v12890_v8 = vadd.f32 %v5639_v26, %v5414_v59  ;;  %v15295_v18 = vld [vmem:[#allocation521_spill] sm:$0xff] }
 0x900   : > { %v4123_v42 = vadd.f32 %v4091_v20, %v3930_v51  ;;  %v4542_v12 = vmul.f32 %v15104_v60, %v15289_v14  ;;  %v5021_v31 = vadd.f32 %v4989_v2, %v4764_v40  ;;  %v5375_v49 = vmul.f32 %v11701_v63, %v15290_v50  ;;  %v15296_v20 = vld [vmem:[#allocation30_spill] sm:$0xff]  ;;  %v7254_v27 = vld [vmem:[%s7347_s29 + $0x112] sm:$0xff] }
 0x901   : > { %v2650_v47 = vadd.f32 %v15292_v29, %v15291_v10  ;;  %v3068_v30 = vmul.f32 %v15294_v5, %v15293_v33  ;;  %v3483_v58 = vadd.f32 %v3451_v7, %v3290_v32  ;;  %v3901_v59 = vmul.f32 %v15088_v53, %v15295_v18  ;;  %v15297_v40 = vld [vmem:[#allocation428_spill] sm:$0xff]  ;;  %v7255_v10 = vld [vmem:[%s7347_s29 + $0x122] sm:$0xff] }
 0x902   : > { %v4381_v26 = vadd.f32 %v4349_v39, %v4123_v42  ;;  %v4735_v51 = vmul.f32 %v15113_v25, %v15296_v20  ;;  %v5214_v41 = vadd.f32 %v5182_v0, %v5021_v31  ;;  %v3261_v15 = vmul.f32 %v15280_v24, %v15297_v40  ;;  %v15298_v14 = vld [vmem:[#allocation552_spill] sm:$0xff]  ;;  %v5514_v7 = vpop.permute.xlu1 %5513  ;;  %v15302_v20 = vld [vmem:[#allocation331_spill] sm:$0xff] }
 0x903   : > { %5763 = vperm.xlu1 %7036, %v7254_v27   ;;  %v2843_v2 = vadd.f32 %v2811_v46, %v2650_v47  ;;  %v3740_v44 = vadd.f32 %v3708_v21, %v3483_v58  ;;  %v4094_v50 = vmul.f32 %v15093_v1, %v15298_v14  ;;  %v15299_v29 = vld [vmem:[#allocation276_spill] sm:$0xff]  ;;  %v5632_v0 = vmul.f32 %v15194_v43, %v5514_v7  ;;  %v15300_v46 = vld [vmem:[#allocation461_spill] sm:$0xff]  ;;  %v15306_v7 = vld [vmem:[#allocation270_spill] sm:$0xff] }
 0x904   : > { %5767 = vperm.xlu2 %7035, %v7255_v10   ;;  %v4574_v32 = vadd.f32 %v4542_v12, %v4381_v26  ;;  %v4992_v39 = vmul.f32 %v15119_v28, %v15299_v29  ;;  %v5407_v42 = vadd.f32 %v5375_v49, %v5214_v41  ;;  %v5564_v31 = vpop.permute.xlu2 %5563  ;;  %v3454_v47 = vmul.f32 %v15064_v6, %v15300_v46  ;;  %v15301_v5 = vld [vmem:[#allocation584_spill] sm:$0xff]  ;;  %v15303_v41 = vld [vmem:[#allocation494_spill] sm:$0xff]  ;;  %v15308_v29 = vld [vmem:[#allocation555_spill] sm:$0xff] }
 0x905   : > { %v3100_v33 = vadd.f32 %v3068_v30, %v2843_v2  ;;  %v3933_v24 = vadd.f32 %v3901_v59, %v3740_v44  ;;  %v5642_v21 = vmul.f32 %v15194_v43, %v5564_v31  ;;  %v4352_v58 = vmul.f32 %v15097_v3, %v15301_v5  ;;  %v15304_v59 = vld [vmem:[#allocation616_spill] sm:$0xff]  ;;  %v15309_v31 = vld [vmem:[#allocation258_spill] sm:$0xff] }
 0x906   : > { %v4767_v18 = vadd.f32 %v4735_v51, %v4574_v32  ;;  %v5185_v12 = vmul.f32 %v11671_v62, %v15302_v20  ;;  %v12920_v26 = vadd.f32 %v5632_v0, %v5407_v42  ;;  %v3711_v30 = vmul.f32 %v15080_v16, %v15303_v41  ;;  %v15305_v14 = vld [vmem:[#allocation524_spill] sm:$0xff]  ;;  %v15311_v20 = vld [vmem:[#allocation630_spill] sm:$0xff] }
 0x907   : > { %v3293_v49 = vadd.f32 %v3261_v15, %v3100_v33  ;;  %v12925_v27 = vadd.f32 %v5642_v21, %v12423_v37  ;;  %v4126_v6 = vadd.f32 %v4094_v50, %v3933_v24  ;;  %v4545_v2 = vmul.f32 %v15104_v60, %v15304_v59 }
 0x908   : > { %v5024_v40 = vadd.f32 %v4992_v39, %v4767_v18  ;;  %v5378_v51 = vmul.f32 %v11701_v63, %v12464_v57  ;;  %v3904_v15 = vmul.f32 %v15088_v53, %v15305_v14  ;;  %v4738_v16 = vmul.f32 %v15113_v25, %v15306_v7  ;;  %v7256_v39 = vld [vmem:[%s7347_s29 + $0x3a] sm:$0xff] }
 0x909   : > { %v3486_v44 = vadd.f32 %v3454_v47, %v3293_v49  ;;  %v4384_v10 = vadd.f32 %v4352_v58, %v4126_v6  ;;  %v15307_v37 = vmov 2   ;;  %v4097_v42 = vmul.f32 %v15093_v1, %v15308_v29  ;;  %v7257_v47 = vld [vmem:[%s7347_s29 + $0x4a] sm:$0xff] }
 0x90a   : > { %v5217_v32 = vadd.f32 %v5185_v12, %v5024_v40  ;;  %v5529_v57 = vpop.permute.xlu1 %5528  ;;  %v4995_v53 = vmul.f32 %v15119_v28, %v15309_v31  ;;  %v15310_v1 = vld [vmem:[#allocation587_spill] sm:$0xff]  ;;  %v5188_v12 = vmul.f32 %v11671_v62, %v15311_v20  ;;  %v5381_v40 = vmul.f32 %v11701_v63, %v12525_v61 }
 0x90b   : > { %7037 = vset.pattern.permute.xlu1 %v15307_v37  ;;  %v3743_v50 = vadd.f32 %v3711_v30, %v3486_v44  ;;  %v4577_v0 = vadd.f32 %v4545_v2, %v4384_v10  ;;  %v5635_v46 = vmul.f32 %v15194_v43, %v5529_v57  ;;  %v4355_v58 = vmul.f32 %v15097_v3, %v15310_v1  ;;  %v15312_v6 = vld [vmem:[#allocation619_spill] sm:$0xff]  ;;  %v15313_v3 = vld [vmem:[#allocation66_spill] sm:$0xff] }
 0x90c   : > { %7038 = vset.pattern.permute.xlu2 %v15307_v37  ;;  %5884 = vperm.xlu1 %7037, %v7256_v39   ;;  %v5410_v33 = vadd.f32 %v5378_v51, %v5217_v32  ;;  %v5579_v24 = vpop.permute.xlu2 %5578  ;;  %v4548_v59 = vmul.f32 %v15104_v60, %v15312_v6  ;;  %v4741_v44 = vmul.f32 %v15113_v25, %v15313_v3  ;;  %v15315_v25 = vld [vmem:[#allocation631_spill] sm:$0xff] }
 0x90d   : > { %5888 = vperm.xlu2 %7038, %v7257_v47   ;;  %v3936_v21 = vadd.f32 %v3904_v15, %v3743_v50  ;;  %v5645_v5 = vmul.f32 %v15194_v43, %v5579_v24  ;;  %v4770_v18 = vadd.f32 %v4738_v16, %v4577_v0  ;;  %v7258_v15 = vld [vmem:[%s7347_s29 + $0x52] sm:$0xff]  ;;  %v7259_v50 = vld [vmem:[%s7347_s29 + $0x62] sm:$0xff]  ;;  %v5191_v39 = vmul.f32 %v11671_v62, %v15315_v25  ;;  %v7266_v3 = vld [vmem:[%s7347_s29 + $0xca] sm:$0xff] }
 0x90e   : > { %v12949_v49 = vadd.f32 %v5635_v46, %v5410_v33  ;;  %v5384_v31 = vmul.f32 %v11701_v63, %v12590_v36  ;;  %v7260_v33 = vld [vmem:[%s7347_s29 + $0x7a] sm:$0xff] }
 0x90f   : > { %v12952_v41 = vadd.f32 %v5645_v5, %v12488_v38  ;;  %v4129_v30 = vadd.f32 %v4097_v42, %v3936_v21  ;;  %v5027_v2 = vadd.f32 %v4995_v53, %v4770_v18  ;;  %v15314_v38 = vld [vmem:[#allocation554_spill] sm:$0xff] }
 0x910   : > { %v4998_v16 = vmul.f32 %v15119_v28, %v15314_v38  ;;  %v7261_v21 = vld [vmem:[%s7347_s29 + $0x82] sm:$0xff]  ;;  %v7262_v63 = vld [vmem:[%s7347_s29 + $0x9a] sm:$0xff]  ;;  %v7268_v38 = vld [vmem:[%s7347_s29 + $0xf2] sm:$0xff] }
 0x911   : > { %v4387_v51 = vadd.f32 %v4355_v58, %v4129_v30  ;;  %v5220_v14 = vadd.f32 %v5188_v12, %v5027_v2  ;;  %v12988_v58 = vld [vmem:[%s13638_s1 + $0x18] sm:$0x7]  ;;  %v7264_v12 = vld [vmem:[%s7347_s29 + $0xaa] sm:$0xff]  ;;  %v7265_v2 = vld [vmem:[%s7347_s29 + $0xc2] sm:$0xff] }
 0x912   : > { %v5544_v10 = vpop.permute.xlu1 %5543  ;;  %v12991_v18 = vperm.slane %v12988_v58, 1 }
 0x913   : > { %v4580_v7 = vadd.f32 %v4548_v59, %v4387_v51  ;;  %v5413_v32 = vadd.f32 %v5381_v40, %v5220_v14  ;;  %v5638_v60 = vmul.f32 %v15194_v43, %v5544_v10 }
 0x914   : > { %5892 = vperm.xlu1 %7037, %v7258_v15  }
 0x915   : > { %5896 = vperm.xlu2 %7038, %v7259_v50   ;;  %v5594_v61 = vpop.permute.xlu2 %5593  ;;  %v4773_v42 = vadd.f32 %v4741_v44, %v4580_v7  ;;  %v12968_v57 = vadd.f32 %v5638_v60, %v5413_v32 }
 0x916   : > { %v5648_v29 = vmul.f32 %v15194_v43, %v5594_v61  ;;  %v7269_v61 = vld [vmem:[%s7347_s29 + $0x10a] sm:$0xff] }
 0x917   : > { %v5030_v28 = vadd.f32 %v4998_v16, %v4773_v42 }
 0x918   : > { %v12971_v0 = vadd.f32 %v5648_v29, %v12552_v45  ;;  %v7270_v29 = vld [vmem:[%s7347_s29 + $0x12a] sm:$0xff] }
 0x919   : > { %v5223_v53 = vadd.f32 %v5191_v39, %v5030_v28 }
 0x91a   : > { %v5559_v46 = vpop.permute.xlu1 %5558 }
 0x91b   : > { %v5416_v47 = vadd.f32 %v5384_v31, %v5223_v53  ;;  %v5641_v24 = vmul.f32 %v15194_v43, %v5559_v46  ;;  %v15317_v53 = vld [vmem:[#allocation156_spill] sm:$0xff] }
 0x91c   : > { %5904 = vperm.xlu1 %7037, %v7260_v33  }
 0x91d   : > { %5908 = vperm.xlu2 %7038, %v7261_v21   ;;  %v5609_v62 = vpop.permute.xlu2 %5608  ;;  %v12979_v45 = vadd.f32 %v5641_v24, %v5416_v47  ;;  %v7271_v21 = vld [vmem:[%s7347_s29 + $0x152] sm:$0xff] }
 0x91e   : > { %v5651_v5 = vmul.f32 %v15194_v43, %v5609_v62 }
 0x920   : > { %v12982_v1 = vadd.f32 %v5651_v5, %v12610_v19 }
 0x922   : > { %v5574_v36 = vpop.permute.xlu1 %5573 }
 0x923   : > { %v5644_v20 = vmul.f32 %v15194_v43, %v5574_v36 }
 0x924   : > { %5916 = vperm.xlu1 %7037, %v7262_v63  }
 0x925   : > { %5920 = vperm.xlu2 %7038, %v7264_v12   ;;  %v12996_v19 = vadd.f32 %v5644_v20, %v12644_v17 }
 0x926   : > { %v5688_v30 = vpop.permute.xlu2 %5687 }
 0x927   : > { %v5815_v6 = vmul.f32 %v12991_v18, %v5688_v30  ;;  %v7272_v30 = vld [vmem:[%s7347_s29 + $0x13a] sm:$0xff] }
 0x929   : > { %v13000_v59 = vadd.f32 %v5815_v6, %v12656_v54  ;;  %v7267_v54 = vld [vmem:[%s7347_s29 + $0xe2] sm:$0xff] }
 0x92c   : > { %5928 = vperm.xlu1 %7037, %v7265_v2   ;;  %v5589_v40 = vpop.permute.xlu1 %5588  ;;  %v7273_v2 = vld [vmem:[%s7347_s29 + $0x142] sm:$0xff] }
 0x92d   : > { %v5647_v51 = vmul.f32 %v15194_v43, %v5589_v40  ;;  %5932 = vperm.xlu2 %7038, %v7266_v3  }
 0x92e   : > { %v5700_v44 = vpop.permute.xlu2 %5699 }
 0x92f   : > { %v13006_v14 = vadd.f32 %v5647_v51, %v12683_v22  ;;  %v5818_v17 = vmul.f32 %v12991_v18, %v5700_v44 }
 0x931   : > { %v13010_v15 = vadd.f32 %v5818_v17, %v12695_v52  ;;  %v13066_v17 = vperm.slane %v12988_v58, 2  ;;  %v13082_v58 = vld [vmem:[%s13639_s2] ss:$0 sm:$0xff] }
 0x934   : > { %5940 = vperm.xlu1 %7037, %v7267_v54   ;;  %v5604_v10 = vpop.permute.xlu1 %5603 }
 0x935   : > { %v5650_v7 = vmul.f32 %v15194_v43, %v5604_v10  ;;  %5944 = vperm.xlu2 %7038, %v7268_v38   ;;  %v7274_v10 = vld [vmem:[%s7347_s29 + $0x172] sm:$0xff] }
 0x936   : > { %v5708_v16 = vpop.permute.xlu2 %5707 }
 0x937   : > { %v13016_v32 = vadd.f32 %v5650_v7, %v12721_v35  ;;  %v5820_v22 = vmul.f32 %v12991_v18, %v5708_v16 }
 0x939   : > { %v13020_v60 = vadd.f32 %v5820_v22, %v12736_v34  ;;  %v15316_v34 = vld [vmem:[#allocation16_spill] sm:$0xff] }
 0x93c   : > { %7039 = vset.pattern.permute.xlu1 %v15021_v23  ;;  %v5619_v52 = vpop.permute.xlu1 %5618 }
 0x93d   : > { %v5653_v50 = vmul.f32 %v15194_v43, %v5619_v52  ;;  %5952 = vperm.xlu2 %7038, %v7269_v61   ;;  %5771 = vperm.xlu1 %7039, %v7270_v29  }
 0x93e   : > { %v5720_v42 = vpop.permute.xlu2 %5719 }
 0x93f   : > { %v13027_v25 = vadd.f32 %v5653_v50, %v12764_v11  ;;  %v5823_v35 = vmul.f32 %v12991_v18, %v5720_v42  ;;  %v15320_v42 = vld [vmem:[#allocation640_spill] sm:$0xff] }
 0x941   : > { %v13031_v39 = vadd.f32 %v5823_v35, %v12777_v4 }
 0x945   : > { %7040 = vset.pattern.permute.xlu2 %v15021_v23  ;;  %5775 = vperm.xlu1 %7039, %v15316_v34   ;;  %v5696_v28 = vpop.permute.xlu1 %5695 }
 0x946   : > { %v5817_v31 = vmul.f32 %v12991_v18, %v5696_v28  ;;  %5779 = vperm.xlu2 %7040, %v15317_v53   ;;  %v5732_v33 = vpop.permute.xlu2 %5731 }
 0x947   : > { %v5826_v46 = vmul.f32 %v12991_v18, %v5732_v33 }
 0x948   : > { %v5849_v11 = vadd.f32 %v5817_v31, %v12809_v9 }
 0x949   : > { %v13040_v47 = vadd.f32 %v5826_v46, %v12815_v55  ;;  %v5881_v55 = vpop.permute.xlu0 %5880 }
 0x94a   : > { %v6008_v38 = vmul.f32 %v13066_v17, %v5881_v55  ;;  %v7275_v55 = vld [vmem:[%s7347_s29 + $0x16a] sm:$0xff] }
 0x94c   : > { %v6040_v16 = vadd.f32 %v6008_v38, %v13000_v59  ;;  %v15322_v38 = vld [vmem:[#allocation228_spill] sm:$0xff] }
 0x94d   : > { %7041 = vset.pattern.permute.xlu1 %v15307_v37  ;;  %v5704_v4 = vpop.permute.xlu1 %5703 }
 0x94e   : > { %v5819_v24 = vmul.f32 %v12991_v18, %v5704_v4  ;;  %5783 = vperm.xlu2 %7040, %v7271_v21   ;;  %v5744_v62 = vpop.permute.xlu2 %5743  ;;  %5964 = vperm.xlu1 %7041, %v7270_v29   ;;  %v15319_v29 = vld [vmem:[#allocation615_spill] sm:$0xff]  ;;  %v6076_v35 = vadd.f32 %v13082_v58, %v6040_v16  ;;  %v5623_v16 = vmul.f32 %v15194_v43, %v15322_v38  ;;  %v15331_v38 = vld [vmem:[#allocation240_spill] sm:$0xff] }
 0x94f   : > { %v5829_v5 = vmul.f32 %v12991_v18, %v5744_v62 }
 0x950   : > { %v5851_v63 = vadd.f32 %v5819_v24, %v12846_v13  ;;  %v6109_v28 = vsel %vm6108_vm0, %v6076_v35, 0.0  ;;  %v6222_v53 = vsel %vm6221_vm1, %v6076_v35, 0.0 }
 0x951   : > { %v13048_v9 = vadd.f32 %v5829_v5, %v12852_v56  ;;  %v13061_v56 = vpop.permute.xlu0 %5900 }
 0x955   : > { %v5716_v36 = vpop.permute.xlu1 %5715 }
 0x956   : > { %v5822_v20 = vmul.f32 %v12991_v18, %v5716_v36  ;;  %7043 = vset.pattern.permute.xlu2 %v15307_v37  ;;  %v5756_v12 = vpop.permute.xlu2 %5755  ;;  %5968 = vperm.xlu1 %7041, %v7272_v30   ;;  %v15321_v36 = vld [vmem:[#allocation46_spill] sm:$0xff] }
 0x957   : > { %v5832_v6 = vmul.f32 %v12991_v18, %v5756_v12  ;;  %5972 = vperm.xlu2 %7043, %v7273_v2  }
 0x958   : > { %v13056_v40 = vadd.f32 %v5822_v20, %v12884_v48  ;;  %v15318_v48 = vld [vmem:[#allocation364_spill] sm:$0xff] }
 0x959   : > { %v13059_v13 = vadd.f32 %v5832_v6, %v12890_v8  ;;  %v13086_v50 = vpop.permute.xlu0 %5912 }
 0x95d   : > { %v5728_v51 = vpop.permute.xlu1 %5727 }
 0x95e   : > { %v5825_v3 = vmul.f32 %v12991_v18, %v5728_v51  ;;  %v5768_v44 = vpop.permute.xlu2 %5767  ;;  %7044 = vset.pattern.permute.xlu1 %v15021_v23 }
 0x95f   : > { %v5835_v54 = vmul.f32 %v12991_v18, %v5768_v44  ;;  %7045 = vset.pattern.permute.xlu2 %v15021_v23  ;;  %5791 = vperm.xlu1 %7044, %v15318_v48  }
 0x960   : > { %v13072_v8 = vadd.f32 %v5825_v3, %v12920_v26  ;;  %5795 = vperm.xlu2 %7045, %v7274_v10  }
 0x961   : > { %v13076_v7 = vadd.f32 %v5835_v54, %v12925_v27  ;;  %v13108_v5 = vpop.permute.xlu0 %5924 }
 0x965   : > { %v5740_v22 = vpop.permute.xlu1 %5739 }
 0x966   : > { %v5828_v52 = vmul.f32 %v12991_v18, %v5740_v22 }
 0x967   : > { %v5889_v26 = vpop.permute.xlu2 %5888  ;;  %7046 = vset.pattern.permute.xlu1 %v15307_v37 }
 0x968   : > { %v13090_v27 = vadd.f32 %v5828_v52, %v12949_v49  ;;  %v6010_v61 = vmul.f32 %v13066_v17, %v5889_v26  ;;  %5799 = vperm.xlu2 %7045, %v15319_v29   ;;  %5980 = vperm.xlu1 %7046, %v15320_v42   ;;  %v7276_v52 = vld [vmem:[%s7347_s29 + $0x182] sm:$0xff]  ;;  %v15323_v26 = vld [vmem:[#allocation409_spill] sm:$0xff] }
 0x969   : > { %v13135_v29 = vpop.permute.xlu0 %5936 }
 0x96a   : > { %v6042_v59 = vadd.f32 %v6010_v61, %v5849_v11  ;;  %v5655_v61 = vadd.f32 %v5623_v16, %v15323_v26  ;;  %v13167_v16 = vmul.f32 %v15194_v43, %v15331_v38 }
 0x96c   : > { %v6078_v34 = vadd.f32 %v13082_v58, %v6042_v59 }
 0x96d   : > { %v5752_v31 = vpop.permute.xlu1 %5751 }
 0x96e   : > { %v6110_v49 = vsel %vm6108_vm0, %v6078_v34, 0.0  ;;  %v6223_v33 = vsel %vm6221_vm1, %v6078_v34, 0.0  ;;  %v5831_v46 = vmul.f32 %v12991_v18, %v5752_v31 }
 0x96f   : > { %v6111_v4 = vadd.f32 %v6110_v49, %v6109_v28  ;;  %v6224_v24 = vadd.f32 %v6223_v33, %v6222_v53  ;;  %v5897_v21 = vpop.permute.xlu2 %5896  ;;  %v7277_v53 = vld [vmem:[%s7347_s29 + $0x19a] sm:$0xff] }
 0x970   : > { %v13103_v11 = vadd.f32 %v5831_v46, %v12968_v57  ;;  %v6012_v62 = vmul.f32 %v13066_v17, %v5897_v21  ;;  %7048 = vset.pattern.permute.xlu2 %v15307_v37  ;;  %7047 = vset.pattern.permute.xlu1 %v15021_v23  ;;  %v15325_v46 = vld [vmem:[#allocation78_spill] sm:$0xff] }
 0x971   : > { %5984 = vperm.xlu2 %7048, %v7275_v55   ;;  %5803 = vperm.xlu1 %7047, %v15321_v36  }
 0x972   : > { %v6044_v20 = vadd.f32 %v6012_v62, %v5851_v63  ;;  %v13152_v62 = vpop.permute.xlu0 %5948 }
 0x974   : > { %v6080_v12 = vadd.f32 %v13082_v58, %v6044_v20 }
 0x975   : > { %v5764_v30 = vpop.permute.xlu1 %5763 }
 0x976   : > { %v6112_v57 = vsel %vm6108_vm0, %v6080_v12, 0.0  ;;  %v6225_v6 = vsel %vm6221_vm1, %v6080_v12, 0.0  ;;  %v5834_v2 = vmul.f32 %v12991_v18, %v5764_v30  ;;  %v15328_v30 = vld [vmem:[#allocation493_spill] sm:$0xff] }
 0x977   : > { %v13116_v51 = vadd.f32 %v6112_v57, %v6111_v4  ;;  %v13118_v3 = vadd.f32 %v6225_v6, %v6224_v24  ;;  %v13120_v44 = vadd.f32 %v6112_v57, %v6110_v49  ;;  %v13122_v54 = vadd.f32 %v6225_v6, %v6223_v33  ;;  %v5909_v48 = vpop.permute.xlu2 %5908  ;;  %v15326_v24 = vld [vmem:[#allocation231_spill] sm:$0xff]  ;;  %v15329_v6 = vld [vmem:[#allocation234_spill] sm:$0xff] }
 0x978   : > { %v13125_v63 = vadd.f32 %v5834_v2, %v12979_v45  ;;  %v6015_v10 = vmul.f32 %v13066_v17, %v5909_v48  ;;  %v15324_v45 = vld [vmem:[#allocation490_spill] sm:$0xff]  ;;  %v5628_v21 = vmul.f32 %v15194_v43, %v15326_v24  ;;  %v5631_v2 = vmul.f32 %v15194_v43, %v15329_v6  ;;  %v15330_v48 = vld [vmem:[#allocation237_spill] sm:$0xff] }
 0x979   : > { %5996 = vperm.xlu2 %7048, %v15321_v36   ;;  %7049 = vset.pattern.permute.xlu1 %v15307_v37  ;;  %v5816_v42 = vmul.f32 %v12991_v18, %v15324_v45  ;;  %v15327_v36 = vld [vmem:[#allocation586_spill] sm:$0xff] }
 0x97a   : > { %v6047_v22 = vadd.f32 %v6015_v10, %v13056_v40  ;;  %5992 = vperm.xlu1 %7049, %v7276_v52   ;;  %v6013_v40 = vmul.f32 %v13066_v17, %v13061_v56  ;;  %v5660_v20 = vadd.f32 %v5628_v21, %v15327_v36  ;;  %v5634_v10 = vmul.f32 %v15194_v43, %v15330_v48  ;;  %v15332_v52 = vld [vmem:[#allocation243_spill] sm:$0xff]  ;;  %v13185_v36 = vpop.permute.xlu0 %5956 }
 0x97b   : > { %v5848_v59 = vadd.f32 %v5816_v42, %v5655_v61  ;;  %v5640_v26 = vmul.f32 %v15194_v43, %v15332_v52  ;;  %v15333_v42 = vld [vmem:[#allocation514_spill] sm:$0xff] }
 0x97c   : > { %v6045_v4 = vadd.f32 %v6013_v40, %v13020_v60  ;;  %v6083_v61 = vadd.f32 %v13082_v58, %v6047_v22 }
 0x97e   : > { %v5885_v35 = vpop.permute.xlu1 %5884 }
 0x97f   : > { %v6009_v34 = vmul.f32 %v13066_v17, %v5885_v35  ;;  %v5921_v28 = vpop.permute.xlu2 %5920  ;;  %v5663_v35 = vadd.f32 %v5631_v2, %v15333_v42  ;;  %v15335_v2 = vld [vmem:[#allocation496_spill] sm:$0xff]  ;;  %v15337_v42 = vld [vmem:[#allocation502_spill] sm:$0xff] }
 0x980   : > { %v6018_v31 = vmul.f32 %v13066_v17, %v5921_v28  ;;  %v5824_v48 = vmul.f32 %v12991_v18, %v15335_v2 }
 0x981   : > { %v6041_v49 = vadd.f32 %v6009_v34, %v5848_v59  ;;  %6000 = vperm.xlu2 %7048, %v7277_v53   ;;  %v6016_v59 = vmul.f32 %v13066_v17, %v13086_v50  ;;  %v15334_v50 = vld [vmem:[#allocation609_spill] sm:$0xff] }
 0x982   : > { %v13145_v33 = vadd.f32 %v6018_v31, %v13072_v8  ;;  %7051 = vset.pattern.permute.xlu1 %v15021_v23  ;;  %v6081_v8 = vadd.f32 %v13082_v58, %v6045_v4  ;;  %v5821_v23 = vmul.f32 %v12991_v18, %v15328_v30  ;;  %v7278_v31 = vld [vmem:[%s7347_s29 + $0x1a2] sm:$0xff]  ;;  %v5961_v2 = vpop.permute.xlu0 %5960 }
 0x983   : > { %5811 = vperm.xlu1 %7051, %v15325_v46   ;;  %v6077_v60 = vadd.f32 %v13082_v58, %v6041_v49 }
 0x984   : > { %v6142_v34 = vsel %vm6138_vm2, %v6081_v8, 0.0  ;;  %v6182_v28 = vsel %vm6108_vm0, %v6081_v8, 0.0 }
 0x985   : > { %v6139_v49 = vsel %vm6138_vm2, %v6077_v60, 0.0  ;;  %v6179_v22 = vsel %vm6108_vm0, %v6077_v60, 0.0 }
 0x986   : > { %v5893_v55 = vpop.permute.xlu1 %5892 }
 0x987   : > { %v6011_v12 = vmul.f32 %v13066_v17, %v5893_v55  ;;  %v5933_v56 = vpop.permute.xlu2 %5932  ;;  %v5666_v55 = vadd.f32 %v5634_v10, %v15334_v50  ;;  %v6019_v10 = vmul.f32 %v13066_v17, %v13108_v5 }
 0x989   : > { %v6043_v57 = vadd.f32 %v6011_v12, %v13010_v15  ;;  %v5853_v15 = vadd.f32 %v5821_v23, %v5660_v20  ;;  %v6048_v20 = vadd.f32 %v6016_v59, %v13031_v39  ;;  %v6144_v12 = vsel %vm6138_vm2, %v6083_v61, 0.0 }
 0x98a   : > { %v6184_v23 = vsel %vm6108_vm0, %v6083_v61, 0.0  ;;  %v13199_v59 = vmul.f32 %v12991_v18, %v15337_v42  ;;  %v15340_v42 = vld [vmem:[#allocation538_spill] sm:$0xff] }
 0x98b   : > { %v6079_v45 = vadd.f32 %v13082_v58, %v6043_v57  ;;  %7052 = vset.pattern.permute.xlu1 %v15307_v37 }
 0x98c   : > { %6004 = vperm.xlu1 %7052, %v7278_v31  }
 0x98d   : > { %v6140_v53 = vsel %vm6138_vm2, %v6079_v45, 0.0  ;;  %v6180_v37 = vsel %vm6108_vm0, %v6079_v45, 0.0  ;;  %v15336_v45 = vld [vmem:[#allocation499_spill] sm:$0xff] }
 0x98e   : > { %v6141_v40 = vadd.f32 %v6140_v53, %v6139_v49  ;;  %v6181_v46 = vadd.f32 %v6180_v37, %v6179_v22  ;;  %v6343_v4 = vadd.f32 %v6142_v34, %v6140_v53  ;;  %v6371_v24 = vadd.f32 %v6182_v28, %v6180_v37  ;;  %v5905_v21 = vpop.permute.xlu1 %5904 }
 0x98f   : > { %v6014_v8 = vmul.f32 %v13066_v17, %v5905_v21  ;;  %v5945_v30 = vpop.permute.xlu2 %5944  ;;  %v5827_v39 = vmul.f32 %v12991_v18, %v15336_v45  ;;  %v6084_v49 = vadd.f32 %v13082_v58, %v6048_v20  ;;  %v6051_v22 = vadd.f32 %v6019_v10, %v13040_v47 }
 0x990   : > { %v6143_v60 = vadd.f32 %v6142_v34, %v6141_v40  ;;  %v6183_v57 = vadd.f32 %v6182_v28, %v6181_v46  ;;  %v6344_v6 = vadd.f32 %v6343_v4, %v6144_v12  ;;  %v6372_v52 = vadd.f32 %v6371_v24, %v6184_v23  ;;  %v15338_v34 = vld [vmem:[#allocation505_spill] sm:$0xff] }
 0x991   : > { %v6046_v38 = vadd.f32 %v6014_v8, %v5853_v15  ;;  %v5833_v28 = vmul.f32 %v12991_v18, %v15338_v34  ;;  %v15339_v15 = vld [vmem:[#allocation412_spill] sm:$0xff]  ;;  %v6022_v37 = vmul.f32 %v13066_v17, %v13135_v29  ;;  %v5856_v40 = vadd.f32 %v5824_v48, %v5663_v35 }
 0x992   : > { %v6145_v31 = vadd.f32 %v6144_v12, %v6143_v60  ;;  %v6185_v61 = vadd.f32 %v6184_v23, %v6183_v57  ;;  %v5672_v53 = vadd.f32 %v5640_v26, %v15339_v15  ;;  %v5859_v46 = vadd.f32 %v5827_v39, %v5666_v55 }
 0x993   : > { %v6082_v5 = vadd.f32 %v13082_v58, %v6046_v38  ;;  %v6086_v4 = vadd.f32 %v13082_v58, %v13145_v33  ;;  %v6021_v24 = vmul.f32 %v13066_v17, %v5933_v56  ;;  %v6116_v35 = vsel %vm6108_vm0, %v6084_v49, 0.0 }
 0x994   : > { %v6229_v55 = vsel %vm6221_vm1, %v6084_v49, 0.0  ;;  %v6087_v33 = vadd.f32 %v13082_v58, %v6051_v22  ;;  %v5669_v34 = vadd.f32 %v13167_v16, %v15340_v42  ;;  %v6054_v49 = vadd.f32 %v6022_v37, %v13048_v9 }
 0x995   : > { %v6114_v21 = vsel %vm6108_vm0, %v6082_v5, 0.0  ;;  %v6227_v50 = vsel %vm6221_vm1, %v6082_v5, 0.0  ;;  %v5865_v5 = vadd.f32 %v5833_v28, %v5672_v53  ;;  %v6025_v15 = vmul.f32 %v13066_v17, %v13152_v62 }
 0x996   : > { %v6115_v47 = vadd.f32 %v6114_v21, %v13116_v51  ;;  %v6228_v20 = vadd.f32 %v6227_v50, %v13118_v3  ;;  %v6330_v26 = vadd.f32 %v13120_v44, %v6114_v21  ;;  %v6399_v12 = vadd.f32 %v13122_v54, %v6227_v50  ;;  %v5917_v29 = vpop.permute.xlu1 %5916 }
 0x997   : > { %v6017_v56 = vmul.f32 %v13066_v17, %v5917_v29  ;;  %v5953_v8 = vpop.permute.xlu2 %5952  ;;  %v6118_v3 = vsel %vm6108_vm0, %v6086_v4, 0.0  ;;  %v6231_v44 = vsel %vm6221_vm1, %v6086_v4, 0.0  ;;  %v6053_v54 = vadd.f32 %v6021_v24, %v13090_v27 }
 0x998   : > { %v6117_v23 = vadd.f32 %v6116_v35, %v6115_v47  ;;  %v6230_v60 = vadd.f32 %v6229_v55, %v6228_v20  ;;  %v6331_v57 = vadd.f32 %v6330_v26, %v6116_v35  ;;  %v6400_v51 = vadd.f32 %v6399_v12, %v6229_v55 }
 0x999   : > { %v6049_v48 = vadd.f32 %v6017_v56, %v5856_v40  ;;  %v6028_v4 = vmul.f32 %v13066_v17, %v5961_v2  ;;  %v6148_v27 = vsel %vm6138_vm2, %v6087_v33, 0.0  ;;  %v6188_v40 = vsel %vm6108_vm0, %v6087_v33, 0.0 }
 0x99a   : > { %v6119_v10 = vadd.f32 %v6118_v3, %v6117_v23  ;;  %v6232_v38 = vadd.f32 %v6231_v44, %v6230_v60  ;;  %v6332_v45 = vadd.f32 %v6331_v57, %v6118_v3  ;;  %v6401_v39 = vadd.f32 %v6400_v51, %v6231_v44 }
 0x99b   : > { %v6085_v22 = vadd.f32 %v13082_v58, %v6049_v48  ;;  %v6089_v24 = vadd.f32 %v13082_v58, %v6053_v54  ;;  %v6024_v21 = vmul.f32 %v13066_v17, %v5945_v30  ;;  %v6090_v62 = vadd.f32 %v13082_v58, %v6054_v49 }
 0x99c   : > { %v6057_v20 = vadd.f32 %v6025_v15, %v13059_v13  ;;  %v6026_v26 = vmul.f32 %v13066_v17, %v5953_v8  ;;  %v6060_v57 = vadd.f32 %v6028_v4, %v13076_v7  ;;  %v6027_v3 = vmul.f32 %v13066_v17, %v13185_v36 }
 0x99d   : > { %v6146_v16 = vsel %vm6138_vm2, %v6085_v22, 0.0  ;;  %v6186_v9 = vsel %vm6108_vm0, %v6085_v22, 0.0  ;;  %v6122_v44 = vsel %vm6108_vm0, %v6090_v62, 0.0  ;;  %v5862_v54 = vadd.f32 %v13199_v59, %v5669_v34 }
 0x99e   : > { %v6147_v37 = vadd.f32 %v6146_v16, %v6145_v31  ;;  %v6187_v50 = vadd.f32 %v6186_v9, %v6185_v61  ;;  %v6345_v28 = vadd.f32 %v6344_v6, %v6146_v16  ;;  %v6373_v53 = vadd.f32 %v6372_v52, %v6186_v9  ;;  %v5929_v47 = vpop.permute.xlu1 %5928 }
 0x99f   : > { %v6020_v12 = vmul.f32 %v13066_v17, %v5929_v47  ;;  %v6150_v31 = vsel %vm6138_vm2, %v6089_v24, 0.0  ;;  %v6190_v6 = vsel %vm6108_vm0, %v6089_v24, 0.0  ;;  %v6056_v52 = vadd.f32 %v6024_v21, %v13103_v11 }
 0x9a0   : > { %v6149_v29 = vadd.f32 %v6148_v27, %v6147_v37  ;;  %v6189_v35 = vadd.f32 %v6188_v40, %v6187_v50  ;;  %v6346_v30 = vadd.f32 %v6345_v28, %v6148_v27  ;;  %v6374_v55 = vadd.f32 %v6373_v53, %v6188_v40  ;;  %v13242_v33 = vpop.permute.xlu2 %5779 }
 0x9a1   : > { %v6052_v61 = vadd.f32 %v6020_v12, %v5859_v46  ;;  %v6093_v8 = vadd.f32 %v13082_v58, %v6057_v20  ;;  %v6058_v51 = vadd.f32 %v6026_v26, %v5865_v5  ;;  %v6235_v11 = vsel %vm6221_vm1, %v6090_v62, 0.0 }
 0x9a2   : > { %v6151_v56 = vadd.f32 %v6150_v31, %v6149_v29  ;;  %v6191_v23 = vadd.f32 %v6190_v6, %v6189_v35  ;;  %v6347_v13 = vadd.f32 %v6346_v30, %v6150_v31  ;;  %v6375_v60 = vadd.f32 %v6374_v55, %v6190_v6 }
 0x9a3   : > { %v6088_v2 = vadd.f32 %v13082_v58, %v6052_v61  ;;  %v6092_v46 = vadd.f32 %v13082_v58, %v6056_v52  ;;  %v6154_v4 = vsel %vm6138_vm2, %v6093_v8, 0.0  ;;  %v6096_v36 = vadd.f32 %v13082_v58, %v6060_v57 }
 0x9a4   : > { %v6094_v27 = vadd.f32 %v13082_v58, %v6058_v51  ;;  %v6059_v16 = vadd.f32 %v6027_v3, %v13125_v63  ;;  %v6194_v51 = vsel %vm6108_vm0, %v6093_v8, 0.0  ;;  %v5838_v8 = vmul.f32 %v12991_v18, %v13242_v33 }
 0x9a5   : > { %v6120_v48 = vsel %vm6108_vm0, %v6088_v2, 0.0  ;;  %v6233_v42 = vsel %vm6221_vm1, %v6088_v2, 0.0  ;;  %v6128_v53 = vsel %vm6108_vm0, %v6096_v36, 0.0  ;;  %v6241_v35 = vsel %vm6221_vm1, %v6096_v36, 0.0  ;;  %v15341_v36 = vld [vmem:[#allocation246_spill] sm:$0xff] }
 0x9a6   : > { %v6121_v49 = vadd.f32 %v6120_v48, %v6119_v10  ;;  %v6234_v7 = vadd.f32 %v6233_v42, %v6232_v38  ;;  %v6333_v22 = vadd.f32 %v6332_v45, %v6120_v48  ;;  %v6402_v5 = vadd.f32 %v6401_v39, %v6233_v42  ;;  %v5941_v15 = vpop.permute.xlu1 %5940 }
 0x9a7   : > { %v6023_v59 = vmul.f32 %v13066_v17, %v5941_v15  ;;  %v6124_v10 = vsel %vm6108_vm0, %v6092_v46, 0.0  ;;  %v6237_v38 = vsel %vm6221_vm1, %v6092_v46, 0.0  ;;  %v6126_v47 = vsel %vm6108_vm0, %v6094_v27, 0.0 }
 0x9a8   : > { %v6123_v34 = vadd.f32 %v6122_v44, %v6121_v49  ;;  %v6236_v40 = vadd.f32 %v6235_v11, %v6234_v7  ;;  %v6334_v24 = vadd.f32 %v6333_v22, %v6122_v44  ;;  %v6403_v21 = vadd.f32 %v6402_v5, %v6235_v11  ;;  %v5784_v28 = vpop.permute.xlu2 %5783 }
 0x9a9   : > { %v6055_v45 = vadd.f32 %v6023_v59, %v5862_v54  ;;  %v6239_v62 = vsel %vm6221_vm1, %v6094_v27, 0.0  ;;  %v6095_v30 = vadd.f32 %v13082_v58, %v6059_v16  ;;  %v5643_v27 = vmul.f32 %v15194_v43, %v15341_v36 }
 0x9aa   : > { %v6125_v39 = vadd.f32 %v6124_v10, %v6123_v34  ;;  %v6238_v9 = vadd.f32 %v6237_v38, %v6236_v40  ;;  %v6335_v37 = vadd.f32 %v6334_v24, %v6124_v10  ;;  %v6404_v50 = vadd.f32 %v6403_v21, %v6237_v38  ;;  %v15342_v40 = vld [vmem:[#allocation249_spill] sm:$0xff]  ;;  %v15343_v10 = vld [vmem:[#allocation634_spill] sm:$0xff] }
 0x9ab   : > { %v6091_v20 = vadd.f32 %v13082_v58, %v6055_v45  ;;  %v6156_v49 = vsel %vm6138_vm2, %v6095_v30, 0.0  ;;  %v6196_v7 = vsel %vm6108_vm0, %v6095_v30, 0.0  ;;  %v5646_v24 = vmul.f32 %v15194_v43, %v15342_v40 }
 0x9ac   : > { %v6127_v26 = vadd.f32 %v6126_v47, %v6125_v39  ;;  %v6240_v63 = vadd.f32 %v6239_v62, %v6238_v9  ;;  %v6336_v12 = vadd.f32 %v6335_v37, %v6126_v47  ;;  %v6405_v29 = vadd.f32 %v6404_v50, %v6239_v62  ;;  %v15344_v39 = vld [vmem:[#allocation612_spill] sm:$0xff] }
 0x9ad   : > { %v6152_v55 = vsel %vm6138_vm2, %v6091_v20, 0.0  ;;  %v6192_v31 = vsel %vm6108_vm0, %v6091_v20, 0.0  ;;  %v5870_v21 = vadd.f32 %v5838_v8, %v12952_v41  ;;  %v5839_v16 = vmul.f32 %v12991_v18, %v5784_v28 }
 0x9ae   : > { %v6153_v6 = vadd.f32 %v6152_v55, %v6151_v56  ;;  %v6193_v52 = vadd.f32 %v6192_v31, %v6191_v23  ;;  %v6348_v61 = vadd.f32 %v6347_v13, %v6152_v55  ;;  %v6376_v57 = vadd.f32 %v6375_v60, %v6192_v31 }
 0x9af   : > { %v5772_v2 = vpop.permute.xlu1 %5771  ;;  %v6129_v3 = vadd.f32 %v6128_v53, %v6127_v26  ;;  %v6242_v44 = vadd.f32 %v6241_v35, %v6240_v63  ;;  %v6337_v54 = vadd.f32 %v6336_v12, %v6128_v53  ;;  %v6406_v22 = vadd.f32 %v6405_v29, %v6241_v35  ;;  %v5977_v53 = vpop.permute.xlu0 %5976 }
 0x9b0   : > { %v6155_v11 = vadd.f32 %v6154_v4, %v6153_v6  ;;  %v6195_v46 = vadd.f32 %v6194_v51, %v6193_v52  ;;  %v6349_v48 = vadd.f32 %v6348_v61, %v6154_v4  ;;  %v6377_v42 = vadd.f32 %v6376_v57, %v6194_v51 }
 0x9b1   : > { %v5973_v60 = vpop.permute.xlu2 %5972  ;;  %v5836_v4 = vmul.f32 %v12991_v18, %v5772_v2  ;;  %v5675_v38 = vadd.f32 %v5643_v27, %v15343_v10  ;;  %v5678_v33 = vadd.f32 %v5646_v24, %v15344_v39  ;;  %v6032_v20 = vmul.f32 %v13066_v17, %v5977_v53 }
 0x9b2   : > { %v6157_v5 = vadd.f32 %v6156_v49, %v6155_v11  ;;  %v6197_v56 = vadd.f32 %v6196_v7, %v6195_v46  ;;  %v6350_v23 = vadd.f32 %v6349_v48, %v6156_v49  ;;  %v6378_v13 = vadd.f32 %v6377_v42, %v6196_v7 }
 0x9b3   : > { %v6031_v59 = vmul.f32 %v13066_v17, %v5973_v60  ;;  %v5868_v9 = vadd.f32 %v5836_v4, %v5675_v38  ;;  %v5871_v47 = vadd.f32 %v5839_v16, %v5678_v33  ;;  %v15345_v16 = vld [vmem:[#allocation252_spill] sm:$0xff] }
 0x9b4   : > { %v5649_v10 = vmul.f32 %v15194_v43, %v15345_v16 }
 0x9b5   : > { %v6063_v37 = vadd.f32 %v6031_v59, %v5870_v21  ;;  %v6064_v63 = vadd.f32 %v6032_v20, %v5871_v47 }
 0x9b7   : > { %v5776_v15 = vpop.permute.xlu1 %5775  ;;  %v6099_v26 = vadd.f32 %v13082_v58, %v6063_v37  ;;  %v6100_v7 = vadd.f32 %v13082_v58, %v6064_v63  ;;  %v5989_v39 = vpop.permute.xlu0 %5988  ;;  %v15347_v37 = vld [vmem:[#allocation508_spill] sm:$0xff] }
 0x9b8   : > { %v5837_v41 = vmul.f32 %v12991_v18, %v5776_v15  ;;  %v6035_v53 = vmul.f32 %v13066_v17, %v5989_v39 }
 0x9b9   : > { %v6160_v61 = vsel %vm6138_vm2, %v6099_v26, 0.0  ;;  %v6200_v57 = vsel %vm6108_vm0, %v6099_v26, 0.0  ;;  %v6245_v36 = vsel %vm6221_vm1, %v6100_v7, 0.0 }
 0x9ba   : > { %v5796_v34 = vpop.permute.xlu2 %5795  ;;  %v5869_v51 = vadd.f32 %v5837_v41, %v12996_v19  ;;  %v6132_v19 = vsel %vm6108_vm0, %v6100_v7, 0.0 }
 0x9bb   : > { %v5842_v38 = vmul.f32 %v12991_v18, %v5796_v34 }
 0x9c0   : > { %v5965_v45 = vpop.permute.xlu1 %5964 }
 0x9c1   : > { %v6029_v50 = vmul.f32 %v13066_v17, %v5965_v45 }
 0x9c2   : > { %v13295_v6 = vpop.permute.xlu2 %5799 }
 0x9c3   : > { %v6061_v62 = vadd.f32 %v6029_v50, %v5868_v9  ;;  %v5840_v50 = vmul.f32 %v12991_v18, %v15347_v37 }
 0x9c5   : > { %v6097_v28 = vadd.f32 %v13082_v58, %v6061_v62  ;;  %v5872_v34 = vadd.f32 %v5840_v50, %v13006_v14 }
 0x9c7   : > { %v6158_v12 = vsel %vm6138_vm2, %v6097_v28, 0.0  ;;  %v6198_v29 = vsel %vm6108_vm0, %v6097_v28, 0.0 }
 0x9c8   : > { %v6159_v35 = vadd.f32 %v6158_v12, %v6157_v5  ;;  %v6199_v30 = vadd.f32 %v6198_v29, %v6197_v56  ;;  %v6351_v55 = vadd.f32 %v6350_v23, %v6158_v12  ;;  %v6379_v31 = vadd.f32 %v6378_v13, %v6198_v29  ;;  %v5969_v52 = vpop.permute.xlu1 %5968 }
 0x9c9   : > { %v6030_v2 = vmul.f32 %v13066_v17, %v5969_v52 }
 0x9ca   : > { %v6161_v11 = vadd.f32 %v6160_v61, %v6159_v35  ;;  %v6201_v46 = vadd.f32 %v6200_v57, %v6199_v30  ;;  %v6352_v48 = vadd.f32 %v6351_v55, %v6160_v61  ;;  %v6380_v42 = vadd.f32 %v6379_v31, %v6200_v57 }
 0x9cb   : > { %v6062_v49 = vadd.f32 %v6030_v2, %v5869_v51  ;;  %v5985_v21 = vpop.permute.xlu2 %5984 }
 0x9cd   : > { %v6098_v5 = vadd.f32 %v13082_v58, %v6062_v49 }
 0x9cf   : > { %v6130_v56 = vsel %vm6108_vm0, %v6098_v5, 0.0  ;;  %v6243_v23 = vsel %vm6221_vm1, %v6098_v5, 0.0 }
 0x9d0   : > { %v6131_v13 = vadd.f32 %v6130_v56, %v6129_v3  ;;  %v6244_v60 = vadd.f32 %v6243_v23, %v6242_v44  ;;  %v6338_v15 = vadd.f32 %v6337_v54, %v6130_v56  ;;  %v6407_v8 = vadd.f32 %v6406_v22, %v6243_v23  ;;  %v15346_v54 = vld [vmem:[#allocation129_spill] sm:$0xff]  ;;  %v5808_v56 = vpop.permute.xlu0 %5807 }
 0x9d1   : > { %v5792_v27 = vpop.permute.xlu1 %5791  ;;  %v6034_v3 = vmul.f32 %v13066_v17, %v5985_v21  ;;  %v5681_v22 = vadd.f32 %v5649_v10, %v15346_v54 }
 0x9d2   : > { %v6133_v4 = vadd.f32 %v6132_v19, %v6131_v13  ;;  %v6246_v59 = vadd.f32 %v6245_v36, %v6244_v60  ;;  %v6339_v40 = vadd.f32 %v6338_v15, %v6132_v19  ;;  %v6408_v24 = vadd.f32 %v6407_v8, %v6245_v36 }
 0x9d3   : > { %v5841_v44 = vmul.f32 %v12991_v18, %v5792_v27  ;;  %v5874_v33 = vadd.f32 %v5842_v38, %v5681_v22  ;;  %v5997_v28 = vpop.permute.xlu2 %5996  ;;  %v15348_v27 = vld [vmem:[#allocation255_spill] sm:$0xff] }
 0x9d4   : > { %v6037_v8 = vmul.f32 %v13066_v17, %v5997_v28 }
 0x9d5   : > { %v5873_v45 = vadd.f32 %v5841_v44, %v12971_v0  ;;  %v6067_v20 = vadd.f32 %v6035_v53, %v5874_v33 }
 0x9d7   : > { %v6066_v9 = vadd.f32 %v6034_v3, %v5873_v45  ;;  %v6103_v55 = vadd.f32 %v13082_v58, %v6067_v20 }
 0x9d9   : > { %v6102_v47 = vadd.f32 %v13082_v58, %v6066_v9  ;;  %v6164_v49 = vsel %vm6138_vm2, %v6103_v55, 0.0  ;;  %v6204_v7 = vsel %vm6108_vm0, %v6103_v55, 0.0 }
 0x9da   : > { %v5981_v62 = vpop.permute.xlu1 %5980 }
 0x9db   : > { %v6134_v26 = vsel %vm6108_vm0, %v6102_v47, 0.0  ;;  %v6247_v41 = vsel %vm6221_vm1, %v6102_v47, 0.0  ;;  %v6033_v0 = vmul.f32 %v13066_v17, %v5981_v62  ;;  %v6001_v36 = vpop.permute.xlu2 %6000 }
 0x9dc   : > { %v6135_v63 = vadd.f32 %v6134_v26, %v6133_v4  ;;  %v6248_v12 = vadd.f32 %v6247_v41, %v6246_v59  ;;  %v6340_v29 = vadd.f32 %v6339_v40, %v6134_v26  ;;  %v6409_v30 = vadd.f32 %v6408_v24, %v6247_v41  ;;  %v15349_v4 = vld [vmem:[#allocation523_spill] sm:$0xff] }
 0x9dd   : > { %v6065_v35 = vadd.f32 %v6033_v0, %v5872_v34  ;;  %v6038_v40 = vmul.f32 %v13066_v17, %v6001_v36 }
 0x9df   : > { %v6101_v31 = vadd.f32 %v13082_v58, %v6065_v35 }
 0x9e1   : > { %v6162_v52 = vsel %vm6138_vm2, %v6101_v31, 0.0  ;;  %v6202_v14 = vsel %vm6108_vm0, %v6101_v31, 0.0 }
 0x9e2   : > { %v6163_v61 = vadd.f32 %v6162_v52, %v6161_v11  ;;  %v6203_v57 = vadd.f32 %v6202_v14, %v6201_v46  ;;  %v6353_v51 = vadd.f32 %v6352_v48, %v6162_v52  ;;  %v6381_v2 = vadd.f32 %v6380_v42, %v6202_v14 }
 0x9e3   : > { %v5804_v5 = vpop.permute.xlu1 %5803  ;;  %v5652_v11 = vmul.f32 %v15194_v43, %v15348_v27  ;;  %v5845_v46 = vmul.f32 %v12991_v18, %v5808_v56  ;;  %v5843_v42 = vmul.f32 %v12991_v18, %v13295_v6 }
 0x9e4   : > { %v6165_v23 = vadd.f32 %v6164_v49, %v6163_v61  ;;  %v6205_v13 = vadd.f32 %v6204_v7, %v6203_v57  ;;  %v6354_v60 = vadd.f32 %v6353_v51, %v6164_v49  ;;  %v6382_v15 = vadd.f32 %v6381_v2, %v6204_v7  ;;  %v6489_v2 = vld [vmem:[%s13642_s5 + $0x1c0] sm:$0xff]  ;;  %v6490_v49 = vld [vmem:[%s13642_s5 + $0x1c8] sm:$0xff]  ;;  %v6491_v7 = vld [vmem:[%s13642_s5 + $0x1d0] sm:$0xff] }
 0x9e5   : > { %v5844_v19 = vmul.f32 %v12991_v18, %v5804_v5  ;;  %v5684_v59 = vadd.f32 %v5652_v11, %v15349_v4  ;;  %v5875_v10 = vadd.f32 %v5843_v42, %v13016_v32  ;;  %6526 = vmatpush.msra.mxu0 %v6489_v2  ;;  %6546 = vmatpush.msra.mxu1 %v6490_v49  ;;  %v6475_v42 = vld [vmem:[%s13642_s5 + $0x150] sm:$0xff] }
 0x9e6   : > { %6566 = vmatpush.msra.mxu2 %v6491_v7  ;;  %v6444_v7 = vld [vmem:[%s13642_s5 + $0x58] sm:$0xff] }
 0x9e7   : > { %v5876_v48 = vadd.f32 %v5844_v19, %v12982_v1  ;;  %v5877_v21 = vadd.f32 %v5845_v46, %v5684_v59  ;;  %v6483_v19 = vld [vmem:[%s13642_s5 + $0x190] sm:$0xff]  ;;  %v6473_v46 = vld [vmem:[%s13642_s5 + $0x140] sm:$0xff] }
 0x9e8   : > { %6567 = vmatpush.msra.mxu2 %v6483_v19  ;;  %v6493_v19 = vld [vmem:[%s13642_s5 + $0x1e0] sm:$0xff] }
 0x9e9   : > { %v6069_v24 = vadd.f32 %v6037_v8, %v5876_v48  ;;  %v6070_v3 = vadd.f32 %v6038_v40, %v5877_v21  ;;  %v6482_v8 = vld [vmem:[%s13642_s5 + $0x188] sm:$0xff] }
 0x9ea   : > { %6547 = vmatpush.msra.mxu1 %v6482_v8  ;;  %v6474_v48 = vld [vmem:[%s13642_s5 + $0x148] sm:$0xff]  ;;  %6568 = vmatpush.msra.mxu2 %v6475_v42  ;;  %v6436_v8 = vld [vmem:[%s13642_s5 + $0x18] sm:$0xff] }
 0x9eb   : > { %v6105_v16 = vadd.f32 %v13082_v58, %v6069_v24  ;;  %v6106_v33 = vadd.f32 %v13082_v58, %v6070_v3  ;;  %v6476_v24 = vld [vmem:[%s13642_s5 + $0x158] sm:$0xff]  ;;  %v6466_v3 = vld [vmem:[%s13642_s5 + $0x108] sm:$0xff] }
 0x9ec   : > { %v5993_v38 = vpop.permute.xlu1 %5992  ;;  %6548 = vmatpush.msra.mxu1 %v6474_v48  ;;  %v6495_v48 = vld [vmem:[%s13642_s5 + $0x1f0] sm:$0xff]  ;;  %v6496_v42 = vld [vmem:[%s13642_s5 + $0x1f8] sm:$0xff] }
 0x9ed   : > { %v6166_v43 = vsel %vm6138_vm2, %v6105_v16, 0.0  ;;  %v6206_v44 = vsel %vm6108_vm0, %v6105_v16, 0.0  ;;  %v6036_v1 = vmul.f32 %v13066_v17, %v5993_v38  ;;  %v6273_v34 = vsel %vm6108_vm0, %v6106_v33, 0.0  ;;  %v6465_v38 = vld [vmem:[%s13642_s5 + $0x100] sm:$0xff] }
 0x9ee   : > { %v13343_v54 = vadd.f32 %v6206_v44, %v6205_v13  ;;  %v13345_v6 = vadd.f32 %v6166_v43, %v6165_v23  ;;  %v13347_v22 = vadd.f32 %v6354_v60, %v6166_v43  ;;  %v13349_v45 = vadd.f32 %v6382_v15, %v6206_v44  ;;  %v6492_v23 = vld [vmem:[%s13642_s5 + $0x1d8] sm:$0xff]  ;;  %v6481_v15 = vld [vmem:[%s13642_s5 + $0x180] sm:$0xff]  ;;  %v6467_v43 = vld [vmem:[%s13642_s5 + $0x110] sm:$0xff]  ;;  %6549 = vmatpush.msra.mxu1 %v6466_v3 }
 0x9ef   : > { %v6068_v39 = vadd.f32 %v6036_v1, %v5875_v10  ;;  %v6306_v20 = vsel %vm6221_vm1, %v6106_v33, 0.0  ;;  %6586 = vmatpush.msra.mxu3 %v6492_v23  ;;  %6527 = vmatpush.msra.mxu0 %v6481_v15  ;;  %v6457_v33 = vld [vmem:[%s13642_s5 + $0xc0] sm:$0xff] }
 0x9f0   : > { %v6255_v26 = vrot.slane %v13343_v54, 1  ;;  %v6208_v41 = vsel %vm6108_vm0, %v13343_v54, 0.0  ;;  %6569 = vmatpush.msra.mxu2 %v6467_v43 }
 0x9f1   : > { %v6104_v32 = vadd.f32 %v13082_v58, %v6068_v39  ;;  %6528 = vmatpush.msra.mxu0 %v6473_v46 }
 0x9f2   : > { %v6260_v61 = vsel %vm6138_vm2, %v6255_v26, 0.0 }
 0x9f3   : > { %v6136_v9 = vsel %vm6108_vm0, %v6104_v32, 0.0  ;;  %v6249_v37 = vsel %vm6221_vm1, %v6104_v32, 0.0  ;;  %6529 = vmatpush.msra.mxu0 %v6465_v38  ;;  %v6458_v32 = vld [vmem:[%s13642_s5 + $0xc8] sm:$0xff] }
 0x9f4   : > { %v6137_v50 = vadd.f32 %v6136_v9, %v6135_v63  ;;  %v6250_v53 = vadd.f32 %v6249_v37, %v6248_v12  ;;  %v6341_v47 = vadd.f32 %v6340_v29, %v6136_v9  ;;  %v6410_v62 = vadd.f32 %v6409_v30, %v6249_v37  ;;  %v6459_v9 = vld [vmem:[%s13642_s5 + $0xd0] sm:$0xff]  ;;  %v13437_v37 = vld [vmem:[%s13640_s3] sm:$0xff]  ;;  %6550 = vmatpush.msra.mxu1 %v6458_v32 }
 0x9f5   : > { %v5812_v0 = vpop.permute.xlu1 %5811  ;;  %v6169_v30 = vsel %vm6138_vm2, %v13345_v6, 0.0  ;;  %6530 = vmatpush.msra.mxu0 %v6457_v33  ;;  %6570 = vmatpush.msra.mxu2 %v6459_v9  ;;  %v6478_v9 = vld [vmem:[%s13642_s5 + $0x168] sm:$0xff] }
 0x9f6   : > { %v6168_v28 = vsel %vm6108_vm0, %v6137_v50, 0.0  ;;  %v6254_v35 = vrot.slane %v6250_v53, 1  ;;  %v13361_v55 = vadd.f32 %v6273_v34, %v6137_v50  ;;  %v13363_v31 = vadd.f32 %v6306_v20, %v6250_v53 }
 0x9f7   : > { %v6209_v63 = vadd.f32 %v6208_v41, %v6168_v28  ;;  %v13365_v12 = vadd.f32 %v6341_v47, %v6273_v34  ;;  %v13367_v29 = vadd.f32 %v6410_v62, %v6306_v20  ;;  %v6170_v14 = vadd.f32 %v6169_v30, %v6168_v28  ;;  %v6460_v47 = vld [vmem:[%s13642_s5 + $0xd8] sm:$0xff]  ;;  %v6449_v20 = vld [vmem:[%s13642_s5 + $0x80] sm:$0xff]  ;;  %v6451_v41 = vld [vmem:[%s13642_s5 + $0x90] sm:$0xff] }
 0x9f8   : > { %v6256_v52 = vsel %vm6253_vm3, %v6254_v35, %v6255_v26  ;;  %v5846_v60 = vmul.f32 %v12991_v18, %v5812_v0  ;;  %v6484_v18 = vld [vmem:[%s13642_s5 + $0x198] sm:$0xff]  ;;  %v6450_v26 = vld [vmem:[%s13642_s5 + $0x88] sm:$0xff]  ;;  %v6310_v28 = vrot.slane %v13363_v31, 1  ;;  %6531 = vmatpush.msra.mxu0 %v6449_v20  ;;  %6571 = vmatpush.msra.mxu2 %v6451_v41  ;;  %v6441_v31 = vld [vmem:[%s13642_s5 + $0x40] sm:$0xff] }
 0x9f9   : > { %v6210_v57 = vrot.slane %v6209_v63, 4  ;;  %v6259_v51 = vsel %vm6108_vm0, %v6256_v52, 0.0  ;;  %v6171_v56 = vrot.slane %v6170_v14, 4  ;;  %6587 = vmatpush.msra.mxu3 %v6484_v18  ;;  %6551 = vmatpush.msra.mxu1 %v6450_v26  ;;  %v6277_v52 = vsel %vm6108_vm0, %v13361_v55, 0.0  ;;  %v6480_v20 = vld [vmem:[%s13642_s5 + $0x178] sm:$0xff]  ;;  %v6469_v26 = vld [vmem:[%s13642_s5 + $0x120] sm:$0xff] }
 0x9fa   : > { %v6261_v5 = vadd.f32 %v6260_v61, %v6259_v51  ;;  %v5878_v16 = vadd.f32 %v5846_v60, %v13027_v25  ;;  %v6468_v25 = vld [vmem:[%s13642_s5 + $0x118] sm:$0xff]  ;;  %v6442_v61 = vld [vmem:[%s13642_s5 + $0x48] sm:$0xff]  ;;  %v6357_v49 = vsel %vm6108_vm0, %v13365_v12, 0.0  ;;  %6532 = vmatpush.msra.mxu0 %v6441_v31  ;;  %v6435_v12 = vld [vmem:[%s13642_s5 + $0x10] sm:$0xff] }
 0x9fb   : > { %v6211_v13 = vadd.f32 %v6210_v57, %v6209_v63  ;;  %v6172_v27 = vadd.f32 %v6171_v56, %v6170_v14  ;;  %6588 = vmatpush.msra.mxu3 %v6476_v24  ;;  %v6443_v57 = vld [vmem:[%s13642_s5 + $0x50] sm:$0xff]  ;;  %6552 = vmatpush.msra.mxu1 %v6442_v61  ;;  %v6461_v31 = vld [vmem:[%s13642_s5 + $0xe0] sm:$0xff] }
 0x9fc   : > { %v6262_v36 = vrot.slane %v6261_v5, 4  ;;  %6572 = vmatpush.msra.mxu2 %v6443_v57 }
 0x9fd   : > { %v6212_v11 = vrot.slane %v6211_v13, 2  ;;  %v6173_v40 = vrot.slane %v6172_v27, 2  ;;  %6589 = vmatpush.msra.mxu3 %v6468_v25  ;;  %v6477_v25 = vld [vmem:[%s13642_s5 + $0x160] sm:$0xff] }
 0x9fe   : > { %v6263_v4 = vadd.f32 %v6262_v36, %v6261_v5  ;;  %v6005_v59 = vpop.permute.xlu1 %6004  ;;  %v6494_v36 = vld [vmem:[%s13642_s5 + $0x1e8] sm:$0xff]  ;;  %6573 = vmatpush.msra.mxu2 %v6435_v12 }
 0x9ff   : > { %v6213_v21 = vadd.f32 %v6212_v11, %v6211_v13  ;;  %v6039_v10 = vmul.f32 %v13066_v17, %v6005_v59  ;;  %v6174_v1 = vadd.f32 %v6173_v40, %v6172_v27  ;;  %6590 = vmatpush.msra.mxu3 %v6460_v47 }
 0xa00   : > { %v6264_v44 = vrot.slane %v6263_v4, 2  ;;  %6646 = vmatpush.msrb.mxu2 %v6495_v48  ;;  %v6447_v48 = vld [vmem:[%s13642_s5 + $0x70] sm:$0xff] }
 0xa01   : > { %v6214_v17 = vrot.slane %v6213_v21, 1  ;;  %v6071_v39 = vadd.f32 %v6039_v10, %v5878_v16  ;;  %v6175_v53 = vrot.slane %v6174_v1, 1  ;;  %v6486_v16 = vld [vmem:[%s13642_s5 + $0x1a8] sm:$0xff]  ;;  %v6487_v10 = vld [vmem:[%s13642_s5 + $0x1b0] sm:$0xff] }
 0xa02   : > { %v6265_v50 = vadd.f32 %v6264_v44, %v6263_v4  ;;  %v6485_v4 = vld [vmem:[%s13642_s5 + $0x1a0] sm:$0xff]  ;;  %6647 = vmatpush.msrb.mxu2 %v6487_v10  ;;  %v6438_v10 = vld [vmem:[%s13642_s5 + $0x28] sm:$0xff] }
 0xa03   : > { %v6215_v62 = vadd.f32 %v6214_v17, %v6213_v21  ;;  %v6107_v34 = vadd.f32 %v13082_v58, %v6071_v39  ;;  %v6176_v35 = vadd.f32 %v6175_v53, %v6174_v1  ;;  %v6452_v58 = vld [vmem:[%s13642_s5 + $0x98] sm:$0xff]  ;;  %v6414_v53 = vrot.slane %v13367_v29, 1  ;;  %v6470_v29 = vld [vmem:[%s13642_s5 + $0x128] sm:$0xff] }
 0xa04   : > { %v6266_v0 = vrot.slane %v6265_v50, 1  ;;  %6591 = vmatpush.msra.mxu3 %v6452_v58  ;;  %v6488_v1 = vld [vmem:[%s13642_s5 + $0x1b8] sm:$0xff] }
 0xa05   : > { %v6216_v63 = vmul.f32 %v6215_v62, %v13437_v37  ;;  %v6275_v30 = vsel %vm6138_vm2, %v6107_v34, 0.0  ;;  %v6291_v14 = vsel %vm6108_vm0, %v6107_v34, 0.0  ;;  %v6177_v56 = vmul.f32 %v6176_v35, %v13437_v37  ;;  %v6471_v35 = vld [vmem:[%s13642_s5 + $0x130] sm:$0xff] }
 0xa06   : > { %v6267_v51 = vadd.f32 %v6266_v0, %v6265_v50  ;;  %v6276_v2 = vadd.f32 %v6275_v30, %v13345_v6  ;;  %v6292_v55 = vadd.f32 %v6291_v14, %v13343_v54  ;;  %v6356_v23 = vadd.f32 %v13347_v22, %v6275_v30  ;;  %v6433_v54 = vld [vmem:[%s13642_s5] sm:$0xff]  ;;  %v6434_v6 = vld [vmem:[%s13642_s5 + $0x8] sm:$0xff]  ;;  %6592 = vmatpush.msra.mxu3 %v6444_v7  ;;  %v6479_v50 = vld [vmem:[%s13642_s5 + $0x170] sm:$0xff] }
 0xa07   : > { %v6218_v5 = vrot.slane %v6216_v63, 1  ;;  %v13480_v13 = vadd.f32 %v13349_v45, %v6291_v14  ;;  %6533 = vmatpush.msra.mxu0 %v6433_v54  ;;  %6553 = vmatpush.msra.mxu1 %v6434_v6  ;;  %v6472_v14 = vld [vmem:[%s13642_s5 + $0x138] sm:$0xff] }
 0xa08   : > { %v6268_v60 = vmul.f32 %v6267_v51, %v13437_v37  ;;  %v6278_v22 = vsel %vm6138_vm2, %v6276_v2, 0.0  ;;  %v6293_v45 = vsel %vm6108_vm0, %v6292_v55, 0.0  ;;  %v6311_v15 = vrot.slane %v6292_v55, 1  ;;  %6593 = vmatpush.msra.mxu3 %v6436_v8  ;;  %6648 = vmatpush.msrb.mxu2 %v6479_v50  ;;  %v6462_v55 = vld [vmem:[%s13642_s5 + $0xe8] sm:$0xff] }
 0xa09   : > { %v6220_v27 = vadd.f32 %v6218_v5, %v6177_v56  ;;  %v6279_v18 = vadd.f32 %v6278_v22, %v6277_v52  ;;  %v6294_v11 = vadd.f32 %v6293_v45, %v6277_v52  ;;  %v6358_v46 = vsel %vm6138_vm2, %v6356_v23, 0.0  ;;  %6606 = vmatpush.msrb.mxu0 %v6493_v19  ;;  %6626 = vmatpush.msrb.mxu1 %v6494_v36  ;;  %v6464_v23 = vld [vmem:[%s13642_s5 + $0xf8] sm:$0xff]  ;;  %v6455_v22 = vld [vmem:[%s13642_s5 + $0xb0] sm:$0xff]  ;;  %v6445_v36 = vld [vmem:[%s13642_s5 + $0x60] sm:$0xff] }
 0xa0a   : > { %v6270_v59 = vrot.slane %v6268_v60, 2  ;;  %v6312_v40 = vsel %vm6253_vm3, %v6310_v28, %v6311_v15  ;;  %v6316_v24 = vsel %vm6138_vm2, %v6311_v15, 0.0  ;;  %v6359_v21 = vadd.f32 %v6358_v46, %v6357_v49  ;;  %6666 = vmatpush.msrb.mxu3 %v6496_v42  ;;  %6649 = vmatpush.msrb.mxu2 %v6471_v35  ;;  %v6454_v60 = vld [vmem:[%s13642_s5 + $0xa8] sm:$0xff]  ;;  %v6456_v19 = vld [vmem:[%s13642_s5 + $0xb8] sm:$0xff] }
 0xa0b   : > { %v6280_v38 = vrot.slane %v6279_v18, 4  ;;  %v6295_v3 = vrot.slane %v6294_v11, 4  ;;  %v6315_v43 = vsel %vm6108_vm0, %v6312_v40, 0.0  ;;  %v6385_v44 = vsel %vm6108_vm0, %v13480_v13, 0.0  ;;  %6607 = vmatpush.msrb.mxu0 %v6485_v4  ;;  %6627 = vmatpush.msrb.mxu1 %v6486_v16  ;;  %v6446_v46 = vld [vmem:[%s13642_s5 + $0x68] sm:$0xff]  ;;  %v6448_v40 = vld [vmem:[%s13642_s5 + $0x78] sm:$0xff] }
 0xa0c   : > { %v13530_v17 = vadd.f32 %v6270_v59, %v6220_v27  ;;  %v6317_v39 = vadd.f32 %v6316_v24, %v6315_v43  ;;  %v6360_v33 = vrot.slane %v6359_v21, 4  ;;  %v6386_v32 = vadd.f32 %v6385_v44, %v6357_v49  ;;  %6667 = vmatpush.msrb.mxu3 %v6488_v1  ;;  %v6463_v49 = vld [vmem:[%s13642_s5 + $0xf0] sm:$0xff]  ;;  %v6437_v24 = vld [vmem:[%s13642_s5 + $0x20] sm:$0xff]  ;;  %v282_v35 = vld [vmem:[%s13640_s3 + $0x8] sm:$0x1] }
 0xa0d   : > { %v6281_v47 = vadd.f32 %v6280_v38, %v6279_v18  ;;  %v6296_v62 = vadd.f32 %v6295_v3, %v6294_v11  ;;  %v6415_v34 = vrot.slane %v13480_v13, 1  ;;  %6608 = vmatpush.msrb.mxu0 %v6477_v25  ;;  %6628 = vmatpush.msrb.mxu1 %v6478_v9  ;;  %v6453_v13 = vld [vmem:[%s13642_s5 + $0xa0] sm:$0xff]  ;;  %v6439_v38 = vld [vmem:[%s13642_s5 + $0x30] sm:$0xff]  ;;  %v6440_v25 = vld [vmem:[%s13642_s5 + $0x38] sm:$0xff] }
 0xa0e   : > { %v6318_v41 = vrot.slane %v6317_v39, 4  ;;  %v6361_v0 = vadd.f32 %v6360_v33, %v6359_v21  ;;  %v6387_v28 = vrot.slane %v6386_v32, 4  ;;  %6668 = vmatpush.msrb.mxu3 %v6480_v20  ;;  %6650 = vmatpush.msrb.mxu2 %v6463_v49 }
 0xa0f   : > { %v6282_v58 = vrot.slane %v6281_v47, 2  ;;  %v6297_v63 = vrot.slane %v6296_v62, 2  ;;  %v6416_v30 = vsel %vm6253_vm3, %v6414_v53, %v6415_v34  ;;  %v6420_v52 = vsel %vm6138_vm2, %v6415_v34, 0.0  ;;  %6609 = vmatpush.msrb.mxu0 %v6469_v26  ;;  %6629 = vmatpush.msrb.mxu1 %v6470_v29 }
 0xa10   : > { %v6319_v61 = vadd.f32 %v6318_v41, %v6317_v39  ;;  %v6362_v57 = vrot.slane %v6361_v0, 2  ;;  %v6388_v51 = vadd.f32 %v6387_v28, %v6386_v32  ;;  %v6419_v2 = vsel %vm6108_vm0, %v6416_v30, 0.0  ;;  %6669 = vmatpush.msrb.mxu3 %v6472_v14  ;;  %6651 = vmatpush.msrb.mxu2 %v6455_v22  ;;  %v6431_v14 = vld [vmem:[%s13641_s4] sm:$0x1] }
 0xa11   : > { %v6283_v7 = vadd.f32 %v6282_v58, %v6281_v47  ;;  %v6298_v5 = vadd.f32 %v6297_v63, %v6296_v62  ;;  %v6421_v56 = vadd.f32 %v6420_v52, %v6419_v2  ;;  %6610 = vmatpush.msrb.mxu0 %v6461_v31  ;;  %6630 = vmatpush.msrb.mxu1 %v6462_v55 }
 0xa12   : > { %v6320_v54 = vrot.slane %v6319_v61, 2  ;;  %v6363_v6 = vadd.f32 %v6362_v57, %v6361_v0  ;;  %v6389_v12 = vrot.slane %v6388_v51, 2  ;;  %6670 = vmatpush.msrb.mxu3 %v6464_v23  ;;  %6652 = vmatpush.msrb.mxu2 %v6447_v48 }
 0xa13   : > { %v6284_v45 = vrot.slane %v6283_v7, 1  ;;  %v6299_v15 = vrot.slane %v6298_v5, 1  ;;  %v6422_v8 = vrot.slane %v6421_v56, 4  ;;  %6611 = vmatpush.msrb.mxu0 %v6453_v13  ;;  %6631 = vmatpush.msrb.mxu1 %v6454_v60 }
 0xa14   : > { %v6321_v27 = vadd.f32 %v6320_v54, %v6319_v61  ;;  %v6364_v18 = vrot.slane %v6363_v6, 1  ;;  %v6390_v11 = vadd.f32 %v6389_v12, %v6388_v51  ;;  %6671 = vmatpush.msrb.mxu3 %v6456_v19  ;;  %6653 = vmatpush.msrb.mxu2 %v6439_v38  ;;  %v6497_v51 = vld [vmem:[%s13643_s6] sm:$0xff] }
 0xa15   : > { %v6285_v42 = vadd.f32 %v6284_v45, %v6283_v7  ;;  %v6300_v4 = vadd.f32 %v6299_v15, %v6298_v5  ;;  %v6423_v59 = vadd.f32 %v6422_v8, %v6421_v56  ;;  %6612 = vmatpush.msrb.mxu0 %v6445_v36  ;;  %6632 = vmatpush.msrb.mxu1 %v6446_v46  ;;  %v6501_v2 = vperm.slane %v6497_v51, 2 }
 0xa16   : > { %v6322_v21 = vrot.slane %v6321_v27, 1  ;;  %v6391_v16 = vrot.slane %v6390_v11, 1  ;;  %v6365_v44 = vadd.f32 %v6364_v18, %v6363_v6  ;;  %6672 = vmatpush.msrb.mxu3 %v6448_v40  ;;  %v6502_v55 = vperm.slane %v6497_v51, 3 }
 0xa17   : > { %v6286_v3 = vmul.f32 %v6285_v42, %v13437_v37  ;;  %v6301_v43 = vmul.f32 %v6300_v4, %v13437_v37  ;;  %v6424_v1 = vrot.slane %v6423_v59, 2  ;;  %6613 = vmatpush.msrb.mxu0 %v6437_v24  ;;  %6633 = vmatpush.msrb.mxu1 %v6438_v10  ;;  %v6500_v49 = vperm.slane %v6497_v51, 1 }
 0xa18   : > { %v6323_v39 = vadd.f32 %v6322_v21, %v6321_v27  ;;  %v6392_v32 = vadd.f32 %v6391_v16, %v6390_v11  ;;  %6673 = vmatpush.msrb.mxu3 %v6440_v25  ;;  %v6366_v62 = vmul.f32 %v6365_v44, %v13437_v37  ;;  %v6503_v56 = vperm.slane %v6497_v51, 4 }
 0xa19   : > { %v6288_v33 = vrot.slane %v6286_v3, 3  ;;  %v6425_v9 = vadd.f32 %v6424_v1, %v6423_v59  ;;  %v6303_v47 = vrot.slane %v6301_v43, 4  ;;  %v6504_v23 = vperm.slane %v6497_v51, 5 }
 0xa1a   : > { %v6324_v50 = vmul.f32 %v6323_v39, %v13437_v37  ;;  %v6393_v41 = vmul.f32 %v6392_v32, %v13437_v37  ;;  %v6368_v28 = vrot.slane %v6366_v62, 6  ;;  %v6505_v15 = vperm.slane %v6497_v51, 6 }
 0xa1b   : > { %v6290_v53 = vadd.f32 %v6288_v33, %v13530_v17  ;;  %v6426_v34 = vrot.slane %v6425_v9, 1  ;;  %v6506_v8 = vperm.slane %v6497_v51, 7  ;;  %v6499_v19 = vperm.slane %v6497_v51, 0 }
 0xa1c   : > { %v6326_v20 = vrot.slane %v6324_v50, 5  ;;  %v6395_v63 = vrot.slane %v6393_v41, 7 }
 0xa1d   : > { %v6305_v26 = vadd.f32 %v6303_v47, %v6290_v53  ;;  %v6427_v29 = vadd.f32 %v6426_v34, %v6425_v9 }
 0xa1f   : > { %v6328_v0 = vadd.f32 %v6326_v20, %v6305_v26  ;;  %v6428_v52 = vmul.f32 %v6427_v29, %v282_v35 }
 0xa21   : > { %v6370_v58 = vadd.f32 %v6368_v28, %v6328_v0 }
 0xa23   : > { %v6397_v30 = vadd.f32 %v6395_v63, %v6370_v58 }
 0xa25   : > { %v6429_v17 = vadd.f32 %v6428_v52, %v6397_v30 }
 0xa27   : > { %v6430_v31 = vmul.f32 0.00390625, %v6429_v17 }
 0xa29   : > { %v6432_v61 = vadd.f32 %v6431_v14, %v6430_v31 }
 0xa2b   : > { %6961 = vmatmul.msk.f32.vlgmr.msra.gmra.mxu0 %vm6108_vm0, %v6432_v61  ;;  %6962 = vmatmul.msk.f32.vlgmr.msra.gmra.mxu1 %vm6108_vm0, %v6432_v61 }
 0xa2c   : > { %6963 = vmatmul.msk.f32.vlgmr.msra.gmra.mxu2 %vm6108_vm0, %v6432_v61  ;;  %6964 = vmatmul.msk.f32.vlgmr.msra.gmra.mxu3 %vm6108_vm0, %v6432_v61 }
 0xa33   : > { %6965 = vmatmul.msk.f32.vlgmr.msrb.gmra.mxu0 %vm6108_vm0, %v6432_v61  ;;  %6966 = vmatmul.msk.f32.vlgmr.msrb.gmra.mxu1 %vm6108_vm0, %v6432_v61 }
 0xa34   : > { %6967 = vmatmul.msk.f32.vlgmr.msrb.gmra.mxu2 %vm6108_vm0, %v6432_v61  ;;  %6968 = vmatmul.msk.f32.vlgmr.msrb.gmra.mxu3 %vm6108_vm0, %v6432_v61 }
 0xaa8   : > { %v6535_v37 = vpop.f32.mrf.mxu0  ;;  %v6555_v57 = vpop.f32.mrf.mxu1 }
 0xaa9   : > { %v6556_v60 = vadd.f32 %v6555_v57, %v6500_v49  ;;  %v6536_v40 = vadd.f32 %v6535_v37, %v6499_v19 }
 0xaab   : > { %v6686_v18 = vrot.slane %v6556_v60, 7 }
 0xaad   : > { %v6694_v10 = vsel %vm6693_vm4, %v6536_v40, %v6686_v18 }
 0xaaf   : > { %v6575_v7 = vpop.f32.mrf.mxu2  ;;  %v6595_v5 = vpop.f32.mrf.mxu3 }
 0xab0   : > { %v6615_v13 = vpop.f32.mrf.mxu0  ;;  %v6635_v54 = vpop.f32.mrf.mxu1  ;;  %v6576_v6 = vadd.f32 %v6575_v7, %v6501_v2  ;;  %v6596_v12 = vadd.f32 %v6595_v5, %v6502_v55 }
 0xab1   : > { %v6616_v22 = vadd.f32 %v6615_v13, %v6503_v56  ;;  %v6636_v45 = vadd.f32 %v6635_v54, %v6504_v23 }
 0xab2   : > { %v6687_v36 = vrot.slane %v6576_v6, 6  ;;  %v6688_v27 = vrot.slane %v6596_v12, 5 }
 0xab3   : > { %v6689_v48 = vrot.slane %v6616_v22, 4  ;;  %v6690_v42 = vrot.slane %v6636_v45, 3 }
 0xab4   : > { %v6696_v24 = vsel %vm6695_vm5, %v6687_v36, %v6688_v27 }
 0xab5   : > { %v6700_v38 = vsel %vm6699_vm7, %v6689_v48, %v6690_v42  ;;  %v6698_v43 = vsel %vm6697_vm6, %v6694_v10, %v6696_v24 }
 0xab7   : > { %v6655_v11 = vpop.f32.mrf.mxu2  ;;  %v6675_v46 = vpop.f32.mrf.mxu3 }
 0xab8   : > { %v6656_v4 = vadd.f32 %v6655_v11, %v6505_v15  ;;  %v6676_v59 = vadd.f32 %v6675_v46, %v6506_v8 }
 0xaba   : > { %v6691_v21 = vrot.slane %v6656_v4, 2  ;;  %v6692_v16 = vrot.slane %v6676_v59, 1 }
 0xabc   : > { %v6702_v3 = vsel %vm6701_vm8, %v6691_v21, %v6692_v16 }
 0xabd   : > { %v6704_v44 = vsel %vm6703_vm9, %v6700_v38, %v6702_v3 }
 0xabe   : > { %v6706_v1 = vsel %vm6705_vm10, %v6698_v43, %v6704_v44 }
 0xabf   : > { %6708 = vst [vmem:[%s276_s13] sm:$0xff] %v6706_v1 }
 0xac0 PF: > { %s17_s24 = sadd.s32 1, %s7285_s24  }
 0xac1   : > { %p14_p4 = scmp.ge.s32.totalorder %s17_s24, 4  }
 0xac3   :  { %16 = sbr.rel (!%p14_p4) target bundleno = 1 (0x1), region = 80 }

</bundles_post_ra>
